<compile_context>
chip_gen: v7x
topology: tpu7x:2x2x1
jax: 0.10.0
libtpu: 0.0.40
codegen_flags: <defaults>
</compile_context>

<pallas_src>
import jax
import jax.numpy as jnp
from jax.experimental import pallas as pl
from jax.experimental.pallas import tpu as pltpu


FC_BK = 4096     # K tile for the fused MLP kernel (fc1 reduction)
MLP_MB = 8       # batch rows padded to one sublane tile


def _round_up(x, m):
    return ((x + m - 1) // m) * m


# ----------------------------------------------------------------------------
# Fused Conv2d(5x5, valid, stride 1) + ReLU + MaxPool2d(2, stride=2) kernel.
#
#   out[oc, m] = relu( max_q (W @ P_q)[oc, m] + b[oc] ),  m = (n, i, j) pooled pos
#
# q = (dh, dw) is the position inside the 2x2 pooling window; ReLU is monotonic and
# the bias is shared across q, so max/relu commute with the bias add and the whole
# conv->relu->pool block reduces to 4 matmuls + an elementwise max epilogue.
# ----------------------------------------------------------------------------
def _conv_relu_pool_kernel(w_ref, b_ref, p00_ref, p01_ref, p10_ref, p11_ref, o_ref):
    w = w_ref[...]
    acc = jnp.dot(w, p00_ref[...], preferred_element_type=jnp.float32)
    acc = jnp.maximum(acc, jnp.dot(w, p01_ref[...], preferred_element_type=jnp.float32))
    acc = jnp.maximum(acc, jnp.dot(w, p10_ref[...], preferred_element_type=jnp.float32))
    acc = jnp.maximum(acc, jnp.dot(w, p11_ref[...], preferred_element_type=jnp.float32))
    o_ref[...] = jnp.maximum(acc + b_ref[...], 0.0).astype(o_ref.dtype)


def conv_relu_pool(x_cnhw, w_mat, b_col, *, bm):
    """x_cnhw: (C, N, H, W) f32; w_mat: (OC, C*25); b_col: (OC, 1).

    Returns the ReLU'd, 2x2-max-pooled conv output in (OC, N, OH//2, OW//2) layout
    (i.e. already channel-major, ready to feed the next conv without a transpose).
    """
    C, N, H, W = x_cnhw.shape
    OC, K = w_mat.shape
    KH = KW = 5
    assert K == C * KH * KW
    OH, OW = H - KH + 1, W - KW + 1
    OH2, OW2 = OH // 2, OW // 2
    M = N * OH2 * OW2
    bm = min(bm, _round_up(M, 128))
    Mp = _round_up(M, bm)

    def patches(dh, dw):
        # P[k=(c,kh,kw), m=(n,i,j)] = x[n, c, 2i+dh+kh, 2j+dw+kw], built K-major so
        # no big transpose is needed (x is already channel-major).
        sl = [x_cnhw[:, :, dh + kh::2, dw + kw::2][:, :, :OH2, :OW2]
              for kh in range(KH) for kw in range(KW)]        # each (C, N, OH2, OW2)
        p = jnp.stack(sl, axis=1).reshape(K, M)               # (C*25, N*OH2*OW2)
        return jnp.pad(p, ((0, 0), (0, Mp - M)))

    # TODO(synk): a direct-conv kernel (row-slab DMA + 25-tap accumulate) would avoid
    # materializing the four im2col patch matrices in HBM entirely.
    ps = [patches(dh, dw) for dh in (0, 1) for dw in (0, 1)]

    out = pl.pallas_call(
        _conv_relu_pool_kernel,
        out_shape=jax.ShapeDtypeStruct((OC, Mp), jnp.float32),
        grid=(Mp // bm,),
        in_specs=[
            pl.BlockSpec((OC, K), lambda i: (0, 0)),   # weights, resident (full-dim K)
            pl.BlockSpec((OC, 1), lambda i: (0, 0)),   # bias column, resident
            pl.BlockSpec((K, bm), lambda i: (0, i)),
            pl.BlockSpec((K, bm), lambda i: (0, i)),
            pl.BlockSpec((K, bm), lambda i: (0, i)),
            pl.BlockSpec((K, bm), lambda i: (0, i)),
        ],
        out_specs=pl.BlockSpec((OC, bm), lambda i: (0, i)),   # lane-dense output
        compiler_params=pltpu.CompilerParams(dimension_semantics=("parallel",)),
    )(w_mat, b_col, *ps)
    return out[:, :M].reshape(OC, N, OH2, OW2)


# ----------------------------------------------------------------------------
# Fused 3-layer MLP: fc1(+ReLU) reduced over K tiles, fc2(+ReLU) and fc3 in the
# epilogue.  One pallas_call, activations never leave VMEM between layers.
# ----------------------------------------------------------------------------
def _mlp_kernel(x_ref, w1_ref, b1_ref, w2_ref, b2_ref, w3_ref, b3_ref,
                o_ref, acc_ref):
    k = pl.program_id(0)

    @pl.when(k == 0)
    def _():
        acc_ref[...] = jnp.zeros_like(acc_ref)

    acc_ref[...] += jnp.dot(x_ref[...], w1_ref[...],
                            preferred_element_type=jnp.float32)

    @pl.when(k == pl.num_programs(0) - 1)
    def _():
        h = jnp.maximum(acc_ref[...] + b1_ref[...], 0.0)
        h = jnp.maximum(jnp.dot(h, w2_ref[...], preferred_element_type=jnp.float32)
                        + b2_ref[...], 0.0)
        y = jnp.dot(h, w3_ref[...], preferred_element_type=jnp.float32) + b3_ref[...]
        o_ref[...] = y.astype(o_ref.dtype)


def fused_mlp(act, w1, b1, w2, b2, w3, b3, *, bk=FC_BK):
    """act: (MLP_MB, Kp) zero-padded; weights pre-transposed to (in, out) layout."""
    MB, Kp = act.shape
    assert Kp % bk == 0
    H1 = w1.shape[1]
    F = w3.shape[1]
    return pl.pallas_call(
        _mlp_kernel,
        out_shape=jax.ShapeDtypeStruct((MB, F), jnp.float32),
        grid=(Kp // bk,),
        in_specs=[
            pl.BlockSpec((MB, bk), lambda k: (0, k)),   # activation K tile
            pl.BlockSpec((bk, H1), lambda k: (k, 0)),   # fc1 weight K tile
            pl.BlockSpec((1, H1), lambda k: (0, 0)),    # fc1 bias
            pl.BlockSpec((H1, H1), lambda k: (0, 0)),   # fc2 weight (resident)
            pl.BlockSpec((1, H1), lambda k: (0, 0)),    # fc2 bias
            pl.BlockSpec((H1, F), lambda k: (0, 0)),    # fc3 weight (resident)
            pl.BlockSpec((1, F), lambda k: (0, 0)),     # fc3 bias
        ],
        out_specs=pl.BlockSpec((MB, F), lambda k: (0, 0)),
        scratch_shapes=[pltpu.VMEM((MB, H1), jnp.float32)],
        compiler_params=pltpu.CompilerParams(dimension_semantics=("arbitrary",)),
    )(act, w1, b1, w2, b2, w3, b3)


# ----------------------------------------------------------------------------
# Full forward pass (expects params prepared by prepare_params)
# ----------------------------------------------------------------------------
def embedding_net_forward(x, pp):
    """x: (N, 1, 224, 224) NCHW float32."""
    N = x.shape[0]
    assert N <= MLP_MB
    x_c = jnp.transpose(x, (1, 0, 2, 3))                              # (1, N, 224, 224)
    y = conv_relu_pool(x_c, pp["conv1_w"], pp["conv1_b"], bm=2048)    # (16, N, 110, 110)
    y = conv_relu_pool(y, pp["conv2_w"], pp["conv2_b"], bm=512)       # (16, N, 53, 53)
    # torch .view(N, -1) flattens per-sample in (c, h, w) order; tiny (~360 KB) copy.
    act = jnp.transpose(y, (1, 0, 2, 3)).reshape(N, -1)               # (N, 44944)
    Kp = pp["fc1_w"].shape[0]
    act = jnp.pad(act, ((0, MLP_MB - N), (0, Kp - act.shape[1])))
    out = fused_mlp(act, pp["fc1_w"], pp["fc1_b"], pp["fc2_w"], pp["fc2_b"],
                    pp["fc3_w"], pp["fc3_b"])
    return out[:N]


# ----------------------------------------------------------------------------
# Parameter construction (PyTorch layouts) + one-time kernel-friendly repack
# ----------------------------------------------------------------------------
def init_params(key, backbone_out=32):
    """Parameters in the PyTorch layouts (nn.Linear weight = (out_features, in_features))."""
    ks = jax.random.split(key, 10)
    f32 = jnp.float32
    return {
        "conv1_w": 0.1 * jax.random.normal(ks[0], (16, 1, 5, 5), f32),
        "conv1_b": 0.1 * jax.random.normal(ks[1], (16,), f32),
        "conv2_w": 0.05 * jax.random.normal(ks[2], (16, 16, 5, 5), f32),
        "conv2_b": 0.1 * jax.random.normal(ks[3], (16,), f32),
        "fc1_w": 0.005 * jax.random.normal(ks[4], (256, 44944), f32),
        "fc1_b": 0.1 * jax.random.normal(ks[5], (256,), f32),
        "fc2_w": 0.05 * jax.random.normal(ks[6], (256, 256), f32),
        "fc2_b": 0.1 * jax.random.normal(ks[7], (256,), f32),
        "fc3_w": 0.05 * jax.random.normal(ks[8], (backbone_out, 256), f32),
        "fc3_b": 0.1 * jax.random.normal(ks[9], (backbone_out,), f32),
    }


def prepare_params(p):
    """One-time (outside the jitted forward) repack: conv weights -> (OC, C*KH*KW),
    biases -> row/column vectors, fc weights transposed to (in, out), fc1 K-padded
    to a multiple of FC_BK.  Avoids the per-call 46 MB fc1_w.T HBM transpose."""
    k_fc1 = p["fc1_w"].shape[1]
    kp = _round_up(k_fc1, FC_BK)
    return {
        "conv1_w": p["conv1_w"].reshape(16, -1),
        "conv1_b": p["conv1_b"].reshape(16, 1),
        "conv2_w": p["conv2_w"].reshape(16, -1),
        "conv2_b": p["conv2_b"].reshape(16, 1),
        "fc1_w": jnp.pad(p["fc1_w"].T, ((0, kp - k_fc1), (0, 0))),
        "fc1_b": p["fc1_b"].reshape(1, -1),
        "fc2_w": p["fc2_w"].T,
        "fc2_b": p["fc2_b"].reshape(1, -1),
        "fc3_w": p["fc3_w"].T,
        "fc3_b": p["fc3_b"].reshape(1, -1),
    }


if __name__ == "__main__":
    key = jax.random.PRNGKey(0)
    k_x, k_p = jax.random.split(key)

    # N=2 grayscale 224x224 images (224 is forced by nn.Linear(44944, 256) in the spec).
    x = jax.random.normal(k_x, (2, 1, 224, 224), jnp.float32)
    params = init_params(k_p, backbone_out=32)
    prepped = prepare_params(params)   # one-time repack, outside the jitted forward
    jax.block_until_ready(prepped)

    fwd = jax.jit(embedding_net_forward)
    out = fwd(x, prepped)
    jax.block_until_ready(out)

    assert out.shape == (2, 32), out.shape
    assert out.dtype == jnp.float32
    assert bool(jnp.all(jnp.isfinite(out)))
    print("KERNEL_OK")
</pallas_src>

<mosaic_0001>
module attributes {stable_mosaic.version = 11 : i64} {
  func.func @_conv_relu_pool_kernel(%arg0: i32, %arg1: memref<16x25xf32, #tpu.memory_space<vmem>>, %arg2: memref<16x1xf32, #tpu.memory_space<vmem>>, %arg3: memref<25x2048xf32, #tpu.memory_space<vmem>>, %arg4: memref<25x2048xf32, #tpu.memory_space<vmem>>, %arg5: memref<25x2048xf32, #tpu.memory_space<vmem>>, %arg6: memref<25x2048xf32, #tpu.memory_space<vmem>>, %arg7: memref<16x2048xf32, #tpu.memory_space<vmem>>) attributes {dimension_semantics = [#tpu.dimension_semantics<parallel>], iteration_bounds = array<i64: 12>, scalar_prefetch = 0 : i64, scratch_operands = 0 : i64, tpu.core_type = #tpu.core_type<tc>, window_params = [{pipeline_mode = #tpu.pipeline_mode<synchronous>, transform_indices = @transform_0, window_bounds = array<i64: 16, 25>}, {pipeline_mode = #tpu.pipeline_mode<synchronous>, transform_indices = @transform_1, window_bounds = array<i64: 16, 1>}, {transform_indices = @transform_2, window_bounds = array<i64: 25, 2048>}, {transform_indices = @transform_3, window_bounds = array<i64: 25, 2048>}, {transform_indices = @transform_4, window_bounds = array<i64: 25, 2048>}, {transform_indices = @transform_5, window_bounds = array<i64: 25, 2048>}, {transform_indices = @transform_6, window_bounds = array<i64: 16, 2048>}]} {
    %c0 = arith.constant 0 : index
    %c0_0 = arith.constant 0 : index
    %0 = vector.load %arg1[%c0, %c0_0] : memref<16x25xf32, #tpu.memory_space<vmem>>, vector<16x25xf32>
    %c0_1 = arith.constant 0 : index
    %c0_2 = arith.constant 0 : index
    %1 = vector.load %arg3[%c0_1, %c0_2] : memref<25x2048xf32, #tpu.memory_space<vmem>>, vector<25x2048xf32>
    %cst = arith.constant dense<0.000000e+00> : vector<16x2048xf32>
    %2 = tpu.matmul %0, %1, %cst {dimension_numbers = #tpu.dot_dimension_numbers<[1], [0], [0], [1], [0, 0, 1, 1], [], []>} : vector<16x25xf32>, vector<25x2048xf32>, vector<16x2048xf32> -> vector<16x2048xf32>
    %c0_3 = arith.constant 0 : index
    %c0_4 = arith.constant 0 : index
    %3 = vector.load %arg4[%c0_3, %c0_4] : memref<25x2048xf32, #tpu.memory_space<vmem>>, vector<25x2048xf32>
    %cst_5 = arith.constant dense<0.000000e+00> : vector<16x2048xf32>
    %4 = tpu.matmul %0, %3, %cst_5 {dimension_numbers = #tpu.dot_dimension_numbers<[1], [0], [0], [1], [0, 0, 1, 1], [], []>} : vector<16x25xf32>, vector<25x2048xf32>, vector<16x2048xf32> -> vector<16x2048xf32>
    %5 = arith.maximumf %2, %4 : vector<16x2048xf32>
    %c0_6 = arith.constant 0 : index
    %c0_7 = arith.constant 0 : index
    %6 = vector.load %arg5[%c0_6, %c0_7] : memref<25x2048xf32, #tpu.memory_space<vmem>>, vector<25x2048xf32>
    %cst_8 = arith.constant dense<0.000000e+00> : vector<16x2048xf32>
    %7 = tpu.matmul %0, %6, %cst_8 {dimension_numbers = #tpu.dot_dimension_numbers<[1], [0], [0], [1], [0, 0, 1, 1], [], []>} : vector<16x25xf32>, vector<25x2048xf32>, vector<16x2048xf32> -> vector<16x2048xf32>
    %8 = arith.maximumf %5, %7 : vector<16x2048xf32>
    %c0_9 = arith.constant 0 : index
    %c0_10 = arith.constant 0 : index
    %9 = vector.load %arg6[%c0_9, %c0_10] : memref<25x2048xf32, #tpu.memory_space<vmem>>, vector<25x2048xf32>
    %cst_11 = arith.constant dense<0.000000e+00> : vector<16x2048xf32>
    %10 = tpu.matmul %0, %9, %cst_11 {dimension_numbers = #tpu.dot_dimension_numbers<[1], [0], [0], [1], [0, 0, 1, 1], [], []>} : vector<16x25xf32>, vector<25x2048xf32>, vector<16x2048xf32> -> vector<16x2048xf32>
    %11 = arith.maximumf %8, %10 : vector<16x2048xf32>
    %c0_12 = arith.constant 0 : index
    %c0_13 = arith.constant 0 : index
    %12 = vector.load %arg2[%c0_12, %c0_13] : memref<16x1xf32, #tpu.memory_space<vmem>>, vector<16x1xf32>
    %13 = vector.broadcast %12 : vector<16x1xf32> to vector<16x2048xf32>
    %14 = arith.addf %11, %13 : vector<16x2048xf32>
    %cst_14 = arith.constant 0.000000e+00 : f32
    %15 = vector.broadcast %cst_14 : f32 to vector<16x2048xf32>
    %16 = arith.maximumf %14, %15 : vector<16x2048xf32>
    %c0_15 = arith.constant 0 : index
    %c0_16 = arith.constant 0 : index
    %17 = vector.load %arg7[%c0_15, %c0_16] : memref<16x2048xf32, #tpu.memory_space<vmem>>, vector<16x2048xf32>
    tpu.vector_store %arg7[%c0_15, %c0_16], %16 {strides = array<i32>} : memref<16x2048xf32, #tpu.memory_space<vmem>>, vector<16x2048xf32>,
    return
  }
  func.func @transform_0(%arg0: i32) -> (i32, i32) {
    %c0_i32 = arith.constant 0 : i32
    %c0_i32_0 = arith.constant 0 : i32
    %c0_i32_1 = arith.constant 0 : i32
    return %c0_i32, %c0_i32_0 : i32, i32
  }
  func.func @transform_1(%arg0: i32) -> (i32, i32) {
    %c0_i32 = arith.constant 0 : i32
    %c0_i32_0 = arith.constant 0 : i32
    %c0_i32_1 = arith.constant 0 : i32
    return %c0_i32, %c0_i32_0 : i32, i32
  }
  func.func @transform_2(%arg0: i32) -> (i32, i32) {
    %c0_i32 = arith.constant 0 : i32
    %c0_i32_0 = arith.constant 0 : i32
    return %c0_i32, %arg0 : i32, i32
  }
  func.func @transform_3(%arg0: i32) -> (i32, i32) {
    %c0_i32 = arith.constant 0 : i32
    %c0_i32_0 = arith.constant 0 : i32
    return %c0_i32, %arg0 : i32, i32
  }
  func.func @transform_4(%arg0: i32) -> (i32, i32) {
    %c0_i32 = arith.constant 0 : i32
    %c0_i32_0 = arith.constant 0 : i32
    return %c0_i32, %arg0 : i32, i32
  }
  func.func @transform_5(%arg0: i32) -> (i32, i32) {
    %c0_i32 = arith.constant 0 : i32
    %c0_i32_0 = arith.constant 0 : i32
    return %c0_i32, %arg0 : i32, i32
  }
  func.func @transform_6(%arg0: i32) -> (i32, i32) {
    %c0_i32 = arith.constant 0 : i32
    %c0_i32_0 = arith.constant 0 : i32
    return %c0_i32, %arg0 : i32, i32
  }
}

module attributes {stable_mosaic.version = 11 : i64} {
  func.func @_conv_relu_pool_kernel(%arg0: i32, %arg1: memref<16x400xf32, #tpu.memory_space<vmem>>, %arg2: memref<16x1xf32, #tpu.memory_space<vmem>>, %arg3: memref<400x512xf32, #tpu.memory_space<vmem>>, %arg4: memref<400x512xf32, #tpu.memory_space<vmem>>, %arg5: memref<400x512xf32, #tpu.memory_space<vmem>>, %arg6: memref<400x512xf32, #tpu.memory_space<vmem>>, %arg7: memref<16x512xf32, #tpu.memory_space<vmem>>) attributes {dimension_semantics = [#tpu.dimension_semantics<parallel>], iteration_bounds = array<i64: 11>, scalar_prefetch = 0 : i64, scratch_operands = 0 : i64, tpu.core_type = #tpu.core_type<tc>, window_params = [{pipeline_mode = #tpu.pipeline_mode<synchronous>, transform_indices = @transform_0, window_bounds = array<i64: 16, 400>}, {pipeline_mode = #tpu.pipeline_mode<synchronous>, transform_indices = @transform_1, window_bounds = array<i64: 16, 1>}, {transform_indices = @transform_2, window_bounds = array<i64: 400, 512>}, {transform_indices = @transform_3, window_bounds = array<i64: 400, 512>}, {transform_indices = @transform_4, window_bounds = array<i64: 400, 512>}, {transform_indices = @transform_5, window_bounds = array<i64: 400, 512>}, {transform_indices = @transform_6, window_bounds = array<i64: 16, 512>}]} {
    %c0 = arith.constant 0 : index
    %c0_0 = arith.constant 0 : index
    %0 = vector.load %arg1[%c0, %c0_0] : memref<16x400xf32, #tpu.memory_space<vmem>>, vector<16x400xf32>
    %c0_1 = arith.constant 0 : index
    %c0_2 = arith.constant 0 : index
    %1 = vector.load %arg3[%c0_1, %c0_2] : memref<400x512xf32, #tpu.memory_space<vmem>>, vector<400x512xf32>
    %cst = arith.constant dense<0.000000e+00> : vector<16x512xf32>
    %2 = tpu.matmul %0, %1, %cst {dimension_numbers = #tpu.dot_dimension_numbers<[1], [0], [0], [1], [0, 0, 1, 1], [], []>} : vector<16x400xf32>, vector<400x512xf32>, vector<16x512xf32> -> vector<16x512xf32>
    %c0_3 = arith.constant 0 : index
    %c0_4 = arith.constant 0 : index
    %3 = vector.load %arg4[%c0_3, %c0_4] : memref<400x512xf32, #tpu.memory_space<vmem>>, vector<400x512xf32>
    %cst_5 = arith.constant dense<0.000000e+00> : vector<16x512xf32>
    %4 = tpu.matmul %0, %3, %cst_5 {dimension_numbers = #tpu.dot_dimension_numbers<[1], [0], [0], [1], [0, 0, 1, 1], [], []>} : vector<16x400xf32>, vector<400x512xf32>, vector<16x512xf32> -> vector<16x512xf32>
    %5 = arith.maximumf %2, %4 : vector<16x512xf32>
    %c0_6 = arith.constant 0 : index
    %c0_7 = arith.constant 0 : index
    %6 = vector.load %arg5[%c0_6, %c0_7] : memref<400x512xf32, #tpu.memory_space<vmem>>, vector<400x512xf32>
    %cst_8 = arith.constant dense<0.000000e+00> : vector<16x512xf32>
    %7 = tpu.matmul %0, %6, %cst_8 {dimension_numbers = #tpu.dot_dimension_numbers<[1], [0], [0], [1], [0, 0, 1, 1], [], []>} : vector<16x400xf32>, vector<400x512xf32>, vector<16x512xf32> -> vector<16x512xf32>
    %8 = arith.maximumf %5, %7 : vector<16x512xf32>
    %c0_9 = arith.constant 0 : index
    %c0_10 = arith.constant 0 : index
    %9 = vector.load %arg6[%c0_9, %c0_10] : memref<400x512xf32, #tpu.memory_space<vmem>>, vector<400x512xf32>
    %cst_11 = arith.constant dense<0.000000e+00> : vector<16x512xf32>
    %10 = tpu.matmul %0, %9, %cst_11 {dimension_numbers = #tpu.dot_dimension_numbers<[1], [0], [0], [1], [0, 0, 1, 1], [], []>} : vector<16x400xf32>, vector<400x512xf32>, vector<16x512xf32> -> vector<16x512xf32>
    %11 = arith.maximumf %8, %10 : vector<16x512xf32>
    %c0_12 = arith.constant 0 : index
    %c0_13 = arith.constant 0 : index
    %12 = vector.load %arg2[%c0_12, %c0_13] : memref<16x1xf32, #tpu.memory_space<vmem>>, vector<16x1xf32>
    %13 = vector.broadcast %12 : vector<16x1xf32> to vector<16x512xf32>
    %14 = arith.addf %11, %13 : vector<16x512xf32>
    %cst_14 = arith.constant 0.000000e+00 : f32
    %15 = vector.broadcast %cst_14 : f32 to vector<16x512xf32>
    %16 = arith.maximumf %14, %15 : vector<16x512xf32>
    %c0_15 = arith.constant 0 : index
    %c0_16 = arith.constant 0 : index
    %17 = vector.load %arg7[%c0_15, %c0_16] : memref<16x512xf32, #tpu.memory_space<vmem>>, vector<16x512xf32>
    tpu.vector_store %arg7[%c0_15, %c0_16], %16 {strides = array<i32>} : memref<16x512xf32, #tpu.memory_space<vmem>>, vector<16x512xf32>,
    return
  }
  func.func @transform_0(%arg0: i32) -> (i32, i32) {
    %c0_i32 = arith.constant 0 : i32
    %c0_i32_0 = arith.constant 0 : i32
    %c0_i32_1 = arith.constant 0 : i32
    return %c0_i32, %c0_i32_0 : i32, i32
  }
  func.func @transform_1(%arg0: i32) -> (i32, i32) {
    %c0_i32 = arith.constant 0 : i32
    %c0_i32_0 = arith.constant 0 : i32
    %c0_i32_1 = arith.constant 0 : i32
    return %c0_i32, %c0_i32_0 : i32, i32
  }
  func.func @transform_2(%arg0: i32) -> (i32, i32) {
    %c0_i32 = arith.constant 0 : i32
    %c0_i32_0 = arith.constant 0 : i32
    return %c0_i32, %arg0 : i32, i32
  }
  func.func @transform_3(%arg0: i32) -> (i32, i32) {
    %c0_i32 = arith.constant 0 : i32
    %c0_i32_0 = arith.constant 0 : i32
    return %c0_i32, %arg0 : i32, i32
  }
  func.func @transform_4(%arg0: i32) -> (i32, i32) {
    %c0_i32 = arith.constant 0 : i32
    %c0_i32_0 = arith.constant 0 : i32
    return %c0_i32, %arg0 : i32, i32
  }
  func.func @transform_5(%arg0: i32) -> (i32, i32) {
    %c0_i32 = arith.constant 0 : i32
    %c0_i32_0 = arith.constant 0 : i32
    return %c0_i32, %arg0 : i32, i32
  }
  func.func @transform_6(%arg0: i32) -> (i32, i32) {
    %c0_i32 = arith.constant 0 : i32
    %c0_i32_0 = arith.constant 0 : i32
    return %c0_i32, %arg0 : i32, i32
  }
}

module attributes {stable_mosaic.version = 11 : i64} {
  func.func @_mlp_kernel(%arg0: i32, %arg1: memref<8x4096xf32, #tpu.memory_space<vmem>>, %arg2: memref<4096x256xf32, #tpu.memory_space<vmem>>, %arg3: memref<1x256xf32, #tpu.memory_space<vmem>>, %arg4: memref<256x256xf32, #tpu.memory_space<vmem>>, %arg5: memref<1x256xf32, #tpu.memory_space<vmem>>, %arg6: memref<256x32xf32, #tpu.memory_space<vmem>>, %arg7: memref<1x32xf32, #tpu.memory_space<vmem>>, %arg8: memref<8x32xf32, #tpu.memory_space<vmem>>, %arg9: memref<8x256xf32, #tpu.memory_space<vmem>>) attributes {dimension_semantics = [#tpu.dimension_semantics<arbitrary>], iteration_bounds = array<i64: 11>, scalar_prefetch = 0 : i64, scratch_operands = 1 : i64, tpu.core_type = #tpu.core_type<tc>, window_params = [{transform_indices = @transform_0, window_bounds = array<i64: 8, 4096>}, {transform_indices = @transform_1, window_bounds = array<i64: 4096, 256>}, {pipeline_mode = #tpu.pipeline_mode<synchronous>, transform_indices = @transform_2, window_bounds = array<i64: 1, 256>}, {pipeline_mode = #tpu.pipeline_mode<synchronous>, transform_indices = @transform_3, window_bounds = array<i64: 256, 256>}, {pipeline_mode = #tpu.pipeline_mode<synchronous>, transform_indices = @transform_4, window_bounds = array<i64: 1, 256>}, {pipeline_mode = #tpu.pipeline_mode<synchronous>, transform_indices = @transform_5, window_bounds = array<i64: 256, 32>}, {pipeline_mode = #tpu.pipeline_mode<synchronous>, transform_indices = @transform_6, window_bounds = array<i64: 1, 32>}, {pipeline_mode = #tpu.pipeline_mode<synchronous>, transform_indices = @transform_7, window_bounds = array<i64: 8, 32>}]} {
    %c0_i32 = arith.constant 0 : i32
    %0 = arith.cmpi eq, %arg0, %c0_i32 : i32
    %1 = arith.extui %0 : i1 to i32
    %c0_i32_0 = arith.constant 0 : i32
    %2 = arith.cmpi ne, %1, %c0_i32_0 : i32
    scf.if %2 {
      %cst_9 = arith.constant 0.000000e+00 : f32
      %12 = vector.broadcast %cst_9 : f32 to vector<8x256xf32>
      %c0_10 = arith.constant 0 : index
      %c0_11 = arith.constant 0 : index
      %13 = vector.load %arg9[%c0_10, %c0_11] : memref<8x256xf32, #tpu.memory_space<vmem>>, vector<8x256xf32>
      tpu.vector_store %arg9[%c0_10, %c0_11], %12 {strides = array<i32>} : memref<8x256xf32, #tpu.memory_space<vmem>>, vector<8x256xf32>,
    } else {
    }
    %c0 = arith.constant 0 : index
    %c0_1 = arith.constant 0 : index
    %3 = vector.load %arg9[%c0, %c0_1] : memref<8x256xf32, #tpu.memory_space<vmem>>, vector<8x256xf32>
    %c0_2 = arith.constant 0 : index
    %c0_3 = arith.constant 0 : index
    %4 = vector.load %arg1[%c0_2, %c0_3] : memref<8x4096xf32, #tpu.memory_space<vmem>>, vector<8x4096xf32>
    %c0_4 = arith.constant 0 : index
    %c0_5 = arith.constant 0 : index
    %5 = vector.load %arg2[%c0_4, %c0_5] : memref<4096x256xf32, #tpu.memory_space<vmem>>, vector<4096x256xf32>
    %cst = arith.constant dense<0.000000e+00> : vector<8x256xf32>
    %6 = tpu.matmul %4, %5, %cst {dimension_numbers = #tpu.dot_dimension_numbers<[1], [0], [0], [1], [0, 0, 1, 1], [], []>} : vector<8x4096xf32>, vector<4096x256xf32>, vector<8x256xf32> -> vector<8x256xf32>
    %7 = arith.addf %3, %6 : vector<8x256xf32>
    %c0_6 = arith.constant 0 : index
    %c0_7 = arith.constant 0 : index
    %8 = vector.load %arg9[%c0_6, %c0_7] : memref<8x256xf32, #tpu.memory_space<vmem>>, vector<8x256xf32>
    tpu.vector_store %arg9[%c0_6, %c0_7], %7 {strides = array<i32>} : memref<8x256xf32, #tpu.memory_space<vmem>>, vector<8x256xf32>,
    %c10_i32 = arith.constant 10 : i32
    %9 = arith.cmpi eq, %arg0, %c10_i32 : i32
    %10 = arith.extui %9 : i1 to i32
    %c0_i32_8 = arith.constant 0 : i32
    %11 = arith.cmpi ne, %10, %c0_i32_8 : i32
    scf.if %11 {
      %c0_9 = arith.constant 0 : index
      %c0_10 = arith.constant 0 : index
      %12 = vector.load %arg9[%c0_9, %c0_10] : memref<8x256xf32, #tpu.memory_space<vmem>>, vector<8x256xf32>
      %c0_11 = arith.constant 0 : index
      %c0_12 = arith.constant 0 : index
      %13 = vector.load %arg3[%c0_11, %c0_12] : memref<1x256xf32, #tpu.memory_space<vmem>>, vector<1x256xf32>
      %14 = vector.broadcast %13 : vector<1x256xf32> to vector<8x256xf32>
      %15 = arith.addf %12, %14 : vector<8x256xf32>
      %cst_13 = arith.constant 0.000000e+00 : f32
      %16 = vector.broadcast %cst_13 : f32 to vector<8x256xf32>
      %17 = arith.maximumf %15, %16 : vector<8x256xf32>
      %c0_14 = arith.constant 0 : index
      %c0_15 = arith.constant 0 : index
      %18 = vector.load %arg4[%c0_14, %c0_15] : memref<256x256xf32, #tpu.memory_space<vmem>>, vector<256x256xf32>
      %cst_16 = arith.constant dense<0.000000e+00> : vector<8x256xf32>
      %19 = tpu.matmul %17, %18, %cst_16 {dimension_numbers = #tpu.dot_dimension_numbers<[1], [0], [0], [1], [0, 0, 1, 1], [], []>} : vector<8x256xf32>, vector<256x256xf32>, vector<8x256xf32> -> vector<8x256xf32>
      %c0_17 = arith.constant 0 : index
      %c0_18 = arith.constant 0 : index
      %20 = vector.load %arg5[%c0_17, %c0_18] : memref<1x256xf32, #tpu.memory_space<vmem>>, vector<1x256xf32>
      %21 = vector.broadcast %20 : vector<1x256xf32> to vector<8x256xf32>
      %22 = arith.addf %19, %21 : vector<8x256xf32>
      %cst_19 = arith.constant 0.000000e+00 : f32
      %23 = vector.broadcast %cst_19 : f32 to vector<8x256xf32>
      %24 = arith.maximumf %22, %23 : vector<8x256xf32>
      %c0_20 = arith.constant 0 : index
      %c0_21 = arith.constant 0 : index
      %25 = vector.load %arg6[%c0_20, %c0_21] : memref<256x32xf32, #tpu.memory_space<vmem>>, vector<256x32xf32>
      %cst_22 = arith.constant dense<0.000000e+00> : vector<8x32xf32>
      %26 = tpu.matmul %24, %25, %cst_22 {dimension_numbers = #tpu.dot_dimension_numbers<[1], [0], [0], [1], [0, 0, 1, 1], [], []>} : vector<8x256xf32>, vector<256x32xf32>, vector<8x32xf32> -> vector<8x32xf32>
      %c0_23 = arith.constant 0 : index
      %c0_24 = arith.constant 0 : index
      %27 = vector.load %arg7[%c0_23, %c0_24] : memref<1x32xf32, #tpu.memory_space<vmem>>, vector<1x32xf32>
      %28 = vector.broadcast %27 : vector<1x32xf32> to vector<8x32xf32>
      %29 = arith.addf %26, %28 : vector<8x32xf32>
      %c0_25 = arith.constant 0 : index
      %c0_26 = arith.constant 0 : index
      %30 = vector.load %arg8[%c0_25, %c0_26] : memref<8x32xf32, #tpu.memory_space<vmem>>, vector<8x32xf32>
      tpu.vector_store %arg8[%c0_25, %c0_26], %29 {strides = array<i32>} : memref<8x32xf32, #tpu.memory_space<vmem>>, vector<8x32xf32>,
    } else {
    }
    return
  }
  func.func @transform_0(%arg0: i32) -> (i32, i32) {
    %c0_i32 = arith.constant 0 : i32
    %c0_i32_0 = arith.constant 0 : i32
    return %c0_i32, %arg0 : i32, i32
  }
  func.func @transform_1(%arg0: i32) -> (i32, i32) {
    %c0_i32 = arith.constant 0 : i32
    %c0_i32_0 = arith.constant 0 : i32
    return %arg0, %c0_i32 : i32, i32
  }
  func.func @transform_2(%arg0: i32) -> (i32, i32) {
    %c0_i32 = arith.constant 0 : i32
    %c0_i32_0 = arith.constant 0 : i32
    %c0_i32_1 = arith.constant 0 : i32
    return %c0_i32, %c0_i32_0 : i32, i32
  }
  func.func @transform_3(%arg0: i32) -> (i32, i32) {
    %c0_i32 = arith.constant 0 : i32
    %c0_i32_0 = arith.constant 0 : i32
    %c0_i32_1 = arith.constant 0 : i32
    return %c0_i32, %c0_i32_0 : i32, i32
  }
  func.func @transform_4(%arg0: i32) -> (i32, i32) {
    %c0_i32 = arith.constant 0 : i32
    %c0_i32_0 = arith.constant 0 : i32
    %c0_i32_1 = arith.constant 0 : i32
    return %c0_i32, %c0_i32_0 : i32, i32
  }
  func.func @transform_5(%arg0: i32) -> (i32, i32) {
    %c0_i32 = arith.constant 0 : i32
    %c0_i32_0 = arith.constant 0 : i32
    %c0_i32_1 = arith.constant 0 : i32
    return %c0_i32, %c0_i32_0 : i32, i32
  }
  func.func @transform_6(%arg0: i32) -> (i32, i32) {
    %c0_i32 = arith.constant 0 : i32
    %c0_i32_0 = arith.constant 0 : i32
    %c0_i32_1 = arith.constant 0 : i32
    return %c0_i32, %c0_i32_0 : i32, i32
  }
  func.func @transform_7(%arg0: i32) -> (i32, i32) {
    %c0_i32 = arith.constant 0 : i32
    %c0_i32_0 = arith.constant 0 : i32
    %c0_i32_1 = arith.constant 0 : i32
    return %c0_i32, %c0_i32_0 : i32, i32
  }
}

</mosaic_0001>

<bundles_post_ra>
// kernel: embedding_net_forward.3
= control target key start
LH: loop header
LB: loop body
LE: loop exit
PB: predicated region body
PF: predicated region fallthrough
CT: control target
= control target key end

     0   :  { %s4792_s21 = smov 0   ;;  %s4794_s22 = smov 0   ;;  %s6543_s0 = inlined_call_operand.vmem [shape: f32[16,25], index: 0, kind: input, shape index: {}]   ;;  %s6544_s1 = inlined_call_operand.vmem [shape: f32[16,1], index: 1, kind: input, shape index: {}]   ;;  %s6545_s2 = inlined_call_operand.vmem [shape: f32[25,24576], index: 2, kind: input, shape index: {}]   ;;  %s6546_s3 = inlined_call_operand.vmem [shape: f32[25,24576], index: 3, kind: input, shape index: {}]   ;;  %s6547_s4 = inlined_call_operand.vmem [shape: f32[25,24576], index: 4, kind: input, shape index: {}]   ;;  %s6548_s5 = inlined_call_operand.vmem [shape: f32[25,24576], index: 5, kind: input, shape index: {}]   ;;  %s6549_s6 = inlined_call_operand.vmem [shape: f32[16,24576], index: 6, kind: output, shape index: {}]  }
   0x1   :  { %s4796_s23 = smov 0  }
   0x2 LB: > { %s4220_s24 = sadd.s32 4294967295, %s4752_s23   ;;  %s4809_s25 = sadd.s32 1, %s4752_s23   ;;  %s4752_s23 = sphi %s4796_s23, %s6624_s23   ;;  %s4748_s22 = sphi %s4794_s22, %s6623_s22   ;;  %s4744_s21 = sphi %s4792_s21, %s6622_s21  }
   0x3   : > { %s62_s26 = ssub.s32 %s4752_s23, %s4809_s25  ;;  %s65_s27 = sadd.s32 1, %s4748_s22 }
   0x4   : > { %p63_p0 = scmp.eq.s32.totalorder %s62_s26, 0  ;;  %p72_p1 = scmp.ne.s32.totalorder %s4748_s22, %s4744_s21 }
   0x5   : > { %p73_p2 = scmp.eq.s32.totalorder %s4752_s23, 0  ;;  %p180_p3 = scmp.eq.s32.totalorder %s4220_s24, 11 }
   0x6   : > { %s4820_s28 = scalar_select %p63_p0, %s4748_s22, %s65_s27  }
   0x7   : > { %p4822_p4 = por %p73_p2, %p72_p1  ;;  %p4826_p5 = por %p180_p3, %p72_p1 }
   0x8   : > { %p4223_p6 = scmp.ge.s32.totalorder %s4752_s23, 12 }
   0xa   : > { %208 = sbr.rel (%p4223_p6) target bundleno = 161 (0xa1), region = 24 }
  0x11   : > { %211 = sbr.rel (!%p4822_p4) target bundleno = 53 (0x35), region = 28  ;;  %s213_s7 = sand.u32 (%p4822_p4), 1, %s4748_s22  }
  0x12   : > { %s4375_s8 = sshll.u32 (%p4822_p4), %s4752_s23, 7  ;;  %s4224_s9 = sshll.u32 (%p4822_p4), %s213_s7, 9 }
  0x13   : > { %s4838_s12 = scalar_lea.vmem (%p4822_p4), %s6545_s2, %s4375_s8  ;;  %s4843_s13 = scalar_lea.vmem (%p4822_p4), [#allocation2], %s4224_s9 }
  0x14   : > { %v231_v0 = vld [vmem:[%s4838_s12] sm:$0xff] (%p4822_p4)  ;;  %v233_v1 = vld [vmem:[%s4838_s12 + $0x8] sm:$0xff] (%p4822_p4)  ;;  %v235_v2 = vld [vmem:[%s4838_s12 + $0x10] sm:$0xff] (%p4822_p4) }
  0x15   : > { %232 = vst [vmem:[%s4843_s13] sm:$0xff] (%p4822_p4), %v231_v0  ;;  %234 = vst [vmem:[%s4843_s13 + $0x8] sm:$0xff] (%p4822_p4), %v233_v1  ;;  %v237_v3 = vld [vmem:[%s4838_s12 + $0x18] sm:$0xff] (%p4822_p4)  ;;  %v239_v4 = vld [vmem:[%s4838_s12 + $0x20] sm:$0xff] (%p4822_p4) }
  0x16   : > { %236 = vst [vmem:[%s4843_s13 + $0x10] sm:$0xff] (%p4822_p4), %v235_v2  ;;  %v241_v5 = vld [vmem:[%s4838_s12 + $0x28] sm:$0xff] (%p4822_p4)  ;;  %238 = vst [vmem:[%s4843_s13 + $0x18] sm:$0xff] (%p4822_p4), %v237_v3  ;;  %v243_v6 = vld [vmem:[%s4838_s12 + $0x30] sm:$0xff] (%p4822_p4) }
  0x17   : > { %240 = vst [vmem:[%s4843_s13 + $0x20] sm:$0xff] (%p4822_p4), %v239_v4  ;;  %242 = vst [vmem:[%s4843_s13 + $0x28] sm:$0xff] (%p4822_p4), %v241_v5  ;;  %v245_v7 = vld [vmem:[%s4838_s12 + $0x38] sm:$0xff] (%p4822_p4)  ;;  %v247_v8 = vld [vmem:[%s4838_s12 + $0x40] sm:$0xff] (%p4822_p4) }
  0x18   : > { %244 = vst [vmem:[%s4843_s13 + $0x30] sm:$0xff] %v243_v6  ;;  %246 = vst [vmem:[%s4843_s13 + $0x38] sm:$0xff] %v245_v7  ;;  %v249_v9 = vld [vmem:[%s4838_s12 + $0x48] sm:$0xff]  ;;  %v251_v10 = vld [vmem:[%s4838_s12 + $0x50] sm:$0xff] }
  0x19   : > { %248 = vst [vmem:[%s4843_s13 + $0x40] sm:$0xff] %v247_v8  ;;  %v253_v11 = vld [vmem:[%s4838_s12 + $0x58] sm:$0xff]  ;;  %250 = vst [vmem:[%s4843_s13 + $0x48] sm:$0xff] %v249_v9  ;;  %v255_v12 = vld [vmem:[%s4838_s12 + $0x60] sm:$0xff] }
  0x1a   : > { %252 = vst [vmem:[%s4843_s13 + $0x50] sm:$0xff] %v251_v10  ;;  %254 = vst [vmem:[%s4843_s13 + $0x58] sm:$0xff] %v253_v11  ;;  %v257_v13 = vld [vmem:[%s4838_s12 + $0x68] sm:$0xff]  ;;  %v259_v14 = vld [vmem:[%s4838_s12 + $0x70] sm:$0xff] }
  0x1b   : > { %256 = vst [vmem:[%s4843_s13 + $0x60] sm:$0xff] %v255_v12  ;;  %258 = vst [vmem:[%s4843_s13 + $0x68] sm:$0xff] %v257_v13  ;;  %v261_v15 = vld [vmem:[%s4838_s12 + $0x78] sm:$0xff]  ;;  %v263_v16 = vld [vmem:[%s4838_s12 + $0x600] sm:$0xff] }
  0x1c   : > { %260 = vst [vmem:[%s4843_s13 + $0x70] sm:$0xff] %v259_v14  ;;  %v265_v17 = vld [vmem:[%s4838_s12 + $0x608] sm:$0xff]  ;;  %262 = vst [vmem:[%s4843_s13 + $0x78] sm:$0xff] %v261_v15  ;;  %v267_v18 = vld [vmem:[%s4838_s12 + $0x610] sm:$0xff] }
  0x1d   : > { %264 = vst [vmem:[%s4843_s13 + $0x80] sm:$0xff] %v263_v16  ;;  %266 = vst [vmem:[%s4843_s13 + $0x88] sm:$0xff] %v265_v17  ;;  %v269_v19 = vld [vmem:[%s4838_s12 + $0x618] sm:$0xff]  ;;  %v271_v20 = vld [vmem:[%s4838_s12 + $0x620] sm:$0xff] }
  0x1e   : > { %268 = vst [vmem:[%s4843_s13 + $0x90] sm:$0xff] %v267_v18  ;;  %270 = vst [vmem:[%s4843_s13 + $0x98] sm:$0xff] %v269_v19  ;;  %v273_v21 = vld [vmem:[%s4838_s12 + $0x628] sm:$0xff]  ;;  %v275_v22 = vld [vmem:[%s4838_s12 + $0x630] sm:$0xff] }
  0x1f   : > { %272 = vst [vmem:[%s4843_s13 + $0xa0] sm:$0xff] %v271_v20  ;;  %v277_v23 = vld [vmem:[%s4838_s12 + $0x638] sm:$0xff]  ;;  %274 = vst [vmem:[%s4843_s13 + $0xa8] sm:$0xff] %v273_v21  ;;  %v279_v24 = vld [vmem:[%s4838_s12 + $0x640] sm:$0xff] }
  0x20   : > { %276 = vst [vmem:[%s4843_s13 + $0xb0] sm:$0xff] %v275_v22  ;;  %278 = vst [vmem:[%s4843_s13 + $0xb8] sm:$0xff] %v277_v23  ;;  %v281_v25 = vld [vmem:[%s4838_s12 + $0x648] sm:$0xff]  ;;  %v283_v26 = vld [vmem:[%s4838_s12 + $0x650] sm:$0xff] }
  0x21   : > { %280 = vst [vmem:[%s4843_s13 + $0xc0] sm:$0xff] %v279_v24  ;;  %282 = vst [vmem:[%s4843_s13 + $0xc8] sm:$0xff] %v281_v25  ;;  %v285_v27 = vld [vmem:[%s4838_s12 + $0x658] sm:$0xff]  ;;  %v287_v28 = vld [vmem:[%s4838_s12 + $0x660] sm:$0xff] }
  0x22   : > { %284 = vst [vmem:[%s4843_s13 + $0xd0] sm:$0xff] %v283_v26  ;;  %v289_v29 = vld [vmem:[%s4838_s12 + $0x668] sm:$0xff]  ;;  %286 = vst [vmem:[%s4843_s13 + $0xd8] sm:$0xff] %v285_v27  ;;  %v291_v30 = vld [vmem:[%s4838_s12 + $0x670] sm:$0xff] }
  0x23   : > { %288 = vst [vmem:[%s4843_s13 + $0xe0] sm:$0xff] %v287_v28  ;;  %290 = vst [vmem:[%s4843_s13 + $0xe8] sm:$0xff] %v289_v29  ;;  %v293_v31 = vld [vmem:[%s4838_s12 + $0x678] sm:$0xff]  ;;  %v295_v32 = vld [vmem:[%s4838_s12 + $0xc00] sm:$0xff] }
  0x24   : > { %292 = vst [vmem:[%s4843_s13 + $0xf0] sm:$0xff] %v291_v30  ;;  %294 = vst [vmem:[%s4843_s13 + $0xf8] sm:$0xff] %v293_v31  ;;  %v297_v33 = vld [vmem:[%s4838_s12 + $0xc08] sm:$0xff]  ;;  %v299_v34 = vld [vmem:[%s4838_s12 + $0xc10] sm:$0xff] }
  0x25   : > { %296 = vst [vmem:[%s4843_s13 + $0x100] sm:$0xff] %v295_v32  ;;  %v301_v35 = vld [vmem:[%s4838_s12 + $0xc18] sm:$0xff]  ;;  %298 = vst [vmem:[%s4843_s13 + $0x108] sm:$0xff] %v297_v33  ;;  %v303_v36 = vld [vmem:[%s4838_s12 + $0xc20] sm:$0xff] }
  0x26   : > { %300 = vst [vmem:[%s4843_s13 + $0x110] sm:$0xff] %v299_v34  ;;  %302 = vst [vmem:[%s4843_s13 + $0x118] sm:$0xff] %v301_v35  ;;  %v305_v37 = vld [vmem:[%s4838_s12 + $0xc28] sm:$0xff]  ;;  %v307_v38 = vld [vmem:[%s4838_s12 + $0xc30] sm:$0xff] }
  0x27   : > { %304 = vst [vmem:[%s4843_s13 + $0x120] sm:$0xff] %v303_v36  ;;  %306 = vst [vmem:[%s4843_s13 + $0x128] sm:$0xff] %v305_v37  ;;  %v309_v39 = vld [vmem:[%s4838_s12 + $0xc38] sm:$0xff]  ;;  %v311_v40 = vld [vmem:[%s4838_s12 + $0xc40] sm:$0xff] }
  0x28   : > { %308 = vst [vmem:[%s4843_s13 + $0x130] sm:$0xff] %v307_v38  ;;  %v313_v41 = vld [vmem:[%s4838_s12 + $0xc48] sm:$0xff]  ;;  %310 = vst [vmem:[%s4843_s13 + $0x138] sm:$0xff] %v309_v39  ;;  %v315_v42 = vld [vmem:[%s4838_s12 + $0xc50] sm:$0xff] }
  0x29   : > { %312 = vst [vmem:[%s4843_s13 + $0x140] sm:$0xff] %v311_v40  ;;  %314 = vst [vmem:[%s4843_s13 + $0x148] sm:$0xff] %v313_v41  ;;  %v317_v43 = vld [vmem:[%s4838_s12 + $0xc58] sm:$0xff]  ;;  %v319_v44 = vld [vmem:[%s4838_s12 + $0xc60] sm:$0xff] }
  0x2a   : > { %316 = vst [vmem:[%s4843_s13 + $0x150] sm:$0xff] %v315_v42  ;;  %318 = vst [vmem:[%s4843_s13 + $0x158] sm:$0xff] %v317_v43  ;;  %v321_v45 = vld [vmem:[%s4838_s12 + $0xc68] sm:$0xff]  ;;  %v323_v46 = vld [vmem:[%s4838_s12 + $0xc70] sm:$0xff] }
  0x2b   : > { %320 = vst [vmem:[%s4843_s13 + $0x160] sm:$0xff] %v319_v44  ;;  %v325_v47 = vld [vmem:[%s4838_s12 + $0xc78] sm:$0xff]  ;;  %322 = vst [vmem:[%s4843_s13 + $0x168] sm:$0xff] %v321_v45  ;;  %v327_v48 = vld [vmem:[%s4838_s12 + $0x1200] sm:$0xff] }
  0x2c   : > { %324 = vst [vmem:[%s4843_s13 + $0x170] sm:$0xff] %v323_v46  ;;  %326 = vst [vmem:[%s4843_s13 + $0x178] sm:$0xff] %v325_v47  ;;  %v329_v49 = vld [vmem:[%s4838_s12 + $0x1208] sm:$0xff]  ;;  %v331_v50 = vld [vmem:[%s4838_s12 + $0x1210] sm:$0xff] }
  0x2d   : > { %328 = vst [vmem:[%s4843_s13 + $0x180] sm:$0xff] %v327_v48  ;;  %330 = vst [vmem:[%s4843_s13 + $0x188] sm:$0xff] %v329_v49  ;;  %v333_v51 = vld [vmem:[%s4838_s12 + $0x1218] sm:$0xff]  ;;  %v335_v52 = vld [vmem:[%s4838_s12 + $0x1220] sm:$0xff] }
  0x2e   : > { %332 = vst [vmem:[%s4843_s13 + $0x190] sm:$0xff] %v331_v50  ;;  %v337_v53 = vld [vmem:[%s4838_s12 + $0x1228] sm:$0xff]  ;;  %334 = vst [vmem:[%s4843_s13 + $0x198] sm:$0xff] %v333_v51  ;;  %v339_v54 = vld [vmem:[%s4838_s12 + $0x1230] sm:$0xff] }
  0x2f   : > { %336 = vst [vmem:[%s4843_s13 + $0x1a0] sm:$0xff] %v335_v52  ;;  %338 = vst [vmem:[%s4843_s13 + $0x1a8] sm:$0xff] %v337_v53  ;;  %v341_v55 = vld [vmem:[%s4838_s12 + $0x1238] sm:$0xff]  ;;  %v343_v56 = vld [vmem:[%s4838_s12 + $0x1240] sm:$0xff] }
  0x30   : > { %340 = vst [vmem:[%s4843_s13 + $0x1b0] sm:$0xff] %v339_v54  ;;  %342 = vst [vmem:[%s4843_s13 + $0x1b8] sm:$0xff] %v341_v55  ;;  %v345_v57 = vld [vmem:[%s4838_s12 + $0x1248] sm:$0xff]  ;;  %v347_v58 = vld [vmem:[%s4838_s12 + $0x1250] sm:$0xff] }
  0x31   : > { %344 = vst [vmem:[%s4843_s13 + $0x1c0] sm:$0xff] %v343_v56  ;;  %v349_v59 = vld [vmem:[%s4838_s12 + $0x1258] sm:$0xff]  ;;  %346 = vst [vmem:[%s4843_s13 + $0x1c8] sm:$0xff] %v345_v57  ;;  %v351_v60 = vld [vmem:[%s4838_s12 + $0x1260] sm:$0xff] }
  0x32   : > { %348 = vst [vmem:[%s4843_s13 + $0x1d0] sm:$0xff] %v347_v58  ;;  %350 = vst [vmem:[%s4843_s13 + $0x1d8] sm:$0xff] %v349_v59  ;;  %v353_v61 = vld [vmem:[%s4838_s12 + $0x1268] sm:$0xff]  ;;  %v355_v62 = vld [vmem:[%s4838_s12 + $0x1270] sm:$0xff] }
  0x33   : > { %352 = vst [vmem:[%s4843_s13 + $0x1e0] sm:$0xff] %v351_v60  ;;  %354 = vst [vmem:[%s4843_s13 + $0x1e8] sm:$0xff] %v353_v61  ;;  %v357_v63 = vld [vmem:[%s4838_s12 + $0x1278] sm:$0xff] }
  0x34   : > { %356 = vst [vmem:[%s4843_s13 + $0x1f0] sm:$0xff] %v355_v62  ;;  %358 = vst [vmem:[%s4843_s13 + $0x1f8] sm:$0xff] %v357_v63 }
  0x35 PF: > { %364 = sbr.rel (!%p4822_p4) target bundleno = 89 (0x59), region = 51  ;;  %s366_s14 = sand.u32 (%p4822_p4), 1, %s4748_s22  }
  0x36   : > { %s4376_s15 = sshll.u32 (%p4822_p4), %s4752_s23, 7  ;;  %s4227_s16 = sshll.u32 (%p4822_p4), %s366_s14, 9 }
  0x37   : > { %s4977_s19 = scalar_lea.vmem (%p4822_p4), %s6546_s3, %s4376_s15  ;;  %s4982_s20 = scalar_lea.vmem (%p4822_p4), [#allocation3], %s4227_s16 }
  0x38   : > { %v384_v0 = vld [vmem:[%s4977_s19] sm:$0xff] (%p4822_p4)  ;;  %v386_v1 = vld [vmem:[%s4977_s19 + $0x8] sm:$0xff] (%p4822_p4)  ;;  %v388_v2 = vld [vmem:[%s4977_s19 + $0x10] sm:$0xff] (%p4822_p4) }
  0x39   : > { %385 = vst [vmem:[%s4982_s20] sm:$0xff] (%p4822_p4), %v384_v0  ;;  %387 = vst [vmem:[%s4982_s20 + $0x8] sm:$0xff] (%p4822_p4), %v386_v1  ;;  %v390_v3 = vld [vmem:[%s4977_s19 + $0x18] sm:$0xff] (%p4822_p4)  ;;  %v392_v4 = vld [vmem:[%s4977_s19 + $0x20] sm:$0xff] (%p4822_p4) }
  0x3a   : > { %389 = vst [vmem:[%s4982_s20 + $0x10] sm:$0xff] (%p4822_p4), %v388_v2  ;;  %v394_v5 = vld [vmem:[%s4977_s19 + $0x28] sm:$0xff] (%p4822_p4)  ;;  %391 = vst [vmem:[%s4982_s20 + $0x18] sm:$0xff] (%p4822_p4), %v390_v3  ;;  %v396_v6 = vld [vmem:[%s4977_s19 + $0x30] sm:$0xff] (%p4822_p4) }
  0x3b   : > { %393 = vst [vmem:[%s4982_s20 + $0x20] sm:$0xff] (%p4822_p4), %v392_v4  ;;  %395 = vst [vmem:[%s4982_s20 + $0x28] sm:$0xff] (%p4822_p4), %v394_v5  ;;  %v398_v7 = vld [vmem:[%s4977_s19 + $0x38] sm:$0xff] (%p4822_p4)  ;;  %v400_v8 = vld [vmem:[%s4977_s19 + $0x40] sm:$0xff] (%p4822_p4) }
  0x3c   : > { %397 = vst [vmem:[%s4982_s20 + $0x30] sm:$0xff] %v396_v6  ;;  %399 = vst [vmem:[%s4982_s20 + $0x38] sm:$0xff] %v398_v7  ;;  %v402_v9 = vld [vmem:[%s4977_s19 + $0x48] sm:$0xff]  ;;  %v404_v10 = vld [vmem:[%s4977_s19 + $0x50] sm:$0xff] }
  0x3d   : > { %401 = vst [vmem:[%s4982_s20 + $0x40] sm:$0xff] %v400_v8  ;;  %v406_v11 = vld [vmem:[%s4977_s19 + $0x58] sm:$0xff]  ;;  %403 = vst [vmem:[%s4982_s20 + $0x48] sm:$0xff] %v402_v9  ;;  %v408_v12 = vld [vmem:[%s4977_s19 + $0x60] sm:$0xff] }
  0x3e   : > { %405 = vst [vmem:[%s4982_s20 + $0x50] sm:$0xff] %v404_v10  ;;  %407 = vst [vmem:[%s4982_s20 + $0x58] sm:$0xff] %v406_v11  ;;  %v410_v13 = vld [vmem:[%s4977_s19 + $0x68] sm:$0xff]  ;;  %v412_v14 = vld [vmem:[%s4977_s19 + $0x70] sm:$0xff] }
  0x3f   : > { %409 = vst [vmem:[%s4982_s20 + $0x60] sm:$0xff] %v408_v12  ;;  %411 = vst [vmem:[%s4982_s20 + $0x68] sm:$0xff] %v410_v13  ;;  %v414_v15 = vld [vmem:[%s4977_s19 + $0x78] sm:$0xff]  ;;  %v416_v16 = vld [vmem:[%s4977_s19 + $0x600] sm:$0xff] }
  0x40   : > { %413 = vst [vmem:[%s4982_s20 + $0x70] sm:$0xff] %v412_v14  ;;  %v418_v17 = vld [vmem:[%s4977_s19 + $0x608] sm:$0xff]  ;;  %415 = vst [vmem:[%s4982_s20 + $0x78] sm:$0xff] %v414_v15  ;;  %v420_v18 = vld [vmem:[%s4977_s19 + $0x610] sm:$0xff] }
  0x41   : > { %417 = vst [vmem:[%s4982_s20 + $0x80] sm:$0xff] %v416_v16  ;;  %419 = vst [vmem:[%s4982_s20 + $0x88] sm:$0xff] %v418_v17  ;;  %v422_v19 = vld [vmem:[%s4977_s19 + $0x618] sm:$0xff]  ;;  %v424_v20 = vld [vmem:[%s4977_s19 + $0x620] sm:$0xff] }
  0x42   : > { %421 = vst [vmem:[%s4982_s20 + $0x90] sm:$0xff] %v420_v18  ;;  %423 = vst [vmem:[%s4982_s20 + $0x98] sm:$0xff] %v422_v19  ;;  %v426_v21 = vld [vmem:[%s4977_s19 + $0x628] sm:$0xff]  ;;  %v428_v22 = vld [vmem:[%s4977_s19 + $0x630] sm:$0xff] }
  0x43   : > { %425 = vst [vmem:[%s4982_s20 + $0xa0] sm:$0xff] %v424_v20  ;;  %v430_v23 = vld [vmem:[%s4977_s19 + $0x638] sm:$0xff]  ;;  %427 = vst [vmem:[%s4982_s20 + $0xa8] sm:$0xff] %v426_v21  ;;  %v432_v24 = vld [vmem:[%s4977_s19 + $0x640] sm:$0xff] }
  0x44   : > { %429 = vst [vmem:[%s4982_s20 + $0xb0] sm:$0xff] %v428_v22  ;;  %431 = vst [vmem:[%s4982_s20 + $0xb8] sm:$0xff] %v430_v23  ;;  %v434_v25 = vld [vmem:[%s4977_s19 + $0x648] sm:$0xff]  ;;  %v436_v26 = vld [vmem:[%s4977_s19 + $0x650] sm:$0xff] }
  0x45   : > { %433 = vst [vmem:[%s4982_s20 + $0xc0] sm:$0xff] %v432_v24  ;;  %435 = vst [vmem:[%s4982_s20 + $0xc8] sm:$0xff] %v434_v25  ;;  %v438_v27 = vld [vmem:[%s4977_s19 + $0x658] sm:$0xff]  ;;  %v440_v28 = vld [vmem:[%s4977_s19 + $0x660] sm:$0xff] }
  0x46   : > { %437 = vst [vmem:[%s4982_s20 + $0xd0] sm:$0xff] %v436_v26  ;;  %v442_v29 = vld [vmem:[%s4977_s19 + $0x668] sm:$0xff]  ;;  %439 = vst [vmem:[%s4982_s20 + $0xd8] sm:$0xff] %v438_v27  ;;  %v444_v30 = vld [vmem:[%s4977_s19 + $0x670] sm:$0xff] }
  0x47   : > { %441 = vst [vmem:[%s4982_s20 + $0xe0] sm:$0xff] %v440_v28  ;;  %443 = vst [vmem:[%s4982_s20 + $0xe8] sm:$0xff] %v442_v29  ;;  %v446_v31 = vld [vmem:[%s4977_s19 + $0x678] sm:$0xff]  ;;  %v448_v32 = vld [vmem:[%s4977_s19 + $0xc00] sm:$0xff] }
  0x48   : > { %445 = vst [vmem:[%s4982_s20 + $0xf0] sm:$0xff] %v444_v30  ;;  %447 = vst [vmem:[%s4982_s20 + $0xf8] sm:$0xff] %v446_v31  ;;  %v450_v33 = vld [vmem:[%s4977_s19 + $0xc08] sm:$0xff]  ;;  %v452_v34 = vld [vmem:[%s4977_s19 + $0xc10] sm:$0xff] }
  0x49   : > { %449 = vst [vmem:[%s4982_s20 + $0x100] sm:$0xff] %v448_v32  ;;  %v454_v35 = vld [vmem:[%s4977_s19 + $0xc18] sm:$0xff]  ;;  %451 = vst [vmem:[%s4982_s20 + $0x108] sm:$0xff] %v450_v33  ;;  %v456_v36 = vld [vmem:[%s4977_s19 + $0xc20] sm:$0xff] }
  0x4a   : > { %453 = vst [vmem:[%s4982_s20 + $0x110] sm:$0xff] %v452_v34  ;;  %455 = vst [vmem:[%s4982_s20 + $0x118] sm:$0xff] %v454_v35  ;;  %v458_v37 = vld [vmem:[%s4977_s19 + $0xc28] sm:$0xff]  ;;  %v460_v38 = vld [vmem:[%s4977_s19 + $0xc30] sm:$0xff] }
  0x4b   : > { %457 = vst [vmem:[%s4982_s20 + $0x120] sm:$0xff] %v456_v36  ;;  %459 = vst [vmem:[%s4982_s20 + $0x128] sm:$0xff] %v458_v37  ;;  %v462_v39 = vld [vmem:[%s4977_s19 + $0xc38] sm:$0xff]  ;;  %v464_v40 = vld [vmem:[%s4977_s19 + $0xc40] sm:$0xff] }
  0x4c   : > { %461 = vst [vmem:[%s4982_s20 + $0x130] sm:$0xff] %v460_v38  ;;  %v466_v41 = vld [vmem:[%s4977_s19 + $0xc48] sm:$0xff]  ;;  %463 = vst [vmem:[%s4982_s20 + $0x138] sm:$0xff] %v462_v39  ;;  %v468_v42 = vld [vmem:[%s4977_s19 + $0xc50] sm:$0xff] }
  0x4d   : > { %465 = vst [vmem:[%s4982_s20 + $0x140] sm:$0xff] %v464_v40  ;;  %467 = vst [vmem:[%s4982_s20 + $0x148] sm:$0xff] %v466_v41  ;;  %v470_v43 = vld [vmem:[%s4977_s19 + $0xc58] sm:$0xff]  ;;  %v472_v44 = vld [vmem:[%s4977_s19 + $0xc60] sm:$0xff] }
  0x4e   : > { %469 = vst [vmem:[%s4982_s20 + $0x150] sm:$0xff] %v468_v42  ;;  %471 = vst [vmem:[%s4982_s20 + $0x158] sm:$0xff] %v470_v43  ;;  %v474_v45 = vld [vmem:[%s4977_s19 + $0xc68] sm:$0xff]  ;;  %v476_v46 = vld [vmem:[%s4977_s19 + $0xc70] sm:$0xff] }
  0x4f   : > { %473 = vst [vmem:[%s4982_s20 + $0x160] sm:$0xff] %v472_v44  ;;  %v478_v47 = vld [vmem:[%s4977_s19 + $0xc78] sm:$0xff]  ;;  %475 = vst [vmem:[%s4982_s20 + $0x168] sm:$0xff] %v474_v45  ;;  %v480_v48 = vld [vmem:[%s4977_s19 + $0x1200] sm:$0xff] }
  0x50   : > { %477 = vst [vmem:[%s4982_s20 + $0x170] sm:$0xff] %v476_v46  ;;  %479 = vst [vmem:[%s4982_s20 + $0x178] sm:$0xff] %v478_v47  ;;  %v482_v49 = vld [vmem:[%s4977_s19 + $0x1208] sm:$0xff]  ;;  %v484_v50 = vld [vmem:[%s4977_s19 + $0x1210] sm:$0xff] }
  0x51   : > { %481 = vst [vmem:[%s4982_s20 + $0x180] sm:$0xff] %v480_v48  ;;  %483 = vst [vmem:[%s4982_s20 + $0x188] sm:$0xff] %v482_v49  ;;  %v486_v51 = vld [vmem:[%s4977_s19 + $0x1218] sm:$0xff]  ;;  %v488_v52 = vld [vmem:[%s4977_s19 + $0x1220] sm:$0xff] }
  0x52   : > { %485 = vst [vmem:[%s4982_s20 + $0x190] sm:$0xff] %v484_v50  ;;  %v490_v53 = vld [vmem:[%s4977_s19 + $0x1228] sm:$0xff]  ;;  %487 = vst [vmem:[%s4982_s20 + $0x198] sm:$0xff] %v486_v51  ;;  %v492_v54 = vld [vmem:[%s4977_s19 + $0x1230] sm:$0xff] }
  0x53   : > { %489 = vst [vmem:[%s4982_s20 + $0x1a0] sm:$0xff] %v488_v52  ;;  %491 = vst [vmem:[%s4982_s20 + $0x1a8] sm:$0xff] %v490_v53  ;;  %v494_v55 = vld [vmem:[%s4977_s19 + $0x1238] sm:$0xff]  ;;  %v496_v56 = vld [vmem:[%s4977_s19 + $0x1240] sm:$0xff] }
  0x54   : > { %493 = vst [vmem:[%s4982_s20 + $0x1b0] sm:$0xff] %v492_v54  ;;  %495 = vst [vmem:[%s4982_s20 + $0x1b8] sm:$0xff] %v494_v55  ;;  %v498_v57 = vld [vmem:[%s4977_s19 + $0x1248] sm:$0xff]  ;;  %v500_v58 = vld [vmem:[%s4977_s19 + $0x1250] sm:$0xff] }
  0x55   : > { %497 = vst [vmem:[%s4982_s20 + $0x1c0] sm:$0xff] %v496_v56  ;;  %v502_v59 = vld [vmem:[%s4977_s19 + $0x1258] sm:$0xff]  ;;  %499 = vst [vmem:[%s4982_s20 + $0x1c8] sm:$0xff] %v498_v57  ;;  %v504_v60 = vld [vmem:[%s4977_s19 + $0x1260] sm:$0xff] }
  0x56   : > { %501 = vst [vmem:[%s4982_s20 + $0x1d0] sm:$0xff] %v500_v58  ;;  %503 = vst [vmem:[%s4982_s20 + $0x1d8] sm:$0xff] %v502_v59  ;;  %v506_v61 = vld [vmem:[%s4977_s19 + $0x1268] sm:$0xff]  ;;  %v508_v62 = vld [vmem:[%s4977_s19 + $0x1270] sm:$0xff] }
  0x57   : > { %505 = vst [vmem:[%s4982_s20 + $0x1e0] sm:$0xff] %v504_v60  ;;  %507 = vst [vmem:[%s4982_s20 + $0x1e8] sm:$0xff] %v506_v61  ;;  %v510_v63 = vld [vmem:[%s4977_s19 + $0x1278] sm:$0xff] }
  0x58   : > { %509 = vst [vmem:[%s4982_s20 + $0x1f0] sm:$0xff] %v508_v62  ;;  %511 = vst [vmem:[%s4982_s20 + $0x1f8] sm:$0xff] %v510_v63 }
  0x59 PF: > { %517 = sbr.rel (!%p4822_p4) target bundleno = 125 (0x7d), region = 74  ;;  %s519_s26 = sand.u32 (%p4822_p4), 1, %s4748_s22  }
  0x5a   : > { %s4377_s27 = sshll.u32 (%p4822_p4), %s4752_s23, 7  ;;  %s4230_s7 = sshll.u32 (%p4822_p4), %s519_s26, 9 }
  0x5b   : > { %s5116_s10 = scalar_lea.vmem (%p4822_p4), %s6547_s4, %s4377_s27  ;;  %s5121_s11 = scalar_lea.vmem (%p4822_p4), [#allocation4], %s4230_s7 }
  0x5c   : > { %v537_v0 = vld [vmem:[%s5116_s10] sm:$0xff] (%p4822_p4)  ;;  %v539_v1 = vld [vmem:[%s5116_s10 + $0x8] sm:$0xff] (%p4822_p4)  ;;  %v541_v2 = vld [vmem:[%s5116_s10 + $0x10] sm:$0xff] (%p4822_p4) }
  0x5d   : > { %538 = vst [vmem:[%s5121_s11] sm:$0xff] (%p4822_p4), %v537_v0  ;;  %540 = vst [vmem:[%s5121_s11 + $0x8] sm:$0xff] (%p4822_p4), %v539_v1  ;;  %v543_v3 = vld [vmem:[%s5116_s10 + $0x18] sm:$0xff] (%p4822_p4)  ;;  %v545_v4 = vld [vmem:[%s5116_s10 + $0x20] sm:$0xff] (%p4822_p4) }
  0x5e   : > { %542 = vst [vmem:[%s5121_s11 + $0x10] sm:$0xff] (%p4822_p4), %v541_v2  ;;  %v547_v5 = vld [vmem:[%s5116_s10 + $0x28] sm:$0xff] (%p4822_p4)  ;;  %544 = vst [vmem:[%s5121_s11 + $0x18] sm:$0xff] (%p4822_p4), %v543_v3  ;;  %v549_v6 = vld [vmem:[%s5116_s10 + $0x30] sm:$0xff] (%p4822_p4) }
  0x5f   : > { %546 = vst [vmem:[%s5121_s11 + $0x20] sm:$0xff] (%p4822_p4), %v545_v4  ;;  %548 = vst [vmem:[%s5121_s11 + $0x28] sm:$0xff] (%p4822_p4), %v547_v5  ;;  %v551_v7 = vld [vmem:[%s5116_s10 + $0x38] sm:$0xff] (%p4822_p4)  ;;  %v553_v8 = vld [vmem:[%s5116_s10 + $0x40] sm:$0xff] (%p4822_p4) }
  0x60   : > { %550 = vst [vmem:[%s5121_s11 + $0x30] sm:$0xff] %v549_v6  ;;  %552 = vst [vmem:[%s5121_s11 + $0x38] sm:$0xff] %v551_v7  ;;  %v555_v9 = vld [vmem:[%s5116_s10 + $0x48] sm:$0xff]  ;;  %v557_v10 = vld [vmem:[%s5116_s10 + $0x50] sm:$0xff] }
  0x61   : > { %554 = vst [vmem:[%s5121_s11 + $0x40] sm:$0xff] %v553_v8  ;;  %v559_v11 = vld [vmem:[%s5116_s10 + $0x58] sm:$0xff]  ;;  %556 = vst [vmem:[%s5121_s11 + $0x48] sm:$0xff] %v555_v9  ;;  %v561_v12 = vld [vmem:[%s5116_s10 + $0x60] sm:$0xff] }
  0x62   : > { %558 = vst [vmem:[%s5121_s11 + $0x50] sm:$0xff] %v557_v10  ;;  %560 = vst [vmem:[%s5121_s11 + $0x58] sm:$0xff] %v559_v11  ;;  %v563_v13 = vld [vmem:[%s5116_s10 + $0x68] sm:$0xff]  ;;  %v565_v14 = vld [vmem:[%s5116_s10 + $0x70] sm:$0xff] }
  0x63   : > { %562 = vst [vmem:[%s5121_s11 + $0x60] sm:$0xff] %v561_v12  ;;  %564 = vst [vmem:[%s5121_s11 + $0x68] sm:$0xff] %v563_v13  ;;  %v567_v15 = vld [vmem:[%s5116_s10 + $0x78] sm:$0xff]  ;;  %v569_v16 = vld [vmem:[%s5116_s10 + $0x600] sm:$0xff] }
  0x64   : > { %566 = vst [vmem:[%s5121_s11 + $0x70] sm:$0xff] %v565_v14  ;;  %v571_v17 = vld [vmem:[%s5116_s10 + $0x608] sm:$0xff]  ;;  %568 = vst [vmem:[%s5121_s11 + $0x78] sm:$0xff] %v567_v15  ;;  %v573_v18 = vld [vmem:[%s5116_s10 + $0x610] sm:$0xff] }
  0x65   : > { %570 = vst [vmem:[%s5121_s11 + $0x80] sm:$0xff] %v569_v16  ;;  %572 = vst [vmem:[%s5121_s11 + $0x88] sm:$0xff] %v571_v17  ;;  %v575_v19 = vld [vmem:[%s5116_s10 + $0x618] sm:$0xff]  ;;  %v577_v20 = vld [vmem:[%s5116_s10 + $0x620] sm:$0xff] }
  0x66   : > { %574 = vst [vmem:[%s5121_s11 + $0x90] sm:$0xff] %v573_v18  ;;  %576 = vst [vmem:[%s5121_s11 + $0x98] sm:$0xff] %v575_v19  ;;  %v579_v21 = vld [vmem:[%s5116_s10 + $0x628] sm:$0xff]  ;;  %v581_v22 = vld [vmem:[%s5116_s10 + $0x630] sm:$0xff] }
  0x67   : > { %578 = vst [vmem:[%s5121_s11 + $0xa0] sm:$0xff] %v577_v20  ;;  %v583_v23 = vld [vmem:[%s5116_s10 + $0x638] sm:$0xff]  ;;  %580 = vst [vmem:[%s5121_s11 + $0xa8] sm:$0xff] %v579_v21  ;;  %v585_v24 = vld [vmem:[%s5116_s10 + $0x640] sm:$0xff] }
  0x68   : > { %582 = vst [vmem:[%s5121_s11 + $0xb0] sm:$0xff] %v581_v22  ;;  %584 = vst [vmem:[%s5121_s11 + $0xb8] sm:$0xff] %v583_v23  ;;  %v587_v25 = vld [vmem:[%s5116_s10 + $0x648] sm:$0xff]  ;;  %v589_v26 = vld [vmem:[%s5116_s10 + $0x650] sm:$0xff] }
  0x69   : > { %586 = vst [vmem:[%s5121_s11 + $0xc0] sm:$0xff] %v585_v24  ;;  %588 = vst [vmem:[%s5121_s11 + $0xc8] sm:$0xff] %v587_v25  ;;  %v591_v27 = vld [vmem:[%s5116_s10 + $0x658] sm:$0xff]  ;;  %v593_v28 = vld [vmem:[%s5116_s10 + $0x660] sm:$0xff] }
  0x6a   : > { %590 = vst [vmem:[%s5121_s11 + $0xd0] sm:$0xff] %v589_v26  ;;  %v595_v29 = vld [vmem:[%s5116_s10 + $0x668] sm:$0xff]  ;;  %592 = vst [vmem:[%s5121_s11 + $0xd8] sm:$0xff] %v591_v27  ;;  %v597_v30 = vld [vmem:[%s5116_s10 + $0x670] sm:$0xff] }
  0x6b   : > { %594 = vst [vmem:[%s5121_s11 + $0xe0] sm:$0xff] %v593_v28  ;;  %596 = vst [vmem:[%s5121_s11 + $0xe8] sm:$0xff] %v595_v29  ;;  %v599_v31 = vld [vmem:[%s5116_s10 + $0x678] sm:$0xff]  ;;  %v601_v32 = vld [vmem:[%s5116_s10 + $0xc00] sm:$0xff] }
  0x6c   : > { %598 = vst [vmem:[%s5121_s11 + $0xf0] sm:$0xff] %v597_v30  ;;  %600 = vst [vmem:[%s5121_s11 + $0xf8] sm:$0xff] %v599_v31  ;;  %v603_v33 = vld [vmem:[%s5116_s10 + $0xc08] sm:$0xff]  ;;  %v605_v34 = vld [vmem:[%s5116_s10 + $0xc10] sm:$0xff] }
  0x6d   : > { %602 = vst [vmem:[%s5121_s11 + $0x100] sm:$0xff] %v601_v32  ;;  %v607_v35 = vld [vmem:[%s5116_s10 + $0xc18] sm:$0xff]  ;;  %604 = vst [vmem:[%s5121_s11 + $0x108] sm:$0xff] %v603_v33  ;;  %v609_v36 = vld [vmem:[%s5116_s10 + $0xc20] sm:$0xff] }
  0x6e   : > { %606 = vst [vmem:[%s5121_s11 + $0x110] sm:$0xff] %v605_v34  ;;  %608 = vst [vmem:[%s5121_s11 + $0x118] sm:$0xff] %v607_v35  ;;  %v611_v37 = vld [vmem:[%s5116_s10 + $0xc28] sm:$0xff]  ;;  %v613_v38 = vld [vmem:[%s5116_s10 + $0xc30] sm:$0xff] }
  0x6f   : > { %610 = vst [vmem:[%s5121_s11 + $0x120] sm:$0xff] %v609_v36  ;;  %612 = vst [vmem:[%s5121_s11 + $0x128] sm:$0xff] %v611_v37  ;;  %v615_v39 = vld [vmem:[%s5116_s10 + $0xc38] sm:$0xff]  ;;  %v617_v40 = vld [vmem:[%s5116_s10 + $0xc40] sm:$0xff] }
  0x70   : > { %614 = vst [vmem:[%s5121_s11 + $0x130] sm:$0xff] %v613_v38  ;;  %v619_v41 = vld [vmem:[%s5116_s10 + $0xc48] sm:$0xff]  ;;  %616 = vst [vmem:[%s5121_s11 + $0x138] sm:$0xff] %v615_v39  ;;  %v621_v42 = vld [vmem:[%s5116_s10 + $0xc50] sm:$0xff] }
  0x71   : > { %618 = vst [vmem:[%s5121_s11 + $0x140] sm:$0xff] %v617_v40  ;;  %620 = vst [vmem:[%s5121_s11 + $0x148] sm:$0xff] %v619_v41  ;;  %v623_v43 = vld [vmem:[%s5116_s10 + $0xc58] sm:$0xff]  ;;  %v625_v44 = vld [vmem:[%s5116_s10 + $0xc60] sm:$0xff] }
  0x72   : > { %622 = vst [vmem:[%s5121_s11 + $0x150] sm:$0xff] %v621_v42  ;;  %624 = vst [vmem:[%s5121_s11 + $0x158] sm:$0xff] %v623_v43  ;;  %v627_v45 = vld [vmem:[%s5116_s10 + $0xc68] sm:$0xff]  ;;  %v629_v46 = vld [vmem:[%s5116_s10 + $0xc70] sm:$0xff] }
  0x73   : > { %626 = vst [vmem:[%s5121_s11 + $0x160] sm:$0xff] %v625_v44  ;;  %v631_v47 = vld [vmem:[%s5116_s10 + $0xc78] sm:$0xff]  ;;  %628 = vst [vmem:[%s5121_s11 + $0x168] sm:$0xff] %v627_v45  ;;  %v633_v48 = vld [vmem:[%s5116_s10 + $0x1200] sm:$0xff] }
  0x74   : > { %630 = vst [vmem:[%s5121_s11 + $0x170] sm:$0xff] %v629_v46  ;;  %632 = vst [vmem:[%s5121_s11 + $0x178] sm:$0xff] %v631_v47  ;;  %v635_v49 = vld [vmem:[%s5116_s10 + $0x1208] sm:$0xff]  ;;  %v637_v50 = vld [vmem:[%s5116_s10 + $0x1210] sm:$0xff] }
  0x75   : > { %634 = vst [vmem:[%s5121_s11 + $0x180] sm:$0xff] %v633_v48  ;;  %636 = vst [vmem:[%s5121_s11 + $0x188] sm:$0xff] %v635_v49  ;;  %v639_v51 = vld [vmem:[%s5116_s10 + $0x1218] sm:$0xff]  ;;  %v641_v52 = vld [vmem:[%s5116_s10 + $0x1220] sm:$0xff] }
  0x76   : > { %638 = vst [vmem:[%s5121_s11 + $0x190] sm:$0xff] %v637_v50  ;;  %v643_v53 = vld [vmem:[%s5116_s10 + $0x1228] sm:$0xff]  ;;  %640 = vst [vmem:[%s5121_s11 + $0x198] sm:$0xff] %v639_v51  ;;  %v645_v54 = vld [vmem:[%s5116_s10 + $0x1230] sm:$0xff] }
  0x77   : > { %642 = vst [vmem:[%s5121_s11 + $0x1a0] sm:$0xff] %v641_v52  ;;  %644 = vst [vmem:[%s5121_s11 + $0x1a8] sm:$0xff] %v643_v53  ;;  %v647_v55 = vld [vmem:[%s5116_s10 + $0x1238] sm:$0xff]  ;;  %v649_v56 = vld [vmem:[%s5116_s10 + $0x1240] sm:$0xff] }
  0x78   : > { %646 = vst [vmem:[%s5121_s11 + $0x1b0] sm:$0xff] %v645_v54  ;;  %648 = vst [vmem:[%s5121_s11 + $0x1b8] sm:$0xff] %v647_v55  ;;  %v651_v57 = vld [vmem:[%s5116_s10 + $0x1248] sm:$0xff]  ;;  %v653_v58 = vld [vmem:[%s5116_s10 + $0x1250] sm:$0xff] }
  0x79   : > { %650 = vst [vmem:[%s5121_s11 + $0x1c0] sm:$0xff] %v649_v56  ;;  %v655_v59 = vld [vmem:[%s5116_s10 + $0x1258] sm:$0xff]  ;;  %652 = vst [vmem:[%s5121_s11 + $0x1c8] sm:$0xff] %v651_v57  ;;  %v657_v60 = vld [vmem:[%s5116_s10 + $0x1260] sm:$0xff] }
  0x7a   : > { %654 = vst [vmem:[%s5121_s11 + $0x1d0] sm:$0xff] %v653_v58  ;;  %656 = vst [vmem:[%s5121_s11 + $0x1d8] sm:$0xff] %v655_v59  ;;  %v659_v61 = vld [vmem:[%s5116_s10 + $0x1268] sm:$0xff]  ;;  %v661_v62 = vld [vmem:[%s5116_s10 + $0x1270] sm:$0xff] }
  0x7b   : > { %658 = vst [vmem:[%s5121_s11 + $0x1e0] sm:$0xff] %v657_v60  ;;  %660 = vst [vmem:[%s5121_s11 + $0x1e8] sm:$0xff] %v659_v61  ;;  %v663_v63 = vld [vmem:[%s5116_s10 + $0x1278] sm:$0xff] }
  0x7c   : > { %662 = vst [vmem:[%s5121_s11 + $0x1f0] sm:$0xff] %v661_v62  ;;  %664 = vst [vmem:[%s5121_s11 + $0x1f8] sm:$0xff] %v663_v63 }
  0x7d PF: > { %670 = sbr.rel (!%p4822_p4) target bundleno = 161 (0xa1), region = 97  ;;  %s672_s12 = sand.u32 (%p4822_p4), 1, %s4748_s22  }
  0x7e   : > { %s4378_s13 = sshll.u32 (%p4822_p4), %s4752_s23, 7  ;;  %s4233_s14 = sshll.u32 (%p4822_p4), %s672_s12, 9 }
  0x7f   : > { %s5255_s17 = scalar_lea.vmem (%p4822_p4), %s6548_s5, %s4378_s13  ;;  %s5260_s29 = scalar_lea.vmem (%p4822_p4), [#allocation5], %s4233_s14 }
  0x80   : > { %v690_v0 = vld [vmem:[%s5255_s17] sm:$0xff] (%p4822_p4)  ;;  %v692_v1 = vld [vmem:[%s5255_s17 + $0x8] sm:$0xff] (%p4822_p4)  ;;  %v694_v2 = vld [vmem:[%s5255_s17 + $0x10] sm:$0xff] (%p4822_p4) }
  0x81   : > { %691 = vst [vmem:[%s5260_s29] sm:$0xff] (%p4822_p4), %v690_v0  ;;  %693 = vst [vmem:[%s5260_s29 + $0x8] sm:$0xff] (%p4822_p4), %v692_v1  ;;  %v696_v3 = vld [vmem:[%s5255_s17 + $0x18] sm:$0xff] (%p4822_p4)  ;;  %v698_v4 = vld [vmem:[%s5255_s17 + $0x20] sm:$0xff] (%p4822_p4) }
  0x82   : > { %695 = vst [vmem:[%s5260_s29 + $0x10] sm:$0xff] (%p4822_p4), %v694_v2  ;;  %v700_v5 = vld [vmem:[%s5255_s17 + $0x28] sm:$0xff] (%p4822_p4)  ;;  %697 = vst [vmem:[%s5260_s29 + $0x18] sm:$0xff] (%p4822_p4), %v696_v3  ;;  %v702_v6 = vld [vmem:[%s5255_s17 + $0x30] sm:$0xff] (%p4822_p4) }
  0x83   : > { %699 = vst [vmem:[%s5260_s29 + $0x20] sm:$0xff] (%p4822_p4), %v698_v4  ;;  %701 = vst [vmem:[%s5260_s29 + $0x28] sm:$0xff] (%p4822_p4), %v700_v5  ;;  %v704_v7 = vld [vmem:[%s5255_s17 + $0x38] sm:$0xff] (%p4822_p4)  ;;  %v706_v8 = vld [vmem:[%s5255_s17 + $0x40] sm:$0xff] (%p4822_p4) }
  0x84   : > { %703 = vst [vmem:[%s5260_s29 + $0x30] sm:$0xff] %v702_v6  ;;  %705 = vst [vmem:[%s5260_s29 + $0x38] sm:$0xff] %v704_v7  ;;  %v708_v9 = vld [vmem:[%s5255_s17 + $0x48] sm:$0xff]  ;;  %v710_v10 = vld [vmem:[%s5255_s17 + $0x50] sm:$0xff] }
  0x85   : > { %707 = vst [vmem:[%s5260_s29 + $0x40] sm:$0xff] %v706_v8  ;;  %v712_v11 = vld [vmem:[%s5255_s17 + $0x58] sm:$0xff]  ;;  %709 = vst [vmem:[%s5260_s29 + $0x48] sm:$0xff] %v708_v9  ;;  %v714_v12 = vld [vmem:[%s5255_s17 + $0x60] sm:$0xff] }
  0x86   : > { %711 = vst [vmem:[%s5260_s29 + $0x50] sm:$0xff] %v710_v10  ;;  %713 = vst [vmem:[%s5260_s29 + $0x58] sm:$0xff] %v712_v11  ;;  %v716_v13 = vld [vmem:[%s5255_s17 + $0x68] sm:$0xff]  ;;  %v718_v14 = vld [vmem:[%s5255_s17 + $0x70] sm:$0xff] }
  0x87   : > { %715 = vst [vmem:[%s5260_s29 + $0x60] sm:$0xff] %v714_v12  ;;  %717 = vst [vmem:[%s5260_s29 + $0x68] sm:$0xff] %v716_v13  ;;  %v720_v15 = vld [vmem:[%s5255_s17 + $0x78] sm:$0xff]  ;;  %v722_v16 = vld [vmem:[%s5255_s17 + $0x600] sm:$0xff] }
  0x88   : > { %719 = vst [vmem:[%s5260_s29 + $0x70] sm:$0xff] %v718_v14  ;;  %v724_v17 = vld [vmem:[%s5255_s17 + $0x608] sm:$0xff]  ;;  %721 = vst [vmem:[%s5260_s29 + $0x78] sm:$0xff] %v720_v15  ;;  %v726_v18 = vld [vmem:[%s5255_s17 + $0x610] sm:$0xff] }
  0x89   : > { %723 = vst [vmem:[%s5260_s29 + $0x80] sm:$0xff] %v722_v16  ;;  %725 = vst [vmem:[%s5260_s29 + $0x88] sm:$0xff] %v724_v17  ;;  %v728_v19 = vld [vmem:[%s5255_s17 + $0x618] sm:$0xff]  ;;  %v730_v20 = vld [vmem:[%s5255_s17 + $0x620] sm:$0xff] }
  0x8a   : > { %727 = vst [vmem:[%s5260_s29 + $0x90] sm:$0xff] %v726_v18  ;;  %729 = vst [vmem:[%s5260_s29 + $0x98] sm:$0xff] %v728_v19  ;;  %v732_v21 = vld [vmem:[%s5255_s17 + $0x628] sm:$0xff]  ;;  %v734_v22 = vld [vmem:[%s5255_s17 + $0x630] sm:$0xff] }
  0x8b   : > { %731 = vst [vmem:[%s5260_s29 + $0xa0] sm:$0xff] %v730_v20  ;;  %v736_v23 = vld [vmem:[%s5255_s17 + $0x638] sm:$0xff]  ;;  %733 = vst [vmem:[%s5260_s29 + $0xa8] sm:$0xff] %v732_v21  ;;  %v738_v24 = vld [vmem:[%s5255_s17 + $0x640] sm:$0xff] }
  0x8c   : > { %735 = vst [vmem:[%s5260_s29 + $0xb0] sm:$0xff] %v734_v22  ;;  %737 = vst [vmem:[%s5260_s29 + $0xb8] sm:$0xff] %v736_v23  ;;  %v740_v25 = vld [vmem:[%s5255_s17 + $0x648] sm:$0xff]  ;;  %v742_v26 = vld [vmem:[%s5255_s17 + $0x650] sm:$0xff] }
  0x8d   : > { %739 = vst [vmem:[%s5260_s29 + $0xc0] sm:$0xff] %v738_v24  ;;  %741 = vst [vmem:[%s5260_s29 + $0xc8] sm:$0xff] %v740_v25  ;;  %v744_v27 = vld [vmem:[%s5255_s17 + $0x658] sm:$0xff]  ;;  %v746_v28 = vld [vmem:[%s5255_s17 + $0x660] sm:$0xff] }
  0x8e   : > { %743 = vst [vmem:[%s5260_s29 + $0xd0] sm:$0xff] %v742_v26  ;;  %v748_v29 = vld [vmem:[%s5255_s17 + $0x668] sm:$0xff]  ;;  %745 = vst [vmem:[%s5260_s29 + $0xd8] sm:$0xff] %v744_v27  ;;  %v750_v30 = vld [vmem:[%s5255_s17 + $0x670] sm:$0xff] }
  0x8f   : > { %747 = vst [vmem:[%s5260_s29 + $0xe0] sm:$0xff] %v746_v28  ;;  %749 = vst [vmem:[%s5260_s29 + $0xe8] sm:$0xff] %v748_v29  ;;  %v752_v31 = vld [vmem:[%s5255_s17 + $0x678] sm:$0xff]  ;;  %v754_v32 = vld [vmem:[%s5255_s17 + $0xc00] sm:$0xff] }
  0x90   : > { %751 = vst [vmem:[%s5260_s29 + $0xf0] sm:$0xff] %v750_v30  ;;  %753 = vst [vmem:[%s5260_s29 + $0xf8] sm:$0xff] %v752_v31  ;;  %v756_v33 = vld [vmem:[%s5255_s17 + $0xc08] sm:$0xff]  ;;  %v758_v34 = vld [vmem:[%s5255_s17 + $0xc10] sm:$0xff] }
  0x91   : > { %755 = vst [vmem:[%s5260_s29 + $0x100] sm:$0xff] %v754_v32  ;;  %v760_v35 = vld [vmem:[%s5255_s17 + $0xc18] sm:$0xff]  ;;  %757 = vst [vmem:[%s5260_s29 + $0x108] sm:$0xff] %v756_v33  ;;  %v762_v36 = vld [vmem:[%s5255_s17 + $0xc20] sm:$0xff] }
  0x92   : > { %759 = vst [vmem:[%s5260_s29 + $0x110] sm:$0xff] %v758_v34  ;;  %761 = vst [vmem:[%s5260_s29 + $0x118] sm:$0xff] %v760_v35  ;;  %v764_v37 = vld [vmem:[%s5255_s17 + $0xc28] sm:$0xff]  ;;  %v766_v38 = vld [vmem:[%s5255_s17 + $0xc30] sm:$0xff] }
  0x93   : > { %763 = vst [vmem:[%s5260_s29 + $0x120] sm:$0xff] %v762_v36  ;;  %765 = vst [vmem:[%s5260_s29 + $0x128] sm:$0xff] %v764_v37  ;;  %v768_v39 = vld [vmem:[%s5255_s17 + $0xc38] sm:$0xff]  ;;  %v770_v40 = vld [vmem:[%s5255_s17 + $0xc40] sm:$0xff] }
  0x94   : > { %767 = vst [vmem:[%s5260_s29 + $0x130] sm:$0xff] %v766_v38  ;;  %v772_v41 = vld [vmem:[%s5255_s17 + $0xc48] sm:$0xff]  ;;  %769 = vst [vmem:[%s5260_s29 + $0x138] sm:$0xff] %v768_v39  ;;  %v774_v42 = vld [vmem:[%s5255_s17 + $0xc50] sm:$0xff] }
  0x95   : > { %771 = vst [vmem:[%s5260_s29 + $0x140] sm:$0xff] %v770_v40  ;;  %773 = vst [vmem:[%s5260_s29 + $0x148] sm:$0xff] %v772_v41  ;;  %v776_v43 = vld [vmem:[%s5255_s17 + $0xc58] sm:$0xff]  ;;  %v778_v44 = vld [vmem:[%s5255_s17 + $0xc60] sm:$0xff] }
  0x96   : > { %775 = vst [vmem:[%s5260_s29 + $0x150] sm:$0xff] %v774_v42  ;;  %777 = vst [vmem:[%s5260_s29 + $0x158] sm:$0xff] %v776_v43  ;;  %v780_v45 = vld [vmem:[%s5255_s17 + $0xc68] sm:$0xff]  ;;  %v782_v46 = vld [vmem:[%s5255_s17 + $0xc70] sm:$0xff] }
  0x97   : > { %779 = vst [vmem:[%s5260_s29 + $0x160] sm:$0xff] %v778_v44  ;;  %v784_v47 = vld [vmem:[%s5255_s17 + $0xc78] sm:$0xff]  ;;  %781 = vst [vmem:[%s5260_s29 + $0x168] sm:$0xff] %v780_v45  ;;  %v786_v48 = vld [vmem:[%s5255_s17 + $0x1200] sm:$0xff] }
  0x98   : > { %783 = vst [vmem:[%s5260_s29 + $0x170] sm:$0xff] %v782_v46  ;;  %785 = vst [vmem:[%s5260_s29 + $0x178] sm:$0xff] %v784_v47  ;;  %v788_v49 = vld [vmem:[%s5255_s17 + $0x1208] sm:$0xff]  ;;  %v790_v50 = vld [vmem:[%s5255_s17 + $0x1210] sm:$0xff] }
  0x99   : > { %787 = vst [vmem:[%s5260_s29 + $0x180] sm:$0xff] %v786_v48  ;;  %789 = vst [vmem:[%s5260_s29 + $0x188] sm:$0xff] %v788_v49  ;;  %v792_v51 = vld [vmem:[%s5255_s17 + $0x1218] sm:$0xff]  ;;  %v794_v52 = vld [vmem:[%s5255_s17 + $0x1220] sm:$0xff] }
  0x9a   : > { %791 = vst [vmem:[%s5260_s29 + $0x190] sm:$0xff] %v790_v50  ;;  %v796_v53 = vld [vmem:[%s5255_s17 + $0x1228] sm:$0xff]  ;;  %793 = vst [vmem:[%s5260_s29 + $0x198] sm:$0xff] %v792_v51  ;;  %v798_v54 = vld [vmem:[%s5255_s17 + $0x1230] sm:$0xff] }
  0x9b   : > { %795 = vst [vmem:[%s5260_s29 + $0x1a0] sm:$0xff] %v794_v52  ;;  %797 = vst [vmem:[%s5260_s29 + $0x1a8] sm:$0xff] %v796_v53  ;;  %v800_v55 = vld [vmem:[%s5255_s17 + $0x1238] sm:$0xff]  ;;  %v802_v56 = vld [vmem:[%s5255_s17 + $0x1240] sm:$0xff] }
  0x9c   : > { %799 = vst [vmem:[%s5260_s29 + $0x1b0] sm:$0xff] %v798_v54  ;;  %801 = vst [vmem:[%s5260_s29 + $0x1b8] sm:$0xff] %v800_v55  ;;  %v804_v57 = vld [vmem:[%s5255_s17 + $0x1248] sm:$0xff]  ;;  %v806_v58 = vld [vmem:[%s5255_s17 + $0x1250] sm:$0xff] }
  0x9d   : > { %803 = vst [vmem:[%s5260_s29 + $0x1c0] sm:$0xff] %v802_v56  ;;  %v808_v59 = vld [vmem:[%s5255_s17 + $0x1258] sm:$0xff]  ;;  %805 = vst [vmem:[%s5260_s29 + $0x1c8] sm:$0xff] %v804_v57  ;;  %v810_v60 = vld [vmem:[%s5255_s17 + $0x1260] sm:$0xff] }
  0x9e   : > { %807 = vst [vmem:[%s5260_s29 + $0x1d0] sm:$0xff] %v806_v58  ;;  %809 = vst [vmem:[%s5260_s29 + $0x1d8] sm:$0xff] %v808_v59  ;;  %v812_v61 = vld [vmem:[%s5255_s17 + $0x1268] sm:$0xff]  ;;  %v814_v62 = vld [vmem:[%s5255_s17 + $0x1270] sm:$0xff] }
  0x9f   : > { %811 = vst [vmem:[%s5260_s29 + $0x1e0] sm:$0xff] %v810_v60  ;;  %813 = vst [vmem:[%s5260_s29 + $0x1e8] sm:$0xff] %v812_v61  ;;  %v816_v63 = vld [vmem:[%s5255_s17 + $0x1278] sm:$0xff] }
  0xa0   : > { %815 = vst [vmem:[%s5260_s29 + $0x1f0] sm:$0xff] %v814_v62  ;;  %817 = vst [vmem:[%s5260_s29 + $0x1f8] sm:$0xff] %v816_v63 }
  0xa1 PF: > { %p4236_p7 = scmp.ge.s32.totalorder %s4752_s23, 1  ;;  %p822_p8 = scmp.lt.s32.totalorder %s4752_s23, 13 }
  0xa3   : > { %p823_p9 = pnand %p4236_p7, %p822_p8 }
  0xa5   : > { %826 = sbr.rel (%p823_p9) target bundleno = 540 (0x21c), region = 120 }
  0xac   : > { %s829_s18 = sand.u32 1, %s4744_s21   ;;  %vm968_vm0 = vcmask 1040384   ;;  %v4754_v0 = vmov 0.0   ;;  %vm4755_vm1 = vmmov 1   ;;  %v5428_v28 = vld [vmem:[%s6543_s0] sm:$0xff]  ;;  %vm961_vm3 = vcmask 203776  }
  0xad   : > { %s5392_s19 = sshll.u32 %s829_s18, 9  ;;  %1081 = vmatprep.mubr.f32.mxu0 %v4754_v0  ;;  %1158 = vmatprep.mubr.f32.mxu1 %v4754_v0  ;;  %vm5396_vm2 = vmpackc.low %vm968_vm0, %vm4755_vm1  ;;  %v4756_v48 = vmov 0   ;;  %v5457_v52 = vld [vmem:[%s6543_s0 + $0x8] sm:$0xff] }
  0xae   : > { %s5401_s20 = scalar_lea.vmem [#allocation2], %s5392_s19  ;;  %4727 = vset.pattern.permute.xlu0 %v4756_v48  ;;  %s5528_s9 = scalar_lea.vmem [#allocation3], %s5392_s19 }
  0xaf   : > { %v898_v2 = vld [vmem:[%s5401_s20 + $0x8] sm:$0xff]  ;;  %v900_v4 = vld [vmem:[%s5401_s20 + $0x18] sm:$0xff]  ;;  %v897_v7 = vld [vmem:[%s5401_s20] sm:$0xff]  ;;  %s5675_s10 = scalar_lea.vmem [#allocation4], %s5392_s19  ;;  %s5822_s11 = scalar_lea.vmem [#allocation5], %s5392_s19 }
  0xb0   : > { %v914_v3 = vld [vmem:[%s5401_s20 + $0x88] sm:$0xff]  ;;  %v916_v6 = vld [vmem:[%s5401_s20 + $0x98] sm:$0xff]  ;;  %v913_v8 = vld [vmem:[%s5401_s20 + $0x80] sm:$0xff] }
  0xb1   : > { %v4380_v5 = vpack.c.bf16 %v914_v3, %v898_v2  ;;  %v4390_v9 = vpack.c.bf16 %v916_v6, %v900_v4  ;;  %v4382_v10 = vpack.c.bf16 %v913_v8, %v897_v7  ;;  %v899_v11 = vld [vmem:[%s5401_s20 + $0x10] sm:$0xff]  ;;  %v930_v13 = vld [vmem:[%s5401_s20 + $0x108] sm:$0xff]  ;;  %v932_v16 = vld [vmem:[%s5401_s20 + $0x118] sm:$0xff] }
  0xb2   : > { %v915_v12 = vld [vmem:[%s5401_s20 + $0x90] sm:$0xff]  ;;  %v946_v15 = vld [vmem:[%s5401_s20 + $0x188] sm:$0x1]  ;;  %v948_v17 = vld [vmem:[%s5401_s20 + $0x198] sm:$0x1] }
  0xb3   : > { %4381 = vmatprep.subr.bf16.mxu0 %v4380_v5  ;;  %v4392_v14 = vpack.c.bf16 %v915_v12, %v899_v11  ;;  %4391 = vmatprep.subr.bf16.mxu1 %v4390_v9  ;;  %v4384_v18 = vpack.c.bf16 %v946_v15, %v930_v13  ;;  %v4394_v19 = vpack.c.bf16 %v948_v17, %v932_v16  ;;  %v929_v20 = vld [vmem:[%s5401_s20 + $0x100] sm:$0xff]  ;;  %v931_v22 = vld [vmem:[%s5401_s20 + $0x110] sm:$0xff]  ;;  %v902_v25 = vld [vmem:[%s5401_s20 + $0x28] sm:$0xff] }
  0xb4   : > { %4383 = vmatpush1.bf16.msra.mxu0 %v4382_v10  ;;  %v945_v21 = vld [vmem:[%s5401_s20 + $0x180] sm:$0x1]  ;;  %v947_v24 = vld [vmem:[%s5401_s20 + $0x190] sm:$0x1]  ;;  %v918_v26 = vld [vmem:[%s5401_s20 + $0xa8] sm:$0xff] }
  0xb5   : > { %4393 = vmatpush1.bf16.msra.mxu1 %v4392_v14  ;;  %v4387_v23 = vpack.c.bf16 %v945_v21, %v929_v20  ;;  %4386 = vmatprep.subr.msk.bf16.mxu0 %vm5396_vm2, %v4384_v18  ;;  %v4397_v27 = vpack.c.bf16 %v947_v24, %v931_v22  ;;  %v4400_v29 = vpack.c.bf16 %v918_v26, %v902_v25  ;;  %v904_v30 = vld [vmem:[%s5401_s20 + $0x38] sm:$0xff]  ;;  %v901_v32 = vld [vmem:[%s5401_s20 + $0x20] sm:$0xff]  ;;  %v903_v35 = vld [vmem:[%s5401_s20 + $0x30] sm:$0xff] }
  0xb6   : > { %4396 = vmatprep.subr.msk.bf16.mxu1 %vm5396_vm2, %v4394_v19  ;;  %v920_v31 = vld [vmem:[%s5401_s20 + $0xb8] sm:$0xff]  ;;  %v917_v34 = vld [vmem:[%s5401_s20 + $0xa0] sm:$0xff]  ;;  %v919_v36 = vld [vmem:[%s5401_s20 + $0xb0] sm:$0xff] }
  0xb7   : > { %v4410_v33 = vpack.c.bf16 %v920_v31, %v904_v30  ;;  %v4402_v37 = vpack.c.bf16 %v917_v34, %v901_v32  ;;  %v934_v38 = vld [vmem:[%s5401_s20 + $0x128] sm:$0xff]  ;;  %v936_v40 = vld [vmem:[%s5401_s20 + $0x138] sm:$0xff]  ;;  %v4412_v41 = vpack.c.bf16 %v919_v36, %v903_v35  ;;  %v933_v43 = vld [vmem:[%s5401_s20 + $0x120] sm:$0xff] }
  0xb8   : > { %4389 = vmatpush1.bf16.msk.msra.mxu0 %vm5396_vm2, %v4387_v23  ;;  %v950_v39 = vld [vmem:[%s5401_s20 + $0x1a8] sm:$0x1]  ;;  %v952_v42 = vld [vmem:[%s5401_s20 + $0x1b8] sm:$0x1]  ;;  %v949_v44 = vld [vmem:[%s5401_s20 + $0x1a0] sm:$0x1] }
  0xb9   : > { %4399 = vmatpush1.bf16.msk.msra.mxu1 %vm5396_vm2, %v4397_v27  ;;  %4401 = vmatprep.subr.bf16.mxu0 %v4400_v29  ;;  %v4404_v45 = vpack.c.bf16 %v950_v39, %v934_v38  ;;  %v935_v46 = vld [vmem:[%s5401_s20 + $0x130] sm:$0xff]  ;;  %v4414_v49 = vpack.c.bf16 %v952_v42, %v936_v40  ;;  %v906_v50 = vld [vmem:[%s5401_s20 + $0x48] sm:$0xff]  ;;  %v4407_v53 = vpack.c.bf16 %v949_v44, %v933_v43  ;;  %v908_v54 = vld [vmem:[%s5401_s20 + $0x58] sm:$0xff] }
  0xba   : > { %4411 = vmatprep.subr.bf16.mxu1 %v4410_v33  ;;  %v951_v47 = vld [vmem:[%s5401_s20 + $0x1b0] sm:$0x1]  ;;  %v922_v51 = vld [vmem:[%s5401_s20 + $0xc8] sm:$0xff]  ;;  %v924_v55 = vld [vmem:[%s5401_s20 + $0xd8] sm:$0xff] }
  0xbb   : > { %4244 = vmatmul.mubr.msk.f32.vlgmr.msra.gmra.mrb[0].mxu0 %vm961_vm3, %v5428_v28  ;;  %v4417_v56 = vpack.c.bf16 %v951_v47, %v935_v46  ;;  %v905_v57 = vld [vmem:[%s5401_s20 + $0x40] sm:$0xff]  ;;  %v4420_v59 = vpack.c.bf16 %v922_v51, %v906_v50  ;;  %v907_v60 = vld [vmem:[%s5401_s20 + $0x50] sm:$0xff]  ;;  %v4430_v62 = vpack.c.bf16 %v924_v55, %v908_v54  ;;  %v938_v63 = vld [vmem:[%s5401_s20 + $0x148] sm:$0xff] }
  0xbc   : > { %4248 = vmatmul.mubr.msk.f32.vlgmr.msra.gmra.mrb[0].mxu1 %vm961_vm3, %v5428_v28  ;;  %4403 = vmatpush1.bf16.msra.mxu0 %v4402_v37  ;;  %v921_v58 = vld [vmem:[%s5401_s20 + $0xc0] sm:$0xff]  ;;  %v923_v61 = vld [vmem:[%s5401_s20 + $0xd0] sm:$0xff]  ;;  %v954_v2 = vld [vmem:[%s5401_s20 + $0x1c8] sm:$0x1] }
  0xbd   : > { %4413 = vmatpush1.bf16.msra.mxu1 %v4412_v41  ;;  %1087 = vmatprep.mubr.f32.mxu0 %v4754_v0  ;;  %v4422_v3 = vpack.c.bf16 %v921_v58, %v905_v57  ;;  %v940_v4 = vld [vmem:[%s5401_s20 + $0x158] sm:$0xff]  ;;  %v4432_v6 = vpack.c.bf16 %v923_v61, %v907_v60  ;;  %v937_v7 = vld [vmem:[%s5401_s20 + $0x140] sm:$0xff]  ;;  %v4424_v9 = vpack.c.bf16 %v954_v2, %v938_v63  ;;  %v939_v10 = vld [vmem:[%s5401_s20 + $0x150] sm:$0xff] }
  0xbe   : > { %1164 = vmatprep.mubr.f32.mxu1 %v4754_v0  ;;  %4406 = vmatprep.subr.msk.bf16.mxu0 %vm5396_vm2, %v4404_v45  ;;  %v956_v5 = vld [vmem:[%s5401_s20 + $0x1d8] sm:$0x1]  ;;  %v953_v8 = vld [vmem:[%s5401_s20 + $0x1c0] sm:$0x1]  ;;  %v955_v11 = vld [vmem:[%s5401_s20 + $0x1d0] sm:$0x1] }
  0xbf   : > { %4245 = vmatmul.mubr.msk.f32.gmra.mrb[2].mxu0 %vm961_vm3, %v5457_v52  ;;  %4416 = vmatprep.subr.msk.bf16.mxu1 %vm5396_vm2, %v4414_v49  ;;  %v4434_v12 = vpack.c.bf16 %v956_v5, %v940_v4  ;;  %v910_v13 = vld [vmem:[%s5401_s20 + $0x68] sm:$0xff]  ;;  %v4427_v15 = vpack.c.bf16 %v953_v8, %v937_v7  ;;  %v912_v16 = vld [vmem:[%s5401_s20 + $0x78] sm:$0xff]  ;;  %v4437_v18 = vpack.c.bf16 %v955_v11, %v939_v10  ;;  %v909_v19 = vld [vmem:[%s5401_s20 + $0x60] sm:$0xff] }
  0xc0   : > { %4249 = vmatmul.mubr.msk.f32.gmra.mrb[2].mxu1 %vm961_vm3, %v5457_v52  ;;  %4409 = vmatpush1.bf16.msk.msra.mxu0 %vm5396_vm2, %v4407_v53  ;;  %v926_v14 = vld [vmem:[%s5401_s20 + $0xe8] sm:$0xff]  ;;  %v928_v17 = vld [vmem:[%s5401_s20 + $0xf8] sm:$0xff]  ;;  %v925_v20 = vld [vmem:[%s5401_s20 + $0xe0] sm:$0xff] }
  0xc1   : > { %4419 = vmatpush1.bf16.msk.msra.mxu1 %vm5396_vm2, %v4417_v56  ;;  %1235 = vmatprep.mubr.f32.mxu0 %v4754_v0  ;;  %v4440_v21 = vpack.c.bf16 %v926_v14, %v910_v13  ;;  %v911_v22 = vld [vmem:[%s5401_s20 + $0x70] sm:$0xff]  ;;  %v4450_v24 = vpack.c.bf16 %v928_v17, %v912_v16  ;;  %v942_v25 = vld [vmem:[%s5401_s20 + $0x168] sm:$0xff]  ;;  %v4442_v27 = vpack.c.bf16 %v925_v20, %v909_v19  ;;  %v944_v29 = vld [vmem:[%s5401_s20 + $0x178] sm:$0xff] }
  0xc2   : > { %1312 = vmatprep.mubr.f32.mxu1 %v4754_v0  ;;  %4421 = vmatprep.subr.bf16.mxu0 %v4420_v59  ;;  %v927_v23 = vld [vmem:[%s5401_s20 + $0xf0] sm:$0xff]  ;;  %v958_v26 = vld [vmem:[%s5401_s20 + $0x1e8] sm:$0x1]  ;;  %v960_v30 = vld [vmem:[%s5401_s20 + $0x1f8] sm:$0x1] }
  0xc3   : > { %4252 = vmatmul.mubr.msk.f32.vlgmr.msra.gmra.mrb[4].mxu0 %vm961_vm3, %v5428_v28  ;;  %4431 = vmatprep.subr.bf16.mxu1 %v4430_v62  ;;  %v4452_v31 = vpack.c.bf16 %v927_v23, %v911_v22  ;;  %v941_v32 = vld [vmem:[%s5401_s20 + $0x160] sm:$0xff]  ;;  %v4444_v34 = vpack.c.bf16 %v958_v26, %v942_v25  ;;  %v943_v35 = vld [vmem:[%s5401_s20 + $0x170] sm:$0xff]  ;;  %v4454_v37 = vpack.c.bf16 %v960_v30, %v944_v29  ;;  %v1634_v38 = vld [vmem:[%s5528_s9 + $0x8] sm:$0xff] }
  0xc4   : > { %4256 = vmatmul.mubr.msk.f32.vlgmr.msra.gmra.mrb[4].mxu1 %vm961_vm3, %v5428_v28  ;;  %4423 = vmatpush1.bf16.msra.mxu0 %v4422_v3  ;;  %v957_v33 = vld [vmem:[%s5401_s20 + $0x1e0] sm:$0x1]  ;;  %v959_v36 = vld [vmem:[%s5401_s20 + $0x1f0] sm:$0x1]  ;;  %v1650_v39 = vld [vmem:[%s5528_s9 + $0x88] sm:$0xff]  ;;  %s4241_s20 = sshll.u32 %s829_s18, 8 }
  0xc5   : > { %4433 = vmatpush1.bf16.msra.mxu1 %v4432_v6  ;;  %1241 = vmatprep.mubr.f32.mxu0 %v4754_v0  ;;  %v4447_v40 = vpack.c.bf16 %v957_v33, %v941_v32  ;;  %v1636_v41 = vld [vmem:[%s5528_s9 + $0x18] sm:$0xff]  ;;  %v4457_v43 = vpack.c.bf16 %v959_v36, %v943_v35  ;;  %v1633_v44 = vld [vmem:[%s5528_s9] sm:$0xff]  ;;  %v4460_v46 = vpack.c.bf16 %v1650_v39, %v1634_v38  ;;  %v1635_v47 = vld [vmem:[%s5528_s9 + $0x10] sm:$0xff]  ;;  %s6373_s21 = scalar_lea.vmem [#allocation6], %s4241_s20  ;;  %s4379_s18 = sshll.u32 (%p4826_p5), %s4220_s24, 7 }
  0xc6   : > { %1318 = vmatprep.mubr.f32.mxu1 %v4754_v0  ;;  %4426 = vmatprep.subr.msk.bf16.mxu0 %vm5396_vm2, %v4424_v9  ;;  %v1652_v42 = vld [vmem:[%s5528_s9 + $0x98] sm:$0xff]  ;;  %v1649_v45 = vld [vmem:[%s5528_s9 + $0x80] sm:$0xff]  ;;  %v1651_v48 = vld [vmem:[%s5528_s9 + $0x90] sm:$0xff]  ;;  %s6470_s30 = scalar_lea.vmem (%p4826_p5), %s6549_s6, %s4379_s18 }
  0xc7   : > { %4253 = vmatmul.mubr.msk.f32.gmra.mrb[6].mxu0 %vm961_vm3, %v5457_v52  ;;  %4436 = vmatprep.subr.msk.bf16.mxu1 %vm5396_vm2, %v4434_v12  ;;  %v4470_v49 = vpack.c.bf16 %v1652_v42, %v1636_v41  ;;  %v1666_v50 = vld [vmem:[%s5528_s9 + $0x108] sm:$0xff]  ;;  %v4462_v53 = vpack.c.bf16 %v1649_v45, %v1633_v44  ;;  %v1668_v54 = vld [vmem:[%s5528_s9 + $0x118] sm:$0xff]  ;;  %v4472_v56 = vpack.c.bf16 %v1651_v48, %v1635_v47  ;;  %v1665_v57 = vld [vmem:[%s5528_s9 + $0x100] sm:$0xff] }
  0xc8   : > { %4257 = vmatmul.mubr.msk.f32.gmra.mrb[6].mxu1 %vm961_vm3, %v5457_v52  ;;  %4429 = vmatpush1.bf16.msk.msra.mxu0 %vm5396_vm2, %v4427_v15  ;;  %v1682_v51 = vld [vmem:[%s5528_s9 + $0x188] sm:$0x1]  ;;  %v1684_v55 = vld [vmem:[%s5528_s9 + $0x198] sm:$0x1]  ;;  %v1681_v58 = vld [vmem:[%s5528_s9 + $0x180] sm:$0x1] }
  0xc9   : > { %4439 = vmatpush1.bf16.msk.msra.mxu1 %vm5396_vm2, %v4437_v18  ;;  %1389 = vmatprep.mubr.f32.mxu0 %v4754_v0  ;;  %v4464_v59 = vpack.c.bf16 %v1682_v51, %v1666_v50  ;;  %v1667_v60 = vld [vmem:[%s5528_s9 + $0x110] sm:$0xff]  ;;  %v4474_v62 = vpack.c.bf16 %v1684_v55, %v1668_v54  ;;  %v1638_v63 = vld [vmem:[%s5528_s9 + $0x28] sm:$0xff]  ;;  %v4467_v3 = vpack.c.bf16 %v1681_v58, %v1665_v57  ;;  %v1640_v4 = vld [vmem:[%s5528_s9 + $0x38] sm:$0xff] }
  0xca   : > { %1466 = vmatprep.mubr.f32.mxu1 %v4754_v0  ;;  %4441 = vmatprep.subr.bf16.mxu0 %v4440_v21  ;;  %v1683_v61 = vld [vmem:[%s5528_s9 + $0x190] sm:$0x1]  ;;  %v1654_v2 = vld [vmem:[%s5528_s9 + $0xa8] sm:$0xff]  ;;  %v1656_v5 = vld [vmem:[%s5528_s9 + $0xb8] sm:$0xff] }
  0xcb   : > { %4260 = vmatmul.mubr.msk.f32.vlgmr.msra.gmra.mrb[8].mxu0 %vm961_vm3, %v5428_v28  ;;  %4451 = vmatprep.subr.bf16.mxu1 %v4450_v24  ;;  %v4477_v6 = vpack.c.bf16 %v1683_v61, %v1667_v60  ;;  %v1637_v7 = vld [vmem:[%s5528_s9 + $0x20] sm:$0xff]  ;;  %v4480_v9 = vpack.c.bf16 %v1654_v2, %v1638_v63  ;;  %v1639_v10 = vld [vmem:[%s5528_s9 + $0x30] sm:$0xff]  ;;  %v4490_v12 = vpack.c.bf16 %v1656_v5, %v1640_v4  ;;  %v1670_v13 = vld [vmem:[%s5528_s9 + $0x128] sm:$0xff] }
  0xcc   : > { %4264 = vmatmul.mubr.msk.f32.vlgmr.msra.gmra.mrb[8].mxu1 %vm961_vm3, %v5428_v28  ;;  %4443 = vmatpush1.bf16.msra.mxu0 %v4442_v27  ;;  %v1653_v8 = vld [vmem:[%s5528_s9 + $0xa0] sm:$0xff]  ;;  %v1655_v11 = vld [vmem:[%s5528_s9 + $0xb0] sm:$0xff]  ;;  %v1686_v14 = vld [vmem:[%s5528_s9 + $0x1a8] sm:$0x1] }
  0xcd   : > { %4453 = vmatpush1.bf16.msra.mxu1 %v4452_v31  ;;  %1395 = vmatprep.mubr.f32.mxu0 %v4754_v0  ;;  %v4482_v15 = vpack.c.bf16 %v1653_v8, %v1637_v7  ;;  %v1672_v16 = vld [vmem:[%s5528_s9 + $0x138] sm:$0xff]  ;;  %v4492_v18 = vpack.c.bf16 %v1655_v11, %v1639_v10  ;;  %v1669_v19 = vld [vmem:[%s5528_s9 + $0x120] sm:$0xff]  ;;  %v4484_v21 = vpack.c.bf16 %v1686_v14, %v1670_v13  ;;  %v1671_v22 = vld [vmem:[%s5528_s9 + $0x130] sm:$0xff] }
  0xce   : > { %1472 = vmatprep.mubr.f32.mxu1 %v4754_v0  ;;  %4446 = vmatprep.subr.msk.bf16.mxu0 %vm5396_vm2, %v4444_v34  ;;  %v1688_v17 = vld [vmem:[%s5528_s9 + $0x1b8] sm:$0x1]  ;;  %v1685_v20 = vld [vmem:[%s5528_s9 + $0x1a0] sm:$0x1]  ;;  %v1687_v23 = vld [vmem:[%s5528_s9 + $0x1b0] sm:$0x1] }
  0xcf   : > { %4261 = vmatmul.mubr.msk.f32.gmra.mrb[10].mxu0 %vm961_vm3, %v5457_v52  ;;  %4456 = vmatprep.subr.msk.bf16.mxu1 %vm5396_vm2, %v4454_v37  ;;  %v4494_v24 = vpack.c.bf16 %v1688_v17, %v1672_v16  ;;  %v1642_v25 = vld [vmem:[%s5528_s9 + $0x48] sm:$0xff]  ;;  %v4487_v27 = vpack.c.bf16 %v1685_v20, %v1669_v19  ;;  %v1644_v29 = vld [vmem:[%s5528_s9 + $0x58] sm:$0xff]  ;;  %v4497_v31 = vpack.c.bf16 %v1687_v23, %v1671_v22  ;;  %v1641_v32 = vld [vmem:[%s5528_s9 + $0x40] sm:$0xff] }
  0xd0   : > { %4265 = vmatmul.mubr.msk.f32.gmra.mrb[10].mxu1 %vm961_vm3, %v5457_v52  ;;  %4449 = vmatpush1.bf16.msk.msra.mxu0 %vm5396_vm2, %v4447_v40  ;;  %v1658_v26 = vld [vmem:[%s5528_s9 + $0xc8] sm:$0xff]  ;;  %v1660_v30 = vld [vmem:[%s5528_s9 + $0xd8] sm:$0xff]  ;;  %v1657_v33 = vld [vmem:[%s5528_s9 + $0xc0] sm:$0xff] }
  0xd1   : > { %4459 = vmatpush1.bf16.msk.msra.mxu1 %vm5396_vm2, %v4457_v43  ;;  %1543 = vmatprep.mubr.f32.mxu0 %v4754_v0  ;;  %v4500_v34 = vpack.c.bf16 %v1658_v26, %v1642_v25  ;;  %v1643_v35 = vld [vmem:[%s5528_s9 + $0x50] sm:$0xff]  ;;  %v4510_v37 = vpack.c.bf16 %v1660_v30, %v1644_v29  ;;  %v1674_v38 = vld [vmem:[%s5528_s9 + $0x148] sm:$0xff]  ;;  %v4502_v40 = vpack.c.bf16 %v1657_v33, %v1641_v32  ;;  %v1676_v41 = vld [vmem:[%s5528_s9 + $0x158] sm:$0xff] }
  0xd2   : > { %1620 = vmatprep.mubr.f32.mxu1 %v4754_v0  ;;  %4461 = vmatprep.subr.bf16.mxu0 %v4460_v46  ;;  %v1659_v36 = vld [vmem:[%s5528_s9 + $0xd0] sm:$0xff]  ;;  %v1690_v39 = vld [vmem:[%s5528_s9 + $0x1c8] sm:$0x1]  ;;  %v1692_v42 = vld [vmem:[%s5528_s9 + $0x1d8] sm:$0x1] }
  0xd3   : > { %4268 = vmatmul.mubr.msk.f32.vlgmr.msra.gmra.mrb[12].mxu0 %vm961_vm3, %v5428_v28  ;;  %4471 = vmatprep.subr.bf16.mxu1 %v4470_v49  ;;  %v4512_v43 = vpack.c.bf16 %v1659_v36, %v1643_v35  ;;  %v1673_v44 = vld [vmem:[%s5528_s9 + $0x140] sm:$0xff]  ;;  %v4504_v46 = vpack.c.bf16 %v1690_v39, %v1674_v38  ;;  %v1675_v47 = vld [vmem:[%s5528_s9 + $0x150] sm:$0xff]  ;;  %v4514_v49 = vpack.c.bf16 %v1692_v42, %v1676_v41  ;;  %v1646_v50 = vld [vmem:[%s5528_s9 + $0x68] sm:$0xff] }
  0xd4   : > { %4272 = vmatmul.mubr.msk.f32.vlgmr.msra.gmra.mrb[12].mxu1 %vm961_vm3, %v5428_v28  ;;  %4463 = vmatpush1.bf16.msra.mxu0 %v4462_v53  ;;  %v1689_v45 = vld [vmem:[%s5528_s9 + $0x1c0] sm:$0x1]  ;;  %v1691_v48 = vld [vmem:[%s5528_s9 + $0x1d0] sm:$0x1]  ;;  %v1662_v51 = vld [vmem:[%s5528_s9 + $0xe8] sm:$0xff] }
  0xd5   : > { %4473 = vmatpush1.bf16.msra.mxu1 %v4472_v56  ;;  %1549 = vmatprep.mubr.f32.mxu0 %v4754_v0  ;;  %v4507_v53 = vpack.c.bf16 %v1689_v45, %v1673_v44  ;;  %v1648_v54 = vld [vmem:[%s5528_s9 + $0x78] sm:$0xff]  ;;  %v4517_v56 = vpack.c.bf16 %v1691_v48, %v1675_v47  ;;  %v1645_v57 = vld [vmem:[%s5528_s9 + $0x60] sm:$0xff]  ;;  %v1647_v60 = vld [vmem:[%s5528_s9 + $0x70] sm:$0xff] }
  0xd6   : > { %1626 = vmatprep.mubr.f32.mxu1 %v4754_v0  ;;  %4466 = vmatprep.subr.msk.bf16.mxu0 %vm5396_vm2, %v4464_v59  ;;  %v1664_v55 = vld [vmem:[%s5528_s9 + $0xf8] sm:$0xff]  ;;  %v1661_v58 = vld [vmem:[%s5528_s9 + $0xe0] sm:$0xff]  ;;  %v4520_v59 = vpack.c.bf16 %v1662_v51, %v1646_v50  ;;  %v1663_v61 = vld [vmem:[%s5528_s9 + $0xf0] sm:$0xff] }
  0xd7   : > { %4269 = vmatmul.mubr.msk.f32.gmra.mrb[14].mxu0 %vm961_vm3, %v5457_v52  ;;  %4476 = vmatprep.subr.msk.bf16.mxu1 %vm5396_vm2, %v4474_v62  ;;  %v4530_v62 = vpack.c.bf16 %v1664_v55, %v1648_v54  ;;  %v1678_v63 = vld [vmem:[%s5528_s9 + $0x168] sm:$0xff]  ;;  %v1680_v4 = vld [vmem:[%s5528_s9 + $0x178] sm:$0xff]  ;;  %v1677_v7 = vld [vmem:[%s5528_s9 + $0x160] sm:$0xff] }
  0xd8   : > { %4273 = vmatmul.mubr.msk.f32.gmra.mrb[14].mxu1 %vm961_vm3, %v5457_v52  ;;  %4469 = vmatpush1.bf16.msk.msra.mxu0 %vm5396_vm2, %v4467_v3  ;;  %v1694_v2 = vld [vmem:[%s5528_s9 + $0x1e8] sm:$0x1]  ;;  %v4522_v3 = vpack.c.bf16 %v1661_v58, %v1645_v57  ;;  %v1696_v5 = vld [vmem:[%s5528_s9 + $0x1f8] sm:$0x1]  ;;  %v1693_v8 = vld [vmem:[%s5528_s9 + $0x1e0] sm:$0x1] }
  0xd9   : > { %4479 = vmatpush1.bf16.msk.msra.mxu1 %vm5396_vm2, %v4477_v6  ;;  %1809 = vmatprep.mubr.f32.mxu0 %v4754_v0  ;;  %v4532_v6 = vpack.c.bf16 %v1663_v61, %v1647_v60  ;;  %v1679_v10 = vld [vmem:[%s5528_s9 + $0x170] sm:$0xff]  ;;  %v2394_v13 = vld [vmem:[%s5675_s10 + $0x8] sm:$0xff]  ;;  %v2396_v16 = vld [vmem:[%s5675_s10 + $0x18] sm:$0xff] }
  0xda   : > { %1886 = vmatprep.mubr.f32.mxu1 %v4754_v0  ;;  %4481 = vmatprep.subr.bf16.mxu0 %v4480_v9  ;;  %v4524_v9 = vpack.c.bf16 %v1694_v2, %v1678_v63  ;;  %v1695_v11 = vld [vmem:[%s5528_s9 + $0x1f0] sm:$0x1]  ;;  %v2410_v14 = vld [vmem:[%s5675_s10 + $0x88] sm:$0xff]  ;;  %v2412_v17 = vld [vmem:[%s5675_s10 + $0x98] sm:$0xff] }
  0xdb   : > { %4276 = vmatmul.mubr.msk.f32.vlgmr.msra.gmra.mrb[16].mxu0 %vm961_vm3, %v5428_v28  ;;  %4491 = vmatprep.subr.bf16.mxu1 %v4490_v12  ;;  %v4534_v12 = vpack.c.bf16 %v1696_v5, %v1680_v4  ;;  %v2393_v19 = vld [vmem:[%s5675_s10] sm:$0xff]  ;;  %v2395_v22 = vld [vmem:[%s5675_s10 + $0x10] sm:$0xff]  ;;  %v2426_v25 = vld [vmem:[%s5675_s10 + $0x108] sm:$0xff] }
  0xdc   : > { %4280 = vmatmul.mubr.msk.f32.vlgmr.msra.gmra.mrb[16].mxu1 %vm961_vm3, %v5428_v28  ;;  %4483 = vmatpush1.bf16.msra.mxu0 %v4482_v15  ;;  %v4527_v15 = vpack.c.bf16 %v1693_v8, %v1677_v7  ;;  %v2409_v20 = vld [vmem:[%s5675_s10 + $0x80] sm:$0xff]  ;;  %v2411_v23 = vld [vmem:[%s5675_s10 + $0x90] sm:$0xff]  ;;  %v2442_v26 = vld [vmem:[%s5675_s10 + $0x188] sm:$0x1] }
  0xdd   : > { %4493 = vmatpush1.bf16.msra.mxu1 %v4492_v18  ;;  %1815 = vmatprep.mubr.f32.mxu0 %v4754_v0  ;;  %v4537_v18 = vpack.c.bf16 %v1695_v11, %v1679_v10  ;;  %v2428_v29 = vld [vmem:[%s5675_s10 + $0x118] sm:$0xff]  ;;  %v2425_v32 = vld [vmem:[%s5675_s10 + $0x100] sm:$0xff]  ;;  %v2427_v35 = vld [vmem:[%s5675_s10 + $0x110] sm:$0xff] }
  0xde   : > { %1892 = vmatprep.mubr.f32.mxu1 %v4754_v0  ;;  %4486 = vmatprep.subr.msk.bf16.mxu0 %vm5396_vm2, %v4484_v21  ;;  %v4540_v21 = vpack.c.bf16 %v2410_v14, %v2394_v13  ;;  %v2444_v30 = vld [vmem:[%s5675_s10 + $0x198] sm:$0x1]  ;;  %v2441_v33 = vld [vmem:[%s5675_s10 + $0x180] sm:$0x1]  ;;  %v2443_v36 = vld [vmem:[%s5675_s10 + $0x190] sm:$0x1] }
  0xdf   : > { %4277 = vmatmul.mubr.msk.f32.gmra.mrb[18].mxu0 %vm961_vm3, %v5457_v52  ;;  %4496 = vmatprep.subr.msk.bf16.mxu1 %vm5396_vm2, %v4494_v24  ;;  %v4550_v24 = vpack.c.bf16 %v2412_v17, %v2396_v16  ;;  %v2398_v38 = vld [vmem:[%s5675_s10 + $0x28] sm:$0xff]  ;;  %v2400_v41 = vld [vmem:[%s5675_s10 + $0x38] sm:$0xff]  ;;  %v2397_v44 = vld [vmem:[%s5675_s10 + $0x20] sm:$0xff] }
  0xe0   : > { %4281 = vmatmul.mubr.msk.f32.gmra.mrb[18].mxu1 %vm961_vm3, %v5457_v52  ;;  %4489 = vmatpush1.bf16.msk.msra.mxu0 %vm5396_vm2, %v4487_v27  ;;  %v4542_v27 = vpack.c.bf16 %v2409_v20, %v2393_v19  ;;  %v2414_v39 = vld [vmem:[%s5675_s10 + $0xa8] sm:$0xff]  ;;  %v2416_v42 = vld [vmem:[%s5675_s10 + $0xb8] sm:$0xff]  ;;  %v2413_v45 = vld [vmem:[%s5675_s10 + $0xa0] sm:$0xff] }
  0xe1   : > { %4499 = vmatpush1.bf16.msk.msra.mxu1 %vm5396_vm2, %v4497_v31  ;;  %1963 = vmatprep.mubr.f32.mxu0 %v4754_v0  ;;  %v4552_v31 = vpack.c.bf16 %v2411_v23, %v2395_v22  ;;  %v2399_v47 = vld [vmem:[%s5675_s10 + $0x30] sm:$0xff]  ;;  %v2430_v50 = vld [vmem:[%s5675_s10 + $0x128] sm:$0xff]  ;;  %v2432_v54 = vld [vmem:[%s5675_s10 + $0x138] sm:$0xff] }
  0xe2   : > { %2040 = vmatprep.mubr.f32.mxu1 %v4754_v0  ;;  %4501 = vmatprep.subr.bf16.mxu0 %v4500_v34  ;;  %v4544_v34 = vpack.c.bf16 %v2442_v26, %v2426_v25  ;;  %v2415_v48 = vld [vmem:[%s5675_s10 + $0xb0] sm:$0xff]  ;;  %v2446_v51 = vld [vmem:[%s5675_s10 + $0x1a8] sm:$0x1]  ;;  %v2448_v55 = vld [vmem:[%s5675_s10 + $0x1b8] sm:$0x1] }
  0xe3   : > { %4284 = vmatmul.mubr.msk.f32.vlgmr.msra.gmra.mrb[20].mxu0 %vm961_vm3, %v5428_v28  ;;  %4511 = vmatprep.subr.bf16.mxu1 %v4510_v37  ;;  %v4554_v37 = vpack.c.bf16 %v2444_v30, %v2428_v29  ;;  %v2429_v57 = vld [vmem:[%s5675_s10 + $0x120] sm:$0xff]  ;;  %v2431_v60 = vld [vmem:[%s5675_s10 + $0x130] sm:$0xff]  ;;  %v2402_v63 = vld [vmem:[%s5675_s10 + $0x48] sm:$0xff] }
  0xe4   : > { %4288 = vmatmul.mubr.msk.f32.vlgmr.msra.gmra.mrb[20].mxu1 %vm961_vm3, %v5428_v28  ;;  %4503 = vmatpush1.bf16.msra.mxu0 %v4502_v40  ;;  %v4547_v40 = vpack.c.bf16 %v2441_v33, %v2425_v32  ;;  %v2445_v58 = vld [vmem:[%s5675_s10 + $0x1a0] sm:$0x1]  ;;  %v2447_v61 = vld [vmem:[%s5675_s10 + $0x1b0] sm:$0x1]  ;;  %v2418_v2 = vld [vmem:[%s5675_s10 + $0xc8] sm:$0xff] }
  0xe5   : > { %4513 = vmatpush1.bf16.msra.mxu1 %v4512_v43  ;;  %1969 = vmatprep.mubr.f32.mxu0 %v4754_v0  ;;  %v4557_v43 = vpack.c.bf16 %v2443_v36, %v2427_v35  ;;  %v2404_v4 = vld [vmem:[%s5675_s10 + $0x58] sm:$0xff]  ;;  %v2401_v7 = vld [vmem:[%s5675_s10 + $0x40] sm:$0xff]  ;;  %v2403_v10 = vld [vmem:[%s5675_s10 + $0x50] sm:$0xff] }
  0xe6   : > { %2046 = vmatprep.mubr.f32.mxu1 %v4754_v0  ;;  %4506 = vmatprep.subr.msk.bf16.mxu0 %vm5396_vm2, %v4504_v46  ;;  %v4560_v46 = vpack.c.bf16 %v2414_v39, %v2398_v38  ;;  %v2420_v5 = vld [vmem:[%s5675_s10 + $0xd8] sm:$0xff]  ;;  %v2417_v8 = vld [vmem:[%s5675_s10 + $0xc0] sm:$0xff]  ;;  %v2419_v11 = vld [vmem:[%s5675_s10 + $0xd0] sm:$0xff] }
  0xe7   : > { %4285 = vmatmul.mubr.msk.f32.gmra.mrb[22].mxu0 %vm961_vm3, %v5457_v52  ;;  %4516 = vmatprep.subr.msk.bf16.mxu1 %vm5396_vm2, %v4514_v49  ;;  %v4570_v49 = vpack.c.bf16 %v2416_v42, %v2400_v41  ;;  %v2434_v13 = vld [vmem:[%s5675_s10 + $0x148] sm:$0xff]  ;;  %v2436_v16 = vld [vmem:[%s5675_s10 + $0x158] sm:$0xff]  ;;  %v2433_v19 = vld [vmem:[%s5675_s10 + $0x140] sm:$0xff] }
  0xe8   : > { %4289 = vmatmul.mubr.msk.f32.gmra.mrb[22].mxu1 %vm961_vm3, %v5457_v52  ;;  %4509 = vmatpush1.bf16.msk.msra.mxu0 %vm5396_vm2, %v4507_v53  ;;  %v4562_v53 = vpack.c.bf16 %v2413_v45, %v2397_v44  ;;  %v2450_v14 = vld [vmem:[%s5675_s10 + $0x1c8] sm:$0x1]  ;;  %v2452_v17 = vld [vmem:[%s5675_s10 + $0x1d8] sm:$0x1]  ;;  %v2449_v20 = vld [vmem:[%s5675_s10 + $0x1c0] sm:$0x1] }
  0xe9   : > { %4519 = vmatpush1.bf16.msk.msra.mxu1 %vm5396_vm2, %v4517_v56  ;;  %2117 = vmatprep.mubr.f32.mxu0 %v4754_v0  ;;  %v4572_v56 = vpack.c.bf16 %v2415_v48, %v2399_v47  ;;  %v2435_v22 = vld [vmem:[%s5675_s10 + $0x150] sm:$0xff]  ;;  %v2406_v25 = vld [vmem:[%s5675_s10 + $0x68] sm:$0xff]  ;;  %v2408_v29 = vld [vmem:[%s5675_s10 + $0x78] sm:$0xff] }
  0xea   : > { %2194 = vmatprep.mubr.f32.mxu1 %v4754_v0  ;;  %4521 = vmatprep.subr.bf16.mxu0 %v4520_v59  ;;  %v4564_v59 = vpack.c.bf16 %v2446_v51, %v2430_v50  ;;  %v2451_v23 = vld [vmem:[%s5675_s10 + $0x1d0] sm:$0x1]  ;;  %v2422_v26 = vld [vmem:[%s5675_s10 + $0xe8] sm:$0xff]  ;;  %v2424_v30 = vld [vmem:[%s5675_s10 + $0xf8] sm:$0xff] }
  0xeb   : > { %4292 = vmatmul.mubr.msk.f32.vlgmr.msra.gmra.mrb[24].mxu0 %vm961_vm3, %v5428_v28  ;;  %4531 = vmatprep.subr.bf16.mxu1 %v4530_v62  ;;  %v4574_v62 = vpack.c.bf16 %v2448_v55, %v2432_v54  ;;  %v2405_v32 = vld [vmem:[%s5675_s10 + $0x60] sm:$0xff]  ;;  %v2407_v35 = vld [vmem:[%s5675_s10 + $0x70] sm:$0xff]  ;;  %v2438_v38 = vld [vmem:[%s5675_s10 + $0x168] sm:$0xff] }
  0xec   : > { %4296 = vmatmul.mubr.msk.f32.vlgmr.msra.gmra.mrb[24].mxu1 %vm961_vm3, %v5428_v28  ;;  %4523 = vmatpush1.bf16.msra.mxu0 %v4522_v3  ;;  %v4567_v3 = vpack.c.bf16 %v2445_v58, %v2429_v57  ;;  %v2421_v33 = vld [vmem:[%s5675_s10 + $0xe0] sm:$0xff]  ;;  %v2423_v36 = vld [vmem:[%s5675_s10 + $0xf0] sm:$0xff]  ;;  %v2454_v39 = vld [vmem:[%s5675_s10 + $0x1e8] sm:$0x1] }
  0xed   : > { %4533 = vmatpush1.bf16.msra.mxu1 %v4532_v6  ;;  %2123 = vmatprep.mubr.f32.mxu0 %v4754_v0  ;;  %v4577_v6 = vpack.c.bf16 %v2447_v61, %v2431_v60  ;;  %v2440_v41 = vld [vmem:[%s5675_s10 + $0x178] sm:$0xff]  ;;  %v2437_v44 = vld [vmem:[%s5675_s10 + $0x160] sm:$0xff]  ;;  %v2439_v47 = vld [vmem:[%s5675_s10 + $0x170] sm:$0xff] }
  0xee   : > { %2200 = vmatprep.mubr.f32.mxu1 %v4754_v0  ;;  %4526 = vmatprep.subr.msk.bf16.mxu0 %vm5396_vm2, %v4524_v9  ;;  %v4580_v9 = vpack.c.bf16 %v2418_v2, %v2402_v63  ;;  %v2456_v42 = vld [vmem:[%s5675_s10 + $0x1f8] sm:$0x1]  ;;  %v2453_v45 = vld [vmem:[%s5675_s10 + $0x1e0] sm:$0x1]  ;;  %v2455_v48 = vld [vmem:[%s5675_s10 + $0x1f0] sm:$0x1] }
  0xef   : > { %4293 = vmatmul.mubr.msk.f32.gmra.mrb[26].mxu0 %vm961_vm3, %v5457_v52  ;;  %4536 = vmatprep.subr.msk.bf16.mxu1 %vm5396_vm2, %v4534_v12  ;;  %v4590_v12 = vpack.c.bf16 %v2420_v5, %v2404_v4  ;;  %v3154_v50 = vld [vmem:[%s5822_s11 + $0x8] sm:$0xff]  ;;  %v3156_v54 = vld [vmem:[%s5822_s11 + $0x18] sm:$0xff]  ;;  %v3153_v57 = vld [vmem:[%s5822_s11] sm:$0xff] }
  0xf0   : > { %4297 = vmatmul.mubr.msk.f32.gmra.mrb[26].mxu1 %vm961_vm3, %v5457_v52  ;;  %4529 = vmatpush1.bf16.msk.msra.mxu0 %vm5396_vm2, %v4527_v15  ;;  %v4582_v15 = vpack.c.bf16 %v2417_v8, %v2401_v7  ;;  %v3170_v51 = vld [vmem:[%s5822_s11 + $0x88] sm:$0xff]  ;;  %v3172_v55 = vld [vmem:[%s5822_s11 + $0x98] sm:$0xff]  ;;  %v3169_v58 = vld [vmem:[%s5822_s11 + $0x80] sm:$0xff] }
  0xf1   : > { %4539 = vmatpush1.bf16.msk.msra.mxu1 %vm5396_vm2, %v4537_v18  ;;  %2271 = vmatprep.mubr.f32.mxu0 %v4754_v0  ;;  %v4592_v18 = vpack.c.bf16 %v2419_v11, %v2403_v10  ;;  %v3155_v60 = vld [vmem:[%s5822_s11 + $0x10] sm:$0xff]  ;;  %v3186_v63 = vld [vmem:[%s5822_s11 + $0x108] sm:$0xff]  ;;  %v3188_v4 = vld [vmem:[%s5822_s11 + $0x118] sm:$0xff] }
  0xf2   : > { %2348 = vmatprep.mubr.f32.mxu1 %v4754_v0  ;;  %4541 = vmatprep.subr.bf16.mxu0 %v4540_v21  ;;  %v4584_v21 = vpack.c.bf16 %v2450_v14, %v2434_v13  ;;  %v3171_v61 = vld [vmem:[%s5822_s11 + $0x90] sm:$0xff]  ;;  %v3202_v2 = vld [vmem:[%s5822_s11 + $0x188] sm:$0x1]  ;;  %v3204_v5 = vld [vmem:[%s5822_s11 + $0x198] sm:$0x1] }
  0xf3   : > { %4300 = vmatmul.mubr.msk.f32.vlgmr.msra.gmra.mrb[28].mxu0 %vm961_vm3, %v5428_v28  ;;  %4551 = vmatprep.subr.bf16.mxu1 %v4550_v24  ;;  %v4594_v24 = vpack.c.bf16 %v2452_v17, %v2436_v16  ;;  %v3185_v7 = vld [vmem:[%s5822_s11 + $0x100] sm:$0xff]  ;;  %v3187_v10 = vld [vmem:[%s5822_s11 + $0x110] sm:$0xff]  ;;  %v3158_v13 = vld [vmem:[%s5822_s11 + $0x28] sm:$0xff] }
  0xf4   : > { %4304 = vmatmul.mubr.msk.f32.vlgmr.msra.gmra.mrb[28].mxu1 %vm961_vm3, %v5428_v28  ;;  %4543 = vmatpush1.bf16.msra.mxu0 %v4542_v27  ;;  %v4587_v27 = vpack.c.bf16 %v2449_v20, %v2433_v19  ;;  %v3201_v8 = vld [vmem:[%s5822_s11 + $0x180] sm:$0x1]  ;;  %v3203_v11 = vld [vmem:[%s5822_s11 + $0x190] sm:$0x1]  ;;  %v3174_v14 = vld [vmem:[%s5822_s11 + $0xa8] sm:$0xff] }
  0xf5   : > { %4553 = vmatpush1.bf16.msra.mxu1 %v4552_v31  ;;  %2277 = vmatprep.mubr.f32.mxu0 %v4754_v0  ;;  %v4597_v31 = vpack.c.bf16 %v2451_v23, %v2435_v22  ;;  %v3160_v16 = vld [vmem:[%s5822_s11 + $0x38] sm:$0xff]  ;;  %v3157_v19 = vld [vmem:[%s5822_s11 + $0x20] sm:$0xff]  ;;  %v3159_v22 = vld [vmem:[%s5822_s11 + $0x30] sm:$0xff] }
  0xf6   : > { %2354 = vmatprep.mubr.f32.mxu1 %v4754_v0  ;;  %4546 = vmatprep.subr.msk.bf16.mxu0 %vm5396_vm2, %v4544_v34  ;;  %v4600_v34 = vpack.c.bf16 %v2422_v26, %v2406_v25  ;;  %v3176_v17 = vld [vmem:[%s5822_s11 + $0xb8] sm:$0xff]  ;;  %v3173_v20 = vld [vmem:[%s5822_s11 + $0xa0] sm:$0xff]  ;;  %v3175_v23 = vld [vmem:[%s5822_s11 + $0xb0] sm:$0xff] }
  0xf7   : > { %4301 = vmatmul.mubr.msk.f32.gmra.mrb[30].mxu0 %vm961_vm3, %v5457_v52  ;;  %4556 = vmatprep.subr.msk.bf16.mxu1 %vm5396_vm2, %v4554_v37  ;;  %v4610_v37 = vpack.c.bf16 %v2424_v30, %v2408_v29  ;;  %v3190_v25 = vld [vmem:[%s5822_s11 + $0x128] sm:$0xff]  ;;  %v3192_v29 = vld [vmem:[%s5822_s11 + $0x138] sm:$0xff] }
  0xf8   : > { %4305 = vmatmul.mubr.msk.f32.gmra.mrb[30].mxu1 %vm961_vm3, %v5457_v52  ;;  %4549 = vmatpush1.bf16.msk.msra.mxu0 %vm5396_vm2, %v4547_v40  ;;  %v4602_v40 = vpack.c.bf16 %v2421_v33, %v2405_v32  ;;  %v3206_v26 = vld [vmem:[%s5822_s11 + $0x1a8] sm:$0x1]  ;;  %v3208_v30 = vld [vmem:[%s5822_s11 + $0x1b8] sm:$0x1]  ;;  %v3189_v32 = vld [vmem:[%s5822_s11 + $0x120] sm:$0xff] }
  0xf9   : > { %4559 = vmatpush1.bf16.msk.msra.mxu1 %vm5396_vm2, %v4557_v43  ;;  %2569 = vmatprep.mubr.f32.mxu0 %v4754_v0  ;;  %v4612_v43 = vpack.c.bf16 %v2423_v36, %v2407_v35  ;;  %v3205_v33 = vld [vmem:[%s5822_s11 + $0x1a0] sm:$0x1]  ;;  %v3191_v35 = vld [vmem:[%s5822_s11 + $0x130] sm:$0xff] }
  0xfa   : > { %2646 = vmatprep.mubr.f32.mxu1 %v4754_v0  ;;  %4561 = vmatprep.subr.bf16.mxu0 %v4560_v46  ;;  %v4604_v46 = vpack.c.bf16 %v2454_v39, %v2438_v38  ;;  %v3207_v36 = vld [vmem:[%s5822_s11 + $0x1b0] sm:$0x1]  ;;  %v3162_v38 = vld [vmem:[%s5822_s11 + $0x48] sm:$0xff] }
  0xfb   : > { %4308 = vmatmul.mubr.msk.f32.vlgmr.msra.gmra.mrb[32].mxu0 %vm961_vm3, %v5428_v28  ;;  %4571 = vmatprep.subr.bf16.mxu1 %v4570_v49  ;;  %v4614_v49 = vpack.c.bf16 %v2456_v42, %v2440_v41  ;;  %v3178_v39 = vld [vmem:[%s5822_s11 + $0xc8] sm:$0xff]  ;;  %v4647_v41 = vpack.c.bf16 %v3205_v33, %v3189_v32  ;;  %v3164_v42 = vld [vmem:[%s5822_s11 + $0x58] sm:$0xff] }
  0xfc   : > { %4312 = vmatmul.mubr.msk.f32.vlgmr.msra.gmra.mrb[32].mxu1 %vm961_vm3, %v5428_v28  ;;  %4563 = vmatpush1.bf16.msra.mxu0 %v4562_v53  ;;  %v4607_v53 = vpack.c.bf16 %v2453_v45, %v2437_v44  ;;  %v3161_v44 = vld [vmem:[%s5822_s11 + $0x40] sm:$0xff] }
  0xfd   : > { %4573 = vmatpush1.bf16.msra.mxu1 %v4572_v56  ;;  %2575 = vmatprep.mubr.f32.mxu0 %v4754_v0  ;;  %v4617_v56 = vpack.c.bf16 %v2455_v48, %v2439_v47  ;;  %v3177_v45 = vld [vmem:[%s5822_s11 + $0xc0] sm:$0xff]  ;;  %v3163_v47 = vld [vmem:[%s5822_s11 + $0x50] sm:$0xff] }
  0xfe   : > { %2652 = vmatprep.mubr.f32.mxu1 %v4754_v0  ;;  %4566 = vmatprep.subr.msk.bf16.mxu0 %vm5396_vm2, %v4564_v59  ;;  %v4620_v59 = vpack.c.bf16 %v3170_v51, %v3154_v50  ;;  %v3179_v48 = vld [vmem:[%s5822_s11 + $0xd0] sm:$0xff]  ;;  %v3194_v50 = vld [vmem:[%s5822_s11 + $0x148] sm:$0xff] }
  0xff   : > { %4309 = vmatmul.mubr.msk.f32.gmra.mrb[34].mxu0 %vm961_vm3, %v5457_v52  ;;  %4576 = vmatprep.subr.msk.bf16.mxu1 %vm5396_vm2, %v4574_v62  ;;  %v4630_v62 = vpack.c.bf16 %v3172_v55, %v3156_v54  ;;  %v3210_v51 = vld [vmem:[%s5822_s11 + $0x1c8] sm:$0x1]  ;;  %v3196_v54 = vld [vmem:[%s5822_s11 + $0x158] sm:$0xff] }
 0x100   : > { %4313 = vmatmul.mubr.msk.f32.gmra.mrb[34].mxu1 %vm961_vm3, %v5457_v52  ;;  %4569 = vmatpush1.bf16.msk.msra.mxu0 %vm5396_vm2, %v4567_v3  ;;  %v4622_v3 = vpack.c.bf16 %v3169_v58, %v3153_v57  ;;  %v3212_v55 = vld [vmem:[%s5822_s11 + $0x1d8] sm:$0x1]  ;;  %v3193_v57 = vld [vmem:[%s5822_s11 + $0x140] sm:$0xff] }
 0x101   : > { %4579 = vmatpush1.bf16.msk.msra.mxu1 %vm5396_vm2, %v4577_v6  ;;  %2723 = vmatprep.mubr.f32.mxu0 %v4754_v0  ;;  %v4632_v6 = vpack.c.bf16 %v3171_v61, %v3155_v60  ;;  %v3209_v58 = vld [vmem:[%s5822_s11 + $0x1c0] sm:$0x1]  ;;  %v3211_v60 = vld [vmem:[%s5822_s11 + $0x1d0] sm:$0x1]  ;;  %v4674_v61 = vpack.c.bf16 %v3212_v55, %v3196_v54 }
 0x102   : > { %2800 = vmatprep.mubr.f32.mxu1 %v4754_v0  ;;  %4581 = vmatprep.subr.bf16.mxu0 %v4580_v9  ;;  %v4624_v9 = vpack.c.bf16 %v3202_v2, %v3186_v63  ;;  %v3182_v63 = vld [vmem:[%s5822_s11 + $0xe8] sm:$0xff]  ;;  %v4667_v2 = vpack.c.bf16 %v3209_v58, %v3193_v57 }
 0x103   : > { %4316 = vmatmul.mubr.msk.f32.vlgmr.msra.gmra.mrb[36].mxu0 %vm961_vm3, %v5428_v28  ;;  %4591 = vmatprep.subr.bf16.mxu1 %v4590_v12  ;;  %v4634_v12 = vpack.c.bf16 %v3204_v5, %v3188_v4  ;;  %v3184_v4 = vld [vmem:[%s5822_s11 + $0xf8] sm:$0xff] }
 0x104   : > { %4320 = vmatmul.mubr.msk.f32.vlgmr.msra.gmra.mrb[36].mxu1 %vm961_vm3, %v5428_v28  ;;  %4583 = vmatpush1.bf16.msra.mxu0 %v4582_v15  ;;  %v4627_v15 = vpack.c.bf16 %v3201_v8, %v3185_v7  ;;  %v3181_v7 = vld [vmem:[%s5822_s11 + $0xe0] sm:$0xff] }
 0x105   : > { %4593 = vmatpush1.bf16.msra.mxu1 %v4592_v18  ;;  %2729 = vmatprep.mubr.f32.mxu0 %v4754_v0  ;;  %v4637_v18 = vpack.c.bf16 %v3203_v11, %v3187_v10  ;;  %v3183_v10 = vld [vmem:[%s5822_s11 + $0xf0] sm:$0xff]  ;;  %v4729_v11 = vld [vmem:[%s6543_s0 + $0x8] sm:$0xff] }
 0x106   : > { %2806 = vmatprep.mubr.f32.mxu1 %v4754_v0  ;;  %4586 = vmatprep.subr.msk.bf16.mxu0 %vm5396_vm2, %v4584_v21  ;;  %v4640_v21 = vpack.c.bf16 %v3174_v14, %v3158_v13  ;;  %v3198_v13 = vld [vmem:[%s5822_s11 + $0x168] sm:$0xff] }
 0x107   : > { %4317 = vmatmul.mubr.msk.f32.gmra.mrb[38].mxu0 %vm961_vm3, %v5457_v52  ;;  %4596 = vmatprep.subr.msk.bf16.mxu1 %vm5396_vm2, %v4594_v24  ;;  %v4650_v24 = vpack.c.bf16 %v3176_v17, %v3160_v16  ;;  %v3214_v14 = vld [vmem:[%s5822_s11 + $0x1e8] sm:$0x1]  ;;  %v3200_v16 = vld [vmem:[%s5822_s11 + $0x178] sm:$0xff] }
 0x108   : > { %4321 = vmatmul.mubr.msk.f32.gmra.mrb[38].mxu1 %vm961_vm3, %v5457_v52  ;;  %4589 = vmatpush1.bf16.msk.msra.mxu0 %vm5396_vm2, %v4587_v27  ;;  %v4642_v27 = vpack.c.bf16 %v3173_v20, %v3157_v19  ;;  %v3216_v17 = vld [vmem:[%s5822_s11 + $0x1f8] sm:$0x1]  ;;  %v3197_v19 = vld [vmem:[%s5822_s11 + $0x160] sm:$0xff] }
 0x109   : > { %4599 = vmatpush1.bf16.msk.msra.mxu1 %vm5396_vm2, %v4597_v31  ;;  %2877 = vmatprep.mubr.f32.mxu0 %v4754_v0  ;;  %v4652_v31 = vpack.c.bf16 %v3175_v23, %v3159_v22  ;;  %v3213_v20 = vld [vmem:[%s5822_s11 + $0x1e0] sm:$0x1]  ;;  %v3199_v22 = vld [vmem:[%s5822_s11 + $0x170] sm:$0xff] }
 0x10a   : > { %2954 = vmatprep.mubr.f32.mxu1 %v4754_v0  ;;  %4601 = vmatprep.subr.bf16.mxu0 %v4600_v34  ;;  %v4644_v34 = vpack.c.bf16 %v3206_v26, %v3190_v25  ;;  %v3215_v23 = vld [vmem:[%s5822_s11 + $0x1f0] sm:$0x1]  ;;  %v4687_v25 = vpack.c.bf16 %v3213_v20, %v3197_v19 }
 0x10b   : > { %4324 = vmatmul.mubr.msk.f32.vlgmr.msra.gmra.mrb[40].mxu0 %vm961_vm3, %v5428_v28  ;;  %4611 = vmatprep.subr.bf16.mxu1 %v4610_v37  ;;  %v4654_v37 = vpack.c.bf16 %v3208_v30, %v3192_v29  ;;  %v4697_v26 = vpack.c.bf16 %v3215_v23, %v3199_v22  ;;  %v3914_v29 = vld [vmem:[%s6544_s1 + $0x8] sm:$0xff] }
 0x10c   : > { %4328 = vmatmul.mubr.msk.f32.vlgmr.msra.gmra.mrb[40].mxu1 %vm961_vm3, %v5428_v28  ;;  %4603 = vmatpush1.bf16.msra.mxu0 %v4602_v40  ;;  %v5901_v40 = vld [vmem:[%s6543_s0] sm:$0xff] }
 0x10d   : > { %4613 = vmatpush1.bf16.msra.mxu1 %v4612_v43  ;;  %2883 = vmatprep.mubr.f32.mxu0 %v4754_v0  ;;  %v4657_v43 = vpack.c.bf16 %v3207_v36, %v3191_v35 }
 0x10e   : > { %2960 = vmatprep.mubr.f32.mxu1 %v4754_v0  ;;  %4606 = vmatprep.subr.msk.bf16.mxu0 %vm5396_vm2, %v4604_v46  ;;  %v4660_v46 = vpack.c.bf16 %v3178_v39, %v3162_v38 }
 0x10f   : > { %4325 = vmatmul.mubr.msk.f32.gmra.mrb[42].mxu0 %vm961_vm3, %v5457_v52  ;;  %4616 = vmatprep.subr.msk.bf16.mxu1 %vm5396_vm2, %v4614_v49 }
 0x110   : > { %4329 = vmatmul.mubr.msk.f32.gmra.mrb[42].mxu1 %vm961_vm3, %v5457_v52  ;;  %4609 = vmatpush1.bf16.msk.msra.mxu0 %vm5396_vm2, %v4607_v53  ;;  %v4662_v53 = vpack.c.bf16 %v3177_v45, %v3161_v44 }
 0x111   : > { %4619 = vmatpush1.bf16.msk.msra.mxu1 %vm5396_vm2, %v4617_v56  ;;  %3031 = vmatprep.mubr.f32.mxu0 %v4754_v0  ;;  %v4672_v56 = vpack.c.bf16 %v3179_v48, %v3163_v47 }
 0x112   : > { %3108 = vmatprep.mubr.f32.mxu1 %v4754_v0  ;;  %4621 = vmatprep.subr.bf16.mxu0 %v4620_v59  ;;  %v3195_v59 = vld [vmem:[%s5822_s11 + $0x150] sm:$0xff] }
 0x113   : > { %4332 = vmatmul.mubr.msk.f32.vlgmr.msra.gmra.mrb[44].mxu0 %vm961_vm3, %v5428_v28  ;;  %4631 = vmatprep.subr.bf16.mxu1 %v4630_v62  ;;  %v3166_v62 = vld [vmem:[%s5822_s11 + $0x68] sm:$0xff]  ;;  %v4677_v5 = vpack.c.bf16 %v3211_v60, %v3195_v59 }
 0x114   : > { %4336 = vmatmul.mubr.msk.f32.vlgmr.msra.gmra.mrb[44].mxu1 %vm961_vm3, %v5428_v28  ;;  %4623 = vmatpush1.bf16.msra.mxu0 %v4622_v3  ;;  %v3168_v3 = vld [vmem:[%s5822_s11 + $0x78] sm:$0xff]  ;;  %v4680_v8 = vpack.c.bf16 %v3182_v63, %v3166_v62 }
 0x115   : > { %4633 = vmatpush1.bf16.msra.mxu1 %v4632_v6  ;;  %3037 = vmatprep.mubr.f32.mxu0 %v4754_v0  ;;  %v3165_v6 = vld [vmem:[%s5822_s11 + $0x60] sm:$0xff] }
 0x116   : > { %3114 = vmatprep.mubr.f32.mxu1 %v4754_v0  ;;  %4626 = vmatprep.subr.msk.bf16.mxu0 %vm5396_vm2, %v4624_v9  ;;  %v3167_v9 = vld [vmem:[%s5822_s11 + $0x70] sm:$0xff] }
 0x117   : > { %4333 = vmatmul.mubr.msk.f32.gmra.mrb[46].mxu0 %vm961_vm3, %v5457_v52  ;;  %4636 = vmatprep.subr.msk.bf16.mxu1 %vm5396_vm2, %v4634_v12  ;;  %v4690_v12 = vpack.c.bf16 %v3184_v4, %v3168_v3 }
 0x118   : > { %4337 = vmatmul.mubr.msk.f32.gmra.mrb[46].mxu1 %vm961_vm3, %v5457_v52  ;;  %4629 = vmatpush1.bf16.msk.msra.mxu0 %vm5396_vm2, %v4627_v15  ;;  %v4682_v15 = vpack.c.bf16 %v3181_v7, %v3165_v6 }
 0x119   : > { %4639 = vmatpush1.bf16.msk.msra.mxu1 %vm5396_vm2, %v4637_v18  ;;  %3329 = vmatprep.mubr.f32.mxu0 %v4754_v0  ;;  %v4692_v18 = vpack.c.bf16 %v3183_v10, %v3167_v9 }
 0x11a   : > { %3406 = vmatprep.mubr.f32.mxu1 %v4754_v0  ;;  %4641 = vmatprep.subr.bf16.mxu0 %v4640_v21  ;;  %v4684_v21 = vpack.c.bf16 %v3214_v14, %v3198_v13 }
 0x11b   : > { %4340 = vmatmul.mubr.msk.f32.vlgmr.msra.gmra.mrb[48].mxu0 %vm961_vm3, %v5428_v28  ;;  %4651 = vmatprep.subr.bf16.mxu1 %v4650_v24  ;;  %v3180_v28 = vld [vmem:[%s5822_s11 + $0xd8] sm:$0xff]  ;;  %v4694_v24 = vpack.c.bf16 %v3216_v17, %v3200_v16 }
 0x11c   : > { %4344 = vmatmul.mubr.msk.f32.vlgmr.msra.gmra.mrb[48].mxu1 %vm961_vm3, %v5901_v40  ;;  %4643 = vmatpush1.bf16.msra.mxu0 %v4642_v27  ;;  %v4670_v49 = vpack.c.bf16 %v3180_v28, %v3164_v42  ;;  %v3913_v27 = vld [vmem:[%s6544_s1] sm:$0xff] }
 0x11d   : > { %4653 = vmatpush1.bf16.msra.mxu1 %v4652_v31  ;;  %3335 = vmatprep.mubr.f32.mxu0 %v4754_v0 }
 0x11e   : > { %3412 = vmatprep.mubr.f32.mxu1 %v4754_v0  ;;  %4646 = vmatprep.subr.msk.bf16.mxu0 %vm5396_vm2, %v4644_v34 }
 0x11f   : > { %4341 = vmatmul.mubr.msk.f32.gmra.mrb[50].mxu0 %vm961_vm3, %v5457_v52  ;;  %4656 = vmatprep.subr.msk.bf16.mxu1 %vm5396_vm2, %v4654_v37 }
 0x120   : > { %4345 = vmatmul.mubr.msk.f32.gmra.mrb[50].mxu1 %vm961_vm3, %v5457_v52  ;;  %4649 = vmatpush1.bf16.msk.msra.mxu0 %vm5396_vm2, %v4647_v41  ;;  %v4664_v52 = vpack.c.bf16 %v3210_v51, %v3194_v50 }
 0x121   : > { %4659 = vmatpush1.bf16.msk.msra.mxu1 %vm5396_vm2, %v4657_v43  ;;  %3483 = vmatprep.mubr.f32.mxu0 %v4754_v0 }
 0x122   : > { %3560 = vmatprep.mubr.f32.mxu1 %v4754_v0  ;;  %4661 = vmatprep.subr.bf16.mxu0 %v4660_v46 }
 0x123   : > { %4348 = vmatmul.mubr.msk.f32.vlgmr.msra.gmra.mrb[52].mxu0 %vm961_vm3, %v5901_v40  ;;  %4671 = vmatprep.subr.bf16.mxu1 %v4670_v49 }
 0x124   : > { %4352 = vmatmul.mubr.msk.f32.vlgmr.msra.gmra.mrb[52].mxu1 %vm961_vm3, %v5901_v40  ;;  %4663 = vmatpush1.bf16.msra.mxu0 %v4662_v53 }
 0x125   : > { %4673 = vmatpush1.bf16.msra.mxu1 %v4672_v56  ;;  %3489 = vmatprep.mubr.f32.mxu0 %v4754_v0 }
 0x126   : > { %3566 = vmatprep.mubr.f32.mxu1 %v4754_v0  ;;  %4666 = vmatprep.subr.msk.bf16.mxu0 %vm5396_vm2, %v4664_v52 }
 0x127   : > { %4349 = vmatmul.mubr.msk.f32.gmra.mrb[54].mxu0 %vm961_vm3, %v4729_v11  ;;  %4676 = vmatprep.subr.msk.bf16.mxu1 %vm5396_vm2, %v4674_v61 }
 0x128   : > { %4353 = vmatmul.mubr.msk.f32.gmra.mrb[54].mxu1 %vm961_vm3, %v4729_v11  ;;  %4669 = vmatpush1.bf16.msk.msra.mxu0 %vm5396_vm2, %v4667_v2 }
 0x129   : > { %4679 = vmatpush1.bf16.msk.msra.mxu1 %vm5396_vm2, %v4677_v5  ;;  %3637 = vmatprep.mubr.f32.mxu0 %v4754_v0 }
 0x12a   : > { %3714 = vmatprep.mubr.f32.mxu1 %v4754_v0  ;;  %4681 = vmatprep.subr.bf16.mxu0 %v4680_v8 }
 0x12b   : > { %4356 = vmatmul.mubr.msk.f32.vlgmr.msra.gmra.mrb[56].mxu0 %vm961_vm3, %v5901_v40  ;;  %4691 = vmatprep.subr.bf16.mxu1 %v4690_v12 }
 0x12c   : > { %4360 = vmatmul.mubr.msk.f32.vlgmr.msra.gmra.mrb[56].mxu1 %vm961_vm3, %v5901_v40  ;;  %4683 = vmatpush1.bf16.msra.mxu0 %v4682_v15 }
 0x12d   : > { %4693 = vmatpush1.bf16.msra.mxu1 %v4692_v18  ;;  %3643 = vmatprep.mubr.f32.mxu0 %v4754_v0 }
 0x12e   : > { %3720 = vmatprep.mubr.f32.mxu1 %v4754_v0  ;;  %4686 = vmatprep.subr.msk.bf16.mxu0 %vm5396_vm2, %v4684_v21 }
 0x12f   : > { %4357 = vmatmul.mubr.msk.f32.gmra.mrb[58].mxu0 %vm961_vm3, %v4729_v11  ;;  %4696 = vmatprep.subr.msk.bf16.mxu1 %vm5396_vm2, %v4694_v24 }
 0x130   : > { %4361 = vmatmul.mubr.msk.f32.gmra.mrb[58].mxu1 %vm961_vm3, %v4729_v11  ;;  %4689 = vmatpush1.bf16.msk.msra.mxu0 %vm5396_vm2, %v4687_v25 }
 0x131   : > { %4699 = vmatpush1.bf16.msk.msra.mxu1 %vm5396_vm2, %v4697_v26  ;;  %3791 = vmatprep.mubr.f32.mxu0 %v4754_v0 }
 0x132   : > { %3868 = vmatprep.mubr.f32.mxu1 %v4754_v0  ;;  %3917 = vperm.xlu0 %4727, %v3913_v27  }
 0x133   : > { %4364 = vmatmul.mubr.msk.f32.vlgmr.msra.gmra.mrb[60].mxu0 %vm961_vm3, %v5901_v40 }
 0x134   : > { %4368 = vmatmul.mubr.msk.f32.vlgmr.msra.gmra.mrb[60].mxu1 %vm961_vm3, %v5901_v40  ;;  %3797 = vmatprep.mubr.f32.mxu0 %v4754_v0 }
 0x135   : > { %3874 = vmatprep.mubr.f32.mxu1 %v4754_v0 }
 0x136   : > { %3922 = vperm.xlu0 %4727, %v3914_v29  }
 0x137   : > { %4365 = vmatmul.mubr.msk.f32.gmra.mrb[62].mxu0 %vm961_vm3, %v4729_v11 }
 0x138   : > { %4369 = vmatmul.mubr.msk.f32.gmra.mrb[62].mxu1 %vm961_vm3, %v4729_v11 }
 0x18e   : > { %v6004_v1 = vpop.f32.mrb[0].mxu0 }
 0x18f   : > { %v6006_v30 = vpop.f32.mrb[0].mxu1  ;;  %v6008_v31 = vpop.f32.mrb[1].mxu0 }
 0x190   : > { %v6010_v32 = vpop.f32.mrb[1].mxu1 }
 0x192   : > { %v6012_v33 = vpop.f32.mrb[2].mxu0 }
 0x193   : > { %v6014_v34 = vpop.f32.mrb[2].mxu1  ;;  %v6016_v35 = vpop.f32.mrb[3].mxu0 }
 0x194   : > { %v6018_v0 = vpop.f32.mrb[3].mxu1 }
 0x196   : > { %v6020_v36 = vpop.f32.mrb[4].mxu0 }
 0x197   : > { %v6022_v37 = vpop.f32.mrb[4].mxu1  ;;  %v6024_v38 = vpop.f32.mrb[5].mxu0 }
 0x198   : > { %v6026_v39 = vpop.f32.mrb[5].mxu1 }
 0x19a   : > { %v6028_v40 = vpop.f32.mrb[6].mxu0 }
 0x19b   : > { %v6030_v41 = vpop.f32.mrb[6].mxu1  ;;  %v6032_v42 = vpop.f32.mrb[7].mxu0 }
 0x19c   : > { %v6034_v28 = vpop.f32.mrb[7].mxu1 }
 0x19e   : > { %v6036_v43 = vpop.f32.mrb[8].mxu0 }
 0x19f   : > { %v6038_v44 = vpop.f32.mrb[8].mxu1  ;;  %v6040_v45 = vpop.f32.mrb[9].mxu0 }
 0x1a0   : > { %v6042_v46 = vpop.f32.mrb[9].mxu1 }
 0x1a2   : > { %v6044_v47 = vpop.f32.mrb[10].mxu0 }
 0x1a3   : > { %v6046_v48 = vpop.f32.mrb[10].mxu1  ;;  %v6048_v49 = vpop.f32.mrb[11].mxu0 }
 0x1a4   : > { %v6050_v50 = vpop.f32.mrb[11].mxu1 }
 0x1a6   : > { %v6052_v51 = vpop.f32.mrb[12].mxu0 }
 0x1a7   : > { %6566 = vst [vmem:[#allocation7_spill] sm:$0xff] %v6052_v51  ;;  %v6054_v53 = vpop.f32.mrb[12].mxu1  ;;  %v6056_v54 = vpop.f32.mrb[13].mxu0 }
 0x1a8   : > { %6567 = vst [vmem:[#allocation8_spill] sm:$0xff] %v6056_v54  ;;  %v6058_v55 = vpop.f32.mrb[13].mxu1 }
 0x1a9   : > { %6568 = vst [vmem:[#allocation9_spill] sm:$0xff] %v6058_v55 }
 0x1aa   : > { %v6060_v56 = vpop.f32.mrb[14].mxu0 }
 0x1ab   : > { %6569 = vst [vmem:[#allocation10_spill] sm:$0xff] %v6060_v56  ;;  %v6062_v57 = vpop.f32.mrb[14].mxu1  ;;  %v6064_v58 = vpop.f32.mrb[15].mxu0 }
 0x1ac   : > { %6570 = vst [vmem:[#allocation11_spill] sm:$0xff] %v6064_v58  ;;  %v6066_v52 = vpop.f32.mrb[15].mxu1 }
 0x1ae   : > { %v6068_v59 = vpop.f32.mrb[16].mxu0 }
 0x1af   : > { %v6072_v61 = vpop.f32.mrb[16].mxu1  ;;  %v6074_v62 = vpop.f32.mrb[17].mxu0  ;;  %v6578_v55 = vmax.f32 %v6004_v1, %v6068_v59 }
 0x1b0   : > { %v6080_v3 = vpop.f32.mrb[17].mxu1  ;;  %v6579_v54 = vmax.f32 %v6006_v30, %v6072_v61  ;;  %v6580_v26 = vmax.f32 %v6008_v31, %v6074_v62 }
 0x1b1   : > { %v6581_v29 = vmax.f32 %v6010_v32, %v6080_v3 }
 0x1b2   : > { %v6084_v5 = vpop.f32.mrb[18].mxu0 }
 0x1b3   : > { %v6088_v7 = vpop.f32.mrb[18].mxu1  ;;  %v6090_v8 = vpop.f32.mrb[19].mxu0 }
 0x1b4   : > { %v6096_v11 = vpop.f32.mrb[19].mxu1 }
 0x1b6   : > { %v6100_v13 = vpop.f32.mrb[20].mxu0 }
 0x1b7   : > { %v6104_v15 = vpop.f32.mrb[20].mxu1  ;;  %v6106_v16 = vpop.f32.mrb[21].mxu0  ;;  %v6586_v3 = vmax.f32 %v6020_v36, %v6100_v13 }
 0x1b8   : > { %v6112_v19 = vpop.f32.mrb[21].mxu1 }
 0x1ba   : > { %v6116_v21 = vpop.f32.mrb[22].mxu0 }
 0x1bb   : > { %v6120_v23 = vpop.f32.mrb[22].mxu1  ;;  %v6122_v24 = vpop.f32.mrb[23].mxu0  ;;  %v6590_v13 = vmax.f32 %v6028_v40, %v6116_v21 }
 0x1bc   : > { %v6128_v27 = vpop.f32.mrb[23].mxu1 }
 0x1be   : > { %v6132_v20 = vpop.f32.mrb[24].mxu0 }
 0x1bf   : > { %v6136_v18 = vpop.f32.mrb[24].mxu1  ;;  %v6138_v17 = vpop.f32.mrb[25].mxu0  ;;  %v6594_v21 = vmax.f32 %v6036_v43, %v6132_v20 }
 0x1c0   : > { %v6144_v14 = vpop.f32.mrb[25].mxu1 }
 0x1c2   : > { %v6148_v12 = vpop.f32.mrb[26].mxu0 }
 0x1c3   : > { %v6152_v10 = vpop.f32.mrb[26].mxu1  ;;  %v6154_v9 = vpop.f32.mrb[27].mxu0  ;;  %v6598_v20 = vmax.f32 %v6044_v47, %v6148_v12  ;;  %v6603_v12 = vld [vmem:[#allocation7_spill] sm:$0xff] }
 0x1c4   : > { %v6160_v6 = vpop.f32.mrb[27].mxu1 }
 0x1c5   : > { %6571 = vst [vmem:[#allocation12_spill] sm:$0xff] %v6160_v6 }
 0x1c6   : > { %v6164_v4 = vpop.f32.mrb[28].mxu0 }
 0x1c7   : > { %6572 = vst [vmem:[#allocation13_spill] sm:$0xff] %v6164_v4  ;;  %v6168_v2 = vpop.f32.mrb[28].mxu1  ;;  %v6170_v63 = vpop.f32.mrb[29].mxu0 }
 0x1c8   : > { %6573 = vst [vmem:[#allocation14_spill] sm:$0xff] %v6170_v63  ;;  %v6176_v60 = vpop.f32.mrb[29].mxu1 }
 0x1c9   : > { %6574 = vst [vmem:[#allocation15_spill] sm:$0xff] %v6176_v60 }
 0x1ca   : > { %v6180_v6 = vpop.f32.mrb[30].mxu0 }
 0x1cb   : > { %6575 = vst [vmem:[#allocation16_spill] sm:$0xff] %v6180_v6  ;;  %v6184_v4 = vpop.f32.mrb[30].mxu1  ;;  %v6186_v51 = vpop.f32.mrb[31].mxu0 }
 0x1cc   : > { %6576 = vst [vmem:[#allocation17_spill] sm:$0xff] %v6186_v51  ;;  %v6192_v63 = vpop.f32.mrb[31].mxu1 }
 0x1cd   : > { %6577 = vst [vmem:[#allocation18_spill] sm:$0xff] %v6192_v63 }
 0x1ce   : > { %v2571_v60 = vpop.f32.mrb[32].mxu0 }
 0x1cf   : > { %v6199_v22 = vmax.f32 %v6578_v55, %v2571_v60  ;;  %v2648_v6 = vpop.f32.mrb[32].mxu1  ;;  %v2573_v56 = vpop.f32.mrb[33].mxu0  ;;  %v6582_v55 = vmax.f32 %v6012_v33, %v6084_v5  ;;  %v6583_v60 = vmax.f32 %v6014_v34, %v6088_v7  ;;  %v6587_v7 = vmax.f32 %v6022_v37, %v6104_v15 }
 0x1d0   : > { %v6204_v25 = vmax.f32 %v6579_v54, %v2648_v6  ;;  %v6209_v51 = vmax.f32 %v6580_v26, %v2573_v56  ;;  %v2650_v58 = vpop.f32.mrb[33].mxu1  ;;  %v6584_v56 = vmax.f32 %v6016_v35, %v6090_v8  ;;  %v6588_v8 = vmax.f32 %v6024_v38, %v6106_v16 }
 0x1d1   : > { %v6214_v63 = vmax.f32 %v6581_v29, %v2650_v58  ;;  %v6585_v58 = vmax.f32 %v6018_v0, %v6096_v11  ;;  %v6589_v11 = vmax.f32 %v6026_v39, %v6112_v19  ;;  %v6592_v16 = vmax.f32 %v6032_v42, %v6122_v24 }
 0x1d2   : > { %v2577_v1 = vpop.f32.mrb[34].mxu0  ;;  %v6593_v19 = vmax.f32 %v6034_v28, %v6128_v27  ;;  %v6596_v24 = vmax.f32 %v6040_v45, %v6138_v17  ;;  %v6597_v27 = vmax.f32 %v6042_v46, %v6144_v14  ;;  %v6600_v17 = vmax.f32 %v6048_v49, %v6154_v9  ;;  %v6601_v14 = vld [vmem:[#allocation12_spill] sm:$0xff] }
 0x1d3   : > { %v6219_v59 = vmax.f32 %v6582_v55, %v2577_v1  ;;  %v2654_v30 = vpop.f32.mrb[34].mxu1  ;;  %v2579_v54 = vpop.f32.mrb[35].mxu0  ;;  %v6591_v55 = vmax.f32 %v6030_v41, %v6120_v23  ;;  %v6607_v9 = vld [vmem:[#allocation8_spill] sm:$0xff] }
 0x1d4   : > { %v6224_v31 = vmax.f32 %v6583_v60, %v2654_v30  ;;  %v6229_v61 = vmax.f32 %v6584_v56, %v2579_v54  ;;  %v2656_v32 = vpop.f32.mrb[35].mxu1  ;;  %v6595_v56 = vmax.f32 %v6038_v44, %v6136_v18 }
 0x1d5   : > { %v6234_v62 = vmax.f32 %v6585_v58, %v2656_v32 }
 0x1d6   : > { %v2725_v33 = vpop.f32.mrb[36].mxu0 }
 0x1d7   : > { %v6239_v5 = vmax.f32 %v6586_v3, %v2725_v33  ;;  %v2802_v34 = vpop.f32.mrb[36].mxu1  ;;  %v2727_v6 = vpop.f32.mrb[37].mxu0  ;;  %v6599_v3 = vmax.f32 %v6046_v48, %v6152_v10 }
 0x1d8   : > { %v6244_v35 = vmax.f32 %v6587_v7, %v2802_v34  ;;  %v6249_v26 = vmax.f32 %v6588_v8, %v2727_v6  ;;  %v2804_v0 = vpop.f32.mrb[37].mxu1  ;;  %v6602_v6 = vmax.f32 %v6050_v50, %v6601_v14  ;;  %v6604_v8 = vld [vmem:[#allocation13_spill] sm:$0xff] }
 0x1d9   : > { %v6254_v29 = vmax.f32 %v6589_v11, %v2804_v0  ;;  %v6605_v0 = vmax.f32 %v6603_v12, %v6604_v8 }
 0x1da   : > { %v2731_v36 = vpop.f32.mrb[38].mxu0 }
 0x1db   : > { %v6259_v1 = vmax.f32 %v6590_v13, %v2731_v36  ;;  %v2808_v37 = vpop.f32.mrb[38].mxu1  ;;  %v2733_v15 = vpop.f32.mrb[39].mxu0  ;;  %v6606_v36 = vmax.f32 %v6054_v53, %v6168_v2  ;;  %v6608_v13 = vld [vmem:[#allocation14_spill] sm:$0xff] }
 0x1dc   : > { %v6264_v38 = vmax.f32 %v6591_v55, %v2808_v37  ;;  %v6269_v30 = vmax.f32 %v6592_v16, %v2733_v15  ;;  %v2810_v39 = vpop.f32.mrb[39].mxu1  ;;  %v6609_v37 = vmax.f32 %v6607_v9, %v6608_v13  ;;  %v6610_v55 = vld [vmem:[#allocation9_spill] sm:$0xff]  ;;  %v6611_v16 = vld [vmem:[#allocation15_spill] sm:$0xff] }
 0x1dd   : > { %v6274_v54 = vmax.f32 %v6593_v19, %v2810_v39  ;;  %v6612_v39 = vmax.f32 %v6610_v55, %v6611_v16 }
 0x1de   : > { %v2879_v40 = vpop.f32.mrb[40].mxu0 }
 0x1df   : > { %v6279_v60 = vmax.f32 %v6594_v21, %v2879_v40  ;;  %v2956_v41 = vpop.f32.mrb[40].mxu1  ;;  %v2881_v23 = vpop.f32.mrb[41].mxu0  ;;  %v6613_v21 = vld [vmem:[#allocation10_spill] sm:$0xff] }
 0x1e0   : > { %v6284_v42 = vmax.f32 %v6595_v56, %v2956_v41  ;;  %v6289_v32 = vmax.f32 %v6596_v24, %v2881_v23  ;;  %v2958_v28 = vpop.f32.mrb[41].mxu1  ;;  %v6614_v41 = vld [vmem:[#allocation16_spill] sm:$0xff]  ;;  %v6616_v24 = vmax.f32 %v6062_v57, %v6184_v4 }
 0x1e1   : > { %v6294_v58 = vmax.f32 %v6597_v27, %v2958_v28  ;;  %v6615_v23 = vmax.f32 %v6613_v21, %v6614_v41  ;;  %v6617_v27 = vld [vmem:[#allocation11_spill] sm:$0xff] }
 0x1e2   : > { %v2885_v43 = vpop.f32.mrb[42].mxu0 }
 0x1e3   : > { %v6299_v33 = vmax.f32 %v6598_v20, %v2885_v43  ;;  %v2962_v44 = vpop.f32.mrb[42].mxu1  ;;  %v2887_v18 = vpop.f32.mrb[43].mxu0  ;;  %v6618_v43 = vld [vmem:[#allocation17_spill] sm:$0xff] }
 0x1e4   : > { %v6304_v45 = vmax.f32 %v6599_v3, %v2962_v44  ;;  %v6309_v34 = vmax.f32 %v6600_v17, %v2887_v18  ;;  %v2964_v46 = vpop.f32.mrb[43].mxu1  ;;  %v6619_v20 = vmax.f32 %v6617_v27, %v6618_v43  ;;  %v6351_v3 = vpop.permute.xlu0 %3917  ;;  %v6620_v17 = vld [vmem:[#allocation18_spill] sm:$0xff] }
 0x1e5   : > { %v6314_v7 = vmax.f32 %v6602_v6, %v2964_v46  ;;  %v6621_v46 = vmax.f32 %v6066_v52, %v6620_v17 }
 0x1e6   : > { %v3033_v47 = vpop.f32.mrb[44].mxu0 }
 0x1e7   : > { %v6319_v11 = vmax.f32 %v6605_v0, %v3033_v47  ;;  %v3110_v48 = vpop.f32.mrb[44].mxu1  ;;  %v3035_v10 = vpop.f32.mrb[45].mxu0 }
 0x1e8   : > { %v6324_v49 = vmax.f32 %v6606_v36, %v3110_v48  ;;  %v6329_v15 = vmax.f32 %v6609_v37, %v3035_v10  ;;  %v3112_v50 = vpop.f32.mrb[45].mxu1  ;;  %v6367_v13 = vpop.permute.xlu0 %3922 }
 0x1e9   : > { %v6334_v19 = vmax.f32 %v6612_v39, %v3112_v50 }
 0x1ea   : > { %v3039_v40 = vpop.f32.mrb[46].mxu0 }
 0x1eb   : > { %v6339_v56 = vmax.f32 %v6615_v23, %v3039_v40  ;;  %v3116_v53 = vpop.f32.mrb[46].mxu1  ;;  %v3041_v2 = vpop.f32.mrb[47].mxu0 }
 0x1ec   : > { %v6344_v28 = vmax.f32 %v6616_v24, %v3116_v53  ;;  %v6349_v44 = vmax.f32 %v6619_v20, %v3041_v2  ;;  %v3118_v18 = vpop.f32.mrb[47].mxu1 }
 0x1ed   : > { %v6356_v14 = vmax.f32 %v6621_v46, %v3118_v18 }
 0x1ee   : > { %v3331_v6 = vpop.f32.mrb[48].mxu0 }
 0x1ef   : > { %v3881_v47 = vmax.f32 %v6199_v22, %v3331_v6  ;;  %v3408_v12 = vpop.f32.mrb[48].mxu1  ;;  %v3333_v57 = vpop.f32.mrb[49].mxu0 }
 0x1f0   : > { %v3883_v4 = vmax.f32 %v6204_v25, %v3408_v12  ;;  %v3882_v8 = vmax.f32 %v6209_v51, %v3333_v57  ;;  %v3410_v0 = vpop.f32.mrb[49].mxu1 }
 0x1f1   : > { %v3884_v48 = vmax.f32 %v6214_v63, %v3410_v0  ;;  %v3925_v10 = vadd.f32 %v6351_v3, %v3881_v47 }
 0x1f2   : > { %v3926_v52 = vadd.f32 %v6351_v3, %v3882_v8  ;;  %v3927_v36 = vadd.f32 %v6351_v3, %v3883_v4  ;;  %v3337_v9 = vpop.f32.mrb[50].mxu0 }
 0x1f3   : > { %v3928_v22 = vadd.f32 %v6351_v3, %v3884_v48  ;;  %v3957_v37 = vmax.f32 %v3925_v10, 0.0  ;;  %v3897_v50 = vmax.f32 %v6219_v59, %v3337_v9  ;;  %v3414_v25 = vpop.f32.mrb[50].mxu1  ;;  %v3339_v55 = vpop.f32.mrb[51].mxu0 }
 0x1f4   : > { %v3958_v51 = vmax.f32 %v3926_v52, 0.0  ;;  %v3959_v16 = vmax.f32 %v3927_v36, 0.0  ;;  %v3899_v63 = vmax.f32 %v6224_v31, %v3414_v25  ;;  %v3898_v39 = vmax.f32 %v6229_v61, %v3339_v55  ;;  %v3416_v40 = vpop.f32.mrb[51].mxu1 }
 0x1f5   : > { %v3960_v21 = vmax.f32 %v3928_v22, 0.0  ;;  %3989 = vst [vmem:[%s6373_s21] sm:$0xff] %v3957_v37  ;;  %v3900_v41 = vmax.f32 %v6234_v62, %v3416_v40  ;;  %v3941_v59 = vadd.f32 %v6367_v13, %v3897_v50 }
 0x1f6   : > { %3990 = vst [vmem:[%s6373_s21 + $0x8] sm:$0xff] %v3958_v51  ;;  %3991 = vst [vmem:[%s6373_s21 + $0x10] sm:$0xff] %v3959_v16  ;;  %v3942_v31 = vadd.f32 %v6367_v13, %v3898_v39  ;;  %v3943_v61 = vadd.f32 %v6367_v13, %v3899_v63  ;;  %v3485_v23 = vpop.f32.mrb[52].mxu0 }
 0x1f7   : > { %3992 = vst [vmem:[%s6373_s21 + $0x18] sm:$0xff] %v3960_v21  ;;  %v3944_v53 = vadd.f32 %v6367_v13, %v3900_v41  ;;  %v3973_v2 = vmax.f32 %v3941_v59, 0.0  ;;  %v3885_v24 = vmax.f32 %v6239_v5, %v3485_v23  ;;  %v3562_v27 = vpop.f32.mrb[52].mxu1  ;;  %v3487_v62 = vpop.f32.mrb[53].mxu0 }
 0x1f8   : > { %v3974_v43 = vmax.f32 %v3942_v31, 0.0  ;;  %v3975_v20 = vmax.f32 %v3943_v61, 0.0  ;;  %v3887_v18 = vmax.f32 %v6244_v35, %v3562_v27  ;;  %v3886_v17 = vmax.f32 %v6249_v26, %v3487_v62  ;;  %v3564_v46 = vpop.f32.mrb[53].mxu1 }
 0x1f9   : > { %v3976_v6 = vmax.f32 %v3944_v53, 0.0  ;;  %4005 = vst [vmem:[%s6373_s21 + $0x80] sm:$0xff] %v3973_v2  ;;  %v3929_v47 = vadd.f32 %v6351_v3, %v3885_v24  ;;  %v3888_v12 = vmax.f32 %v6254_v29, %v3564_v46 }
 0x1fa   : > { %4006 = vst [vmem:[%s6373_s21 + $0x88] sm:$0xff] %v3974_v43  ;;  %4007 = vst [vmem:[%s6373_s21 + $0x90] sm:$0xff] %v3975_v20  ;;  %v3931_v5 = vadd.f32 %v6351_v3, %v3887_v18  ;;  %v3930_v57 = vadd.f32 %v6351_v3, %v3886_v17  ;;  %v3491_v4 = vpop.f32.mrb[54].mxu0 }
 0x1fb   : > { %4008 = vst [vmem:[%s6373_s21 + $0x98] sm:$0xff] %v3976_v6  ;;  %v3961_v35 = vmax.f32 %v3929_v47, 0.0  ;;  %v3932_v26 = vadd.f32 %v6351_v3, %v3888_v12  ;;  %v3901_v8 = vmax.f32 %v6259_v1, %v3491_v4  ;;  %v3568_v0 = vpop.f32.mrb[54].mxu1  ;;  %v3493_v48 = vpop.f32.mrb[55].mxu0 }
 0x1fc   : > { %v3963_v29 = vmax.f32 %v3931_v5, 0.0  ;;  %v3962_v10 = vmax.f32 %v3930_v57, 0.0  ;;  %v3903_v52 = vmax.f32 %v6264_v38, %v3568_v0  ;;  %v3902_v36 = vmax.f32 %v6269_v30, %v3493_v48  ;;  %v3570_v9 = vpop.f32.mrb[55].mxu1 }
 0x1fd   : > { %3993 = vst [vmem:[%s6373_s21 + $0x20] sm:$0xff] %v3961_v35  ;;  %v3964_v22 = vmax.f32 %v3932_v26, 0.0  ;;  %v3945_v37 = vadd.f32 %v6367_v13, %v3901_v8  ;;  %v3904_v50 = vmax.f32 %v6274_v54, %v3570_v9 }
 0x1fe   : > { %3995 = vst [vmem:[%s6373_s21 + $0x30] sm:$0xff] %v3963_v29  ;;  %3994 = vst [vmem:[%s6373_s21 + $0x28] sm:$0xff] %v3962_v10  ;;  %v3947_v1 = vadd.f32 %v6367_v13, %v3903_v52  ;;  %v3946_v25 = vadd.f32 %v6367_v13, %v3902_v36  ;;  %v3639_v55 = vpop.f32.mrb[56].mxu0 }
 0x1ff   : > { %3996 = vst [vmem:[%s6373_s21 + $0x38] sm:$0xff] %v3964_v22  ;;  %v3977_v38 = vmax.f32 %v3945_v37, 0.0  ;;  %v3948_v30 = vadd.f32 %v6367_v13, %v3904_v50  ;;  %v3889_v51 = vmax.f32 %v6279_v60, %v3639_v55  ;;  %v3716_v16 = vpop.f32.mrb[56].mxu1  ;;  %v3641_v63 = vpop.f32.mrb[57].mxu0 }
 0x200   : > { %v3979_v54 = vmax.f32 %v3947_v1, 0.0  ;;  %v3978_v39 = vmax.f32 %v3946_v25, 0.0  ;;  %v3891_v40 = vmax.f32 %v6284_v42, %v3716_v16  ;;  %v3890_v21 = vmax.f32 %v6289_v32, %v3641_v63  ;;  %v3718_v41 = vpop.f32.mrb[57].mxu1 }
 0x201   : > { %4009 = vst [vmem:[%s6373_s21 + $0xa0] sm:$0xff] %v3977_v38  ;;  %v3980_v59 = vmax.f32 %v3948_v30, 0.0  ;;  %v3933_v31 = vadd.f32 %v6351_v3, %v3889_v51  ;;  %v3892_v61 = vmax.f32 %v6294_v58, %v3718_v41 }
 0x202   : > { %4011 = vst [vmem:[%s6373_s21 + $0xb0] sm:$0xff] %v3979_v54  ;;  %4010 = vst [vmem:[%s6373_s21 + $0xa8] sm:$0xff] %v3978_v39  ;;  %v3935_v60 = vadd.f32 %v6351_v3, %v3891_v40  ;;  %v3934_v23 = vadd.f32 %v6351_v3, %v3890_v21  ;;  %v3645_v53 = vpop.f32.mrb[58].mxu0  ;;  %v4047_v39 = vld [vmem:[%s6373_s21 + $0x10] sm:$0xff] (%p4826_p5)  ;;  %v4049_v40 = vld [vmem:[%s6373_s21 + $0x18] sm:$0xff] (%p4826_p5) }
 0x203   : > { %4012 = vst [vmem:[%s6373_s21 + $0xb8] sm:$0xff] %v3980_v59  ;;  %v3965_v42 = vmax.f32 %v3933_v31, 0.0  ;;  %v3936_v32 = vadd.f32 %v6351_v3, %v3892_v61  ;;  %v3905_v2 = vmax.f32 %v6299_v33, %v3645_v53  ;;  %v3722_v24 = vpop.f32.mrb[58].mxu1  ;;  %v3647_v27 = vpop.f32.mrb[59].mxu0  ;;  %4048 = vst [vmem:[%s6470_s30 + $0x10] sm:$0xff] (%p4826_p5), %v4047_v39 }
 0x204   : > { %v3967_v58 = vmax.f32 %v3935_v60, 0.0  ;;  %v3966_v62 = vmax.f32 %v3934_v23, 0.0  ;;  %v3907_v43 = vmax.f32 %v6304_v45, %v3722_v24  ;;  %v3906_v20 = vmax.f32 %v6309_v34, %v3647_v27  ;;  %v3724_v18 = vpop.f32.mrb[59].mxu1  ;;  %v4051_v21 = vld [vmem:[%s6373_s21 + $0x20] sm:$0xff] (%p4826_p5)  ;;  %4050 = vst [vmem:[%s6470_s30 + $0x18] sm:$0xff] (%p4826_p5), %v4049_v40 }
 0x205   : > { %3997 = vst [vmem:[%s6373_s21 + $0x40] sm:$0xff] %v3965_v42  ;;  %v3968_v17 = vmax.f32 %v3936_v32, 0.0  ;;  %v3949_v46 = vadd.f32 %v6367_v13, %v3905_v2  ;;  %v3908_v6 = vmax.f32 %v6314_v7, %v3724_v18  ;;  %v4053_v41 = vld [vmem:[%s6373_s21 + $0x28] sm:$0xff] (%p4826_p5)  ;;  %4052 = vst [vmem:[%s6470_s30 + $0x20] sm:$0xff] (%p4826_p5), %v4051_v21  ;;  %v4055_v59 = vld [vmem:[%s6373_s21 + $0x30] sm:$0xff] (%p4826_p5) }
 0x206   : > { %3999 = vst [vmem:[%s6373_s21 + $0x50] sm:$0xff] %v3967_v58  ;;  %3998 = vst [vmem:[%s6373_s21 + $0x48] sm:$0xff] %v3966_v62  ;;  %v3951_v33 = vadd.f32 %v6367_v13, %v3907_v43  ;;  %v3950_v47 = vadd.f32 %v6367_v13, %v3906_v20  ;;  %v3793_v12 = vpop.f32.mrb[60].mxu0  ;;  %v4057_v31 = vld [vmem:[%s6373_s21 + $0x38] sm:$0xff] (%p4826_p5)  ;;  %v4075_v27 = vld [vmem:[%s6373_s21 + $0x80] sm:$0xff] (%p4826_p5) }
 0x207   : > { %4000 = vst [vmem:[%s6373_s21 + $0x58] sm:$0xff] %v3968_v17  ;;  %v3981_v45 = vmax.f32 %v3949_v46, 0.0  ;;  %v3952_v34 = vadd.f32 %v6367_v13, %v3908_v6  ;;  %v3893_v5 = vmax.f32 %v6319_v11, %v3793_v12  ;;  %v3870_v57 = vpop.f32.mrb[60].mxu1  ;;  %v3795_v4 = vpop.f32.mrb[61].mxu0  ;;  %4054 = vst [vmem:[%s6470_s30 + $0x28] sm:$0xff] (%p4826_p5), %v4053_v41  ;;  %v4077_v58 = vld [vmem:[%s6373_s21 + $0x88] sm:$0xff] (%p4826_p5) }
 0x208   : > { %v3983_v7 = vmax.f32 %v3951_v33, 0.0  ;;  %v3982_v35 = vmax.f32 %v3950_v47, 0.0  ;;  %v3895_v26 = vmax.f32 %v6324_v49, %v3870_v57  ;;  %v3894_v8 = vmax.f32 %v6329_v15, %v3795_v4  ;;  %v3872_v0 = vpop.f32.mrb[61].mxu1  ;;  %4056 = vst [vmem:[%s6470_s30 + $0x30] sm:$0xff] (%p4826_p5), %v4055_v59  ;;  %4058 = vst [vmem:[%s6470_s30 + $0x38] sm:$0xff] (%p4826_p5), %v4057_v31  ;;  %v4079_v62 = vld [vmem:[%s6373_s21 + $0x90] sm:$0xff] (%p4826_p5) }
 0x209   : > { %4013 = vst [vmem:[%s6373_s21 + $0xc0] sm:$0xff] %v3981_v45  ;;  %v3984_v48 = vmax.f32 %v3952_v34, 0.0  ;;  %v3937_v29 = vadd.f32 %v6351_v3, %v3893_v5  ;;  %v3896_v10 = vmax.f32 %v6334_v19, %v3872_v0  ;;  %4076 = vst [vmem:[%s6470_s30 + $0x600] sm:$0xff] (%p4826_p5), %v4075_v27  ;;  %v4081_v43 = vld [vmem:[%s6373_s21 + $0x98] sm:$0xff] (%p4826_p5)  ;;  %v4083_v20 = vld [vmem:[%s6373_s21 + $0xa0] sm:$0xff] (%p4826_p5) }
 0x20a   : > { %4015 = vst [vmem:[%s6373_s21 + $0xd0] sm:$0xff] %v3983_v7  ;;  %4014 = vst [vmem:[%s6373_s21 + $0xc8] sm:$0xff] %v3982_v35  ;;  %v3939_v11 = vadd.f32 %v6351_v3, %v3895_v26  ;;  %v3938_v52 = vadd.f32 %v6351_v3, %v3894_v8  ;;  %v3799_v36 = vpop.f32.mrb[62].mxu0  ;;  %v4085_v18 = vld [vmem:[%s6373_s21 + $0xa8] sm:$0xff] (%p4826_p5)  ;;  %v4087_v17 = vld [vmem:[%s6373_s21 + $0xb0] sm:$0xff] (%p4826_p5) }
 0x20b   : > { %4016 = vst [vmem:[%s6373_s21 + $0xd8] sm:$0xff] %v3984_v48  ;;  %v3969_v49 = vmax.f32 %v3937_v29, 0.0  ;;  %v3940_v15 = vadd.f32 %v6351_v3, %v3896_v10  ;;  %v3909_v9 = vmax.f32 %v6339_v56, %v3799_v36  ;;  %v3876_v22 = vpop.f32.mrb[62].mxu1  ;;  %v3801_v37 = vpop.f32.mrb[63].mxu0  ;;  %4078 = vst [vmem:[%s6470_s30 + $0x608] sm:$0xff] (%p4826_p5), %v4077_v58  ;;  %v4089_v46 = vld [vmem:[%s6373_s21 + $0xb8] sm:$0xff] (%p4826_p5) }
 0x20c   : > { %v3971_v19 = vmax.f32 %v3939_v11, 0.0  ;;  %v3970_v50 = vmax.f32 %v3938_v52, 0.0  ;;  %v3911_v1 = vmax.f32 %v6344_v28, %v3876_v22  ;;  %v3910_v25 = vmax.f32 %v6349_v44, %v3801_v37  ;;  %v3878_v55 = vpop.f32.mrb[63].mxu1  ;;  %v4059_v61 = vld [vmem:[%s6373_s21 + $0x40] sm:$0xff] (%p4826_p5)  ;;  %4080 = vst [vmem:[%s6470_s30 + $0x610] sm:$0xff] (%p4826_p5), %v4079_v62  ;;  %4082 = vst [vmem:[%s6470_s30 + $0x618] sm:$0xff] (%p4826_p5), %v4081_v43 }
 0x20d   : > { %4001 = vst [vmem:[%s6373_s21 + $0x60] sm:$0xff] %v3969_v49  ;;  %v3972_v38 = vmax.f32 %v3940_v15, 0.0  ;;  %v3953_v3 = vadd.f32 %v6367_v13, %v3909_v9  ;;  %v3912_v56 = vmax.f32 %v6356_v14, %v3878_v55  ;;  %4027 = sbr.rel (!%p4826_p5) target bundleno = 540 (0x21c), region = 140  ;;  %v4043_v14 = vld [vmem:[%s6373_s21] sm:$0xff] (%p4826_p5)  ;;  %4060 = vst [vmem:[%s6470_s30 + $0x40] sm:$0xff] (%p4826_p5), %v4059_v61  ;;  %v4061_v60 = vld [vmem:[%s6373_s21 + $0x48] sm:$0xff] (%p4826_p5) }
 0x20e   : > { %4003 = vst [vmem:[%s6373_s21 + $0x70] sm:$0xff] %v3971_v19  ;;  %4002 = vst [vmem:[%s6373_s21 + $0x68] sm:$0xff] %v3970_v50  ;;  %v3955_v30 = vadd.f32 %v6367_v13, %v3911_v1  ;;  %v3954_v51 = vadd.f32 %v6367_v13, %v3910_v25  ;;  %v4063_v23 = vld [vmem:[%s6373_s21 + $0x50] sm:$0xff] (%p4826_p5)  ;;  %v4065_v53 = vld [vmem:[%s6373_s21 + $0x58] sm:$0xff] (%p4826_p5) }
 0x20f   : > { %4004 = vst [vmem:[%s6373_s21 + $0x78] sm:$0xff] %v3972_v38  ;;  %v3985_v28 = vmax.f32 %v3953_v3, 0.0  ;;  %v3956_v44 = vadd.f32 %v6367_v13, %v3912_v56  ;;  %v4045_v13 = vld [vmem:[%s6373_s21 + $0x8] sm:$0xff] (%p4826_p5)  ;;  %4044 = vst [vmem:[%s6470_s30] sm:$0xff] (%p4826_p5), %v4043_v14 }
 0x210   : > { %v3987_v16 = vmax.f32 %v3955_v30, 0.0  ;;  %v3986_v63 = vmax.f32 %v3954_v51, 0.0  ;;  %4046 = vst [vmem:[%s6470_s30 + $0x8] sm:$0xff] (%p4826_p5), %v4045_v13  ;;  %4062 = vst [vmem:[%s6470_s30 + $0x48] sm:$0xff] (%p4826_p5), %v4061_v60  ;;  %v4091_v6 = vld [vmem:[%s6373_s21 + $0xc0] sm:$0xff] (%p4826_p5) }
 0x211   : > { %4017 = vst [vmem:[%s6373_s21 + $0xe0] sm:$0xff] %v3985_v28  ;;  %v3988_v54 = vmax.f32 %v3956_v44, 0.0  ;;  %4064 = vst [vmem:[%s6470_s30 + $0x50] sm:$0xff] (%p4826_p5), %v4063_v23  ;;  %v4093_v33 = vld [vmem:[%s6373_s21 + $0xc8] sm:$0xff] (%p4826_p5)  ;;  %v4095_v47 = vld [vmem:[%s6373_s21 + $0xd0] sm:$0xff] (%p4826_p5) }
 0x212   : > { %4019 = vst [vmem:[%s6373_s21 + $0xf0] sm:$0xff] %v3987_v16  ;;  %4018 = vst [vmem:[%s6373_s21 + $0xe8] sm:$0xff] %v3986_v63  ;;  %v4097_v12 = vld [vmem:[%s6373_s21 + $0xd8] sm:$0xff] (%p4826_p5) }
 0x213   : > { %4020 = vst [vmem:[%s6373_s21 + $0xf8] sm:$0xff] %v3988_v54  ;;  %4066 = vst [vmem:[%s6470_s30 + $0x58] sm:$0xff] (%p4826_p5), %v4065_v53 }
 0x214   : > { %v4067_v42 = vld [vmem:[%s6373_s21 + $0x60] sm:$0xff]  ;;  %4084 = vst [vmem:[%s6470_s30 + $0x620] sm:$0xff] %v4083_v20  ;;  %4086 = vst [vmem:[%s6470_s30 + $0x628] sm:$0xff] %v4085_v18 }
 0x215   : > { %v4069_v32 = vld [vmem:[%s6373_s21 + $0x68] sm:$0xff]  ;;  %v4071_v2 = vld [vmem:[%s6373_s21 + $0x70] sm:$0xff]  ;;  %4068 = vst [vmem:[%s6470_s30 + $0x60] sm:$0xff] %v4067_v42  ;;  %4088 = vst [vmem:[%s6470_s30 + $0x630] sm:$0xff] %v4087_v17 }
 0x216   : > { %4070 = vst [vmem:[%s6470_s30 + $0x68] sm:$0xff] %v4069_v32  ;;  %4072 = vst [vmem:[%s6470_s30 + $0x70] sm:$0xff] %v4071_v2  ;;  %v4073_v24 = vld [vmem:[%s6373_s21 + $0x78] sm:$0xff] }
 0x217   : > { %4074 = vst [vmem:[%s6470_s30 + $0x78] sm:$0xff] %v4073_v24  ;;  %4090 = vst [vmem:[%s6470_s30 + $0x638] sm:$0xff] %v4089_v46 }
 0x218   : > { %4092 = vst [vmem:[%s6470_s30 + $0x640] sm:$0xff] %v4091_v6  ;;  %4094 = vst [vmem:[%s6470_s30 + $0x648] sm:$0xff] %v4093_v33  ;;  %v4099_v45 = vld [vmem:[%s6373_s21 + $0xe0] sm:$0xff] }
 0x219   : > { %4096 = vst [vmem:[%s6470_s30 + $0x650] sm:$0xff] %v4095_v47  ;;  %v4101_v34 = vld [vmem:[%s6373_s21 + $0xe8] sm:$0xff]  ;;  %4098 = vst [vmem:[%s6470_s30 + $0x658] sm:$0xff] %v4097_v12  ;;  %v4103_v5 = vld [vmem:[%s6373_s21 + $0xf0] sm:$0xff] }
 0x21a   : > { %4100 = vst [vmem:[%s6470_s30 + $0x660] sm:$0xff] %v4099_v45  ;;  %4102 = vst [vmem:[%s6470_s30 + $0x668] sm:$0xff] %v4101_v34  ;;  %v4105_v57 = vld [vmem:[%s6373_s21 + $0xf8] sm:$0xff] }
 0x21b   : > { %4104 = vst [vmem:[%s6470_s30 + $0x670] sm:$0xff] %v4103_v5  ;;  %4106 = vst [vmem:[%s6470_s30 + $0x678] sm:$0xff] %v4105_v57 }
 0x21c PF: > { %p13_p10 = scmp.ge.s32.totalorder %s4809_s25, 14   ;;  %s6622_s21 = smov %s4748_s22 }
 0x21d   : > { %s6623_s22 = smov %s4820_s28  ;;  %s6624_s23 = smov %s4809_s25 }
 0x21e   :  { %15 = sbr.rel (!%p13_p10) target bundleno = 2 (0x2), region = 218 }

// kernel: embedding_net_forward.4
= control target key start
LH: loop header
LB: loop body
LE: loop exit
PB: predicated region body
PF: predicated region fallthrough
CT: control target
= control target key end

     0   :  { %s6528_s0 = inlined_call_operand.vmem [shape: f32[16,400], index: 0, kind: input, shape index: {}]   ;;  %s6529_s1 = inlined_call_operand.vmem [shape: f32[16,1], index: 1, kind: input, shape index: {}]   ;;  %s6530_s2 = inlined_call_operand.vmem [shape: f32[400,5632], index: 2, kind: input, shape index: {}]   ;;  %s6531_s3 = inlined_call_operand.hbm [shape: f32[400,5632], index: 3, kind: input, shape index: {}]   ;;  %s6532_s4 = inlined_call_operand.hbm [shape: f32[400,5632], index: 4, kind: input, shape index: {}]   ;;  %s6533_s5 = inlined_call_operand.vmem [shape: f32[400,5632], index: 5, kind: input, shape index: {}]   ;;  %s6534_s6 = inlined_call_operand.vmem [shape: f32[16,5632], index: 6, kind: output, shape index: {}]  }
   0x1   :  { %6535 = sst [smem:[#allocation11_spill]] %s6530_s2 }
   0x2   :  { %11 = vsyncpa [#allocation4], 0 }
   0x3   :  { %13 = vsyncpa [#allocation4 + $0x1], 0 }
   0x4   :  { %14 = vsyncpa [#allocation6], 0 }
   0x5   :  { %16 = vsyncpa [#allocation6 + $0x1], 0  ;;  %s4518_s21 = smov 0   ;;  %s4520_s22 = smov 0  }
   0x6   :  { %s4522_s23 = smov 0   ;;  %s4524_s24 = smov 0  }
   0x7 LB: > { %s4537_s25 = sadd.s32 4294967295, %s4475_s24   ;;  %s4540_s26 = sadd.s32 1, %s4475_s24   ;;  %s4475_s24 = sphi %s4524_s24, %s6544_s24   ;;  %s4471_s23 = sphi %s4522_s23, %s6543_s23   ;;  %s4467_s22 = sphi %s4520_s22, %s6542_s22   ;;  %s4463_s21 = sphi %s4518_s21, %s6541_s21  }
   0x8   : > { %s68_s27 = ssub.s32 %s4475_s24, %s4540_s26  ;;  %s71_s28 = sadd.s32 1, %s4471_s23 }
   0x9   : > { %p69_p0 = scmp.eq.s32.totalorder %s68_s27, 0  ;;  %p78_p1 = scmp.ne.s32.totalorder %s4471_s23, %s4467_s22 }
   0xa   : > { %p79_p2 = scmp.eq.s32.totalorder %s4475_s24, 0  ;;  %p110_p3 = scmp.ne.s32.totalorder %s4467_s22, %s4463_s21 }
   0xb   : > { %s4550_s29 = scalar_select %p69_p0, %s4471_s23, %s71_s28  }
   0xc   : > { %p4552_p4 = por %p79_p2, %p78_p1  ;;  %p111_p5 = scmp.eq.s32.totalorder %s4537_s25, 0 }
   0xd   : > { %p186_p6 = scmp.eq.s32.totalorder %s4537_s25, 10  ;;  %p3458_p9 = scmp.ge.s32.totalorder %s4475_s24, 11 }
   0xe   : > { %p4558_p7 = por %p111_p5, %p110_p3 }
   0xf   : > { %p4562_p8 = por %p186_p6, %p78_p1  ;;  %214 = sbr.rel (%p3458_p9) target bundleno = 287 (0x11f), region = 24 }
  0x11   : > { %s6538_s8 = scalar_select %p4562_p8, 1, 0 }
  0x16   : > { %217 = sbr.rel (!%p4552_p4) target bundleno = 133 (0x85), region = 28  ;;  %s219_s9 = sand.u32 (%p4552_p4), 1, %s4471_s23  }
  0x17   : > { %s3490_s10 = sshll.u32 (%p4552_p4), %s4475_s24, 5  ;;  %s4327_s11 = smul.u32 (%p4552_p4), 1600, %s219_s9 }
  0x18   : > { %s6539_s2 = sld [smem:[#allocation11_spill]] (%p4552_p4) }
  0x19   : > { %s4582_s15 = scalar_lea.vmem (%p4552_p4), [#allocation2], %s4327_s11 }
  0x1e   : > { %s4574_s14 = scalar_lea.vmem %s6539_s2, %s3490_s10 }
  0x1f   : > { %v237_v0 = vld [vmem:[%s4574_s14] sm:$0xff]  ;;  %v239_v1 = vld [vmem:[%s4574_s14 + $0x8] sm:$0xff]  ;;  %v241_v2 = vld [vmem:[%s4574_s14 + $0x10] sm:$0xff] }
  0x20   : > { %v243_v3 = vld [vmem:[%s4574_s14 + $0x18] sm:$0xff]  ;;  %v245_v4 = vld [vmem:[%s4574_s14 + $0x160] sm:$0xff]  ;;  %v247_v5 = vld [vmem:[%s4574_s14 + $0x168] sm:$0xff]  ;;  %238 = vst [vmem:[%s4582_s15] sm:$0xff] %v237_v0 }
  0x21   : > { %240 = vst [vmem:[%s4582_s15 + $0x8] sm:$0xff] %v239_v1  ;;  %242 = vst [vmem:[%s4582_s15 + $0x10] sm:$0xff] %v241_v2  ;;  %v249_v6 = vld [vmem:[%s4574_s14 + $0x170] sm:$0xff]  ;;  %v251_v7 = vld [vmem:[%s4574_s14 + $0x178] sm:$0xff] }
  0x22   : > { %244 = vst [vmem:[%s4582_s15 + $0x18] sm:$0xff] %v243_v3  ;;  %246 = vst [vmem:[%s4582_s15 + $0x20] sm:$0xff] %v245_v4  ;;  %v253_v8 = vld [vmem:[%s4574_s14 + $0x2c0] sm:$0xff]  ;;  %v255_v9 = vld [vmem:[%s4574_s14 + $0x2c8] sm:$0xff] }
  0x23   : > { %248 = vst [vmem:[%s4582_s15 + $0x28] sm:$0xff] %v247_v5  ;;  %250 = vst [vmem:[%s4582_s15 + $0x30] sm:$0xff] %v249_v6  ;;  %v257_v10 = vld [vmem:[%s4574_s14 + $0x2d0] sm:$0xff]  ;;  %v259_v11 = vld [vmem:[%s4574_s14 + $0x2d8] sm:$0xff] }
  0x24   : > { %252 = vst [vmem:[%s4582_s15 + $0x38] sm:$0xff] %v251_v7  ;;  %254 = vst [vmem:[%s4582_s15 + $0x40] sm:$0xff] %v253_v8  ;;  %v261_v12 = vld [vmem:[%s4574_s14 + $0x420] sm:$0xff]  ;;  %v263_v13 = vld [vmem:[%s4574_s14 + $0x428] sm:$0xff] }
  0x25   : > { %256 = vst [vmem:[%s4582_s15 + $0x48] sm:$0xff] %v255_v9  ;;  %258 = vst [vmem:[%s4582_s15 + $0x50] sm:$0xff] %v257_v10  ;;  %v265_v14 = vld [vmem:[%s4574_s14 + $0x430] sm:$0xff]  ;;  %v267_v15 = vld [vmem:[%s4574_s14 + $0x438] sm:$0xff] }
  0x26   : > { %260 = vst [vmem:[%s4582_s15 + $0x58] sm:$0xff] %v259_v11  ;;  %262 = vst [vmem:[%s4582_s15 + $0x60] sm:$0xff] %v261_v12  ;;  %v269_v16 = vld [vmem:[%s4574_s14 + $0x580] sm:$0xff]  ;;  %v271_v17 = vld [vmem:[%s4574_s14 + $0x588] sm:$0xff] }
  0x27   : > { %264 = vst [vmem:[%s4582_s15 + $0x68] sm:$0xff] %v263_v13  ;;  %266 = vst [vmem:[%s4582_s15 + $0x70] sm:$0xff] %v265_v14  ;;  %v273_v18 = vld [vmem:[%s4574_s14 + $0x590] sm:$0xff]  ;;  %v275_v19 = vld [vmem:[%s4574_s14 + $0x598] sm:$0xff] }
  0x28   : > { %268 = vst [vmem:[%s4582_s15 + $0x78] sm:$0xff] %v267_v15  ;;  %270 = vst [vmem:[%s4582_s15 + $0x80] sm:$0xff] %v269_v16  ;;  %v277_v20 = vld [vmem:[%s4574_s14 + $0x6e0] sm:$0xff]  ;;  %v279_v21 = vld [vmem:[%s4574_s14 + $0x6e8] sm:$0xff] }
  0x29   : > { %272 = vst [vmem:[%s4582_s15 + $0x88] sm:$0xff] %v271_v17  ;;  %274 = vst [vmem:[%s4582_s15 + $0x90] sm:$0xff] %v273_v18  ;;  %v281_v22 = vld [vmem:[%s4574_s14 + $0x6f0] sm:$0xff]  ;;  %v283_v23 = vld [vmem:[%s4574_s14 + $0x6f8] sm:$0xff] }
  0x2a   : > { %276 = vst [vmem:[%s4582_s15 + $0x98] sm:$0xff] %v275_v19  ;;  %278 = vst [vmem:[%s4582_s15 + $0xa0] sm:$0xff] %v277_v20  ;;  %v285_v24 = vld [vmem:[%s4574_s14 + $0x840] sm:$0xff]  ;;  %v287_v25 = vld [vmem:[%s4574_s14 + $0x848] sm:$0xff] }
  0x2b   : > { %280 = vst [vmem:[%s4582_s15 + $0xa8] sm:$0xff] %v279_v21  ;;  %282 = vst [vmem:[%s4582_s15 + $0xb0] sm:$0xff] %v281_v22  ;;  %v289_v26 = vld [vmem:[%s4574_s14 + $0x850] sm:$0xff]  ;;  %v291_v27 = vld [vmem:[%s4574_s14 + $0x858] sm:$0xff] }
  0x2c   : > { %284 = vst [vmem:[%s4582_s15 + $0xb8] sm:$0xff] %v283_v23  ;;  %286 = vst [vmem:[%s4582_s15 + $0xc0] sm:$0xff] %v285_v24  ;;  %v293_v28 = vld [vmem:[%s4574_s14 + $0x9a0] sm:$0xff]  ;;  %v295_v29 = vld [vmem:[%s4574_s14 + $0x9a8] sm:$0xff] }
  0x2d   : > { %288 = vst [vmem:[%s4582_s15 + $0xc8] sm:$0xff] %v287_v25  ;;  %290 = vst [vmem:[%s4582_s15 + $0xd0] sm:$0xff] %v289_v26  ;;  %v297_v30 = vld [vmem:[%s4574_s14 + $0x9b0] sm:$0xff]  ;;  %v299_v31 = vld [vmem:[%s4574_s14 + $0x9b8] sm:$0xff] }
  0x2e   : > { %292 = vst [vmem:[%s4582_s15 + $0xd8] sm:$0xff] %v291_v27  ;;  %294 = vst [vmem:[%s4582_s15 + $0xe0] sm:$0xff] %v293_v28  ;;  %v301_v32 = vld [vmem:[%s4574_s14 + $0xb00] sm:$0xff]  ;;  %v303_v33 = vld [vmem:[%s4574_s14 + $0xb08] sm:$0xff] }
  0x2f   : > { %296 = vst [vmem:[%s4582_s15 + $0xe8] sm:$0xff] %v295_v29  ;;  %298 = vst [vmem:[%s4582_s15 + $0xf0] sm:$0xff] %v297_v30  ;;  %v305_v34 = vld [vmem:[%s4574_s14 + $0xb10] sm:$0xff]  ;;  %v307_v35 = vld [vmem:[%s4574_s14 + $0xb18] sm:$0xff] }
  0x30   : > { %300 = vst [vmem:[%s4582_s15 + $0xf8] sm:$0xff] %v299_v31  ;;  %302 = vst [vmem:[%s4582_s15 + $0x100] sm:$0xff] %v301_v32  ;;  %v309_v36 = vld [vmem:[%s4574_s14 + $0xc60] sm:$0xff]  ;;  %v311_v37 = vld [vmem:[%s4574_s14 + $0xc68] sm:$0xff] }
  0x31   : > { %304 = vst [vmem:[%s4582_s15 + $0x108] sm:$0xff] %v303_v33  ;;  %306 = vst [vmem:[%s4582_s15 + $0x110] sm:$0xff] %v305_v34  ;;  %v313_v38 = vld [vmem:[%s4574_s14 + $0xc70] sm:$0xff]  ;;  %v315_v39 = vld [vmem:[%s4574_s14 + $0xc78] sm:$0xff] }
  0x32   : > { %308 = vst [vmem:[%s4582_s15 + $0x118] sm:$0xff] %v307_v35  ;;  %310 = vst [vmem:[%s4582_s15 + $0x120] sm:$0xff] %v309_v36  ;;  %v317_v40 = vld [vmem:[%s4574_s14 + $0xdc0] sm:$0xff]  ;;  %v319_v41 = vld [vmem:[%s4574_s14 + $0xdc8] sm:$0xff] }
  0x33   : > { %312 = vst [vmem:[%s4582_s15 + $0x128] sm:$0xff] %v311_v37  ;;  %314 = vst [vmem:[%s4582_s15 + $0x130] sm:$0xff] %v313_v38  ;;  %v321_v42 = vld [vmem:[%s4574_s14 + $0xdd0] sm:$0xff]  ;;  %v323_v43 = vld [vmem:[%s4574_s14 + $0xdd8] sm:$0xff] }
  0x34   : > { %316 = vst [vmem:[%s4582_s15 + $0x138] sm:$0xff] %v315_v39  ;;  %318 = vst [vmem:[%s4582_s15 + $0x140] sm:$0xff] %v317_v40  ;;  %v325_v44 = vld [vmem:[%s4574_s14 + $0xf20] sm:$0xff]  ;;  %v327_v45 = vld [vmem:[%s4574_s14 + $0xf28] sm:$0xff] }
  0x35   : > { %320 = vst [vmem:[%s4582_s15 + $0x148] sm:$0xff] %v319_v41  ;;  %322 = vst [vmem:[%s4582_s15 + $0x150] sm:$0xff] %v321_v42  ;;  %v329_v46 = vld [vmem:[%s4574_s14 + $0xf30] sm:$0xff]  ;;  %v331_v47 = vld [vmem:[%s4574_s14 + $0xf38] sm:$0xff] }
  0x36   : > { %324 = vst [vmem:[%s4582_s15 + $0x158] sm:$0xff] %v323_v43  ;;  %326 = vst [vmem:[%s4582_s15 + $0x160] sm:$0xff] %v325_v44  ;;  %v333_v48 = vld [vmem:[%s4574_s14 + $0x1080] sm:$0xff]  ;;  %v335_v49 = vld [vmem:[%s4574_s14 + $0x1088] sm:$0xff] }
  0x37   : > { %328 = vst [vmem:[%s4582_s15 + $0x168] sm:$0xff] %v327_v45  ;;  %330 = vst [vmem:[%s4582_s15 + $0x170] sm:$0xff] %v329_v46  ;;  %v337_v50 = vld [vmem:[%s4574_s14 + $0x1090] sm:$0xff]  ;;  %v339_v51 = vld [vmem:[%s4574_s14 + $0x1098] sm:$0xff] }
  0x38   : > { %332 = vst [vmem:[%s4582_s15 + $0x178] sm:$0xff] %v331_v47  ;;  %334 = vst [vmem:[%s4582_s15 + $0x180] sm:$0xff] %v333_v48  ;;  %v341_v52 = vld [vmem:[%s4574_s14 + $0x11e0] sm:$0xff]  ;;  %v343_v53 = vld [vmem:[%s4574_s14 + $0x11e8] sm:$0xff] }
  0x39   : > { %336 = vst [vmem:[%s4582_s15 + $0x188] sm:$0xff] %v335_v49  ;;  %338 = vst [vmem:[%s4582_s15 + $0x190] sm:$0xff] %v337_v50  ;;  %v345_v54 = vld [vmem:[%s4574_s14 + $0x11f0] sm:$0xff]  ;;  %v347_v55 = vld [vmem:[%s4574_s14 + $0x11f8] sm:$0xff] }
  0x3a   : > { %340 = vst [vmem:[%s4582_s15 + $0x198] sm:$0xff] %v339_v51  ;;  %342 = vst [vmem:[%s4582_s15 + $0x1a0] sm:$0xff] %v341_v52  ;;  %v349_v56 = vld [vmem:[%s4574_s14 + $0x1340] sm:$0xff]  ;;  %v351_v57 = vld [vmem:[%s4574_s14 + $0x1348] sm:$0xff] }
  0x3b   : > { %344 = vst [vmem:[%s4582_s15 + $0x1a8] sm:$0xff] %v343_v53  ;;  %346 = vst [vmem:[%s4582_s15 + $0x1b0] sm:$0xff] %v345_v54  ;;  %v353_v58 = vld [vmem:[%s4574_s14 + $0x1350] sm:$0xff]  ;;  %v355_v59 = vld [vmem:[%s4574_s14 + $0x1358] sm:$0xff] }
  0x3c   : > { %348 = vst [vmem:[%s4582_s15 + $0x1b8] sm:$0xff] %v347_v55  ;;  %350 = vst [vmem:[%s4582_s15 + $0x1c0] sm:$0xff] %v349_v56  ;;  %v357_v60 = vld [vmem:[%s4574_s14 + $0x14a0] sm:$0xff]  ;;  %v359_v61 = vld [vmem:[%s4574_s14 + $0x14a8] sm:$0xff] }
  0x3d   : > { %352 = vst [vmem:[%s4582_s15 + $0x1c8] sm:$0xff] %v351_v57  ;;  %354 = vst [vmem:[%s4582_s15 + $0x1d0] sm:$0xff] %v353_v58  ;;  %v361_v62 = vld [vmem:[%s4574_s14 + $0x14b0] sm:$0xff]  ;;  %v363_v63 = vld [vmem:[%s4574_s14 + $0x14b8] sm:$0xff] }
  0x3e   : > { %356 = vst [vmem:[%s4582_s15 + $0x1d8] sm:$0xff] %v355_v59  ;;  %358 = vst [vmem:[%s4582_s15 + $0x1e0] sm:$0xff] %v357_v60  ;;  %v365_v0 = vld [vmem:[%s4574_s14 + $0x1600] sm:$0xff]  ;;  %v367_v1 = vld [vmem:[%s4574_s14 + $0x1608] sm:$0xff] }
  0x3f   : > { %360 = vst [vmem:[%s4582_s15 + $0x1e8] sm:$0xff] %v359_v61  ;;  %362 = vst [vmem:[%s4582_s15 + $0x1f0] sm:$0xff] %v361_v62  ;;  %v369_v2 = vld [vmem:[%s4574_s14 + $0x1610] sm:$0xff]  ;;  %v371_v3 = vld [vmem:[%s4574_s14 + $0x1618] sm:$0xff] }
  0x40   : > { %364 = vst [vmem:[%s4582_s15 + $0x1f8] sm:$0xff] %v363_v63  ;;  %366 = vst [vmem:[%s4582_s15 + $0x200] sm:$0xff] %v365_v0  ;;  %v373_v4 = vld [vmem:[%s4574_s14 + $0x1760] sm:$0xff]  ;;  %v375_v5 = vld [vmem:[%s4574_s14 + $0x1768] sm:$0xff] }
  0x41   : > { %368 = vst [vmem:[%s4582_s15 + $0x208] sm:$0xff] %v367_v1  ;;  %370 = vst [vmem:[%s4582_s15 + $0x210] sm:$0xff] %v369_v2  ;;  %v377_v6 = vld [vmem:[%s4574_s14 + $0x1770] sm:$0xff]  ;;  %v379_v7 = vld [vmem:[%s4574_s14 + $0x1778] sm:$0xff] }
  0x42   : > { %372 = vst [vmem:[%s4582_s15 + $0x218] sm:$0xff] %v371_v3  ;;  %374 = vst [vmem:[%s4582_s15 + $0x220] sm:$0xff] %v373_v4  ;;  %v381_v8 = vld [vmem:[%s4574_s14 + $0x18c0] sm:$0xff]  ;;  %v383_v9 = vld [vmem:[%s4574_s14 + $0x18c8] sm:$0xff] }
  0x43   : > { %376 = vst [vmem:[%s4582_s15 + $0x228] sm:$0xff] %v375_v5  ;;  %378 = vst [vmem:[%s4582_s15 + $0x230] sm:$0xff] %v377_v6  ;;  %v385_v10 = vld [vmem:[%s4574_s14 + $0x18d0] sm:$0xff]  ;;  %v387_v11 = vld [vmem:[%s4574_s14 + $0x18d8] sm:$0xff] }
  0x44   : > { %380 = vst [vmem:[%s4582_s15 + $0x238] sm:$0xff] %v379_v7  ;;  %382 = vst [vmem:[%s4582_s15 + $0x240] sm:$0xff] %v381_v8  ;;  %v389_v12 = vld [vmem:[%s4574_s14 + $0x1a20] sm:$0xff]  ;;  %v391_v13 = vld [vmem:[%s4574_s14 + $0x1a28] sm:$0xff] }
  0x45   : > { %384 = vst [vmem:[%s4582_s15 + $0x248] sm:$0xff] %v383_v9  ;;  %386 = vst [vmem:[%s4582_s15 + $0x250] sm:$0xff] %v385_v10  ;;  %v393_v14 = vld [vmem:[%s4574_s14 + $0x1a30] sm:$0xff]  ;;  %v395_v15 = vld [vmem:[%s4574_s14 + $0x1a38] sm:$0xff] }
  0x46   : > { %388 = vst [vmem:[%s4582_s15 + $0x258] sm:$0xff] %v387_v11  ;;  %390 = vst [vmem:[%s4582_s15 + $0x260] sm:$0xff] %v389_v12  ;;  %v397_v16 = vld [vmem:[%s4574_s14 + $0x1b80] sm:$0xff]  ;;  %v399_v17 = vld [vmem:[%s4574_s14 + $0x1b88] sm:$0xff] }
  0x47   : > { %392 = vst [vmem:[%s4582_s15 + $0x268] sm:$0xff] %v391_v13  ;;  %394 = vst [vmem:[%s4582_s15 + $0x270] sm:$0xff] %v393_v14  ;;  %v401_v18 = vld [vmem:[%s4574_s14 + $0x1b90] sm:$0xff]  ;;  %v403_v19 = vld [vmem:[%s4574_s14 + $0x1b98] sm:$0xff] }
  0x48   : > { %396 = vst [vmem:[%s4582_s15 + $0x278] sm:$0xff] %v395_v15  ;;  %398 = vst [vmem:[%s4582_s15 + $0x280] sm:$0xff] %v397_v16  ;;  %v405_v20 = vld [vmem:[%s4574_s14 + $0x1ce0] sm:$0xff]  ;;  %v407_v21 = vld [vmem:[%s4574_s14 + $0x1ce8] sm:$0xff] }
  0x49   : > { %400 = vst [vmem:[%s4582_s15 + $0x288] sm:$0xff] %v399_v17  ;;  %402 = vst [vmem:[%s4582_s15 + $0x290] sm:$0xff] %v401_v18  ;;  %v409_v22 = vld [vmem:[%s4574_s14 + $0x1cf0] sm:$0xff]  ;;  %v411_v23 = vld [vmem:[%s4574_s14 + $0x1cf8] sm:$0xff] }
  0x4a   : > { %404 = vst [vmem:[%s4582_s15 + $0x298] sm:$0xff] %v403_v19  ;;  %406 = vst [vmem:[%s4582_s15 + $0x2a0] sm:$0xff] %v405_v20  ;;  %v413_v24 = vld [vmem:[%s4574_s14 + $0x1e40] sm:$0xff]  ;;  %v415_v25 = vld [vmem:[%s4574_s14 + $0x1e48] sm:$0xff] }
  0x4b   : > { %408 = vst [vmem:[%s4582_s15 + $0x2a8] sm:$0xff] %v407_v21  ;;  %410 = vst [vmem:[%s4582_s15 + $0x2b0] sm:$0xff] %v409_v22  ;;  %v417_v26 = vld [vmem:[%s4574_s14 + $0x1e50] sm:$0xff]  ;;  %v419_v27 = vld [vmem:[%s4574_s14 + $0x1e58] sm:$0xff] }
  0x4c   : > { %412 = vst [vmem:[%s4582_s15 + $0x2b8] sm:$0xff] %v411_v23  ;;  %414 = vst [vmem:[%s4582_s15 + $0x2c0] sm:$0xff] %v413_v24  ;;  %v421_v28 = vld [vmem:[%s4574_s14 + $0x1fa0] sm:$0xff]  ;;  %v423_v29 = vld [vmem:[%s4574_s14 + $0x1fa8] sm:$0xff] }
  0x4d   : > { %416 = vst [vmem:[%s4582_s15 + $0x2c8] sm:$0xff] %v415_v25  ;;  %418 = vst [vmem:[%s4582_s15 + $0x2d0] sm:$0xff] %v417_v26  ;;  %v425_v30 = vld [vmem:[%s4574_s14 + $0x1fb0] sm:$0xff]  ;;  %v427_v31 = vld [vmem:[%s4574_s14 + $0x1fb8] sm:$0xff] }
  0x4e   : > { %420 = vst [vmem:[%s4582_s15 + $0x2d8] sm:$0xff] %v419_v27  ;;  %422 = vst [vmem:[%s4582_s15 + $0x2e0] sm:$0xff] %v421_v28  ;;  %v429_v32 = vld [vmem:[%s4574_s14 + $0x2100] sm:$0xff]  ;;  %v431_v33 = vld [vmem:[%s4574_s14 + $0x2108] sm:$0xff] }
  0x4f   : > { %424 = vst [vmem:[%s4582_s15 + $0x2e8] sm:$0xff] %v423_v29  ;;  %426 = vst [vmem:[%s4582_s15 + $0x2f0] sm:$0xff] %v425_v30  ;;  %v433_v34 = vld [vmem:[%s4574_s14 + $0x2110] sm:$0xff]  ;;  %v435_v35 = vld [vmem:[%s4574_s14 + $0x2118] sm:$0xff] }
  0x50   : > { %428 = vst [vmem:[%s4582_s15 + $0x2f8] sm:$0xff] %v427_v31  ;;  %430 = vst [vmem:[%s4582_s15 + $0x300] sm:$0xff] %v429_v32  ;;  %v437_v36 = vld [vmem:[%s4574_s14 + $0x2260] sm:$0xff]  ;;  %v439_v37 = vld [vmem:[%s4574_s14 + $0x2268] sm:$0xff] }
  0x51   : > { %432 = vst [vmem:[%s4582_s15 + $0x308] sm:$0xff] %v431_v33  ;;  %434 = vst [vmem:[%s4582_s15 + $0x310] sm:$0xff] %v433_v34  ;;  %v441_v38 = vld [vmem:[%s4574_s14 + $0x2270] sm:$0xff]  ;;  %v443_v39 = vld [vmem:[%s4574_s14 + $0x2278] sm:$0xff] }
  0x52   : > { %436 = vst [vmem:[%s4582_s15 + $0x318] sm:$0xff] %v435_v35  ;;  %438 = vst [vmem:[%s4582_s15 + $0x320] sm:$0xff] %v437_v36  ;;  %v445_v40 = vld [vmem:[%s4574_s14 + $0x23c0] sm:$0xff]  ;;  %v447_v41 = vld [vmem:[%s4574_s14 + $0x23c8] sm:$0xff] }
  0x53   : > { %440 = vst [vmem:[%s4582_s15 + $0x328] sm:$0xff] %v439_v37  ;;  %442 = vst [vmem:[%s4582_s15 + $0x330] sm:$0xff] %v441_v38  ;;  %v449_v42 = vld [vmem:[%s4574_s14 + $0x23d0] sm:$0xff]  ;;  %v451_v43 = vld [vmem:[%s4574_s14 + $0x23d8] sm:$0xff] }
  0x54   : > { %444 = vst [vmem:[%s4582_s15 + $0x338] sm:$0xff] %v443_v39  ;;  %446 = vst [vmem:[%s4582_s15 + $0x340] sm:$0xff] %v445_v40  ;;  %v453_v44 = vld [vmem:[%s4574_s14 + $0x2520] sm:$0xff]  ;;  %v455_v45 = vld [vmem:[%s4574_s14 + $0x2528] sm:$0xff] }
  0x55   : > { %448 = vst [vmem:[%s4582_s15 + $0x348] sm:$0xff] %v447_v41  ;;  %450 = vst [vmem:[%s4582_s15 + $0x350] sm:$0xff] %v449_v42  ;;  %v457_v46 = vld [vmem:[%s4574_s14 + $0x2530] sm:$0xff]  ;;  %v459_v47 = vld [vmem:[%s4574_s14 + $0x2538] sm:$0xff] }
  0x56   : > { %452 = vst [vmem:[%s4582_s15 + $0x358] sm:$0xff] %v451_v43  ;;  %454 = vst [vmem:[%s4582_s15 + $0x360] sm:$0xff] %v453_v44  ;;  %v461_v48 = vld [vmem:[%s4574_s14 + $0x2680] sm:$0xff]  ;;  %v463_v49 = vld [vmem:[%s4574_s14 + $0x2688] sm:$0xff] }
  0x57   : > { %456 = vst [vmem:[%s4582_s15 + $0x368] sm:$0xff] %v455_v45  ;;  %458 = vst [vmem:[%s4582_s15 + $0x370] sm:$0xff] %v457_v46  ;;  %v465_v50 = vld [vmem:[%s4574_s14 + $0x2690] sm:$0xff]  ;;  %v467_v51 = vld [vmem:[%s4574_s14 + $0x2698] sm:$0xff] }
  0x58   : > { %460 = vst [vmem:[%s4582_s15 + $0x378] sm:$0xff] %v459_v47  ;;  %462 = vst [vmem:[%s4582_s15 + $0x380] sm:$0xff] %v461_v48  ;;  %v469_v52 = vld [vmem:[%s4574_s14 + $0x27e0] sm:$0xff]  ;;  %v471_v53 = vld [vmem:[%s4574_s14 + $0x27e8] sm:$0xff] }
  0x59   : > { %464 = vst [vmem:[%s4582_s15 + $0x388] sm:$0xff] %v463_v49  ;;  %466 = vst [vmem:[%s4582_s15 + $0x390] sm:$0xff] %v465_v50  ;;  %v473_v54 = vld [vmem:[%s4574_s14 + $0x27f0] sm:$0xff]  ;;  %v475_v55 = vld [vmem:[%s4574_s14 + $0x27f8] sm:$0xff] }
  0x5a   : > { %468 = vst [vmem:[%s4582_s15 + $0x398] sm:$0xff] %v467_v51  ;;  %470 = vst [vmem:[%s4582_s15 + $0x3a0] sm:$0xff] %v469_v52  ;;  %v477_v56 = vld [vmem:[%s4574_s14 + $0x2940] sm:$0xff]  ;;  %v479_v57 = vld [vmem:[%s4574_s14 + $0x2948] sm:$0xff] }
  0x5b   : > { %472 = vst [vmem:[%s4582_s15 + $0x3a8] sm:$0xff] %v471_v53  ;;  %474 = vst [vmem:[%s4582_s15 + $0x3b0] sm:$0xff] %v473_v54  ;;  %v481_v58 = vld [vmem:[%s4574_s14 + $0x2950] sm:$0xff]  ;;  %v483_v59 = vld [vmem:[%s4574_s14 + $0x2958] sm:$0xff] }
  0x5c   : > { %476 = vst [vmem:[%s4582_s15 + $0x3b8] sm:$0xff] %v475_v55  ;;  %478 = vst [vmem:[%s4582_s15 + $0x3c0] sm:$0xff] %v477_v56  ;;  %v485_v60 = vld [vmem:[%s4574_s14 + $0x2aa0] sm:$0xff]  ;;  %v487_v61 = vld [vmem:[%s4574_s14 + $0x2aa8] sm:$0xff] }
  0x5d   : > { %480 = vst [vmem:[%s4582_s15 + $0x3c8] sm:$0xff] %v479_v57  ;;  %482 = vst [vmem:[%s4582_s15 + $0x3d0] sm:$0xff] %v481_v58  ;;  %v489_v62 = vld [vmem:[%s4574_s14 + $0x2ab0] sm:$0xff]  ;;  %v491_v63 = vld [vmem:[%s4574_s14 + $0x2ab8] sm:$0xff] }
  0x5e   : > { %484 = vst [vmem:[%s4582_s15 + $0x3d8] sm:$0xff] %v483_v59  ;;  %486 = vst [vmem:[%s4582_s15 + $0x3e0] sm:$0xff] %v485_v60  ;;  %v493_v0 = vld [vmem:[%s4574_s14 + $0x2c00] sm:$0xff]  ;;  %v495_v1 = vld [vmem:[%s4574_s14 + $0x2c08] sm:$0xff] }
  0x5f   : > { %488 = vst [vmem:[%s4582_s15 + $0x3e8] sm:$0xff] %v487_v61  ;;  %490 = vst [vmem:[%s4582_s15 + $0x3f0] sm:$0xff] %v489_v62  ;;  %v497_v2 = vld [vmem:[%s4574_s14 + $0x2c10] sm:$0xff]  ;;  %v499_v3 = vld [vmem:[%s4574_s14 + $0x2c18] sm:$0xff] }
  0x60   : > { %492 = vst [vmem:[%s4582_s15 + $0x3f8] sm:$0xff] %v491_v63  ;;  %494 = vst [vmem:[%s4582_s15 + $0x400] sm:$0xff] %v493_v0  ;;  %v501_v4 = vld [vmem:[%s4574_s14 + $0x2d60] sm:$0xff]  ;;  %v503_v5 = vld [vmem:[%s4574_s14 + $0x2d68] sm:$0xff] }
  0x61   : > { %496 = vst [vmem:[%s4582_s15 + $0x408] sm:$0xff] %v495_v1  ;;  %498 = vst [vmem:[%s4582_s15 + $0x410] sm:$0xff] %v497_v2  ;;  %v505_v6 = vld [vmem:[%s4574_s14 + $0x2d70] sm:$0xff]  ;;  %v507_v7 = vld [vmem:[%s4574_s14 + $0x2d78] sm:$0xff] }
  0x62   : > { %500 = vst [vmem:[%s4582_s15 + $0x418] sm:$0xff] %v499_v3  ;;  %502 = vst [vmem:[%s4582_s15 + $0x420] sm:$0xff] %v501_v4  ;;  %v509_v8 = vld [vmem:[%s4574_s14 + $0x2ec0] sm:$0xff]  ;;  %v511_v9 = vld [vmem:[%s4574_s14 + $0x2ec8] sm:$0xff] }
  0x63   : > { %504 = vst [vmem:[%s4582_s15 + $0x428] sm:$0xff] %v503_v5  ;;  %506 = vst [vmem:[%s4582_s15 + $0x430] sm:$0xff] %v505_v6  ;;  %v513_v10 = vld [vmem:[%s4574_s14 + $0x2ed0] sm:$0xff]  ;;  %v515_v11 = vld [vmem:[%s4574_s14 + $0x2ed8] sm:$0xff] }
  0x64   : > { %508 = vst [vmem:[%s4582_s15 + $0x438] sm:$0xff] %v507_v7  ;;  %510 = vst [vmem:[%s4582_s15 + $0x440] sm:$0xff] %v509_v8  ;;  %v517_v12 = vld [vmem:[%s4574_s14 + $0x3020] sm:$0xff]  ;;  %v519_v13 = vld [vmem:[%s4574_s14 + $0x3028] sm:$0xff] }
  0x65   : > { %512 = vst [vmem:[%s4582_s15 + $0x448] sm:$0xff] %v511_v9  ;;  %514 = vst [vmem:[%s4582_s15 + $0x450] sm:$0xff] %v513_v10  ;;  %v521_v14 = vld [vmem:[%s4574_s14 + $0x3030] sm:$0xff]  ;;  %v523_v15 = vld [vmem:[%s4574_s14 + $0x3038] sm:$0xff] }
  0x66   : > { %516 = vst [vmem:[%s4582_s15 + $0x458] sm:$0xff] %v515_v11  ;;  %518 = vst [vmem:[%s4582_s15 + $0x460] sm:$0xff] %v517_v12  ;;  %v525_v16 = vld [vmem:[%s4574_s14 + $0x3180] sm:$0xff]  ;;  %v527_v17 = vld [vmem:[%s4574_s14 + $0x3188] sm:$0xff] }
  0x67   : > { %520 = vst [vmem:[%s4582_s15 + $0x468] sm:$0xff] %v519_v13  ;;  %522 = vst [vmem:[%s4582_s15 + $0x470] sm:$0xff] %v521_v14  ;;  %v529_v18 = vld [vmem:[%s4574_s14 + $0x3190] sm:$0xff]  ;;  %v531_v19 = vld [vmem:[%s4574_s14 + $0x3198] sm:$0xff] }
  0x68   : > { %524 = vst [vmem:[%s4582_s15 + $0x478] sm:$0xff] %v523_v15  ;;  %526 = vst [vmem:[%s4582_s15 + $0x480] sm:$0xff] %v525_v16  ;;  %v533_v20 = vld [vmem:[%s4574_s14 + $0x32e0] sm:$0xff]  ;;  %v535_v21 = vld [vmem:[%s4574_s14 + $0x32e8] sm:$0xff] }
  0x69   : > { %528 = vst [vmem:[%s4582_s15 + $0x488] sm:$0xff] %v527_v17  ;;  %530 = vst [vmem:[%s4582_s15 + $0x490] sm:$0xff] %v529_v18  ;;  %v537_v22 = vld [vmem:[%s4574_s14 + $0x32f0] sm:$0xff]  ;;  %v539_v23 = vld [vmem:[%s4574_s14 + $0x32f8] sm:$0xff] }
  0x6a   : > { %532 = vst [vmem:[%s4582_s15 + $0x498] sm:$0xff] %v531_v19  ;;  %534 = vst [vmem:[%s4582_s15 + $0x4a0] sm:$0xff] %v533_v20  ;;  %v541_v24 = vld [vmem:[%s4574_s14 + $0x3440] sm:$0xff]  ;;  %v543_v25 = vld [vmem:[%s4574_s14 + $0x3448] sm:$0xff] }
  0x6b   : > { %536 = vst [vmem:[%s4582_s15 + $0x4a8] sm:$0xff] %v535_v21  ;;  %538 = vst [vmem:[%s4582_s15 + $0x4b0] sm:$0xff] %v537_v22  ;;  %v545_v26 = vld [vmem:[%s4574_s14 + $0x3450] sm:$0xff]  ;;  %v547_v27 = vld [vmem:[%s4574_s14 + $0x3458] sm:$0xff] }
  0x6c   : > { %540 = vst [vmem:[%s4582_s15 + $0x4b8] sm:$0xff] %v539_v23  ;;  %542 = vst [vmem:[%s4582_s15 + $0x4c0] sm:$0xff] %v541_v24  ;;  %v549_v28 = vld [vmem:[%s4574_s14 + $0x35a0] sm:$0xff]  ;;  %v551_v29 = vld [vmem:[%s4574_s14 + $0x35a8] sm:$0xff] }
  0x6d   : > { %544 = vst [vmem:[%s4582_s15 + $0x4c8] sm:$0xff] %v543_v25  ;;  %546 = vst [vmem:[%s4582_s15 + $0x4d0] sm:$0xff] %v545_v26  ;;  %v553_v30 = vld [vmem:[%s4574_s14 + $0x35b0] sm:$0xff]  ;;  %v555_v31 = vld [vmem:[%s4574_s14 + $0x35b8] sm:$0xff] }
  0x6e   : > { %548 = vst [vmem:[%s4582_s15 + $0x4d8] sm:$0xff] %v547_v27  ;;  %550 = vst [vmem:[%s4582_s15 + $0x4e0] sm:$0xff] %v549_v28  ;;  %v557_v32 = vld [vmem:[%s4574_s14 + $0x3700] sm:$0xff]  ;;  %v559_v33 = vld [vmem:[%s4574_s14 + $0x3708] sm:$0xff] }
  0x6f   : > { %552 = vst [vmem:[%s4582_s15 + $0x4e8] sm:$0xff] %v551_v29  ;;  %554 = vst [vmem:[%s4582_s15 + $0x4f0] sm:$0xff] %v553_v30  ;;  %v561_v34 = vld [vmem:[%s4574_s14 + $0x3710] sm:$0xff]  ;;  %v563_v35 = vld [vmem:[%s4574_s14 + $0x3718] sm:$0xff] }
  0x70   : > { %556 = vst [vmem:[%s4582_s15 + $0x4f8] sm:$0xff] %v555_v31  ;;  %558 = vst [vmem:[%s4582_s15 + $0x500] sm:$0xff] %v557_v32  ;;  %v565_v36 = vld [vmem:[%s4574_s14 + $0x3860] sm:$0xff]  ;;  %v567_v37 = vld [vmem:[%s4574_s14 + $0x3868] sm:$0xff] }
  0x71   : > { %560 = vst [vmem:[%s4582_s15 + $0x508] sm:$0xff] %v559_v33  ;;  %562 = vst [vmem:[%s4582_s15 + $0x510] sm:$0xff] %v561_v34  ;;  %v569_v38 = vld [vmem:[%s4574_s14 + $0x3870] sm:$0xff]  ;;  %v571_v39 = vld [vmem:[%s4574_s14 + $0x3878] sm:$0xff] }
  0x72   : > { %564 = vst [vmem:[%s4582_s15 + $0x518] sm:$0xff] %v563_v35  ;;  %566 = vst [vmem:[%s4582_s15 + $0x520] sm:$0xff] %v565_v36  ;;  %v573_v40 = vld [vmem:[%s4574_s14 + $0x39c0] sm:$0xff]  ;;  %v575_v41 = vld [vmem:[%s4574_s14 + $0x39c8] sm:$0xff] }
  0x73   : > { %568 = vst [vmem:[%s4582_s15 + $0x528] sm:$0xff] %v567_v37  ;;  %570 = vst [vmem:[%s4582_s15 + $0x530] sm:$0xff] %v569_v38  ;;  %v577_v42 = vld [vmem:[%s4574_s14 + $0x39d0] sm:$0xff]  ;;  %v579_v43 = vld [vmem:[%s4574_s14 + $0x39d8] sm:$0xff] }
  0x74   : > { %572 = vst [vmem:[%s4582_s15 + $0x538] sm:$0xff] %v571_v39  ;;  %574 = vst [vmem:[%s4582_s15 + $0x540] sm:$0xff] %v573_v40  ;;  %v581_v44 = vld [vmem:[%s4574_s14 + $0x3b20] sm:$0xff]  ;;  %v583_v45 = vld [vmem:[%s4574_s14 + $0x3b28] sm:$0xff] }
  0x75   : > { %576 = vst [vmem:[%s4582_s15 + $0x548] sm:$0xff] %v575_v41  ;;  %578 = vst [vmem:[%s4582_s15 + $0x550] sm:$0xff] %v577_v42  ;;  %v585_v46 = vld [vmem:[%s4574_s14 + $0x3b30] sm:$0xff]  ;;  %v587_v47 = vld [vmem:[%s4574_s14 + $0x3b38] sm:$0xff] }
  0x76   : > { %580 = vst [vmem:[%s4582_s15 + $0x558] sm:$0xff] %v579_v43  ;;  %582 = vst [vmem:[%s4582_s15 + $0x560] sm:$0xff] %v581_v44  ;;  %v589_v48 = vld [vmem:[%s4574_s14 + $0x3c80] sm:$0xff]  ;;  %v591_v49 = vld [vmem:[%s4574_s14 + $0x3c88] sm:$0xff] }
  0x77   : > { %584 = vst [vmem:[%s4582_s15 + $0x568] sm:$0xff] %v583_v45  ;;  %586 = vst [vmem:[%s4582_s15 + $0x570] sm:$0xff] %v585_v46  ;;  %v593_v50 = vld [vmem:[%s4574_s14 + $0x3c90] sm:$0xff]  ;;  %v595_v51 = vld [vmem:[%s4574_s14 + $0x3c98] sm:$0xff] }
  0x78   : > { %588 = vst [vmem:[%s4582_s15 + $0x578] sm:$0xff] %v587_v47  ;;  %590 = vst [vmem:[%s4582_s15 + $0x580] sm:$0xff] %v589_v48  ;;  %v597_v52 = vld [vmem:[%s4574_s14 + $0x3de0] sm:$0xff]  ;;  %v599_v53 = vld [vmem:[%s4574_s14 + $0x3de8] sm:$0xff] }
  0x79   : > { %592 = vst [vmem:[%s4582_s15 + $0x588] sm:$0xff] %v591_v49  ;;  %594 = vst [vmem:[%s4582_s15 + $0x590] sm:$0xff] %v593_v50  ;;  %v601_v54 = vld [vmem:[%s4574_s14 + $0x3df0] sm:$0xff]  ;;  %v603_v55 = vld [vmem:[%s4574_s14 + $0x3df8] sm:$0xff] }
  0x7a   : > { %596 = vst [vmem:[%s4582_s15 + $0x598] sm:$0xff] %v595_v51  ;;  %598 = vst [vmem:[%s4582_s15 + $0x5a0] sm:$0xff] %v597_v52  ;;  %v605_v56 = vld [vmem:[%s4574_s14 + $0x3f40] sm:$0xff]  ;;  %v607_v57 = vld [vmem:[%s4574_s14 + $0x3f48] sm:$0xff] }
  0x7b   : > { %600 = vst [vmem:[%s4582_s15 + $0x5a8] sm:$0xff] %v599_v53  ;;  %602 = vst [vmem:[%s4582_s15 + $0x5b0] sm:$0xff] %v601_v54  ;;  %v609_v58 = vld [vmem:[%s4574_s14 + $0x3f50] sm:$0xff]  ;;  %v611_v59 = vld [vmem:[%s4574_s14 + $0x3f58] sm:$0xff] }
  0x7c   : > { %604 = vst [vmem:[%s4582_s15 + $0x5b8] sm:$0xff] %v603_v55  ;;  %606 = vst [vmem:[%s4582_s15 + $0x5c0] sm:$0xff] %v605_v56  ;;  %v613_v60 = vld [vmem:[%s4574_s14 + $0x40a0] sm:$0xff]  ;;  %v615_v61 = vld [vmem:[%s4574_s14 + $0x40a8] sm:$0xff] }
  0x7d   : > { %608 = vst [vmem:[%s4582_s15 + $0x5c8] sm:$0xff] %v607_v57  ;;  %610 = vst [vmem:[%s4582_s15 + $0x5d0] sm:$0xff] %v609_v58  ;;  %v617_v62 = vld [vmem:[%s4574_s14 + $0x40b0] sm:$0xff]  ;;  %v619_v63 = vld [vmem:[%s4574_s14 + $0x40b8] sm:$0xff] }
  0x7e   : > { %612 = vst [vmem:[%s4582_s15 + $0x5d8] sm:$0xff] %v611_v59  ;;  %614 = vst [vmem:[%s4582_s15 + $0x5e0] sm:$0xff] %v613_v60  ;;  %v621_v0 = vld [vmem:[%s4574_s14 + $0x4200] sm:$0xff]  ;;  %v623_v1 = vld [vmem:[%s4574_s14 + $0x4208] sm:$0xff] }
  0x7f   : > { %616 = vst [vmem:[%s4582_s15 + $0x5e8] sm:$0xff] %v615_v61  ;;  %618 = vst [vmem:[%s4582_s15 + $0x5f0] sm:$0xff] %v617_v62  ;;  %v625_v2 = vld [vmem:[%s4574_s14 + $0x4210] sm:$0xff]  ;;  %v627_v3 = vld [vmem:[%s4574_s14 + $0x4218] sm:$0xff] }
  0x80   : > { %620 = vst [vmem:[%s4582_s15 + $0x5f8] sm:$0xff] %v619_v63  ;;  %622 = vst [vmem:[%s4582_s15 + $0x600] sm:$0xff] %v621_v0  ;;  %v629_v4 = vld [vmem:[%s4574_s14 + $0x4360] sm:$0xff]  ;;  %v631_v5 = vld [vmem:[%s4574_s14 + $0x4368] sm:$0xff] }
  0x81   : > { %624 = vst [vmem:[%s4582_s15 + $0x608] sm:$0xff] %v623_v1  ;;  %626 = vst [vmem:[%s4582_s15 + $0x610] sm:$0xff] %v625_v2  ;;  %v633_v6 = vld [vmem:[%s4574_s14 + $0x4370] sm:$0xff]  ;;  %v635_v7 = vld [vmem:[%s4574_s14 + $0x4378] sm:$0xff] }
  0x82   : > { %628 = vst [vmem:[%s4582_s15 + $0x618] sm:$0xff] %v627_v3  ;;  %630 = vst [vmem:[%s4582_s15 + $0x620] sm:$0xff] %v629_v4 }
  0x83   : > { %632 = vst [vmem:[%s4582_s15 + $0x628] sm:$0xff] %v631_v5  ;;  %634 = vst [vmem:[%s4582_s15 + $0x630] sm:$0xff] %v633_v6 }
  0x84   : > { %636 = vst [vmem:[%s4582_s15 + $0x638] sm:$0xff] %v635_v7 }
  0x85 PF: > { %s4979_s16 = sand.u32 1, %s4471_s23   ;;  %s3491_s17 = sshll.u32 %s4475_s24, 9 }
  0x86   : > { %s4983_s18 = smul.u32 1600, %s4979_s16  ;;  %s4990_s21 = scalar_lea.hbm %s6531_s3, %s3491_s17 }
  0x87   : > { %s644_s9 = scalar_lea.sflag [#allocation4], %s4979_s16  ;;  %s4381_s10 = scalar_lea.hbm %s4990_s21, 25600 }
  0x88   : > { %s647_s27 = scalar_lea.vmem [#allocation3], %s4983_s18  ;;  %p4382_p10 = scmp.ne.s32.totalorder %s4990_s21, %s4381_s10 }
  0x89   : > { %s654_s28 = sshll.u32 %s647_s27, 4  ;;  %s4385_s13 = scalar_lea.hbm %s6531_s3, 281600  ;;  %s4993_s28 = int_to_ptr.vmem [resolvable:$true] %s654_s28 }
  0x8a   : > { %p4383_p11 = pnand %p4382_p10, %p4552_p4  ;;  %p4386_p13 = scmp.lt.u32.totalorder %s4990_s21, %s6531_s3 }
  0x8b   : > { %p4387_p0 = scmp.lt.u32.totalorder %s4385_s13, %s4381_s10  ;;  %p4389_p2 = scmp.lt.u32.totalorder %s4381_s10, %s4990_s21 }
  0x8c   : > { %p4384_p12 = pneg %p4383_p11 }
  0x8d   : > { %p4388_p1 = por %p4387_p0, %p4386_p13 }
  0x8f   : > { %p4390_p3 = por %p4389_p2, %p4388_p1 }
  0x91   : > { %p4391_p5 = pnand %p4390_p3, %p4384_p12 }
  0x93   : > { %4394 = shalt.err (!%p4391_p5)
}
  0x94   : > { %s4395_s19 = scalar_lea.vmem %s4993_s28, 25600  ;;  %s4477_s20 = smov [#allocation3]  }
  0x95   : > { %p4396_p6 = scmp.ne.s32.totalorder %s4993_s28, %s4395_s19  ;;  %s4399_s27 = sshll.u32 %s4477_s20, 4  ;;  %s4400_s27 = int_to_ptr.vmem [resolvable:$false] %s4399_s27 }
  0x96   : > { %s4401_s11 = scalar_lea.vmem %s4400_s27, 51200  ;;  %p4402_p11 = scmp.lt.s32.totalorder %s4993_s28, %s4400_s27 }
  0x97   : > { %p4397_p9 = pnand %p4396_p6, %p4552_p4  ;;  %p4403_p8 = scmp.lt.s32.totalorder %s4401_s11, %s4395_s19 }
  0x99   : > { %p4398_p10 = pneg %p4397_p9  ;;  %p4404_p13 = por %p4403_p8, %p4402_p11 }
  0x9b   : > { %p4405_p0 = pnand %p4404_p13, %p4398_p10 }
  0x9d   : > { %4408 = shalt.err (!%p4405_p0)
}
  0x9e   : > { %s4478_s10 = smov 5632   ;;  %s4479_s12 = smov 512  }
  0x9f   : > { %s4480_s13 = smov 32   ;;  %s5027_s19 = scalar_lea.hbm %s6532_s4, %s3491_s17 }
  0xa0   : > { %4332 = dma.hbm_to_vmem [thread:$0]  (%p4552_p4), %s4990_s21, 25600, %s4993_s28, %s644_s9, %s4478_s10, %s4479_s12, %s4480_s13  }
  0xa1   : > { %s668_s20 = scalar_lea.vmem [#allocation5], %s4983_s18  ;;  %s665_s11 = scalar_lea.sflag [#allocation6], %s4979_s16 }
  0xa2   : > { %s675_s27 = sshll.u32 %s668_s20, 4  ;;  %s4409_s2 = scalar_lea.hbm %s5027_s19, 25600  ;;  %s5030_s27 = int_to_ptr.vmem [resolvable:$true] %s675_s27 }
  0xa3   : > { %p4410_p8 = scmp.ne.s32.totalorder %s5027_s19, %s4409_s2  ;;  %s4413_s9 = scalar_lea.hbm %s6532_s4, 281600 }
  0xa4   : > { %p4414_p2 = scmp.lt.u32.totalorder %s5027_s19, %s6532_s4  ;;  %p4415_p3 = scmp.lt.u32.totalorder %s4413_s9, %s4409_s2 }
  0xa5   : > { %p4411_p12 = pnand %p4410_p8, %p4552_p4  ;;  %p4417_p6 = scmp.lt.u32.totalorder %s4409_s2, %s5027_s19 }
  0xa6   : > { %p4416_p5 = por %p4415_p3, %p4414_p2 }
  0xa7   : > { %p4412_p1 = pneg %p4411_p12 }
  0xa8   : > { %p4418_p9 = por %p4417_p6, %p4416_p5 }
  0xaa   : > { %p4419_p10 = pnand %p4418_p9, %p4412_p1 }
  0xac   : > { %4422 = shalt.err (!%p4419_p10)
}
  0xad   : > { %s4423_s15 = scalar_lea.vmem %s5030_s27, 25600  ;;  %s4481_s20 = smov [#allocation5]  }
  0xae   : > { %p4424_p11 = scmp.ne.s32.totalorder %s5030_s27, %s4423_s15  ;;  %s4427_s21 = sshll.u32 %s4481_s20, 4  ;;  %s4428_s21 = int_to_ptr.vmem [resolvable:$false] %s4427_s21 }
  0xaf   : > { %s4429_s28 = scalar_lea.vmem %s4428_s21, 51200  ;;  %p4430_p8 = scmp.lt.s32.totalorder %s5030_s27, %s4428_s21 }
  0xb0   : > { %p4425_p13 = pnand %p4424_p11, %p4552_p4  ;;  %p4431_p12 = scmp.lt.s32.totalorder %s4429_s28, %s4423_s15 }
  0xb2   : > { %p4426_p0 = pneg %p4425_p13  ;;  %p4432_p2 = por %p4431_p12, %p4430_p8 }
  0xb4   : > { %p4433_p3 = pnand %p4432_p2, %p4426_p0 }
  0xb6   : > { %4436 = shalt.err (!%p4433_p3)
}
  0xb7   : > { %4333 = dma.hbm_to_vmem [thread:$0]  (%p4552_p4), %s5027_s19, 25600, %s5030_s27, %s665_s11, %s4478_s10, %s4479_s12, %s4480_s13  }
  0xb8   : > { %684 = sbr.rel (!%p4552_p4) target bundleno = 287 (0x11f), region = 59  ;;  %s3493_s2 = sshll.u32 (%p4552_p4), %s4475_s24, 5 }
  0xb9   : > { %s5065_s14 = scalar_lea.vmem (%p4552_p4), %s6533_s5, %s3493_s2  ;;  %s5071_s30 = scalar_lea.vmem (%p4552_p4), [#allocation7], %s4983_s18 }
  0xba   : > { %v704_v8 = vld [vmem:[%s5065_s14] sm:$0xff] (%p4552_p4)  ;;  %v706_v9 = vld [vmem:[%s5065_s14 + $0x8] sm:$0xff] (%p4552_p4)  ;;  %v708_v10 = vld [vmem:[%s5065_s14 + $0x10] sm:$0xff] (%p4552_p4) }
  0xbb   : > { %705 = vst [vmem:[%s5071_s30] sm:$0xff] (%p4552_p4), %v704_v8  ;;  %707 = vst [vmem:[%s5071_s30 + $0x8] sm:$0xff] (%p4552_p4), %v706_v9  ;;  %v710_v11 = vld [vmem:[%s5065_s14 + $0x18] sm:$0xff] (%p4552_p4)  ;;  %v712_v12 = vld [vmem:[%s5065_s14 + $0x160] sm:$0xff] (%p4552_p4) }
  0xbc   : > { %709 = vst [vmem:[%s5071_s30 + $0x10] sm:$0xff] (%p4552_p4), %v708_v10  ;;  %v714_v13 = vld [vmem:[%s5065_s14 + $0x168] sm:$0xff] (%p4552_p4)  ;;  %711 = vst [vmem:[%s5071_s30 + $0x18] sm:$0xff] (%p4552_p4), %v710_v11  ;;  %v716_v14 = vld [vmem:[%s5065_s14 + $0x170] sm:$0xff] (%p4552_p4) }
  0xbd   : > { %713 = vst [vmem:[%s5071_s30 + $0x20] sm:$0xff] (%p4552_p4), %v712_v12  ;;  %715 = vst [vmem:[%s5071_s30 + $0x28] sm:$0xff] (%p4552_p4), %v714_v13  ;;  %v718_v15 = vld [vmem:[%s5065_s14 + $0x178] sm:$0xff] (%p4552_p4)  ;;  %v720_v16 = vld [vmem:[%s5065_s14 + $0x2c0] sm:$0xff] (%p4552_p4) }
  0xbe   : > { %717 = vst [vmem:[%s5071_s30 + $0x30] sm:$0xff] (%p4552_p4), %v716_v14  ;;  %719 = vst [vmem:[%s5071_s30 + $0x38] sm:$0xff] (%p4552_p4), %v718_v15  ;;  %v722_v17 = vld [vmem:[%s5065_s14 + $0x2c8] sm:$0xff] (%p4552_p4)  ;;  %v724_v18 = vld [vmem:[%s5065_s14 + $0x2d0] sm:$0xff] (%p4552_p4) }
  0xbf   : > { %721 = vst [vmem:[%s5071_s30 + $0x40] sm:$0xff] %v720_v16  ;;  %v726_v19 = vld [vmem:[%s5065_s14 + $0x2d8] sm:$0xff]  ;;  %723 = vst [vmem:[%s5071_s30 + $0x48] sm:$0xff] %v722_v17  ;;  %v728_v20 = vld [vmem:[%s5065_s14 + $0x420] sm:$0xff] }
  0xc0   : > { %725 = vst [vmem:[%s5071_s30 + $0x50] sm:$0xff] %v724_v18  ;;  %727 = vst [vmem:[%s5071_s30 + $0x58] sm:$0xff] %v726_v19  ;;  %v730_v21 = vld [vmem:[%s5065_s14 + $0x428] sm:$0xff]  ;;  %v732_v22 = vld [vmem:[%s5065_s14 + $0x430] sm:$0xff] }
  0xc1   : > { %729 = vst [vmem:[%s5071_s30 + $0x60] sm:$0xff] %v728_v20  ;;  %731 = vst [vmem:[%s5071_s30 + $0x68] sm:$0xff] %v730_v21  ;;  %v734_v23 = vld [vmem:[%s5065_s14 + $0x438] sm:$0xff]  ;;  %v736_v24 = vld [vmem:[%s5065_s14 + $0x580] sm:$0xff] }
  0xc2   : > { %733 = vst [vmem:[%s5071_s30 + $0x70] sm:$0xff] %v732_v22  ;;  %v738_v25 = vld [vmem:[%s5065_s14 + $0x588] sm:$0xff]  ;;  %735 = vst [vmem:[%s5071_s30 + $0x78] sm:$0xff] %v734_v23  ;;  %v740_v26 = vld [vmem:[%s5065_s14 + $0x590] sm:$0xff] }
  0xc3   : > { %737 = vst [vmem:[%s5071_s30 + $0x80] sm:$0xff] %v736_v24  ;;  %739 = vst [vmem:[%s5071_s30 + $0x88] sm:$0xff] %v738_v25  ;;  %v742_v27 = vld [vmem:[%s5065_s14 + $0x598] sm:$0xff]  ;;  %v744_v28 = vld [vmem:[%s5065_s14 + $0x6e0] sm:$0xff] }
  0xc4   : > { %741 = vst [vmem:[%s5071_s30 + $0x90] sm:$0xff] %v740_v26  ;;  %743 = vst [vmem:[%s5071_s30 + $0x98] sm:$0xff] %v742_v27  ;;  %v746_v29 = vld [vmem:[%s5065_s14 + $0x6e8] sm:$0xff]  ;;  %v748_v30 = vld [vmem:[%s5065_s14 + $0x6f0] sm:$0xff] }
  0xc5   : > { %745 = vst [vmem:[%s5071_s30 + $0xa0] sm:$0xff] %v744_v28  ;;  %v750_v31 = vld [vmem:[%s5065_s14 + $0x6f8] sm:$0xff]  ;;  %747 = vst [vmem:[%s5071_s30 + $0xa8] sm:$0xff] %v746_v29  ;;  %v752_v32 = vld [vmem:[%s5065_s14 + $0x840] sm:$0xff] }
  0xc6   : > { %749 = vst [vmem:[%s5071_s30 + $0xb0] sm:$0xff] %v748_v30  ;;  %751 = vst [vmem:[%s5071_s30 + $0xb8] sm:$0xff] %v750_v31  ;;  %v754_v33 = vld [vmem:[%s5065_s14 + $0x848] sm:$0xff]  ;;  %v756_v34 = vld [vmem:[%s5065_s14 + $0x850] sm:$0xff] }
  0xc7   : > { %753 = vst [vmem:[%s5071_s30 + $0xc0] sm:$0xff] %v752_v32  ;;  %755 = vst [vmem:[%s5071_s30 + $0xc8] sm:$0xff] %v754_v33  ;;  %v758_v35 = vld [vmem:[%s5065_s14 + $0x858] sm:$0xff]  ;;  %v760_v36 = vld [vmem:[%s5065_s14 + $0x9a0] sm:$0xff] }
  0xc8   : > { %757 = vst [vmem:[%s5071_s30 + $0xd0] sm:$0xff] %v756_v34  ;;  %v762_v37 = vld [vmem:[%s5065_s14 + $0x9a8] sm:$0xff]  ;;  %759 = vst [vmem:[%s5071_s30 + $0xd8] sm:$0xff] %v758_v35  ;;  %v764_v38 = vld [vmem:[%s5065_s14 + $0x9b0] sm:$0xff] }
  0xc9   : > { %761 = vst [vmem:[%s5071_s30 + $0xe0] sm:$0xff] %v760_v36  ;;  %763 = vst [vmem:[%s5071_s30 + $0xe8] sm:$0xff] %v762_v37  ;;  %v766_v39 = vld [vmem:[%s5065_s14 + $0x9b8] sm:$0xff]  ;;  %v768_v40 = vld [vmem:[%s5065_s14 + $0xb00] sm:$0xff] }
  0xca   : > { %765 = vst [vmem:[%s5071_s30 + $0xf0] sm:$0xff] %v764_v38  ;;  %767 = vst [vmem:[%s5071_s30 + $0xf8] sm:$0xff] %v766_v39  ;;  %v770_v41 = vld [vmem:[%s5065_s14 + $0xb08] sm:$0xff]  ;;  %v772_v42 = vld [vmem:[%s5065_s14 + $0xb10] sm:$0xff] }
  0xcb   : > { %769 = vst [vmem:[%s5071_s30 + $0x100] sm:$0xff] %v768_v40  ;;  %v774_v43 = vld [vmem:[%s5065_s14 + $0xb18] sm:$0xff]  ;;  %771 = vst [vmem:[%s5071_s30 + $0x108] sm:$0xff] %v770_v41  ;;  %v776_v44 = vld [vmem:[%s5065_s14 + $0xc60] sm:$0xff] }
  0xcc   : > { %773 = vst [vmem:[%s5071_s30 + $0x110] sm:$0xff] %v772_v42  ;;  %775 = vst [vmem:[%s5071_s30 + $0x118] sm:$0xff] %v774_v43  ;;  %v778_v45 = vld [vmem:[%s5065_s14 + $0xc68] sm:$0xff]  ;;  %v780_v46 = vld [vmem:[%s5065_s14 + $0xc70] sm:$0xff] }
  0xcd   : > { %777 = vst [vmem:[%s5071_s30 + $0x120] sm:$0xff] %v776_v44  ;;  %779 = vst [vmem:[%s5071_s30 + $0x128] sm:$0xff] %v778_v45  ;;  %v782_v47 = vld [vmem:[%s5065_s14 + $0xc78] sm:$0xff]  ;;  %v784_v48 = vld [vmem:[%s5065_s14 + $0xdc0] sm:$0xff] }
  0xce   : > { %781 = vst [vmem:[%s5071_s30 + $0x130] sm:$0xff] %v780_v46  ;;  %v786_v49 = vld [vmem:[%s5065_s14 + $0xdc8] sm:$0xff]  ;;  %783 = vst [vmem:[%s5071_s30 + $0x138] sm:$0xff] %v782_v47  ;;  %v788_v50 = vld [vmem:[%s5065_s14 + $0xdd0] sm:$0xff] }
  0xcf   : > { %785 = vst [vmem:[%s5071_s30 + $0x140] sm:$0xff] %v784_v48  ;;  %787 = vst [vmem:[%s5071_s30 + $0x148] sm:$0xff] %v786_v49  ;;  %v790_v51 = vld [vmem:[%s5065_s14 + $0xdd8] sm:$0xff]  ;;  %v792_v52 = vld [vmem:[%s5065_s14 + $0xf20] sm:$0xff] }
  0xd0   : > { %789 = vst [vmem:[%s5071_s30 + $0x150] sm:$0xff] %v788_v50  ;;  %791 = vst [vmem:[%s5071_s30 + $0x158] sm:$0xff] %v790_v51  ;;  %v794_v53 = vld [vmem:[%s5065_s14 + $0xf28] sm:$0xff]  ;;  %v796_v54 = vld [vmem:[%s5065_s14 + $0xf30] sm:$0xff] }
  0xd1   : > { %793 = vst [vmem:[%s5071_s30 + $0x160] sm:$0xff] %v792_v52  ;;  %v798_v55 = vld [vmem:[%s5065_s14 + $0xf38] sm:$0xff]  ;;  %795 = vst [vmem:[%s5071_s30 + $0x168] sm:$0xff] %v794_v53  ;;  %v800_v56 = vld [vmem:[%s5065_s14 + $0x1080] sm:$0xff] }
  0xd2   : > { %797 = vst [vmem:[%s5071_s30 + $0x170] sm:$0xff] %v796_v54  ;;  %799 = vst [vmem:[%s5071_s30 + $0x178] sm:$0xff] %v798_v55  ;;  %v802_v57 = vld [vmem:[%s5065_s14 + $0x1088] sm:$0xff]  ;;  %v804_v58 = vld [vmem:[%s5065_s14 + $0x1090] sm:$0xff] }
  0xd3   : > { %801 = vst [vmem:[%s5071_s30 + $0x180] sm:$0xff] %v800_v56  ;;  %803 = vst [vmem:[%s5071_s30 + $0x188] sm:$0xff] %v802_v57  ;;  %v806_v59 = vld [vmem:[%s5065_s14 + $0x1098] sm:$0xff]  ;;  %v808_v60 = vld [vmem:[%s5065_s14 + $0x11e0] sm:$0xff] }
  0xd4   : > { %805 = vst [vmem:[%s5071_s30 + $0x190] sm:$0xff] %v804_v58  ;;  %v810_v61 = vld [vmem:[%s5065_s14 + $0x11e8] sm:$0xff]  ;;  %807 = vst [vmem:[%s5071_s30 + $0x198] sm:$0xff] %v806_v59  ;;  %v812_v62 = vld [vmem:[%s5065_s14 + $0x11f0] sm:$0xff] }
  0xd5   : > { %809 = vst [vmem:[%s5071_s30 + $0x1a0] sm:$0xff] %v808_v60  ;;  %811 = vst [vmem:[%s5071_s30 + $0x1a8] sm:$0xff] %v810_v61  ;;  %v814_v63 = vld [vmem:[%s5065_s14 + $0x11f8] sm:$0xff]  ;;  %v816_v0 = vld [vmem:[%s5065_s14 + $0x1340] sm:$0xff] }
  0xd6   : > { %813 = vst [vmem:[%s5071_s30 + $0x1b0] sm:$0xff] %v812_v62  ;;  %815 = vst [vmem:[%s5071_s30 + $0x1b8] sm:$0xff] %v814_v63  ;;  %v818_v1 = vld [vmem:[%s5065_s14 + $0x1348] sm:$0xff]  ;;  %v820_v2 = vld [vmem:[%s5065_s14 + $0x1350] sm:$0xff] }
  0xd7   : > { %817 = vst [vmem:[%s5071_s30 + $0x1c0] sm:$0xff] %v816_v0  ;;  %v822_v3 = vld [vmem:[%s5065_s14 + $0x1358] sm:$0xff]  ;;  %819 = vst [vmem:[%s5071_s30 + $0x1c8] sm:$0xff] %v818_v1  ;;  %v824_v4 = vld [vmem:[%s5065_s14 + $0x14a0] sm:$0xff] }
  0xd8   : > { %821 = vst [vmem:[%s5071_s30 + $0x1d0] sm:$0xff] %v820_v2  ;;  %823 = vst [vmem:[%s5071_s30 + $0x1d8] sm:$0xff] %v822_v3  ;;  %v826_v5 = vld [vmem:[%s5065_s14 + $0x14a8] sm:$0xff]  ;;  %v828_v6 = vld [vmem:[%s5065_s14 + $0x14b0] sm:$0xff] }
  0xd9   : > { %825 = vst [vmem:[%s5071_s30 + $0x1e0] sm:$0xff] %v824_v4  ;;  %827 = vst [vmem:[%s5071_s30 + $0x1e8] sm:$0xff] %v826_v5  ;;  %v830_v7 = vld [vmem:[%s5065_s14 + $0x14b8] sm:$0xff]  ;;  %v832_v8 = vld [vmem:[%s5065_s14 + $0x1600] sm:$0xff] }
  0xda   : > { %829 = vst [vmem:[%s5071_s30 + $0x1f0] sm:$0xff] %v828_v6  ;;  %v834_v9 = vld [vmem:[%s5065_s14 + $0x1608] sm:$0xff]  ;;  %831 = vst [vmem:[%s5071_s30 + $0x1f8] sm:$0xff] %v830_v7  ;;  %v836_v10 = vld [vmem:[%s5065_s14 + $0x1610] sm:$0xff] }
  0xdb   : > { %833 = vst [vmem:[%s5071_s30 + $0x200] sm:$0xff] %v832_v8  ;;  %835 = vst [vmem:[%s5071_s30 + $0x208] sm:$0xff] %v834_v9  ;;  %v838_v11 = vld [vmem:[%s5065_s14 + $0x1618] sm:$0xff]  ;;  %v840_v12 = vld [vmem:[%s5065_s14 + $0x1760] sm:$0xff] }
  0xdc   : > { %837 = vst [vmem:[%s5071_s30 + $0x210] sm:$0xff] %v836_v10  ;;  %839 = vst [vmem:[%s5071_s30 + $0x218] sm:$0xff] %v838_v11  ;;  %v842_v13 = vld [vmem:[%s5065_s14 + $0x1768] sm:$0xff]  ;;  %v844_v14 = vld [vmem:[%s5065_s14 + $0x1770] sm:$0xff] }
  0xdd   : > { %841 = vst [vmem:[%s5071_s30 + $0x220] sm:$0xff] %v840_v12  ;;  %v846_v15 = vld [vmem:[%s5065_s14 + $0x1778] sm:$0xff]  ;;  %843 = vst [vmem:[%s5071_s30 + $0x228] sm:$0xff] %v842_v13  ;;  %v848_v16 = vld [vmem:[%s5065_s14 + $0x18c0] sm:$0xff] }
  0xde   : > { %845 = vst [vmem:[%s5071_s30 + $0x230] sm:$0xff] %v844_v14  ;;  %847 = vst [vmem:[%s5071_s30 + $0x238] sm:$0xff] %v846_v15  ;;  %v850_v17 = vld [vmem:[%s5065_s14 + $0x18c8] sm:$0xff]  ;;  %v852_v18 = vld [vmem:[%s5065_s14 + $0x18d0] sm:$0xff] }
  0xdf   : > { %849 = vst [vmem:[%s5071_s30 + $0x240] sm:$0xff] %v848_v16  ;;  %851 = vst [vmem:[%s5071_s30 + $0x248] sm:$0xff] %v850_v17  ;;  %v854_v19 = vld [vmem:[%s5065_s14 + $0x18d8] sm:$0xff]  ;;  %v856_v20 = vld [vmem:[%s5065_s14 + $0x1a20] sm:$0xff] }
  0xe0   : > { %853 = vst [vmem:[%s5071_s30 + $0x250] sm:$0xff] %v852_v18  ;;  %v858_v21 = vld [vmem:[%s5065_s14 + $0x1a28] sm:$0xff]  ;;  %855 = vst [vmem:[%s5071_s30 + $0x258] sm:$0xff] %v854_v19  ;;  %v860_v22 = vld [vmem:[%s5065_s14 + $0x1a30] sm:$0xff] }
  0xe1   : > { %857 = vst [vmem:[%s5071_s30 + $0x260] sm:$0xff] %v856_v20  ;;  %859 = vst [vmem:[%s5071_s30 + $0x268] sm:$0xff] %v858_v21  ;;  %v862_v23 = vld [vmem:[%s5065_s14 + $0x1a38] sm:$0xff]  ;;  %v864_v24 = vld [vmem:[%s5065_s14 + $0x1b80] sm:$0xff] }
  0xe2   : > { %861 = vst [vmem:[%s5071_s30 + $0x270] sm:$0xff] %v860_v22  ;;  %863 = vst [vmem:[%s5071_s30 + $0x278] sm:$0xff] %v862_v23  ;;  %v866_v25 = vld [vmem:[%s5065_s14 + $0x1b88] sm:$0xff]  ;;  %v868_v26 = vld [vmem:[%s5065_s14 + $0x1b90] sm:$0xff] }
  0xe3   : > { %865 = vst [vmem:[%s5071_s30 + $0x280] sm:$0xff] %v864_v24  ;;  %v870_v27 = vld [vmem:[%s5065_s14 + $0x1b98] sm:$0xff]  ;;  %867 = vst [vmem:[%s5071_s30 + $0x288] sm:$0xff] %v866_v25  ;;  %v872_v28 = vld [vmem:[%s5065_s14 + $0x1ce0] sm:$0xff] }
  0xe4   : > { %869 = vst [vmem:[%s5071_s30 + $0x290] sm:$0xff] %v868_v26  ;;  %871 = vst [vmem:[%s5071_s30 + $0x298] sm:$0xff] %v870_v27  ;;  %v874_v29 = vld [vmem:[%s5065_s14 + $0x1ce8] sm:$0xff]  ;;  %v876_v30 = vld [vmem:[%s5065_s14 + $0x1cf0] sm:$0xff] }
  0xe5   : > { %873 = vst [vmem:[%s5071_s30 + $0x2a0] sm:$0xff] %v872_v28  ;;  %875 = vst [vmem:[%s5071_s30 + $0x2a8] sm:$0xff] %v874_v29  ;;  %v878_v31 = vld [vmem:[%s5065_s14 + $0x1cf8] sm:$0xff]  ;;  %v880_v32 = vld [vmem:[%s5065_s14 + $0x1e40] sm:$0xff] }
  0xe6   : > { %877 = vst [vmem:[%s5071_s30 + $0x2b0] sm:$0xff] %v876_v30  ;;  %v882_v33 = vld [vmem:[%s5065_s14 + $0x1e48] sm:$0xff]  ;;  %879 = vst [vmem:[%s5071_s30 + $0x2b8] sm:$0xff] %v878_v31  ;;  %v884_v34 = vld [vmem:[%s5065_s14 + $0x1e50] sm:$0xff] }
  0xe7   : > { %881 = vst [vmem:[%s5071_s30 + $0x2c0] sm:$0xff] %v880_v32  ;;  %883 = vst [vmem:[%s5071_s30 + $0x2c8] sm:$0xff] %v882_v33  ;;  %v886_v35 = vld [vmem:[%s5065_s14 + $0x1e58] sm:$0xff]  ;;  %v888_v36 = vld [vmem:[%s5065_s14 + $0x1fa0] sm:$0xff] }
  0xe8   : > { %885 = vst [vmem:[%s5071_s30 + $0x2d0] sm:$0xff] %v884_v34  ;;  %887 = vst [vmem:[%s5071_s30 + $0x2d8] sm:$0xff] %v886_v35  ;;  %v890_v37 = vld [vmem:[%s5065_s14 + $0x1fa8] sm:$0xff]  ;;  %v892_v38 = vld [vmem:[%s5065_s14 + $0x1fb0] sm:$0xff] }
  0xe9   : > { %889 = vst [vmem:[%s5071_s30 + $0x2e0] sm:$0xff] %v888_v36  ;;  %v894_v39 = vld [vmem:[%s5065_s14 + $0x1fb8] sm:$0xff]  ;;  %891 = vst [vmem:[%s5071_s30 + $0x2e8] sm:$0xff] %v890_v37  ;;  %v896_v40 = vld [vmem:[%s5065_s14 + $0x2100] sm:$0xff] }
  0xea   : > { %893 = vst [vmem:[%s5071_s30 + $0x2f0] sm:$0xff] %v892_v38  ;;  %895 = vst [vmem:[%s5071_s30 + $0x2f8] sm:$0xff] %v894_v39  ;;  %v898_v41 = vld [vmem:[%s5065_s14 + $0x2108] sm:$0xff]  ;;  %v900_v42 = vld [vmem:[%s5065_s14 + $0x2110] sm:$0xff] }
  0xeb   : > { %897 = vst [vmem:[%s5071_s30 + $0x300] sm:$0xff] %v896_v40  ;;  %899 = vst [vmem:[%s5071_s30 + $0x308] sm:$0xff] %v898_v41  ;;  %v902_v43 = vld [vmem:[%s5065_s14 + $0x2118] sm:$0xff]  ;;  %v904_v44 = vld [vmem:[%s5065_s14 + $0x2260] sm:$0xff] }
  0xec   : > { %901 = vst [vmem:[%s5071_s30 + $0x310] sm:$0xff] %v900_v42  ;;  %v906_v45 = vld [vmem:[%s5065_s14 + $0x2268] sm:$0xff]  ;;  %903 = vst [vmem:[%s5071_s30 + $0x318] sm:$0xff] %v902_v43  ;;  %v908_v46 = vld [vmem:[%s5065_s14 + $0x2270] sm:$0xff] }
  0xed   : > { %905 = vst [vmem:[%s5071_s30 + $0x320] sm:$0xff] %v904_v44  ;;  %907 = vst [vmem:[%s5071_s30 + $0x328] sm:$0xff] %v906_v45  ;;  %v910_v47 = vld [vmem:[%s5065_s14 + $0x2278] sm:$0xff]  ;;  %v912_v48 = vld [vmem:[%s5065_s14 + $0x23c0] sm:$0xff] }
  0xee   : > { %909 = vst [vmem:[%s5071_s30 + $0x330] sm:$0xff] %v908_v46  ;;  %911 = vst [vmem:[%s5071_s30 + $0x338] sm:$0xff] %v910_v47  ;;  %v914_v49 = vld [vmem:[%s5065_s14 + $0x23c8] sm:$0xff]  ;;  %v916_v50 = vld [vmem:[%s5065_s14 + $0x23d0] sm:$0xff] }
  0xef   : > { %913 = vst [vmem:[%s5071_s30 + $0x340] sm:$0xff] %v912_v48  ;;  %v918_v51 = vld [vmem:[%s5065_s14 + $0x23d8] sm:$0xff]  ;;  %915 = vst [vmem:[%s5071_s30 + $0x348] sm:$0xff] %v914_v49  ;;  %v920_v52 = vld [vmem:[%s5065_s14 + $0x2520] sm:$0xff] }
  0xf0   : > { %917 = vst [vmem:[%s5071_s30 + $0x350] sm:$0xff] %v916_v50  ;;  %919 = vst [vmem:[%s5071_s30 + $0x358] sm:$0xff] %v918_v51  ;;  %v922_v53 = vld [vmem:[%s5065_s14 + $0x2528] sm:$0xff]  ;;  %v924_v54 = vld [vmem:[%s5065_s14 + $0x2530] sm:$0xff] }
  0xf1   : > { %921 = vst [vmem:[%s5071_s30 + $0x360] sm:$0xff] %v920_v52  ;;  %923 = vst [vmem:[%s5071_s30 + $0x368] sm:$0xff] %v922_v53  ;;  %v926_v55 = vld [vmem:[%s5065_s14 + $0x2538] sm:$0xff]  ;;  %v928_v56 = vld [vmem:[%s5065_s14 + $0x2680] sm:$0xff] }
  0xf2   : > { %925 = vst [vmem:[%s5071_s30 + $0x370] sm:$0xff] %v924_v54  ;;  %v930_v57 = vld [vmem:[%s5065_s14 + $0x2688] sm:$0xff]  ;;  %927 = vst [vmem:[%s5071_s30 + $0x378] sm:$0xff] %v926_v55  ;;  %v932_v58 = vld [vmem:[%s5065_s14 + $0x2690] sm:$0xff] }
  0xf3   : > { %929 = vst [vmem:[%s5071_s30 + $0x380] sm:$0xff] %v928_v56  ;;  %931 = vst [vmem:[%s5071_s30 + $0x388] sm:$0xff] %v930_v57  ;;  %v934_v59 = vld [vmem:[%s5065_s14 + $0x2698] sm:$0xff]  ;;  %v936_v60 = vld [vmem:[%s5065_s14 + $0x27e0] sm:$0xff] }
  0xf4   : > { %933 = vst [vmem:[%s5071_s30 + $0x390] sm:$0xff] %v932_v58  ;;  %935 = vst [vmem:[%s5071_s30 + $0x398] sm:$0xff] %v934_v59  ;;  %v938_v61 = vld [vmem:[%s5065_s14 + $0x27e8] sm:$0xff]  ;;  %v940_v62 = vld [vmem:[%s5065_s14 + $0x27f0] sm:$0xff] }
  0xf5   : > { %937 = vst [vmem:[%s5071_s30 + $0x3a0] sm:$0xff] %v936_v60  ;;  %v942_v63 = vld [vmem:[%s5065_s14 + $0x27f8] sm:$0xff]  ;;  %939 = vst [vmem:[%s5071_s30 + $0x3a8] sm:$0xff] %v938_v61  ;;  %v944_v0 = vld [vmem:[%s5065_s14 + $0x2940] sm:$0xff] }
  0xf6   : > { %941 = vst [vmem:[%s5071_s30 + $0x3b0] sm:$0xff] %v940_v62  ;;  %943 = vst [vmem:[%s5071_s30 + $0x3b8] sm:$0xff] %v942_v63  ;;  %v946_v1 = vld [vmem:[%s5065_s14 + $0x2948] sm:$0xff]  ;;  %v948_v2 = vld [vmem:[%s5065_s14 + $0x2950] sm:$0xff] }
  0xf7   : > { %945 = vst [vmem:[%s5071_s30 + $0x3c0] sm:$0xff] %v944_v0  ;;  %947 = vst [vmem:[%s5071_s30 + $0x3c8] sm:$0xff] %v946_v1  ;;  %v950_v3 = vld [vmem:[%s5065_s14 + $0x2958] sm:$0xff]  ;;  %v952_v4 = vld [vmem:[%s5065_s14 + $0x2aa0] sm:$0xff] }
  0xf8   : > { %949 = vst [vmem:[%s5071_s30 + $0x3d0] sm:$0xff] %v948_v2  ;;  %v954_v5 = vld [vmem:[%s5065_s14 + $0x2aa8] sm:$0xff]  ;;  %951 = vst [vmem:[%s5071_s30 + $0x3d8] sm:$0xff] %v950_v3  ;;  %v956_v6 = vld [vmem:[%s5065_s14 + $0x2ab0] sm:$0xff] }
  0xf9   : > { %953 = vst [vmem:[%s5071_s30 + $0x3e0] sm:$0xff] %v952_v4  ;;  %955 = vst [vmem:[%s5071_s30 + $0x3e8] sm:$0xff] %v954_v5  ;;  %v958_v7 = vld [vmem:[%s5065_s14 + $0x2ab8] sm:$0xff]  ;;  %v960_v8 = vld [vmem:[%s5065_s14 + $0x2c00] sm:$0xff] }
  0xfa   : > { %957 = vst [vmem:[%s5071_s30 + $0x3f0] sm:$0xff] %v956_v6  ;;  %959 = vst [vmem:[%s5071_s30 + $0x3f8] sm:$0xff] %v958_v7  ;;  %v962_v9 = vld [vmem:[%s5065_s14 + $0x2c08] sm:$0xff]  ;;  %v964_v10 = vld [vmem:[%s5065_s14 + $0x2c10] sm:$0xff] }
  0xfb   : > { %961 = vst [vmem:[%s5071_s30 + $0x400] sm:$0xff] %v960_v8  ;;  %v966_v11 = vld [vmem:[%s5065_s14 + $0x2c18] sm:$0xff]  ;;  %963 = vst [vmem:[%s5071_s30 + $0x408] sm:$0xff] %v962_v9  ;;  %v968_v12 = vld [vmem:[%s5065_s14 + $0x2d60] sm:$0xff] }
  0xfc   : > { %965 = vst [vmem:[%s5071_s30 + $0x410] sm:$0xff] %v964_v10  ;;  %967 = vst [vmem:[%s5071_s30 + $0x418] sm:$0xff] %v966_v11  ;;  %v970_v13 = vld [vmem:[%s5065_s14 + $0x2d68] sm:$0xff]  ;;  %v972_v14 = vld [vmem:[%s5065_s14 + $0x2d70] sm:$0xff] }
  0xfd   : > { %969 = vst [vmem:[%s5071_s30 + $0x420] sm:$0xff] %v968_v12  ;;  %971 = vst [vmem:[%s5071_s30 + $0x428] sm:$0xff] %v970_v13  ;;  %v974_v15 = vld [vmem:[%s5065_s14 + $0x2d78] sm:$0xff]  ;;  %v976_v16 = vld [vmem:[%s5065_s14 + $0x2ec0] sm:$0xff] }
  0xfe   : > { %973 = vst [vmem:[%s5071_s30 + $0x430] sm:$0xff] %v972_v14  ;;  %v978_v17 = vld [vmem:[%s5065_s14 + $0x2ec8] sm:$0xff]  ;;  %975 = vst [vmem:[%s5071_s30 + $0x438] sm:$0xff] %v974_v15  ;;  %v980_v18 = vld [vmem:[%s5065_s14 + $0x2ed0] sm:$0xff] }
  0xff   : > { %977 = vst [vmem:[%s5071_s30 + $0x440] sm:$0xff] %v976_v16  ;;  %979 = vst [vmem:[%s5071_s30 + $0x448] sm:$0xff] %v978_v17  ;;  %v982_v19 = vld [vmem:[%s5065_s14 + $0x2ed8] sm:$0xff]  ;;  %v984_v20 = vld [vmem:[%s5065_s14 + $0x3020] sm:$0xff] }
 0x100   : > { %981 = vst [vmem:[%s5071_s30 + $0x450] sm:$0xff] %v980_v18  ;;  %983 = vst [vmem:[%s5071_s30 + $0x458] sm:$0xff] %v982_v19  ;;  %v986_v21 = vld [vmem:[%s5065_s14 + $0x3028] sm:$0xff]  ;;  %v988_v22 = vld [vmem:[%s5065_s14 + $0x3030] sm:$0xff] }
 0x101   : > { %985 = vst [vmem:[%s5071_s30 + $0x460] sm:$0xff] %v984_v20  ;;  %v990_v23 = vld [vmem:[%s5065_s14 + $0x3038] sm:$0xff]  ;;  %987 = vst [vmem:[%s5071_s30 + $0x468] sm:$0xff] %v986_v21  ;;  %v992_v24 = vld [vmem:[%s5065_s14 + $0x3180] sm:$0xff] }
 0x102   : > { %989 = vst [vmem:[%s5071_s30 + $0x470] sm:$0xff] %v988_v22  ;;  %991 = vst [vmem:[%s5071_s30 + $0x478] sm:$0xff] %v990_v23  ;;  %v994_v25 = vld [vmem:[%s5065_s14 + $0x3188] sm:$0xff]  ;;  %v996_v26 = vld [vmem:[%s5065_s14 + $0x3190] sm:$0xff] }
 0x103   : > { %993 = vst [vmem:[%s5071_s30 + $0x480] sm:$0xff] %v992_v24  ;;  %995 = vst [vmem:[%s5071_s30 + $0x488] sm:$0xff] %v994_v25  ;;  %v998_v27 = vld [vmem:[%s5065_s14 + $0x3198] sm:$0xff]  ;;  %v1000_v28 = vld [vmem:[%s5065_s14 + $0x32e0] sm:$0xff] }
 0x104   : > { %997 = vst [vmem:[%s5071_s30 + $0x490] sm:$0xff] %v996_v26  ;;  %v1002_v29 = vld [vmem:[%s5065_s14 + $0x32e8] sm:$0xff]  ;;  %999 = vst [vmem:[%s5071_s30 + $0x498] sm:$0xff] %v998_v27  ;;  %v1004_v30 = vld [vmem:[%s5065_s14 + $0x32f0] sm:$0xff] }
 0x105   : > { %1001 = vst [vmem:[%s5071_s30 + $0x4a0] sm:$0xff] %v1000_v28  ;;  %1003 = vst [vmem:[%s5071_s30 + $0x4a8] sm:$0xff] %v1002_v29  ;;  %v1006_v31 = vld [vmem:[%s5065_s14 + $0x32f8] sm:$0xff]  ;;  %v1008_v32 = vld [vmem:[%s5065_s14 + $0x3440] sm:$0xff] }
 0x106   : > { %1005 = vst [vmem:[%s5071_s30 + $0x4b0] sm:$0xff] %v1004_v30  ;;  %1007 = vst [vmem:[%s5071_s30 + $0x4b8] sm:$0xff] %v1006_v31  ;;  %v1010_v33 = vld [vmem:[%s5065_s14 + $0x3448] sm:$0xff]  ;;  %v1012_v34 = vld [vmem:[%s5065_s14 + $0x3450] sm:$0xff] }
 0x107   : > { %1009 = vst [vmem:[%s5071_s30 + $0x4c0] sm:$0xff] %v1008_v32  ;;  %v1014_v35 = vld [vmem:[%s5065_s14 + $0x3458] sm:$0xff]  ;;  %1011 = vst [vmem:[%s5071_s30 + $0x4c8] sm:$0xff] %v1010_v33  ;;  %v1016_v36 = vld [vmem:[%s5065_s14 + $0x35a0] sm:$0xff] }
 0x108   : > { %1013 = vst [vmem:[%s5071_s30 + $0x4d0] sm:$0xff] %v1012_v34  ;;  %1015 = vst [vmem:[%s5071_s30 + $0x4d8] sm:$0xff] %v1014_v35  ;;  %v1018_v37 = vld [vmem:[%s5065_s14 + $0x35a8] sm:$0xff]  ;;  %v1020_v38 = vld [vmem:[%s5065_s14 + $0x35b0] sm:$0xff] }
 0x109   : > { %1017 = vst [vmem:[%s5071_s30 + $0x4e0] sm:$0xff] %v1016_v36  ;;  %1019 = vst [vmem:[%s5071_s30 + $0x4e8] sm:$0xff] %v1018_v37  ;;  %v1022_v39 = vld [vmem:[%s5065_s14 + $0x35b8] sm:$0xff]  ;;  %v1024_v40 = vld [vmem:[%s5065_s14 + $0x3700] sm:$0xff] }
 0x10a   : > { %1021 = vst [vmem:[%s5071_s30 + $0x4f0] sm:$0xff] %v1020_v38  ;;  %v1026_v41 = vld [vmem:[%s5065_s14 + $0x3708] sm:$0xff]  ;;  %1023 = vst [vmem:[%s5071_s30 + $0x4f8] sm:$0xff] %v1022_v39  ;;  %v1028_v42 = vld [vmem:[%s5065_s14 + $0x3710] sm:$0xff] }
 0x10b   : > { %1025 = vst [vmem:[%s5071_s30 + $0x500] sm:$0xff] %v1024_v40  ;;  %1027 = vst [vmem:[%s5071_s30 + $0x508] sm:$0xff] %v1026_v41  ;;  %v1030_v43 = vld [vmem:[%s5065_s14 + $0x3718] sm:$0xff]  ;;  %v1032_v44 = vld [vmem:[%s5065_s14 + $0x3860] sm:$0xff] }
 0x10c   : > { %1029 = vst [vmem:[%s5071_s30 + $0x510] sm:$0xff] %v1028_v42  ;;  %1031 = vst [vmem:[%s5071_s30 + $0x518] sm:$0xff] %v1030_v43  ;;  %v1034_v45 = vld [vmem:[%s5065_s14 + $0x3868] sm:$0xff]  ;;  %v1036_v46 = vld [vmem:[%s5065_s14 + $0x3870] sm:$0xff] }
 0x10d   : > { %1033 = vst [vmem:[%s5071_s30 + $0x520] sm:$0xff] %v1032_v44  ;;  %v1038_v47 = vld [vmem:[%s5065_s14 + $0x3878] sm:$0xff]  ;;  %1035 = vst [vmem:[%s5071_s30 + $0x528] sm:$0xff] %v1034_v45  ;;  %v1040_v48 = vld [vmem:[%s5065_s14 + $0x39c0] sm:$0xff] }
 0x10e   : > { %1037 = vst [vmem:[%s5071_s30 + $0x530] sm:$0xff] %v1036_v46  ;;  %1039 = vst [vmem:[%s5071_s30 + $0x538] sm:$0xff] %v1038_v47  ;;  %v1042_v49 = vld [vmem:[%s5065_s14 + $0x39c8] sm:$0xff]  ;;  %v1044_v50 = vld [vmem:[%s5065_s14 + $0x39d0] sm:$0xff] }
 0x10f   : > { %1041 = vst [vmem:[%s5071_s30 + $0x540] sm:$0xff] %v1040_v48  ;;  %1043 = vst [vmem:[%s5071_s30 + $0x548] sm:$0xff] %v1042_v49  ;;  %v1046_v51 = vld [vmem:[%s5065_s14 + $0x39d8] sm:$0xff]  ;;  %v1048_v52 = vld [vmem:[%s5065_s14 + $0x3b20] sm:$0xff] }
 0x110   : > { %1045 = vst [vmem:[%s5071_s30 + $0x550] sm:$0xff] %v1044_v50  ;;  %v1050_v53 = vld [vmem:[%s5065_s14 + $0x3b28] sm:$0xff]  ;;  %1047 = vst [vmem:[%s5071_s30 + $0x558] sm:$0xff] %v1046_v51  ;;  %v1052_v54 = vld [vmem:[%s5065_s14 + $0x3b30] sm:$0xff] }
 0x111   : > { %1049 = vst [vmem:[%s5071_s30 + $0x560] sm:$0xff] %v1048_v52  ;;  %1051 = vst [vmem:[%s5071_s30 + $0x568] sm:$0xff] %v1050_v53  ;;  %v1054_v55 = vld [vmem:[%s5065_s14 + $0x3b38] sm:$0xff]  ;;  %v1056_v56 = vld [vmem:[%s5065_s14 + $0x3c80] sm:$0xff] }
 0x112   : > { %1053 = vst [vmem:[%s5071_s30 + $0x570] sm:$0xff] %v1052_v54  ;;  %1055 = vst [vmem:[%s5071_s30 + $0x578] sm:$0xff] %v1054_v55  ;;  %v1058_v57 = vld [vmem:[%s5065_s14 + $0x3c88] sm:$0xff]  ;;  %v1060_v58 = vld [vmem:[%s5065_s14 + $0x3c90] sm:$0xff] }
 0x113   : > { %1057 = vst [vmem:[%s5071_s30 + $0x580] sm:$0xff] %v1056_v56  ;;  %v1062_v59 = vld [vmem:[%s5065_s14 + $0x3c98] sm:$0xff]  ;;  %1059 = vst [vmem:[%s5071_s30 + $0x588] sm:$0xff] %v1058_v57  ;;  %v1064_v60 = vld [vmem:[%s5065_s14 + $0x3de0] sm:$0xff] }
 0x114   : > { %1061 = vst [vmem:[%s5071_s30 + $0x590] sm:$0xff] %v1060_v58  ;;  %1063 = vst [vmem:[%s5071_s30 + $0x598] sm:$0xff] %v1062_v59  ;;  %v1066_v61 = vld [vmem:[%s5065_s14 + $0x3de8] sm:$0xff]  ;;  %v1068_v62 = vld [vmem:[%s5065_s14 + $0x3df0] sm:$0xff] }
 0x115   : > { %1065 = vst [vmem:[%s5071_s30 + $0x5a0] sm:$0xff] %v1064_v60  ;;  %1067 = vst [vmem:[%s5071_s30 + $0x5a8] sm:$0xff] %v1066_v61  ;;  %v1070_v63 = vld [vmem:[%s5065_s14 + $0x3df8] sm:$0xff]  ;;  %v1072_v0 = vld [vmem:[%s5065_s14 + $0x3f40] sm:$0xff] }
 0x116   : > { %1069 = vst [vmem:[%s5071_s30 + $0x5b0] sm:$0xff] %v1068_v62  ;;  %v1074_v1 = vld [vmem:[%s5065_s14 + $0x3f48] sm:$0xff]  ;;  %1071 = vst [vmem:[%s5071_s30 + $0x5b8] sm:$0xff] %v1070_v63  ;;  %v1076_v2 = vld [vmem:[%s5065_s14 + $0x3f50] sm:$0xff] }
 0x117   : > { %1073 = vst [vmem:[%s5071_s30 + $0x5c0] sm:$0xff] %v1072_v0  ;;  %1075 = vst [vmem:[%s5071_s30 + $0x5c8] sm:$0xff] %v1074_v1  ;;  %v1078_v3 = vld [vmem:[%s5065_s14 + $0x3f58] sm:$0xff]  ;;  %v1080_v4 = vld [vmem:[%s5065_s14 + $0x40a0] sm:$0xff] }
 0x118   : > { %1077 = vst [vmem:[%s5071_s30 + $0x5d0] sm:$0xff] %v1076_v2  ;;  %1079 = vst [vmem:[%s5071_s30 + $0x5d8] sm:$0xff] %v1078_v3  ;;  %v1082_v5 = vld [vmem:[%s5065_s14 + $0x40a8] sm:$0xff]  ;;  %v1084_v6 = vld [vmem:[%s5065_s14 + $0x40b0] sm:$0xff] }
 0x119   : > { %1081 = vst [vmem:[%s5071_s30 + $0x5e0] sm:$0xff] %v1080_v4  ;;  %v1086_v7 = vld [vmem:[%s5065_s14 + $0x40b8] sm:$0xff]  ;;  %1083 = vst [vmem:[%s5071_s30 + $0x5e8] sm:$0xff] %v1082_v5  ;;  %v1088_v8 = vld [vmem:[%s5065_s14 + $0x4200] sm:$0xff] }
 0x11a   : > { %1085 = vst [vmem:[%s5071_s30 + $0x5f0] sm:$0xff] %v1084_v6  ;;  %1087 = vst [vmem:[%s5071_s30 + $0x5f8] sm:$0xff] %v1086_v7  ;;  %v1090_v9 = vld [vmem:[%s5065_s14 + $0x4208] sm:$0xff]  ;;  %v1092_v10 = vld [vmem:[%s5065_s14 + $0x4210] sm:$0xff] }
 0x11b   : > { %1089 = vst [vmem:[%s5071_s30 + $0x600] sm:$0xff] %v1088_v8  ;;  %1091 = vst [vmem:[%s5071_s30 + $0x608] sm:$0xff] %v1090_v9  ;;  %v1094_v11 = vld [vmem:[%s5065_s14 + $0x4218] sm:$0xff]  ;;  %v1096_v12 = vld [vmem:[%s5065_s14 + $0x4360] sm:$0xff] }
 0x11c   : > { %1093 = vst [vmem:[%s5071_s30 + $0x610] sm:$0xff] %v1092_v10  ;;  %v1098_v13 = vld [vmem:[%s5065_s14 + $0x4368] sm:$0xff]  ;;  %1095 = vst [vmem:[%s5071_s30 + $0x618] sm:$0xff] %v1094_v11  ;;  %v1100_v14 = vld [vmem:[%s5065_s14 + $0x4370] sm:$0xff] }
 0x11d   : > { %1097 = vst [vmem:[%s5071_s30 + $0x620] sm:$0xff] %v1096_v12  ;;  %1099 = vst [vmem:[%s5071_s30 + $0x628] sm:$0xff] %v1098_v13  ;;  %v1102_v15 = vld [vmem:[%s5065_s14 + $0x4378] sm:$0xff] }
 0x11e   : > { %1101 = vst [vmem:[%s5071_s30 + $0x630] sm:$0xff] %v1100_v14  ;;  %1103 = vst [vmem:[%s5071_s30 + $0x638] sm:$0xff] %v1102_v15 }
 0x11f PF: > { %p3467_p4 = scmp.ge.s32.totalorder %s4475_s24, 1  ;;  %p1108_p1 = scmp.lt.s32.totalorder %s4475_s24, 12 }
 0x121   : > { %p1109_p5 = pnand %p3467_p4, %p1108_p1 }
 0x122   : > { %s5473_s16 = sand.u32 (!%p1109_p5), 1, %s4467_s22  }
 0x123   : > { %1112 = sbr.rel (%p1109_p5) target bundleno = 938 (0x3aa), region = 82  ;;  %s1122_s12 = scalar_lea.sflag (!%p1109_p5), [#allocation4], %s5473_s16 }
 0x124   : > { %s5476_s18 = smul.u32 (!%p1109_p5), 1600, %s5473_s16 }
 0x126   : > { %s5479_s10 = scalar_lea.vmem (!%p1109_p5), [#allocation2], %s5476_s18  ;;  %s5483_s13 = scalar_lea.vmem (!%p1109_p5), [#allocation3], %s5476_s18 }
 0x12a   : > { %4454 = dma.done.wait (%p4558_p7), %s1122_s12, 25600  }
 0x12b   : > { %4456 = vsyncadd (%p4558_p7), %s1122_s12, 4294941696  ;;  %s1131_s24 = scalar_lea.sflag [#allocation6], %s5473_s16  ;;  %s5491_s19 = scalar_lea.vmem [#allocation5], %s5476_s18 }
 0x12c   : > { %4458 = dma.done.wait (%p4558_p7), %s1131_s24, 25600  }
 0x12d   : > { %4460 = vsyncadd (%p4558_p7), %s1131_s24, 4294941696  ;;  %v1196_v16 = vld [vmem:[%s5479_s10 + $0x8] sm:$0xff]  ;;  %v1198_v18 = vld [vmem:[%s5479_s10 + $0x18] sm:$0xff]  ;;  %vm1395_vm0 = vcmask 130048   ;;  %s3468_s15 = sshll.u32 %s5473_s16, 6  ;;  %p6540_p7 = scmp.ne.s32.totalorder %s6538_s8, 0 }
 0x12e   : > { %v1200_v17 = vld [vmem:[%s5479_s10 + $0x28] sm:$0xff]  ;;  %v1202_v20 = vld [vmem:[%s5479_s10 + $0x38] sm:$0xff]  ;;  %v1195_v21 = vld [vmem:[%s5479_s10] sm:$0xff]  ;;  %s6491_s16 = scalar_lea.vmem [#allocation8], %s3468_s15  ;;  %s3494_s20 = sshll.u32 (%p6540_p7), %s4537_s25, 5 }
 0x12f   : > { %v3495_v19 = vpack.c.bf16 %v1200_v17, %v1196_v16  ;;  %v1199_v22 = vld [vmem:[%s5479_s10 + $0x20] sm:$0xff]  ;;  %v3595_v23 = vpack.c.bf16 %v1202_v20, %v1198_v18  ;;  %v1197_v25 = vld [vmem:[%s5479_s10 + $0x10] sm:$0xff]  ;;  %v1204_v27 = vld [vmem:[%s5479_s10 + $0x48] sm:$0xff]  ;;  %s3303_s2 = scalar_lea.vmem (%p6540_p7), %s6534_s6, %s3494_s20 }
 0x130   : > { %v3497_v24 = vpack.c.bf16 %v1199_v22, %v1195_v21  ;;  %v1201_v26 = vld [vmem:[%s5479_s10 + $0x30] sm:$0xff]  ;;  %v1208_v29 = vld [vmem:[%s5479_s10 + $0x68] sm:$0xff]  ;;  %v1206_v30 = vld [vmem:[%s5479_s10 + $0x58] sm:$0xff] }
 0x131   : > { %3496 = vmatprep.subr.bf16.mxu0 %v3495_v19  ;;  %v3597_v28 = vpack.c.bf16 %v1201_v26, %v1197_v25  ;;  %v1210_v31 = vld [vmem:[%s5479_s10 + $0x78] sm:$0xff]  ;;  %3596 = vmatprep.subr.bf16.mxu1 %v3595_v23  ;;  %v3499_v32 = vpack.c.bf16 %v1208_v29, %v1204_v27  ;;  %v1203_v34 = vld [vmem:[%s5479_s10 + $0x40] sm:$0xff]  ;;  %v1205_v36 = vld [vmem:[%s5479_s10 + $0x50] sm:$0xff] }
 0x132   : > { %3498 = vmatpush1.bf16.msra.mxu0 %v3497_v24  ;;  %v3599_v33 = vpack.c.bf16 %v1210_v31, %v1206_v30  ;;  %v1207_v35 = vld [vmem:[%s5479_s10 + $0x60] sm:$0xff]  ;;  %v1209_v38 = vld [vmem:[%s5479_s10 + $0x70] sm:$0xff]  ;;  %v1212_v39 = vld [vmem:[%s5479_s10 + $0x88] sm:$0xff] }
 0x133   : > { %3598 = vmatpush1.bf16.msra.mxu1 %v3597_v28  ;;  %v3501_v37 = vpack.c.bf16 %v1207_v35, %v1203_v34  ;;  %v1216_v40 = vld [vmem:[%s5479_s10 + $0xa8] sm:$0xff]  ;;  %3500 = vmatprep.subr.bf16.mxu0 %v3499_v32  ;;  %v3601_v41 = vpack.c.bf16 %v1209_v38, %v1205_v36  ;;  %v1214_v43 = vld [vmem:[%s5479_s10 + $0x98] sm:$0xff]  ;;  %v1211_v45 = vld [vmem:[%s5479_s10 + $0x80] sm:$0xff] }
 0x134   : > { %3600 = vmatprep.subr.bf16.mxu1 %v3599_v33  ;;  %v3503_v42 = vpack.c.bf16 %v1216_v40, %v1212_v39  ;;  %v1218_v44 = vld [vmem:[%s5479_s10 + $0xb8] sm:$0xff]  ;;  %v1215_v47 = vld [vmem:[%s5479_s10 + $0xa0] sm:$0xff]  ;;  %v1213_v48 = vld [vmem:[%s5479_s10 + $0x90] sm:$0xff] }
 0x135   : > { %v3603_v46 = vpack.c.bf16 %v1218_v44, %v1214_v43  ;;  %v1217_v49 = vld [vmem:[%s5479_s10 + $0xb0] sm:$0xff]  ;;  %v3505_v50 = vpack.c.bf16 %v1215_v47, %v1211_v45  ;;  %v1220_v51 = vld [vmem:[%s5479_s10 + $0xc8] sm:$0xff]  ;;  %v1222_v53 = vld [vmem:[%s5479_s10 + $0xd8] sm:$0xff] }
 0x136   : > { %3502 = vmatpush1.bf16.msra.mxu0 %v3501_v37  ;;  %v1224_v52 = vld [vmem:[%s5479_s10 + $0xe8] sm:$0xff]  ;;  %v3605_v54 = vpack.c.bf16 %v1217_v49, %v1213_v48  ;;  %v1226_v56 = vld [vmem:[%s5479_s10 + $0xf8] sm:$0xff]  ;;  %v1219_v57 = vld [vmem:[%s5479_s10 + $0xc0] sm:$0xff] }
 0x137   : > { %3602 = vmatpush1.bf16.msra.mxu1 %v3601_v41  ;;  %3504 = vmatprep.subr.bf16.mxu0 %v3503_v42  ;;  %v3507_v55 = vpack.c.bf16 %v1224_v52, %v1220_v51  ;;  %v1223_v58 = vld [vmem:[%s5479_s10 + $0xe0] sm:$0xff]  ;;  %v3607_v59 = vpack.c.bf16 %v1226_v56, %v1222_v53  ;;  %v1221_v60 = vld [vmem:[%s5479_s10 + $0xd0] sm:$0xff]  ;;  %v1228_v62 = vld [vmem:[%s5479_s10 + $0x108] sm:$0xff] }
 0x138   : > { %3604 = vmatprep.subr.bf16.mxu1 %v3603_v46  ;;  %v1225_v61 = vld [vmem:[%s5479_s10 + $0xf0] sm:$0xff]  ;;  %v1232_v63 = vld [vmem:[%s5479_s10 + $0x128] sm:$0xff]  ;;  %v1230_v0 = vld [vmem:[%s5479_s10 + $0x118] sm:$0xff]  ;;  %v3509_v2 = vpack.c.bf16 %v1223_v58, %v1219_v57 }
 0x139   : > { %v1234_v1 = vld [vmem:[%s5479_s10 + $0x138] sm:$0xff]  ;;  %v3609_v3 = vpack.c.bf16 %v1225_v61, %v1221_v60  ;;  %v3511_v4 = vpack.c.bf16 %v1232_v63, %v1228_v62  ;;  %v1227_v5 = vld [vmem:[%s5479_s10 + $0x100] sm:$0xff]  ;;  %v1229_v7 = vld [vmem:[%s5479_s10 + $0x110] sm:$0xff] }
 0x13a   : > { %3506 = vmatpush1.bf16.msra.mxu0 %v3505_v50  ;;  %v1231_v6 = vld [vmem:[%s5479_s10 + $0x120] sm:$0xff]  ;;  %v3611_v8 = vpack.c.bf16 %v1234_v1, %v1230_v0  ;;  %v1233_v9 = vld [vmem:[%s5479_s10 + $0x130] sm:$0xff]  ;;  %v1236_v10 = vld [vmem:[%s5479_s10 + $0x148] sm:$0xff] }
 0x13b   : > { %3606 = vmatpush1.bf16.msra.mxu1 %v3605_v54  ;;  %3508 = vmatprep.subr.bf16.mxu0 %v3507_v55  ;;  %v1240_v11 = vld [vmem:[%s5479_s10 + $0x168] sm:$0xff]  ;;  %v1238_v12 = vld [vmem:[%s5479_s10 + $0x158] sm:$0xff]  ;;  %v3513_v14 = vpack.c.bf16 %v1231_v6, %v1227_v5  ;;  %v3613_v15 = vpack.c.bf16 %v1233_v9, %v1229_v7  ;;  %v1235_v17 = vld [vmem:[%s5479_s10 + $0x140] sm:$0xff] }
 0x13c   : > { %3608 = vmatprep.subr.bf16.mxu1 %v3607_v59  ;;  %v1242_v13 = vld [vmem:[%s5479_s10 + $0x178] sm:$0xff]  ;;  %v3515_v16 = vpack.c.bf16 %v1240_v11, %v1236_v10  ;;  %v1239_v18 = vld [vmem:[%s5479_s10 + $0x160] sm:$0xff]  ;;  %v1237_v19 = vld [vmem:[%s5479_s10 + $0x150] sm:$0xff] }
 0x13d   : > { %v3615_v20 = vpack.c.bf16 %v1242_v13, %v1238_v12  ;;  %v1241_v21 = vld [vmem:[%s5479_s10 + $0x170] sm:$0xff]  ;;  %v1244_v22 = vld [vmem:[%s5479_s10 + $0x188] sm:$0xff]  ;;  %v1246_v24 = vld [vmem:[%s5479_s10 + $0x198] sm:$0xff]  ;;  %v3517_v26 = vpack.c.bf16 %v1239_v18, %v1235_v17 }
 0x13e   : > { %3510 = vmatpush1.bf16.msra.mxu0 %v3509_v2  ;;  %v1248_v23 = vld [vmem:[%s5479_s10 + $0x1a8] sm:$0xff]  ;;  %v1250_v25 = vld [vmem:[%s5479_s10 + $0x1b8] sm:$0xff]  ;;  %v3617_v27 = vpack.c.bf16 %v1241_v21, %v1237_v19  ;;  %v1243_v29 = vld [vmem:[%s5479_s10 + $0x180] sm:$0xff] }
 0x13f   : > { %3610 = vmatpush1.bf16.msra.mxu1 %v3609_v3  ;;  %3512 = vmatprep.subr.bf16.mxu0 %v3511_v4  ;;  %v3519_v28 = vpack.c.bf16 %v1248_v23, %v1244_v22  ;;  %v1247_v30 = vld [vmem:[%s5479_s10 + $0x1a0] sm:$0xff]  ;;  %v1245_v31 = vld [vmem:[%s5479_s10 + $0x190] sm:$0xff]  ;;  %v3619_v32 = vpack.c.bf16 %v1250_v25, %v1246_v24  ;;  %v1252_v34 = vld [vmem:[%s5479_s10 + $0x1c8] sm:$0xff] }
 0x140   : > { %3612 = vmatprep.subr.bf16.mxu1 %v3611_v8  ;;  %v1249_v33 = vld [vmem:[%s5479_s10 + $0x1b0] sm:$0xff]  ;;  %v1256_v35 = vld [vmem:[%s5479_s10 + $0x1e8] sm:$0xff]  ;;  %v1254_v36 = vld [vmem:[%s5479_s10 + $0x1d8] sm:$0xff]  ;;  %v3521_v38 = vpack.c.bf16 %v1247_v30, %v1243_v29 }
 0x141   : > { %v1258_v37 = vld [vmem:[%s5479_s10 + $0x1f8] sm:$0xff]  ;;  %v3621_v39 = vpack.c.bf16 %v1249_v33, %v1245_v31  ;;  %v3523_v40 = vpack.c.bf16 %v1256_v35, %v1252_v34  ;;  %v1251_v41 = vld [vmem:[%s5479_s10 + $0x1c0] sm:$0xff]  ;;  %v1253_v43 = vld [vmem:[%s5479_s10 + $0x1d0] sm:$0xff] }
 0x142   : > { %3514 = vmatpush1.bf16.msra.mxu0 %v3513_v14  ;;  %v1255_v42 = vld [vmem:[%s5479_s10 + $0x1e0] sm:$0xff]  ;;  %v3623_v44 = vpack.c.bf16 %v1258_v37, %v1254_v36  ;;  %v1257_v45 = vld [vmem:[%s5479_s10 + $0x1f0] sm:$0xff]  ;;  %v1260_v46 = vld [vmem:[%s5479_s10 + $0x208] sm:$0xff] }
 0x143   : > { %3614 = vmatpush1.bf16.msra.mxu1 %v3613_v15  ;;  %3516 = vmatprep.subr.bf16.mxu0 %v3515_v16  ;;  %v1264_v47 = vld [vmem:[%s5479_s10 + $0x228] sm:$0xff]  ;;  %v1262_v48 = vld [vmem:[%s5479_s10 + $0x218] sm:$0xff]  ;;  %v3525_v50 = vpack.c.bf16 %v1255_v42, %v1251_v41  ;;  %v3625_v51 = vpack.c.bf16 %v1257_v45, %v1253_v43  ;;  %v1259_v53 = vld [vmem:[%s5479_s10 + $0x200] sm:$0xff] }
 0x144   : > { %3616 = vmatprep.subr.bf16.mxu1 %v3615_v20  ;;  %v1266_v49 = vld [vmem:[%s5479_s10 + $0x238] sm:$0xff]  ;;  %v3527_v52 = vpack.c.bf16 %v1264_v47, %v1260_v46  ;;  %v1263_v54 = vld [vmem:[%s5479_s10 + $0x220] sm:$0xff]  ;;  %v1261_v55 = vld [vmem:[%s5479_s10 + $0x210] sm:$0xff] }
 0x145   : > { %v3627_v56 = vpack.c.bf16 %v1266_v49, %v1262_v48  ;;  %v1265_v57 = vld [vmem:[%s5479_s10 + $0x230] sm:$0xff]  ;;  %v1268_v58 = vld [vmem:[%s5479_s10 + $0x248] sm:$0xff]  ;;  %v1270_v60 = vld [vmem:[%s5479_s10 + $0x258] sm:$0xff]  ;;  %v3529_v62 = vpack.c.bf16 %v1263_v54, %v1259_v53 }
 0x146   : > { %3518 = vmatpush1.bf16.msra.mxu0 %v3517_v26  ;;  %v1272_v59 = vld [vmem:[%s5479_s10 + $0x268] sm:$0xff]  ;;  %v1274_v61 = vld [vmem:[%s5479_s10 + $0x278] sm:$0xff]  ;;  %v3629_v63 = vpack.c.bf16 %v1265_v57, %v1261_v55  ;;  %v1267_v1 = vld [vmem:[%s5479_s10 + $0x240] sm:$0xff] }
 0x147   : > { %3618 = vmatpush1.bf16.msra.mxu1 %v3617_v27  ;;  %3520 = vmatprep.subr.bf16.mxu0 %v3519_v28  ;;  %v3531_v0 = vpack.c.bf16 %v1272_v59, %v1268_v58  ;;  %v1271_v2 = vld [vmem:[%s5479_s10 + $0x260] sm:$0xff]  ;;  %v1269_v3 = vld [vmem:[%s5479_s10 + $0x250] sm:$0xff]  ;;  %v3631_v4 = vpack.c.bf16 %v1274_v61, %v1270_v60  ;;  %v1276_v6 = vld [vmem:[%s5479_s10 + $0x288] sm:$0xff] }
 0x148   : > { %3620 = vmatprep.subr.bf16.mxu1 %v3619_v32  ;;  %v1273_v5 = vld [vmem:[%s5479_s10 + $0x270] sm:$0xff]  ;;  %v1280_v7 = vld [vmem:[%s5479_s10 + $0x2a8] sm:$0xff]  ;;  %v1278_v8 = vld [vmem:[%s5479_s10 + $0x298] sm:$0xff]  ;;  %v3533_v10 = vpack.c.bf16 %v1271_v2, %v1267_v1 }
 0x149   : > { %v1282_v9 = vld [vmem:[%s5479_s10 + $0x2b8] sm:$0xff]  ;;  %v3633_v11 = vpack.c.bf16 %v1273_v5, %v1269_v3  ;;  %v3535_v12 = vpack.c.bf16 %v1280_v7, %v1276_v6  ;;  %v1275_v13 = vld [vmem:[%s5479_s10 + $0x280] sm:$0xff]  ;;  %v1277_v15 = vld [vmem:[%s5479_s10 + $0x290] sm:$0xff] }
 0x14a   : > { %3522 = vmatpush1.bf16.msra.mxu0 %v3521_v38  ;;  %v1279_v14 = vld [vmem:[%s5479_s10 + $0x2a0] sm:$0xff]  ;;  %v3635_v16 = vpack.c.bf16 %v1282_v9, %v1278_v8  ;;  %v1281_v17 = vld [vmem:[%s5479_s10 + $0x2b0] sm:$0xff]  ;;  %v1284_v18 = vld [vmem:[%s5479_s10 + $0x2c8] sm:$0xff] }
 0x14b   : > { %3622 = vmatpush1.bf16.msra.mxu1 %v3621_v39  ;;  %3524 = vmatprep.subr.bf16.mxu0 %v3523_v40  ;;  %v1288_v19 = vld [vmem:[%s5479_s10 + $0x2e8] sm:$0xff]  ;;  %v1286_v20 = vld [vmem:[%s5479_s10 + $0x2d8] sm:$0xff]  ;;  %v3537_v22 = vpack.c.bf16 %v1279_v14, %v1275_v13  ;;  %v1283_v23 = vld [vmem:[%s5479_s10 + $0x2c0] sm:$0xff]  ;;  %v3637_v24 = vpack.c.bf16 %v1281_v17, %v1277_v15 }
 0x14c   : > { %3624 = vmatprep.subr.bf16.mxu1 %v3623_v44  ;;  %v1290_v21 = vld [vmem:[%s5479_s10 + $0x2f8] sm:$0xff]  ;;  %v3539_v25 = vpack.c.bf16 %v1288_v19, %v1284_v18  ;;  %v1287_v26 = vld [vmem:[%s5479_s10 + $0x2e0] sm:$0xff]  ;;  %v1285_v27 = vld [vmem:[%s5479_s10 + $0x2d0] sm:$0xff] }
 0x14d   : > { %v1289_v28 = vld [vmem:[%s5479_s10 + $0x2f0] sm:$0xff]  ;;  %v3639_v29 = vpack.c.bf16 %v1290_v21, %v1286_v20  ;;  %v1292_v30 = vld [vmem:[%s5479_s10 + $0x308] sm:$0xff]  ;;  %v1294_v33 = vld [vmem:[%s5479_s10 + $0x318] sm:$0xff]  ;;  %v3541_v35 = vpack.c.bf16 %v1287_v26, %v1283_v23 }
 0x14e   : > { %3526 = vmatpush1.bf16.msra.mxu0 %v3525_v50  ;;  %v1296_v31 = vld [vmem:[%s5479_s10 + $0x328] sm:$0xff]  ;;  %v1298_v34 = vld [vmem:[%s5479_s10 + $0x338] sm:$0xff]  ;;  %v3641_v36 = vpack.c.bf16 %v1289_v28, %v1285_v27  ;;  %v1291_v38 = vld [vmem:[%s5479_s10 + $0x300] sm:$0xff] }
 0x14f   : > { %3626 = vmatpush1.bf16.msra.mxu1 %v3625_v51  ;;  %3528 = vmatprep.subr.bf16.mxu0 %v3527_v52  ;;  %v5598_v32 = vld [vmem:[%s6528_s0 + $0x8] sm:$0xff]  ;;  %v3543_v37 = vpack.c.bf16 %v1296_v31, %v1292_v30  ;;  %v1295_v39 = vld [vmem:[%s5479_s10 + $0x320] sm:$0xff]  ;;  %v1293_v40 = vld [vmem:[%s5479_s10 + $0x310] sm:$0xff]  ;;  %v3643_v41 = vpack.c.bf16 %v1298_v34, %v1294_v33 }
 0x150   : > { %3628 = vmatprep.subr.bf16.mxu1 %v3627_v56  ;;  %1466 = vmatprep.mubr.f32.mxu0 %v5598_v32  ;;  %v1297_v42 = vld [vmem:[%s5479_s10 + $0x330] sm:$0xff]  ;;  %v1300_v43 = vld [vmem:[%s5479_s10 + $0x348] sm:$0xff]  ;;  %v1302_v45 = vld [vmem:[%s5479_s10 + $0x358] sm:$0xff]  ;;  %v3545_v47 = vpack.c.bf16 %v1295_v39, %v1291_v38 }
 0x151   : > { %1620 = vmatprep.mubr.f32.mxu1 %v5598_v32  ;;  %v1304_v44 = vld [vmem:[%s5479_s10 + $0x368] sm:$0xff]  ;;  %v1306_v46 = vld [vmem:[%s5479_s10 + $0x378] sm:$0xff]  ;;  %v3645_v48 = vpack.c.bf16 %v1297_v42, %v1293_v40  ;;  %v1299_v50 = vld [vmem:[%s5479_s10 + $0x340] sm:$0xff] }
 0x152   : > { %3530 = vmatpush1.bf16.msra.mxu0 %v3529_v62  ;;  %v3547_v49 = vpack.c.bf16 %v1304_v44, %v1300_v43  ;;  %v1303_v51 = vld [vmem:[%s5479_s10 + $0x360] sm:$0xff]  ;;  %v1301_v52 = vld [vmem:[%s5479_s10 + $0x350] sm:$0xff]  ;;  %v3647_v53 = vpack.c.bf16 %v1306_v46, %v1302_v45  ;;  %v1308_v55 = vld [vmem:[%s5479_s10 + $0x388] sm:$0xff] }
 0x153   : > { %3630 = vmatpush1.bf16.msra.mxu1 %v3629_v63  ;;  %3532 = vmatprep.subr.bf16.mxu0 %v3531_v0  ;;  %v1305_v54 = vld [vmem:[%s5479_s10 + $0x370] sm:$0xff]  ;;  %v1312_v56 = vld [vmem:[%s5479_s10 + $0x3a8] sm:$0xff]  ;;  %v1310_v57 = vld [vmem:[%s5479_s10 + $0x398] sm:$0xff]  ;;  %v3549_v59 = vpack.c.bf16 %v1303_v51, %v1299_v50 }
 0x154   : > { %3632 = vmatprep.subr.bf16.mxu1 %v3631_v4  ;;  %v1314_v58 = vld [vmem:[%s5479_s10 + $0x3b8] sm:$0xff]  ;;  %v3649_v60 = vpack.c.bf16 %v1305_v54, %v1301_v52  ;;  %v3551_v61 = vpack.c.bf16 %v1312_v56, %v1308_v55  ;;  %v1307_v62 = vld [vmem:[%s5479_s10 + $0x380] sm:$0xff]  ;;  %v1309_v0 = vld [vmem:[%s5479_s10 + $0x390] sm:$0xff] }
 0x155   : > { %v1311_v63 = vld [vmem:[%s5479_s10 + $0x3a0] sm:$0xff]  ;;  %v3651_v1 = vpack.c.bf16 %v1314_v58, %v1310_v57  ;;  %v1313_v2 = vld [vmem:[%s5479_s10 + $0x3b0] sm:$0xff]  ;;  %v1316_v3 = vld [vmem:[%s5479_s10 + $0x3c8] sm:$0xff] }
 0x156   : > { %3534 = vmatpush1.bf16.msra.mxu0 %v3533_v10  ;;  %v1320_v4 = vld [vmem:[%s5479_s10 + $0x3e8] sm:$0xff]  ;;  %v1318_v5 = vld [vmem:[%s5479_s10 + $0x3d8] sm:$0xff]  ;;  %v3553_v7 = vpack.c.bf16 %v1311_v63, %v1307_v62  ;;  %v3653_v8 = vpack.c.bf16 %v1313_v2, %v1309_v0  ;;  %v1315_v10 = vld [vmem:[%s5479_s10 + $0x3c0] sm:$0xff] }
 0x157   : > { %3634 = vmatpush1.bf16.msra.mxu1 %v3633_v11  ;;  %3536 = vmatprep.subr.bf16.mxu0 %v3535_v12  ;;  %v1322_v6 = vld [vmem:[%s5479_s10 + $0x3f8] sm:$0xff]  ;;  %v3555_v9 = vpack.c.bf16 %v1320_v4, %v1316_v3  ;;  %v1319_v11 = vld [vmem:[%s5479_s10 + $0x3e0] sm:$0xff]  ;;  %v1317_v12 = vld [vmem:[%s5479_s10 + $0x3d0] sm:$0xff] }
 0x158   : > { %3636 = vmatprep.subr.bf16.mxu1 %v3635_v16  ;;  %v3655_v13 = vpack.c.bf16 %v1322_v6, %v1318_v5  ;;  %v1321_v14 = vld [vmem:[%s5479_s10 + $0x3f0] sm:$0xff]  ;;  %v1324_v15 = vld [vmem:[%s5479_s10 + $0x408] sm:$0xff]  ;;  %v1326_v17 = vld [vmem:[%s5479_s10 + $0x418] sm:$0xff]  ;;  %v3557_v19 = vpack.c.bf16 %v1319_v11, %v1315_v10 }
 0x159   : > { %v1328_v16 = vld [vmem:[%s5479_s10 + $0x428] sm:$0xff]  ;;  %v1330_v18 = vld [vmem:[%s5479_s10 + $0x438] sm:$0xff]  ;;  %v3657_v20 = vpack.c.bf16 %v1321_v14, %v1317_v12  ;;  %v1327_v23 = vld [vmem:[%s5479_s10 + $0x420] sm:$0xff] }
 0x15a   : > { %3538 = vmatpush1.bf16.msra.mxu0 %v3537_v22  ;;  %v3559_v21 = vpack.c.bf16 %v1328_v16, %v1324_v15  ;;  %v1323_v22 = vld [vmem:[%s5479_s10 + $0x400] sm:$0xff]  ;;  %v1329_v26 = vld [vmem:[%s5479_s10 + $0x430] sm:$0xff]  ;;  %v1332_v27 = vld [vmem:[%s5479_s10 + $0x448] sm:$0xff] }
 0x15b   : > { %3638 = vmatpush1.bf16.msra.mxu1 %v3637_v24  ;;  %3540 = vmatprep.subr.bf16.mxu0 %v3539_v25  ;;  %v1325_v24 = vld [vmem:[%s5479_s10 + $0x410] sm:$0xff]  ;;  %v3659_v25 = vpack.c.bf16 %v1330_v18, %v1326_v17  ;;  %v1336_v28 = vld [vmem:[%s5479_s10 + $0x468] sm:$0xff]  ;;  %v1338_v30 = vld [vmem:[%s5479_s10 + $0x478] sm:$0xff]  ;;  %v3561_v33 = vpack.c.bf16 %v1327_v23, %v1323_v22 }
 0x15c   : > { %3640 = vmatprep.subr.bf16.mxu1 %v3639_v29  ;;  %v1334_v29 = vld [vmem:[%s5479_s10 + $0x458] sm:$0xff]  ;;  %v5647_v31 = vld [vmem:[%s6528_s0] sm:$0xff]  ;;  %v3661_v34 = vpack.c.bf16 %v1329_v26, %v1325_v24  ;;  %v1333_v38 = vld [vmem:[%s5479_s10 + $0x450] sm:$0xff] }
 0x15d   : > { %v3663_v39 = vpack.c.bf16 %v1338_v30, %v1334_v29  ;;  %v1337_v40 = vld [vmem:[%s5479_s10 + $0x470] sm:$0xff]  ;;  %v1344_v42 = vld [vmem:[%s5479_s10 + $0x4a8] sm:$0xff]  ;;  %v1342_v43 = vld [vmem:[%s5479_s10 + $0x498] sm:$0xff] }
 0x15e   : > { %3542 = vmatpush1.bf16.msra.mxu0 %v3541_v35  ;;  %v3563_v35 = vpack.c.bf16 %v1336_v28, %v1332_v27  ;;  %v1346_v44 = vld [vmem:[%s5479_s10 + $0x4b8] sm:$0xff]  ;;  %v5661_v45 = vld [vmem:[%s6528_s0 + $0x28] sm:$0xff]  ;;  %v1339_v50 = vld [vmem:[%s5479_s10 + $0x480] sm:$0xff] }
 0x15f   : > { %3642 = vmatpush1.bf16.msra.mxu1 %v3641_v36  ;;  %3544 = vmatprep.subr.bf16.mxu0 %v3543_v37  ;;  %v1331_v36 = vld [vmem:[%s5479_s10 + $0x440] sm:$0xff]  ;;  %v1341_v52 = vld [vmem:[%s5479_s10 + $0x490] sm:$0xff]  ;;  %v1348_v55 = vld [vmem:[%s5479_s10 + $0x4c8] sm:$0xff] }
 0x160   : > { %3644 = vmatprep.subr.bf16.mxu1 %v3643_v41  ;;  %v1335_v37 = vld [vmem:[%s5479_s10 + $0x460] sm:$0xff]  ;;  %v1340_v41 = vld [vmem:[%s5479_s10 + $0x488] sm:$0xff]  ;;  %v1345_v54 = vld [vmem:[%s5479_s10 + $0x4b0] sm:$0xff] }
 0x161   : > { %v3565_v46 = vpack.c.bf16 %v1335_v37, %v1331_v36  ;;  %v1343_v51 = vld [vmem:[%s5479_s10 + $0x4a0] sm:$0xff]  ;;  %v1352_v56 = vld [vmem:[%s5479_s10 + $0x4e8] sm:$0xff]  ;;  %v1350_v57 = vld [vmem:[%s5479_s10 + $0x4d8] sm:$0xff] }
 0x162   : > { %3546 = vmatpush1.bf16.msra.mxu0 %v3545_v47  ;;  %v5667_v47 = vld [vmem:[%s6528_s0 + $0x20] sm:$0xff]  ;;  %v1354_v58 = vld [vmem:[%s5479_s10 + $0x4f8] sm:$0xff]  ;;  %v3571_v62 = vpack.c.bf16 %v1352_v56, %v1348_v55  ;;  %v1353_v3 = vld [vmem:[%s5479_s10 + $0x4f0] sm:$0xff] }
 0x163   : > { %3646 = vmatpush1.bf16.msra.mxu1 %v3645_v48  ;;  %3548 = vmatprep.subr.bf16.mxu0 %v3547_v49  ;;  %v3665_v48 = vpack.c.bf16 %v1337_v40, %v1333_v38  ;;  %v3567_v49 = vpack.c.bf16 %v1344_v42, %v1340_v41  ;;  %v1347_v63 = vld [vmem:[%s5479_s10 + $0x4c0] sm:$0xff]  ;;  %v3671_v2 = vpack.c.bf16 %v1354_v58, %v1350_v57  ;;  %v1356_v4 = vld [vmem:[%s5479_s10 + $0x508] sm:$0xff]  ;;  %v1358_v6 = vld [vmem:[%s5479_s10 + $0x518] sm:$0xff] }
 0x164   : > { %3648 = vmatprep.subr.bf16.mxu1 %v3647_v53  ;;  %v3667_v53 = vpack.c.bf16 %v1346_v44, %v1342_v43  ;;  %v1351_v0 = vld [vmem:[%s5479_s10 + $0x4e0] sm:$0xff]  ;;  %v1360_v5 = vld [vmem:[%s5479_s10 + $0x528] sm:$0xff]  ;;  %v1361_v15 = vld [vmem:[%s5479_s10 + $0x530] sm:$0xff] }
 0x165   : > { %v3575_v10 = vpack.c.bf16 %v1360_v5, %v1356_v4  ;;  %v1355_v11 = vld [vmem:[%s5479_s10 + $0x500] sm:$0xff]  ;;  %v1364_v16 = vld [vmem:[%s5479_s10 + $0x548] sm:$0xff]  ;;  %v1366_v18 = vld [vmem:[%s5479_s10 + $0x558] sm:$0xff] }
 0x166   : > { %3550 = vmatpush1.bf16.msra.mxu0 %v3549_v59  ;;  %v5683_v59 = vld [vmem:[%s6528_s0 + $0x18] sm:$0xff]  ;;  %v1359_v12 = vld [vmem:[%s5479_s10 + $0x520] sm:$0xff]  ;;  %v1368_v17 = vld [vmem:[%s5479_s10 + $0x568] sm:$0xff] }
 0x167   : > { %3650 = vmatpush1.bf16.msra.mxu1 %v3649_v60  ;;  %3552 = vmatprep.subr.bf16.mxu0 %v3551_v61  ;;  %v3569_v60 = vpack.c.bf16 %v1343_v51, %v1339_v50  ;;  %v3669_v61 = vpack.c.bf16 %v1345_v54, %v1341_v52  ;;  %v3579_v22 = vpack.c.bf16 %v1368_v17, %v1364_v16  ;;  %v1363_v23 = vld [vmem:[%s5479_s10 + $0x540] sm:$0xff]  ;;  %v1369_v27 = vld [vmem:[%s5479_s10 + $0x570] sm:$0xff]  ;;  %v1372_v28 = vld [vmem:[%s5479_s10 + $0x588] sm:$0xff] }
 0x168   : > { %3652 = vmatprep.subr.bf16.mxu1 %v3651_v1  ;;  %v1349_v1 = vld [vmem:[%s5479_s10 + $0x4d0] sm:$0xff]  ;;  %v1367_v24 = vld [vmem:[%s5479_s10 + $0x560] sm:$0xff]  ;;  %v1376_v29 = vld [vmem:[%s5479_s10 + $0x5a8] sm:$0xff] }
 0x169   : > { %v1374_v30 = vld [vmem:[%s5479_s10 + $0x598] sm:$0xff]  ;;  %v3583_v36 = vpack.c.bf16 %v1376_v29, %v1372_v28  ;;  %v1371_v37 = vld [vmem:[%s5479_s10 + $0x580] sm:$0xff]  ;;  %v1377_v41 = vld [vmem:[%s5479_s10 + $0x5b0] sm:$0xff] }
 0x16a   : > { %3554 = vmatpush1.bf16.msra.mxu0 %v3553_v7  ;;  %v1362_v7 = vld [vmem:[%s5479_s10 + $0x538] sm:$0xff]  ;;  %v1375_v38 = vld [vmem:[%s5479_s10 + $0x5a0] sm:$0xff]  ;;  %v1380_v42 = vld [vmem:[%s5479_s10 + $0x5c8] sm:$0xff] }
 0x16b   : > { %3654 = vmatpush1.bf16.msra.mxu1 %v3653_v8  ;;  %3556 = vmatprep.subr.bf16.mxu0 %v3555_v9  ;;  %v3573_v8 = vpack.c.bf16 %v1351_v0, %v1347_v63  ;;  %v3673_v9 = vpack.c.bf16 %v1353_v3, %v1349_v1  ;;  %v3675_v14 = vpack.c.bf16 %v1362_v7, %v1358_v6  ;;  %v1384_v43 = vld [vmem:[%s5479_s10 + $0x5e8] sm:$0xff]  ;;  %v1382_v44 = vld [vmem:[%s5479_s10 + $0x5d8] sm:$0xff]  ;;  %v1379_v51 = vld [vmem:[%s5479_s10 + $0x5c0] sm:$0xff] }
 0x16c   : > { %3656 = vmatprep.subr.bf16.mxu1 %v3655_v13  ;;  %v1357_v13 = vld [vmem:[%s5479_s10 + $0x510] sm:$0xff]  ;;  %v3587_v50 = vpack.c.bf16 %v1384_v43, %v1380_v42  ;;  %v1383_v52 = vld [vmem:[%s5479_s10 + $0x5e0] sm:$0xff]  ;;  %v1388_v56 = vld [vmem:[%s5479_s10 + $0x608] sm:$0xff] }
 0x16d   : > { %v1385_v55 = vld [vmem:[%s5479_s10 + $0x5f0] sm:$0xff]  ;;  %v1392_v57 = vld [vmem:[%s5479_s10 + $0x628] sm:$0xff]  ;;  %v1390_v58 = vld [vmem:[%s5479_s10 + $0x618] sm:$0xff] }
 0x16e   : > { %3558 = vmatpush1.bf16.msra.mxu0 %v3557_v19  ;;  %v1370_v19 = vld [vmem:[%s5479_s10 + $0x578] sm:$0xff]  ;;  %v3591_v63 = vpack.c.bf16 %v1392_v57, %v1388_v56  ;;  %v1387_v0 = vld [vmem:[%s5479_s10 + $0x600] sm:$0xff]  ;;  %v1393_v4 = vld [vmem:[%s5479_s10 + $0x630] sm:$0xff] }
 0x16f   : > { %3658 = vmatpush1.bf16.msra.mxu1 %v3657_v20  ;;  %3560 = vmatprep.subr.bf16.mxu0 %v3559_v21  ;;  %v3577_v20 = vpack.c.bf16 %v1359_v12, %v1355_v11  ;;  %v3677_v21 = vpack.c.bf16 %v1361_v15, %v1357_v13  ;;  %v3679_v26 = vpack.c.bf16 %v1370_v19, %v1366_v18  ;;  %v1391_v1 = vld [vmem:[%s5479_s10 + $0x620] sm:$0xff]  ;;  %v1711_v5 = vld [vmem:[%s5483_s13 + $0x8] sm:$0xff]  ;;  %v1713_v7 = vld [vmem:[%s5483_s13 + $0x18] sm:$0xff] }
 0x170   : > { %3660 = vmatprep.subr.bf16.mxu1 %v3659_v25  ;;  %v1365_v25 = vld [vmem:[%s5479_s10 + $0x550] sm:$0xff]  ;;  %v1715_v6 = vld [vmem:[%s5483_s13 + $0x28] sm:$0xff]  ;;  %v1710_v12 = vld [vmem:[%s5483_s13] sm:$0xff] }
 0x171   : > { %1467 = vmatmul.mubr.f32.vlgmr.msra.gmra.mrb[0].mxu0 %v5647_v31  ;;  %v3695_v11 = vpack.c.bf16 %v1715_v6, %v1711_v5  ;;  %v1714_v13 = vld [vmem:[%s5483_s13 + $0x20] sm:$0xff]  ;;  %v1712_v15 = vld [vmem:[%s5483_s13 + $0x10] sm:$0xff]  ;;  %v1719_v18 = vld [vmem:[%s5483_s13 + $0x48] sm:$0xff] }
 0x172   : > { %3562 = vmatpush1.bf16.msra.mxu0 %v3561_v33  ;;  %1621 = vmatmul.mubr.f32.vlgmr.msra.gmra.mrb[0].mxu1 %v5647_v31  ;;  %v1378_v33 = vld [vmem:[%s5479_s10 + $0x5b8] sm:$0xff]  ;;  %v1716_v16 = vld [vmem:[%s5483_s13 + $0x30] sm:$0xff]  ;;  %v1723_v19 = vld [vmem:[%s5483_s13 + $0x68] sm:$0xff] }
 0x173   : > { %3662 = vmatpush1.bf16.msra.mxu1 %v3661_v34  ;;  %3564 = vmatprep.subr.bf16.mxu0 %v3563_v35  ;;  %v3581_v34 = vpack.c.bf16 %v1367_v24, %v1363_v23  ;;  %v3681_v35 = vpack.c.bf16 %v1369_v27, %v1365_v25  ;;  %v3683_v40 = vpack.c.bf16 %v1378_v33, %v1374_v30  ;;  %v5745_v17 = vld [vmem:[%s6528_s0 + $0x10] sm:$0xff]  ;;  %v1725_v23 = vld [vmem:[%s5483_s13 + $0x78] sm:$0xff]  ;;  %v1718_v25 = vld [vmem:[%s5483_s13 + $0x40] sm:$0xff] }
 0x174   : > { %3664 = vmatprep.subr.bf16.mxu1 %v3663_v39  ;;  %1472 = vmatprep.mubr.f32.mxu0 %v5661_v45  ;;  %v1373_v39 = vld [vmem:[%s5479_s10 + $0x590] sm:$0xff]  ;;  %v3797_v24 = vpack.c.bf16 %v1716_v16, %v1712_v15  ;;  %v3699_v28 = vpack.c.bf16 %v1723_v19, %v1719_v18  ;;  %v1727_v30 = vld [vmem:[%s5483_s13 + $0x88] sm:$0xff]  ;;  %v1730_v42 = vld [vmem:[%s5483_s13 + $0xa0] sm:$0xff] }
 0x175   : > { %1626 = vmatprep.mubr.f32.mxu1 %v5661_v45  ;;  %1473 = vmatmul.mubr.f32.gmra.mrb[2].mxu0 %v5667_v47  ;;  %v1720_v27 = vld [vmem:[%s5483_s13 + $0x50] sm:$0xff]  ;;  %v1731_v33 = vld [vmem:[%s5483_s13 + $0xa8] sm:$0xff]  ;;  %v1738_v56 = vld [vmem:[%s5483_s13 + $0xe0] sm:$0xff] }
 0x176   : > { %3566 = vmatpush1.bf16.msra.mxu0 %v3565_v46  ;;  %1627 = vmatmul.mubr.f32.gmra.mrb[2].mxu1 %v5667_v47  ;;  %v1386_v46 = vld [vmem:[%s5479_s10 + $0x5f8] sm:$0xff]  ;;  %v1724_v29 = vld [vmem:[%s5483_s13 + $0x70] sm:$0xff]  ;;  %v1746_v5 = vld [vmem:[%s5483_s13 + $0x120] sm:$0xff] }
 0x177   : > { %3666 = vmatpush1.bf16.msra.mxu1 %v3665_v48  ;;  %3568 = vmatprep.subr.bf16.mxu0 %v3567_v49  ;;  %v3585_v48 = vpack.c.bf16 %v1375_v38, %v1371_v37  ;;  %v3685_v49 = vpack.c.bf16 %v1377_v41, %v1373_v39  ;;  %v3687_v54 = vpack.c.bf16 %v1386_v46, %v1382_v44  ;;  %v5769_v37 = vld [vmem:[%s6528_s0 + $0x30] sm:$0xff]  ;;  %v1726_v41 = vld [vmem:[%s5483_s13 + $0x80] sm:$0xff] }
 0x178   : > { %3668 = vmatprep.subr.bf16.mxu1 %v3667_v53  ;;  %3469 = vmatprep.mubr.msk.f32.mxu0 %vm1395_vm0, %v5683_v59  ;;  %v1381_v53 = vld [vmem:[%s5479_s10 + $0x5d0] sm:$0xff]  ;;  %v3801_v39 = vpack.c.bf16 %v1724_v29, %v1720_v27  ;;  %v1750_v15 = vld [vmem:[%s5483_s13 + $0x140] sm:$0xff] }
 0x179   : > { %3471 = vmatprep.mubr.msk.f32.mxu1 %vm1395_vm0, %v5683_v59  ;;  %v1728_v43 = vld [vmem:[%s5483_s13 + $0x90] sm:$0xff]  ;;  %v1754_v16 = vld [vmem:[%s5483_s13 + $0x160] sm:$0xff] }
 0x17a   : > { %3570 = vmatpush1.bf16.msra.mxu0 %v3569_v60  ;;  %v1394_v60 = vld [vmem:[%s5479_s10 + $0x638] sm:$0xff]  ;;  %v1732_v46 = vld [vmem:[%s5483_s13 + $0xb0] sm:$0xff]  ;;  %v1758_v29 = vld [vmem:[%s5483_s13 + $0x180] sm:$0xff] }
 0x17b   : > { %3670 = vmatpush1.bf16.msra.mxu1 %v3669_v61  ;;  %3572 = vmatprep.subr.bf16.mxu0 %v3571_v62  ;;  %v3589_v61 = vpack.c.bf16 %v1383_v52, %v1379_v51  ;;  %v3689_v62 = vpack.c.bf16 %v1385_v55, %v1381_v53  ;;  %v3691_v3 = vpack.c.bf16 %v1394_v60, %v1390_v58  ;;  %v1741_v51 = vld [vmem:[%s5483_s13 + $0xf8] sm:$0xff]  ;;  %v1734_v55 = vld [vmem:[%s5483_s13 + $0xc0] sm:$0xff]  ;;  %v1736_v57 = vld [vmem:[%s5483_s13 + $0xd0] sm:$0xff] }
 0x17c   : > { %3672 = vmatprep.subr.bf16.mxu1 %v3671_v2  ;;  %v1389_v2 = vld [vmem:[%s5479_s10 + $0x610] sm:$0xff]  ;;  %v3705_v52 = vpack.c.bf16 %v1730_v42, %v1726_v41  ;;  %v3805_v53 = vpack.c.bf16 %v1732_v46, %v1728_v43  ;;  %v1770_v46 = vld [vmem:[%s5483_s13 + $0x1e0] sm:$0xff]  ;;  %s6218_s10 = scalar_lea.vmem [#allocation7], %s5476_s18 }
 0x17d   : > { %v1740_v60 = vld [vmem:[%s5483_s13 + $0xf0] sm:$0xff] }
 0x17e   : > { %3574 = vmatpush1.bf16.msra.mxu0 %v3573_v8  ;;  %v1717_v8 = vld [vmem:[%s5483_s13 + $0x38] sm:$0xff]  ;;  %v1744_v6 = vld [vmem:[%s5483_s13 + $0x110] sm:$0xff] }
 0x17f   : > { %3674 = vmatpush1.bf16.msra.mxu1 %v3673_v9  ;;  %3576 = vmatprep.subr.bf16.mxu0 %v3575_v10  ;;  %v3593_v9 = vpack.c.bf16 %v1391_v1, %v1387_v0  ;;  %v3693_v10 = vpack.c.bf16 %v1393_v4, %v1389_v2  ;;  %v1749_v0 = vld [vmem:[%s5483_s13 + $0x138] sm:$0xff]  ;;  %v3709_v1 = vpack.c.bf16 %v1738_v56, %v1734_v55  ;;  %v1742_v4 = vld [vmem:[%s5483_s13 + $0x100] sm:$0xff]  ;;  %v1752_v18 = vld [vmem:[%s5483_s13 + $0x150] sm:$0xff] }
 0x180   : > { %3676 = vmatprep.subr.bf16.mxu1 %v3675_v14  ;;  %v3795_v14 = vpack.c.bf16 %v1717_v8, %v1713_v7  ;;  %v3809_v2 = vpack.c.bf16 %v1740_v60, %v1736_v57  ;;  %v1748_v8 = vld [vmem:[%s5483_s13 + $0x130] sm:$0xff]  ;;  %v1778_v60 = vld [vmem:[%s5483_s13 + $0x220] sm:$0xff] }
 0x182   : > { %3578 = vmatpush1.bf16.msra.mxu0 %v3577_v20  ;;  %v3697_v20 = vpack.c.bf16 %v1714_v13, %v1710_v12  ;;  %v3713_v12 = vpack.c.bf16 %v1746_v5, %v1742_v4  ;;  %v3813_v13 = vpack.c.bf16 %v1748_v8, %v1744_v6  ;;  %v1786_v8 = vld [vmem:[%s5483_s13 + $0x260] sm:$0xff] }
 0x183   : > { %3678 = vmatpush1.bf16.msra.mxu1 %v3677_v21  ;;  %3580 = vmatprep.subr.bf16.mxu0 %v3579_v22  ;;  %v5752_v21 = vld [vmem:[%s6528_s0 + $0x38] sm:$0xff] }
 0x184   : > { %3680 = vmatprep.subr.bf16.mxu1 %v3679_v26  ;;  %v1721_v22 = vld [vmem:[%s5483_s13 + $0x58] sm:$0xff]  ;;  %v1722_v26 = vld [vmem:[%s5483_s13 + $0x60] sm:$0xff] }
 0x185   : > { %v3701_v38 = vpack.c.bf16 %v1722_v26, %v1718_v25  ;;  %v1765_v25 = vld [vmem:[%s5483_s13 + $0x1b8] sm:$0xff]  ;;  %v3717_v26 = vpack.c.bf16 %v1754_v16, %v1750_v15 }
 0x186   : > { %3582 = vmatpush1.bf16.msra.mxu0 %v3581_v34  ;;  %v3799_v34 = vpack.c.bf16 %v1725_v23, %v1721_v22  ;;  %v1759_v22 = vld [vmem:[%s5483_s13 + $0x188] sm:$0xff] }
 0x187   : > { %3682 = vmatpush1.bf16.msra.mxu1 %v3681_v35  ;;  %3584 = vmatprep.subr.bf16.mxu0 %v3583_v36  ;;  %v1729_v35 = vld [vmem:[%s5483_s13 + $0x98] sm:$0xff]  ;;  %v1763_v23 = vld [vmem:[%s5483_s13 + $0x1a8] sm:$0xff] }
 0x188   : > { %3684 = vmatprep.subr.bf16.mxu1 %v3683_v40  ;;  %v1733_v36 = vld [vmem:[%s5483_s13 + $0xb8] sm:$0xff]  ;;  %v3703_v40 = vpack.c.bf16 %v1731_v33, %v1727_v30  ;;  %v1762_v30 = vld [vmem:[%s5483_s13 + $0x1a0] sm:$0xff]  ;;  %v1760_v33 = vld [vmem:[%s5483_s13 + $0x190] sm:$0xff] }
 0x189   : > { %v3803_v44 = vpack.c.bf16 %v1733_v36, %v1729_v35  ;;  %v1764_v35 = vld [vmem:[%s5483_s13 + $0x1b0] sm:$0xff]  ;;  %v1767_v36 = vld [vmem:[%s5483_s13 + $0x1c8] sm:$0xff]  ;;  %v3721_v41 = vpack.c.bf16 %v1762_v30, %v1758_v29 }
 0x18a   : > { %3586 = vmatpush1.bf16.msra.mxu0 %v3585_v48  ;;  %v1735_v48 = vld [vmem:[%s5483_s13 + $0xc8] sm:$0xff]  ;;  %v3821_v42 = vpack.c.bf16 %v1764_v35, %v1760_v33  ;;  %v1802_v35 = vld [vmem:[%s5483_s13 + $0x2e0] sm:$0xff] }
 0x18b   : > { %3686 = vmatpush1.bf16.msra.mxu1 %v3685_v49  ;;  %3588 = vmatprep.subr.bf16.mxu0 %v3587_v50  ;;  %v1739_v49 = vld [vmem:[%s5483_s13 + $0xe8] sm:$0xff]  ;;  %v1737_v50 = vld [vmem:[%s5483_s13 + $0xd8] sm:$0xff] }
 0x18c   : > { %3688 = vmatprep.subr.bf16.mxu1 %v3687_v54  ;;  %v3707_v54 = vpack.c.bf16 %v1739_v49, %v1735_v48  ;;  %v3807_v58 = vpack.c.bf16 %v1741_v51, %v1737_v50  ;;  %v1768_v48 = vld [vmem:[%s5483_s13 + $0x1d0] sm:$0xff]  ;;  %v1775_v51 = vld [vmem:[%s5483_s13 + $0x208] sm:$0xff] }
 0x18d   : > { %v1772_v50 = vld [vmem:[%s5483_s13 + $0x1f0] sm:$0xff] }
 0x18e   : > { %3590 = vmatpush1.bf16.msra.mxu0 %v3589_v61  ;;  %v1743_v61 = vld [vmem:[%s5483_s13 + $0x108] sm:$0xff]  ;;  %v3825_v56 = vpack.c.bf16 %v1772_v50, %v1768_v48  ;;  %v1810_v50 = vld [vmem:[%s5483_s13 + $0x320] sm:$0xff] }
 0x18f   : > { %3690 = vmatpush1.bf16.msra.mxu1 %v3689_v62  ;;  %3592 = vmatprep.subr.bf16.mxu0 %v3591_v63  ;;  %v1747_v62 = vld [vmem:[%s5483_s13 + $0x128] sm:$0xff]  ;;  %v1745_v63 = vld [vmem:[%s5483_s13 + $0x118] sm:$0xff] }
 0x190   : > { %3692 = vmatprep.subr.bf16.mxu1 %v3691_v3  ;;  %v3711_v3 = vpack.c.bf16 %v1747_v62, %v1743_v61  ;;  %v3811_v7 = vpack.c.bf16 %v1749_v0, %v1745_v63  ;;  %v1776_v61 = vld [vmem:[%s5483_s13 + $0x210] sm:$0xff]  ;;  %v1783_v0 = vld [vmem:[%s5483_s13 + $0x248] sm:$0xff] }
 0x191   : > { %v1780_v63 = vld [vmem:[%s5483_s13 + $0x230] sm:$0xff] }
 0x192   : > { %3594 = vmatpush1.bf16.msra.mxu0 %v3593_v9  ;;  %v1751_v9 = vld [vmem:[%s5483_s13 + $0x148] sm:$0xff]  ;;  %v3829_v5 = vpack.c.bf16 %v1780_v63, %v1776_v61  ;;  %v1818_v63 = vld [vmem:[%s5483_s13 + $0x360] sm:$0xff] }
 0x193   : > { %3694 = vmatpush1.bf16.msra.mxu1 %v3693_v10  ;;  %3696 = vmatprep.subr.bf16.mxu0 %v3695_v11  ;;  %v1753_v10 = vld [vmem:[%s5483_s13 + $0x158] sm:$0xff] }
 0x194   : > { %3796 = vmatprep.subr.bf16.mxu1 %v3795_v14  ;;  %v1757_v11 = vld [vmem:[%s5483_s13 + $0x178] sm:$0xff] }
 0x195   : > { %1544 = vmatmul.mubr.f32.vlgmr.msra.gmra.mrb[0].mxu0 %v5745_v17  ;;  %v3815_v19 = vpack.c.bf16 %v1757_v11, %v1753_v10  ;;  %v1788_v10 = vld [vmem:[%s5483_s13 + $0x270] sm:$0xff]  ;;  %v1791_v11 = vld [vmem:[%s5483_s13 + $0x288] sm:$0xff] }
 0x196   : > { %1698 = vmatmul.mubr.f32.vlgmr.msra.gmra.mrb[0].mxu1 %v5745_v17  ;;  %3698 = vmatpush1.bf16.msra.mxu0 %v3697_v20  ;;  %v1756_v20 = vld [vmem:[%s5483_s13 + $0x170] sm:$0xff] }
 0x197   : > { %3798 = vmatpush1.bf16.msra.mxu1 %v3797_v24  ;;  %3470 = vmatprep.mubr.msk.f32.mxu0 %vm1395_vm0, %v5752_v21  ;;  %v1761_v24 = vld [vmem:[%s5483_s13 + $0x198] sm:$0xff]  ;;  %v3817_v27 = vpack.c.bf16 %v1756_v20, %v1752_v18  ;;  %v1794_v20 = vld [vmem:[%s5483_s13 + $0x2a0] sm:$0xff] }
 0x198   : > { %3472 = vmatprep.mubr.msk.f32.mxu1 %vm1395_vm0, %v5752_v21  ;;  %3700 = vmatprep.subr.bf16.mxu0 %v3699_v28  ;;  %v3719_v28 = vpack.c.bf16 %v1763_v23, %v1759_v22  ;;  %v1792_v22 = vld [vmem:[%s5483_s13 + $0x290] sm:$0xff] }
 0x199   : > { %1550 = vmatmul.mubr.f32.gmra.mrb[2].mxu0 %v5769_v37  ;;  %3800 = vmatprep.subr.bf16.mxu1 %v3799_v34  ;;  %v3819_v34 = vpack.c.bf16 %v1765_v25, %v1761_v24  ;;  %v1796_v24 = vld [vmem:[%s5483_s13 + $0x2b0] sm:$0xff]  ;;  %v1799_v25 = vld [vmem:[%s5483_s13 + $0x2c8] sm:$0xff] }
 0x19a   : > { %1704 = vmatmul.mubr.f32.gmra.mrb[2].mxu1 %v5769_v37  ;;  %3702 = vmatpush1.bf16.msra.mxu0 %v3701_v38  ;;  %v1771_v38 = vld [vmem:[%s5483_s13 + $0x1e8] sm:$0xff]  ;;  %v3837_v30 = vpack.c.bf16 %v1796_v24, %v1792_v22  ;;  %v1834_v24 = vld [vmem:[%s5483_s13 + $0x3e0] sm:$0xff] }
 0x19b   : > { %3802 = vmatpush1.bf16.msra.mxu1 %v3801_v39  ;;  %3704 = vmatprep.subr.bf16.mxu0 %v3703_v40  ;;  %v1769_v39 = vld [vmem:[%s5483_s13 + $0x1d8] sm:$0xff]  ;;  %v3723_v43 = vpack.c.bf16 %v1771_v38, %v1767_v36  ;;  %v1800_v36 = vld [vmem:[%s5483_s13 + $0x2d0] sm:$0xff] }
 0x19c   : > { %3804 = vmatprep.subr.bf16.mxu1 %v3803_v44  ;;  %1974 = vmatprep.mubr.f32.mxu0 %v5598_v32  ;;  %v1773_v40 = vld [vmem:[%s5483_s13 + $0x1f8] sm:$0xff]  ;;  %v1766_v44 = vld [vmem:[%s5483_s13 + $0x1c0] sm:$0xff] }
 0x19d   : > { %2128 = vmatprep.mubr.f32.mxu1 %v5598_v32  ;;  %v1755_v32 = vld [vmem:[%s5483_s13 + $0x168] sm:$0xff]  ;;  %v3823_v49 = vpack.c.bf16 %v1773_v40, %v1769_v39  ;;  %v3725_v55 = vpack.c.bf16 %v1770_v46, %v1766_v44  ;;  %v1804_v39 = vld [vmem:[%s5483_s13 + $0x2f0] sm:$0xff] }
 0x19e   : > { %3706 = vmatpush1.bf16.msra.mxu0 %v3705_v52  ;;  %v3715_v14 = vpack.c.bf16 %v1755_v32, %v1751_v9  ;;  %v1779_v52 = vld [vmem:[%s5483_s13 + $0x228] sm:$0xff]  ;;  %v1784_v9 = vld [vmem:[%s5483_s13 + $0x250] sm:$0xff]  ;;  %v3841_v46 = vpack.c.bf16 %v1804_v39, %v1800_v36  ;;  %v1842_v39 = vld [vmem:[%s5483_s13 + $0x420] sm:$0xff] }
 0x19f   : > { %3806 = vmatpush1.bf16.msra.mxu1 %v3805_v53  ;;  %3708 = vmatprep.subr.bf16.mxu0 %v3707_v54  ;;  %v1777_v53 = vld [vmem:[%s5483_s13 + $0x218] sm:$0xff]  ;;  %v3727_v57 = vpack.c.bf16 %v1779_v52, %v1775_v51  ;;  %v3833_v16 = vpack.c.bf16 %v1788_v10, %v1784_v9  ;;  %v1807_v40 = vld [vmem:[%s5483_s13 + $0x308] sm:$0xff]  ;;  %v1808_v51 = vld [vmem:[%s5483_s13 + $0x310] sm:$0xff] }
 0x1a0   : > { %3808 = vmatprep.subr.bf16.mxu1 %v3807_v58  ;;  %v1781_v54 = vld [vmem:[%s5483_s13 + $0x238] sm:$0xff]  ;;  %v1774_v58 = vld [vmem:[%s5483_s13 + $0x200] sm:$0xff] }
 0x1a1   : > { %v3827_v62 = vpack.c.bf16 %v1781_v54, %v1777_v53  ;;  %v3729_v4 = vpack.c.bf16 %v1778_v60, %v1774_v58  ;;  %v1812_v53 = vld [vmem:[%s5483_s13 + $0x330] sm:$0xff]  ;;  %v1815_v54 = vld [vmem:[%s5483_s13 + $0x348] sm:$0xff]  ;;  %v1826_v10 = vld [vmem:[%s5483_s13 + $0x3a0] sm:$0xff] }
 0x1a2   : > { %3710 = vmatpush1.bf16.msra.mxu0 %v3709_v1  ;;  %v1787_v1 = vld [vmem:[%s5483_s13 + $0x268] sm:$0xff]  ;;  %v3845_v60 = vpack.c.bf16 %v1812_v53, %v1808_v51  ;;  %v1850_v53 = vld [vmem:[%s5483_s13 + $0x460] sm:$0xff] }
 0x1a3   : > { %3810 = vmatpush1.bf16.msra.mxu1 %v3809_v2  ;;  %3712 = vmatprep.subr.bf16.mxu0 %v3711_v3  ;;  %v1785_v2 = vld [vmem:[%s5483_s13 + $0x258] sm:$0xff]  ;;  %v3731_v6 = vpack.c.bf16 %v1787_v1, %v1783_v0  ;;  %v1816_v0 = vld [vmem:[%s5483_s13 + $0x350] sm:$0xff] }
 0x1a4   : > { %3812 = vmatprep.subr.bf16.mxu1 %v3811_v7  ;;  %v1789_v3 = vld [vmem:[%s5483_s13 + $0x278] sm:$0xff]  ;;  %v1782_v7 = vld [vmem:[%s5483_s13 + $0x240] sm:$0xff] }
 0x1a5   : > { %v3831_v32 = vpack.c.bf16 %v1789_v3, %v1785_v2  ;;  %v3733_v15 = vpack.c.bf16 %v1786_v8, %v1782_v7  ;;  %v1820_v2 = vld [vmem:[%s5483_s13 + $0x370] sm:$0xff]  ;;  %v1823_v3 = vld [vmem:[%s5483_s13 + $0x388] sm:$0xff] }
 0x1a6   : > { %3714 = vmatpush1.bf16.msra.mxu0 %v3713_v12  ;;  %v1795_v12 = vld [vmem:[%s5483_s13 + $0x2a8] sm:$0xff]  ;;  %v3849_v8 = vpack.c.bf16 %v1820_v2, %v1816_v0  ;;  %v1858_v2 = vld [vmem:[%s5483_s13 + $0x4a0] sm:$0xff] }
 0x1a7   : > { %3814 = vmatpush1.bf16.msra.mxu1 %v3813_v13  ;;  %3716 = vmatprep.subr.bf16.mxu0 %v3715_v14  ;;  %v1793_v13 = vld [vmem:[%s5483_s13 + $0x298] sm:$0xff]  ;;  %v3735_v18 = vpack.c.bf16 %v1795_v12, %v1791_v11  ;;  %v1824_v11 = vld [vmem:[%s5483_s13 + $0x390] sm:$0xff] }
 0x1a8   : > { %3816 = vmatprep.subr.bf16.mxu1 %v3815_v19  ;;  %v1797_v14 = vld [vmem:[%s5483_s13 + $0x2b8] sm:$0xff]  ;;  %v1790_v19 = vld [vmem:[%s5483_s13 + $0x280] sm:$0xff] }
 0x1a9   : > { %v3835_v23 = vpack.c.bf16 %v1797_v14, %v1793_v13  ;;  %v3737_v29 = vpack.c.bf16 %v1794_v20, %v1790_v19  ;;  %v1828_v13 = vld [vmem:[%s5483_s13 + $0x3b0] sm:$0xff]  ;;  %v1831_v14 = vld [vmem:[%s5483_s13 + $0x3c8] sm:$0xff] }
 0x1aa   : > { %3718 = vmatpush1.bf16.msra.mxu0 %v3717_v26  ;;  %v1803_v26 = vld [vmem:[%s5483_s13 + $0x2e8] sm:$0xff]  ;;  %v3853_v20 = vpack.c.bf16 %v1828_v13, %v1824_v11  ;;  %v1862_v11 = vld [vmem:[%s5483_s13 + $0x4c0] sm:$0xff]  ;;  %v1864_v13 = vld [vmem:[%s5483_s13 + $0x4d0] sm:$0xff] }
 0x1ab   : > { %3818 = vmatpush1.bf16.msra.mxu1 %v3817_v27  ;;  %3720 = vmatprep.subr.bf16.mxu0 %v3719_v28  ;;  %v1801_v27 = vld [vmem:[%s5483_s13 + $0x2d8] sm:$0xff]  ;;  %v3739_v33 = vpack.c.bf16 %v1803_v26, %v1799_v25  ;;  %v1832_v25 = vld [vmem:[%s5483_s13 + $0x3d0] sm:$0xff] }
 0x1ac   : > { %3820 = vmatprep.subr.bf16.mxu1 %v3819_v34  ;;  %v1805_v28 = vld [vmem:[%s5483_s13 + $0x2f8] sm:$0xff]  ;;  %v1798_v34 = vld [vmem:[%s5483_s13 + $0x2c0] sm:$0xff] }
 0x1ad   : > { %v3839_v38 = vpack.c.bf16 %v1805_v28, %v1801_v27  ;;  %v3741_v44 = vpack.c.bf16 %v1802_v35, %v1798_v34  ;;  %v1836_v27 = vld [vmem:[%s5483_s13 + $0x3f0] sm:$0xff]  ;;  %v1839_v28 = vld [vmem:[%s5483_s13 + $0x408] sm:$0xff] }
 0x1ae   : > { %3722 = vmatpush1.bf16.msra.mxu0 %v3721_v41  ;;  %v1811_v41 = vld [vmem:[%s5483_s13 + $0x328] sm:$0xff]  ;;  %v3857_v35 = vpack.c.bf16 %v1836_v27, %v1832_v25  ;;  %v1872_v25 = vld [vmem:[%s5483_s13 + $0x510] sm:$0xff] }
 0x1af   : > { %3822 = vmatpush1.bf16.msra.mxu1 %v3821_v42  ;;  %3724 = vmatprep.subr.bf16.mxu0 %v3723_v43  ;;  %v1809_v42 = vld [vmem:[%s5483_s13 + $0x318] sm:$0xff]  ;;  %v3743_v48 = vpack.c.bf16 %v1811_v41, %v1807_v40  ;;  %v1840_v40 = vld [vmem:[%s5483_s13 + $0x410] sm:$0xff] }
 0x1b0   : > { %3824 = vmatprep.subr.bf16.mxu1 %v3823_v49  ;;  %v1813_v43 = vld [vmem:[%s5483_s13 + $0x338] sm:$0xff]  ;;  %v1806_v49 = vld [vmem:[%s5483_s13 + $0x300] sm:$0xff]  ;;  %v1876_v27 = vld [vmem:[%s5483_s13 + $0x530] sm:$0xff] }
 0x1b1   : > { %v3843_v52 = vpack.c.bf16 %v1813_v43, %v1809_v42  ;;  %v3745_v58 = vpack.c.bf16 %v1810_v50, %v1806_v49  ;;  %v1844_v42 = vld [vmem:[%s5483_s13 + $0x430] sm:$0xff]  ;;  %v1847_v43 = vld [vmem:[%s5483_s13 + $0x448] sm:$0xff] }
 0x1b2   : > { %3726 = vmatpush1.bf16.msra.mxu0 %v3725_v55  ;;  %v1819_v55 = vld [vmem:[%s5483_s13 + $0x368] sm:$0xff]  ;;  %v3861_v50 = vpack.c.bf16 %v1844_v42, %v1840_v40 }
 0x1b3   : > { %3826 = vmatpush1.bf16.msra.mxu1 %v3825_v56  ;;  %3728 = vmatprep.subr.bf16.mxu0 %v3727_v57  ;;  %v1817_v56 = vld [vmem:[%s5483_s13 + $0x358] sm:$0xff]  ;;  %v3747_v61 = vpack.c.bf16 %v1819_v55, %v1815_v54  ;;  %v1848_v54 = vld [vmem:[%s5483_s13 + $0x450] sm:$0xff]  ;;  %v1887_v42 = vld [vmem:[%s5483_s13 + $0x588] sm:$0xff] }
 0x1b4   : > { %3828 = vmatprep.subr.bf16.mxu1 %v3827_v62  ;;  %v1821_v57 = vld [vmem:[%s5483_s13 + $0x378] sm:$0xff]  ;;  %v1814_v62 = vld [vmem:[%s5483_s13 + $0x340] sm:$0xff] }
 0x1b5   : > { %v3847_v1 = vpack.c.bf16 %v1821_v57, %v1817_v56  ;;  %v3749_v7 = vpack.c.bf16 %v1818_v63, %v1814_v62  ;;  %v1852_v56 = vld [vmem:[%s5483_s13 + $0x470] sm:$0xff]  ;;  %v1855_v57 = vld [vmem:[%s5483_s13 + $0x488] sm:$0xff] }
 0x1b6   : > { %3730 = vmatpush1.bf16.msra.mxu0 %v3729_v4  ;;  %v1827_v4 = vld [vmem:[%s5483_s13 + $0x3a8] sm:$0xff]  ;;  %v3865_v63 = vpack.c.bf16 %v1852_v56, %v1848_v54 }
 0x1b7   : > { %3830 = vmatpush1.bf16.msra.mxu1 %v3829_v5  ;;  %3732 = vmatprep.subr.bf16.mxu0 %v3731_v6  ;;  %v1825_v5 = vld [vmem:[%s5483_s13 + $0x398] sm:$0xff]  ;;  %v3751_v9 = vpack.c.bf16 %v1827_v4, %v1823_v3  ;;  %v1856_v3 = vld [vmem:[%s5483_s13 + $0x490] sm:$0xff]  ;;  %v1895_v56 = vld [vmem:[%s5483_s13 + $0x5c8] sm:$0xff] }
 0x1b8   : > { %3832 = vmatprep.subr.bf16.mxu1 %v3831_v32  ;;  %v1829_v6 = vld [vmem:[%s5483_s13 + $0x3b8] sm:$0xff]  ;;  %v1822_v32 = vld [vmem:[%s5483_s13 + $0x380] sm:$0xff] }
 0x1b9   : > { %v3851_v12 = vpack.c.bf16 %v1829_v6, %v1825_v5  ;;  %v3753_v19 = vpack.c.bf16 %v1826_v10, %v1822_v32  ;;  %v1860_v5 = vld [vmem:[%s5483_s13 + $0x4b0] sm:$0xff]  ;;  %v1863_v6 = vld [vmem:[%s5483_s13 + $0x4c8] sm:$0xff] }
 0x1ba   : > { %3734 = vmatpush1.bf16.msra.mxu0 %v3733_v15  ;;  %v1835_v15 = vld [vmem:[%s5483_s13 + $0x3e8] sm:$0xff]  ;;  %v3869_v32 = vpack.c.bf16 %v1860_v5, %v1856_v3 }
 0x1bb   : > { %3834 = vmatpush1.bf16.msra.mxu1 %v3833_v16  ;;  %3736 = vmatprep.subr.bf16.mxu0 %v3735_v18  ;;  %v1833_v16 = vld [vmem:[%s5483_s13 + $0x3d8] sm:$0xff]  ;;  %v3755_v22 = vpack.c.bf16 %v1835_v15, %v1831_v14  ;;  %v1868_v14 = vld [vmem:[%s5483_s13 + $0x4f0] sm:$0xff]  ;;  %v1871_v15 = vld [vmem:[%s5483_s13 + $0x508] sm:$0xff] }
 0x1bc   : > { %3836 = vmatprep.subr.bf16.mxu1 %v3835_v23  ;;  %v1837_v18 = vld [vmem:[%s5483_s13 + $0x3f8] sm:$0xff]  ;;  %v1830_v23 = vld [vmem:[%s5483_s13 + $0x3c0] sm:$0xff]  ;;  %v1903_v5 = vld [vmem:[%s5483_s13 + $0x608] sm:$0xff] }
 0x1bd   : > { %v3855_v26 = vpack.c.bf16 %v1837_v18, %v1833_v16  ;;  %v3757_v34 = vpack.c.bf16 %v1834_v24, %v1830_v23  ;;  %v1875_v16 = vld [vmem:[%s5483_s13 + $0x528] sm:$0xff]  ;;  %v1877_v18 = vld [vmem:[%s5483_s13 + $0x538] sm:$0xff]  ;;  %v1870_v23 = vld [vmem:[%s5483_s13 + $0x500] sm:$0xff] }
 0x1be   : > { %3738 = vmatpush1.bf16.msra.mxu0 %v3737_v29  ;;  %v1843_v29 = vld [vmem:[%s5483_s13 + $0x428] sm:$0xff]  ;;  %v1874_v24 = vld [vmem:[%s5483_s13 + $0x520] sm:$0xff] }
 0x1bf   : > { %3838 = vmatpush1.bf16.msra.mxu1 %v3837_v30  ;;  %3740 = vmatprep.subr.bf16.mxu0 %v3739_v33  ;;  %v1841_v30 = vld [vmem:[%s5483_s13 + $0x418] sm:$0xff]  ;;  %v3759_v36 = vpack.c.bf16 %v1843_v29, %v1839_v28  ;;  %v1879_v28 = vld [vmem:[%s5483_s13 + $0x548] sm:$0xff] }
 0x1c0   : > { %3840 = vmatprep.subr.bf16.mxu1 %v3839_v38  ;;  %v1845_v33 = vld [vmem:[%s5483_s13 + $0x438] sm:$0xff]  ;;  %v1838_v38 = vld [vmem:[%s5483_s13 + $0x400] sm:$0xff] }
 0x1c1   : > { %v3859_v41 = vpack.c.bf16 %v1845_v33, %v1841_v30  ;;  %v3761_v49 = vpack.c.bf16 %v1842_v39, %v1838_v38  ;;  %v1881_v29 = vld [vmem:[%s5483_s13 + $0x558] sm:$0xff]  ;;  %v3777_v33 = vpack.c.bf16 %v1874_v24, %v1870_v23  ;;  %v1882_v38 = vld [vmem:[%s5483_s13 + $0x560] sm:$0xff]  ;;  %v1880_v39 = vld [vmem:[%s5483_s13 + $0x550] sm:$0xff] }
 0x1c2   : > { %3742 = vmatpush1.bf16.msra.mxu0 %v3741_v44  ;;  %v1851_v44 = vld [vmem:[%s5483_s13 + $0x468] sm:$0xff]  ;;  %v1885_v30 = vld [vmem:[%s5483_s13 + $0x578] sm:$0xff]  ;;  %v2230_v23 = vld [vmem:[%s5491_s19 + $0x20] sm:$0xff] }
 0x1c3   : > { %3842 = vmatpush1.bf16.msra.mxu1 %v3841_v46  ;;  %3744 = vmatprep.subr.bf16.mxu0 %v3743_v48  ;;  %v1849_v46 = vld [vmem:[%s5483_s13 + $0x458] sm:$0xff]  ;;  %v3763_v51 = vpack.c.bf16 %v1851_v44, %v1847_v43  ;;  %v3879_v40 = vpack.c.bf16 %v1885_v30, %v1881_v29  ;;  %v1891_v43 = vld [vmem:[%s5483_s13 + $0x5a8] sm:$0xff] }
 0x1c4   : > { %3844 = vmatprep.subr.bf16.mxu1 %v3843_v52  ;;  %v1853_v48 = vld [vmem:[%s5483_s13 + $0x478] sm:$0xff]  ;;  %v1846_v52 = vld [vmem:[%s5483_s13 + $0x440] sm:$0xff] }
 0x1c5   : > { %v3863_v55 = vpack.c.bf16 %v1853_v48, %v1849_v46  ;;  %v3765_v62 = vpack.c.bf16 %v1850_v53, %v1846_v52  ;;  %v1889_v44 = vld [vmem:[%s5483_s13 + $0x598] sm:$0xff]  ;;  %v1890_v52 = vld [vmem:[%s5483_s13 + $0x5a0] sm:$0xff]  ;;  %v1888_v53 = vld [vmem:[%s5483_s13 + $0x590] sm:$0xff] }
 0x1c6   : > { %3746 = vmatpush1.bf16.msra.mxu0 %v3745_v58  ;;  %v1859_v58 = vld [vmem:[%s5483_s13 + $0x4a8] sm:$0xff]  ;;  %v1893_v46 = vld [vmem:[%s5483_s13 + $0x5b8] sm:$0xff] }
 0x1c7   : > { %3846 = vmatpush1.bf16.msra.mxu1 %v3845_v60  ;;  %3748 = vmatprep.subr.bf16.mxu0 %v3747_v61  ;;  %v1857_v60 = vld [vmem:[%s5483_s13 + $0x498] sm:$0xff]  ;;  %v3767_v0 = vpack.c.bf16 %v1859_v58, %v1855_v57  ;;  %v3883_v54 = vpack.c.bf16 %v1893_v46, %v1889_v44  ;;  %v1899_v57 = vld [vmem:[%s5483_s13 + $0x5e8] sm:$0xff] }
 0x1c8   : > { %3848 = vmatprep.subr.bf16.mxu1 %v3847_v1  ;;  %v1861_v61 = vld [vmem:[%s5483_s13 + $0x4b8] sm:$0xff]  ;;  %v1854_v1 = vld [vmem:[%s5483_s13 + $0x480] sm:$0xff] }
 0x1c9   : > { %v3867_v4 = vpack.c.bf16 %v1861_v61, %v1857_v60  ;;  %v1897_v58 = vld [vmem:[%s5483_s13 + $0x5d8] sm:$0xff] }
 0x1ca   : > { %3750 = vmatpush1.bf16.msra.mxu0 %v3749_v7  ;;  %v1867_v7 = vld [vmem:[%s5483_s13 + $0x4e8] sm:$0xff]  ;;  %v1901_v60 = vld [vmem:[%s5483_s13 + $0x5f8] sm:$0xff] }
 0x1cb   : > { %3850 = vmatpush1.bf16.msra.mxu1 %v3849_v8  ;;  %3752 = vmatprep.subr.bf16.mxu0 %v3751_v9  ;;  %v1869_v8 = vld [vmem:[%s5483_s13 + $0x4f8] sm:$0xff]  ;;  %v3769_v9 = vpack.c.bf16 %v1858_v2, %v1854_v1  ;;  %v3771_v10 = vpack.c.bf16 %v1867_v7, %v1863_v6  ;;  %v1898_v1 = vld [vmem:[%s5483_s13 + $0x5e0] sm:$0xff]  ;;  %v1896_v2 = vld [vmem:[%s5483_s13 + $0x5d0] sm:$0xff]  ;;  %v3887_v3 = vpack.c.bf16 %v1901_v60, %v1897_v58 }
 0x1cc   : > { %3852 = vmatprep.subr.bf16.mxu1 %v3851_v12  ;;  %v1866_v12 = vld [vmem:[%s5483_s13 + $0x4e0] sm:$0xff]  ;;  %v1907_v6 = vld [vmem:[%s5483_s13 + $0x628] sm:$0xff]  ;;  %v1905_v7 = vld [vmem:[%s5483_s13 + $0x618] sm:$0xff] }
 0x1cd   : > { %v2237_v29 = vld [vmem:[%s5491_s19 + $0x58] sm:$0xff] }
 0x1ce   : > { %3754 = vmatpush1.bf16.msra.mxu0 %v3753_v19  ;;  %v3773_v19 = vpack.c.bf16 %v1866_v12, %v1862_v11  ;;  %v1906_v11 = vld [vmem:[%s5483_s13 + $0x620] sm:$0xff]  ;;  %v1904_v12 = vld [vmem:[%s5483_s13 + $0x610] sm:$0xff]  ;;  %v2241_v30 = vld [vmem:[%s5491_s19 + $0x78] sm:$0xff] }
 0x1cf   : > { %3854 = vmatpush1.bf16.msra.mxu1 %v3853_v20  ;;  %3756 = vmatprep.subr.bf16.mxu0 %v3755_v22  ;;  %v3873_v20 = vpack.c.bf16 %v1868_v14, %v1864_v13  ;;  %v3775_v22 = vpack.c.bf16 %v1875_v16, %v1871_v15  ;;  %v2227_v14 = vld [vmem:[%s5491_s19 + $0x8] sm:$0xff]  ;;  %v2229_v16 = vld [vmem:[%s5491_s19 + $0x18] sm:$0xff] }
 0x1d0   : > { %3856 = vmatprep.subr.bf16.mxu1 %v3855_v26  ;;  %v2231_v15 = vld [vmem:[%s5491_s19 + $0x28] sm:$0xff]  ;;  %v2249_v44 = vld [vmem:[%s5491_s19 + $0xb8] sm:$0xff] }
 0x1d2   : > { %3758 = vmatpush1.bf16.msra.mxu0 %v3757_v34  ;;  %v3877_v34 = vpack.c.bf16 %v1876_v27, %v1872_v25  ;;  %v2228_v25 = vld [vmem:[%s5491_s19 + $0x10] sm:$0xff]  ;;  %v2235_v27 = vld [vmem:[%s5491_s19 + $0x48] sm:$0xff] }
 0x1d3   : > { %3858 = vmatpush1.bf16.msra.mxu1 %v3857_v35  ;;  %3760 = vmatprep.subr.bf16.mxu0 %v3759_v36  ;;  %v1878_v36 = vld [vmem:[%s5483_s13 + $0x540] sm:$0xff] }
 0x1d4   : > { %3860 = vmatprep.subr.bf16.mxu1 %v3859_v41  ;;  %v1884_v41 = vld [vmem:[%s5483_s13 + $0x570] sm:$0xff]  ;;  %v3781_v48 = vpack.c.bf16 %v1882_v38, %v1878_v36 }
 0x1d5   : > { %1975 = vmatmul.mubr.f32.vlgmr.msra.gmra.mrb[4].mxu0 %v5647_v31  ;;  %v2236_v36 = vld [vmem:[%s5491_s19 + $0x50] sm:$0xff] }
 0x1d6   : > { %3762 = vmatpush1.bf16.msra.mxu0 %v3761_v49  ;;  %2129 = vmatmul.mubr.f32.vlgmr.msra.gmra.mrb[4].mxu1 %v5647_v31  ;;  %v1865_v31 = vld [vmem:[%s5483_s13 + $0x4d8] sm:$0xff]  ;;  %v3881_v49 = vpack.c.bf16 %v1884_v41, %v1880_v39  ;;  %v2240_v39 = vld [vmem:[%s5491_s19 + $0x70] sm:$0xff]  ;;  %v2247_v41 = vld [vmem:[%s5491_s19 + $0xa8] sm:$0xff] }
 0x1d7   : > { %3862 = vmatpush1.bf16.msra.mxu1 %v3861_v50  ;;  %3764 = vmatprep.subr.bf16.mxu0 %v3763_v51  ;;  %v3783_v50 = vpack.c.bf16 %v1891_v43, %v1887_v42  ;;  %v1886_v51 = vld [vmem:[%s5483_s13 + $0x580] sm:$0xff]  ;;  %v3999_v42 = vpack.c.bf16 %v2241_v30, %v2237_v29  ;;  %v2245_v43 = vld [vmem:[%s5491_s19 + $0x98] sm:$0xff] }
 0x1d8   : > { %3864 = vmatprep.subr.bf16.mxu1 %v3863_v55  ;;  %1980 = vmatprep.mubr.f32.mxu0 %v5661_v45  ;;  %v1892_v55 = vld [vmem:[%s5483_s13 + $0x5b0] sm:$0xff]  ;;  %v3785_v61 = vpack.c.bf16 %v1890_v52, %v1886_v51  ;;  %v2246_v51 = vld [vmem:[%s5491_s19 + $0xa0] sm:$0xff] }
 0x1d9   : > { %2134 = vmatprep.mubr.f32.mxu1 %v5661_v45  ;;  %1981 = vmatmul.mubr.f32.gmra.mrb[6].mxu0 %v5667_v47  ;;  %v3871_v45 = vpack.c.bf16 %v1869_v8, %v1865_v31  ;;  %v1909_v31 = vld [vmem:[%s5483_s13 + $0x638] sm:$0xff]  ;;  %v2244_v52 = vld [vmem:[%s5491_s19 + $0x90] sm:$0xff]  ;;  %v2274_v30 = vld [vmem:[%s5491_s19 + $0x180] sm:$0xff] }
 0x1da   : > { %3766 = vmatpush1.bf16.msra.mxu0 %v3765_v62  ;;  %2135 = vmatmul.mubr.f32.gmra.mrb[6].mxu1 %v5667_v47  ;;  %v1873_v47 = vld [vmem:[%s5483_s13 + $0x518] sm:$0xff]  ;;  %v3885_v62 = vpack.c.bf16 %v1892_v55, %v1888_v53  ;;  %v3891_v13 = vpack.c.bf16 %v1909_v31, %v1905_v7  ;;  %v4003_v53 = vpack.c.bf16 %v2249_v44, %v2245_v43  ;;  %v2255_v55 = vld [vmem:[%s5491_s19 + $0xe8] sm:$0xff] }
 0x1db   : > { %3866 = vmatpush1.bf16.msra.mxu1 %v3865_v63  ;;  %3768 = vmatprep.subr.bf16.mxu0 %v3767_v0  ;;  %v3875_v26 = vpack.c.bf16 %v1877_v18, %v1873_v47  ;;  %v3787_v63 = vpack.c.bf16 %v1899_v57, %v1895_v56  ;;  %v1894_v0 = vld [vmem:[%s5483_s13 + $0x5c0] sm:$0xff]  ;;  %v2233_v47 = vld [vmem:[%s5491_s19 + $0x38] sm:$0xff] }
 0x1dc   : > { %3868 = vmatprep.subr.bf16.mxu1 %v3867_v4  ;;  %3473 = vmatprep.mubr.msk.f32.mxu0 %vm1395_vm0, %v5683_v59  ;;  %v1900_v4 = vld [vmem:[%s5483_s13 + $0x5f0] sm:$0xff]  ;;  %v3789_v8 = vpack.c.bf16 %v1898_v1, %v1894_v0  ;;  %v3995_v24 = vpack.c.bf16 %v2233_v47, %v2229_v16  ;;  %v2253_v56 = vld [vmem:[%s5491_s19 + $0xd8] sm:$0xff] }
 0x1dd   : > { %3475 = vmatprep.mubr.msk.f32.mxu1 %vm1395_vm0, %v5683_v59  ;;  %v1883_v59 = vld [vmem:[%s5483_s13 + $0x568] sm:$0xff]  ;;  %v2257_v57 = vld [vmem:[%s5491_s19 + $0xf8] sm:$0xff]  ;;  %v2256_v1 = vld [vmem:[%s5491_s19 + $0xf0] sm:$0xff] }
 0x1de   : > { %3770 = vmatpush1.bf16.msra.mxu0 %v3769_v9  ;;  %v3779_v35 = vpack.c.bf16 %v1883_v59, %v1879_v28  ;;  %v3889_v9 = vpack.c.bf16 %v1900_v4, %v1896_v2  ;;  %v2239_v28 = vld [vmem:[%s5491_s19 + $0x68] sm:$0xff]  ;;  %v4007_v0 = vpack.c.bf16 %v2257_v57, %v2253_v56  ;;  %v2261_v4 = vld [vmem:[%s5491_s19 + $0x118] sm:$0xff] }
 0x1df   : > { %3870 = vmatpush1.bf16.msra.mxu1 %v3869_v32  ;;  %3772 = vmatprep.subr.bf16.mxu0 %v3771_v10  ;;  %v3791_v32 = vpack.c.bf16 %v1907_v6, %v1903_v5  ;;  %v1902_v10 = vld [vmem:[%s5483_s13 + $0x600] sm:$0xff]  ;;  %v3899_v38 = vpack.c.bf16 %v2239_v28, %v2235_v27  ;;  %v2259_v2 = vld [vmem:[%s5491_s19 + $0x108] sm:$0xff]  ;;  %v2265_v5 = vld [vmem:[%s5491_s19 + $0x138] sm:$0xff] }
 0x1e0   : > { %3872 = vmatprep.subr.bf16.mxu1 %v3871_v45  ;;  %v1908_v45 = vld [vmem:[%s5483_s13 + $0x630] sm:$0xff]  ;;  %v3793_v18 = vpack.c.bf16 %v1906_v11, %v1902_v10  ;;  %v4011_v10 = vpack.c.bf16 %v2265_v5, %v2261_v4  ;;  %v2281_v27 = vld [vmem:[%s5491_s19 + $0x1b8] sm:$0xff] }
 0x1e1   : > { %v2264_v11 = vld [vmem:[%s5491_s19 + $0x130] sm:$0xff] }
 0x1e2   : > { %3774 = vmatpush1.bf16.msra.mxu0 %v3773_v19  ;;  %v3893_v19 = vpack.c.bf16 %v1908_v45, %v1904_v12  ;;  %v2267_v12 = vld [vmem:[%s5491_s19 + $0x148] sm:$0xff]  ;;  %v2269_v45 = vld [vmem:[%s5491_s19 + $0x158] sm:$0xff] }
 0x1e3   : > { %3874 = vmatpush1.bf16.msra.mxu1 %v3873_v20  ;;  %3776 = vmatprep.subr.bf16.mxu0 %v3775_v22  ;;  %v3895_v20 = vpack.c.bf16 %v2231_v15, %v2227_v14  ;;  %v2226_v22 = vld [vmem:[%s5491_s19] sm:$0xff]  ;;  %v2273_v14 = vld [vmem:[%s5491_s19 + $0x178] sm:$0xff] }
 0x1e4   : > { %3876 = vmatprep.subr.bf16.mxu1 %v3875_v26  ;;  %v2232_v26 = vld [vmem:[%s5491_s19 + $0x30] sm:$0xff]  ;;  %v3897_v59 = vpack.c.bf16 %v2230_v23, %v2226_v22  ;;  %v4015_v22 = vpack.c.bf16 %v2273_v14, %v2269_v45 }
 0x1e5   : > { %v2272_v23 = vld [vmem:[%s5491_s19 + $0x170] sm:$0xff] }
 0x1e6   : > { %3778 = vmatpush1.bf16.msra.mxu0 %v3777_v33  ;;  %v3997_v33 = vpack.c.bf16 %v2232_v26, %v2228_v25  ;;  %v2279_v25 = vld [vmem:[%s5491_s19 + $0x1a8] sm:$0xff]  ;;  %v2277_v26 = vld [vmem:[%s5491_s19 + $0x198] sm:$0xff] }
 0x1e7   : > { %3878 = vmatpush1.bf16.msra.mxu1 %v3877_v34  ;;  %3780 = vmatprep.subr.bf16.mxu0 %v3779_v35  ;;  %v2234_v34 = vld [vmem:[%s5491_s19 + $0x40] sm:$0xff] }
 0x1e8   : > { %3880 = vmatprep.subr.bf16.mxu1 %v3879_v40  ;;  %v2238_v35 = vld [vmem:[%s5491_s19 + $0x60] sm:$0xff]  ;;  %v2243_v40 = vld [vmem:[%s5491_s19 + $0x88] sm:$0xff] }
 0x1e9   : > { %v3901_v46 = vpack.c.bf16 %v2238_v35, %v2234_v34  ;;  %v2276_v34 = vld [vmem:[%s5491_s19 + $0x190] sm:$0xff]  ;;  %v4019_v35 = vpack.c.bf16 %v2281_v27, %v2277_v26 }
 0x1ea   : > { %3782 = vmatpush1.bf16.msra.mxu0 %v3781_v48  ;;  %v4001_v48 = vpack.c.bf16 %v2240_v39, %v2236_v36  ;;  %v2280_v36 = vld [vmem:[%s5491_s19 + $0x1b0] sm:$0xff]  ;;  %v2287_v39 = vld [vmem:[%s5491_s19 + $0x1e8] sm:$0xff] }
 0x1eb   : > { %3882 = vmatpush1.bf16.msra.mxu1 %v3881_v49  ;;  %3784 = vmatprep.subr.bf16.mxu0 %v3783_v50  ;;  %v3903_v49 = vpack.c.bf16 %v2247_v41, %v2243_v40  ;;  %v2242_v50 = vld [vmem:[%s5491_s19 + $0x80] sm:$0xff]  ;;  %v2285_v40 = vld [vmem:[%s5491_s19 + $0x1d8] sm:$0xff]  ;;  %v4021_v43 = vpack.c.bf16 %v2280_v36, %v2276_v34  ;;  %v2323_v34 = vld [vmem:[%s5491_s19 + $0x308] sm:$0xff] }
 0x1ec   : > { %3884 = vmatprep.subr.bf16.mxu1 %v3883_v54  ;;  %v2251_v54 = vld [vmem:[%s5491_s19 + $0xc8] sm:$0xff]  ;;  %v2289_v41 = vld [vmem:[%s5491_s19 + $0x1f8] sm:$0xff] }
 0x1ed   : > { %v3907_v60 = vpack.c.bf16 %v2255_v55, %v2251_v54  ;;  %v2297_v54 = vld [vmem:[%s5491_s19 + $0x238] sm:$0xff] }
 0x1ee   : > { %3786 = vmatpush1.bf16.msra.mxu0 %v3785_v61  ;;  %v2250_v61 = vld [vmem:[%s5491_s19 + $0xc0] sm:$0xff]  ;;  %v2325_v36 = vld [vmem:[%s5491_s19 + $0x318] sm:$0xff] }
 0x1ef   : > { %3886 = vmatpush1.bf16.msra.mxu1 %v3885_v62  ;;  %3788 = vmatprep.subr.bf16.mxu0 %v3787_v63  ;;  %v2254_v62 = vld [vmem:[%s5491_s19 + $0xe0] sm:$0xff]  ;;  %v2252_v63 = vld [vmem:[%s5491_s19 + $0xd0] sm:$0xff] }
 0x1f0   : > { %3888 = vmatprep.subr.bf16.mxu1 %v3887_v3  ;;  %v2263_v3 = vld [vmem:[%s5491_s19 + $0x128] sm:$0xff]  ;;  %v3909_v6 = vpack.c.bf16 %v2254_v62, %v2250_v61  ;;  %v4009_v7 = vpack.c.bf16 %v2256_v1, %v2252_v63  ;;  %v2296_v62 = vld [vmem:[%s5491_s19 + $0x230] sm:$0xff]  ;;  %v2301_v1 = vld [vmem:[%s5491_s19 + $0x258] sm:$0xff] }
 0x1f1   : > { %v3911_v31 = vpack.c.bf16 %v2263_v3, %v2259_v2  ;;  %v2299_v63 = vld [vmem:[%s5491_s19 + $0x248] sm:$0xff]  ;;  %v2305_v2 = vld [vmem:[%s5491_s19 + $0x278] sm:$0xff] }
 0x1f2   : > { %3790 = vmatpush1.bf16.msra.mxu0 %v3789_v8  ;;  %v2258_v8 = vld [vmem:[%s5491_s19 + $0x100] sm:$0xff] }
 0x1f3   : > { %3890 = vmatpush1.bf16.msra.mxu1 %v3889_v9  ;;  %3792 = vmatprep.subr.bf16.mxu0 %v3791_v32  ;;  %v2262_v9 = vld [vmem:[%s5491_s19 + $0x120] sm:$0xff]  ;;  %v2260_v32 = vld [vmem:[%s5491_s19 + $0x110] sm:$0xff] }
 0x1f4   : > { %3892 = vmatprep.subr.bf16.mxu1 %v3891_v13  ;;  %v2271_v13 = vld [vmem:[%s5491_s19 + $0x168] sm:$0xff]  ;;  %v3913_v15 = vpack.c.bf16 %v2262_v9, %v2258_v8  ;;  %v4013_v16 = vpack.c.bf16 %v2264_v11, %v2260_v32  ;;  %v4031_v8 = vpack.c.bf16 %v2305_v2, %v2301_v1  ;;  %v2304_v9 = vld [vmem:[%s5491_s19 + $0x270] sm:$0xff]  ;;  %v2309_v11 = vld [vmem:[%s5491_s19 + $0x298] sm:$0xff] }
 0x1f5   : > { %v3915_v47 = vpack.c.bf16 %v2271_v13, %v2267_v12  ;;  %v2307_v32 = vld [vmem:[%s5491_s19 + $0x288] sm:$0xff]  ;;  %v2313_v12 = vld [vmem:[%s5491_s19 + $0x2b8] sm:$0xff] }
 0x1f6   : > { %3794 = vmatpush1.bf16.msra.mxu0 %v3793_v18  ;;  %v2266_v18 = vld [vmem:[%s5491_s19 + $0x140] sm:$0xff] }
 0x1f7   : > { %3894 = vmatpush1.bf16.msra.mxu1 %v3893_v19  ;;  %3896 = vmatprep.subr.bf16.mxu0 %v3895_v20  ;;  %v2270_v19 = vld [vmem:[%s5491_s19 + $0x160] sm:$0xff]  ;;  %v2268_v20 = vld [vmem:[%s5491_s19 + $0x150] sm:$0xff] }
 0x1f8   : > { %3996 = vmatprep.subr.bf16.mxu1 %v3995_v24  ;;  %v2275_v24 = vld [vmem:[%s5491_s19 + $0x188] sm:$0xff]  ;;  %v3917_v28 = vpack.c.bf16 %v2270_v19, %v2266_v18  ;;  %v4035_v18 = vpack.c.bf16 %v2313_v12, %v2309_v11  ;;  %v2312_v19 = vld [vmem:[%s5491_s19 + $0x2b0] sm:$0xff] }
 0x1f9   : > { %2052 = vmatmul.mubr.f32.vlgmr.msra.gmra.mrb[4].mxu0 %v5745_v17  ;;  %v3919_v29 = vpack.c.bf16 %v2279_v25, %v2275_v24  ;;  %v2321_v24 = vld [vmem:[%s5491_s19 + $0x2f8] sm:$0xff] }
 0x1fa   : > { %2206 = vmatmul.mubr.f32.vlgmr.msra.gmra.mrb[4].mxu1 %v5745_v17  ;;  %3898 = vmatpush1.bf16.msra.mxu0 %v3897_v59  ;;  %v2248_v17 = vld [vmem:[%s5491_s19 + $0xb0] sm:$0xff]  ;;  %v4017_v59 = vpack.c.bf16 %v2272_v23, %v2268_v20  ;;  %v2315_v20 = vld [vmem:[%s5491_s19 + $0x2c8] sm:$0xff]  ;;  %v2317_v23 = vld [vmem:[%s5491_s19 + $0x2d8] sm:$0xff] }
 0x1fb   : > { %3998 = vmatpush1.bf16.msra.mxu1 %v3997_v33  ;;  %3474 = vmatprep.mubr.msk.f32.mxu0 %vm1395_vm0, %v5752_v21  ;;  %v4005_v58 = vpack.c.bf16 %v2248_v17, %v2244_v52  ;;  %v2278_v33 = vld [vmem:[%s5491_s19 + $0x1a0] sm:$0xff]  ;;  %v2291_v52 = vld [vmem:[%s5491_s19 + $0x208] sm:$0xff]  ;;  %v2293_v17 = vld [vmem:[%s5491_s19 + $0x218] sm:$0xff] }
 0x1fc   : > { %3476 = vmatprep.mubr.msk.f32.mxu1 %vm1395_vm0, %v5752_v21  ;;  %3900 = vmatprep.subr.bf16.mxu0 %v3899_v38  ;;  %v3905_v21 = vpack.c.bf16 %v2246_v51, %v2242_v50  ;;  %v2283_v38 = vld [vmem:[%s5491_s19 + $0x1c8] sm:$0xff]  ;;  %v4023_v50 = vpack.c.bf16 %v2289_v41, %v2285_v40  ;;  %v2288_v51 = vld [vmem:[%s5491_s19 + $0x1f0] sm:$0xff]  ;;  %v4027_v61 = vpack.c.bf16 %v2297_v54, %v2293_v17 }
 0x1fd   : > { %2058 = vmatmul.mubr.f32.gmra.mrb[6].mxu0 %v5769_v37  ;;  %4000 = vmatprep.subr.bf16.mxu1 %v3999_v42  ;;  %v3921_v42 = vpack.c.bf16 %v2278_v33, %v2274_v30  ;;  %v3923_v44 = vpack.c.bf16 %v2287_v39, %v2283_v38  ;;  %v4039_v30 = vpack.c.bf16 %v2321_v24, %v2317_v23  ;;  %v2320_v33 = vld [vmem:[%s5491_s19 + $0x2f0] sm:$0xff]  ;;  %v2329_v38 = vld [vmem:[%s5491_s19 + $0x338] sm:$0xff] }
 0x1fe   : > { %2212 = vmatmul.mubr.f32.gmra.mrb[6].mxu1 %v5769_v37  ;;  %3902 = vmatpush1.bf16.msra.mxu0 %v3901_v46  ;;  %v6014_v37 = vld [vmem:[%s6528_s0 + $0x8] sm:$0xff]  ;;  %v2282_v46 = vld [vmem:[%s5491_s19 + $0x1c0] sm:$0xff] }
 0x1ff   : > { %4002 = vmatpush1.bf16.msra.mxu1 %v4001_v48  ;;  %3904 = vmatprep.subr.bf16.mxu0 %v3903_v49  ;;  %v2286_v48 = vld [vmem:[%s5491_s19 + $0x1e0] sm:$0xff]  ;;  %v2284_v49 = vld [vmem:[%s5491_s19 + $0x1d0] sm:$0xff] }
 0x200   : > { %4004 = vmatprep.subr.bf16.mxu1 %v4003_v53  ;;  %2490 = vmatprep.mubr.f32.mxu0 %v6014_v37  ;;  %v2295_v53 = vld [vmem:[%s5491_s19 + $0x228] sm:$0xff]  ;;  %v3925_v55 = vpack.c.bf16 %v2286_v48, %v2282_v46  ;;  %v4025_v56 = vpack.c.bf16 %v2288_v51, %v2284_v49  ;;  %v4043_v46 = vpack.c.bf16 %v2329_v38, %v2325_v36  ;;  %v2328_v48 = vld [vmem:[%s5491_s19 + $0x330] sm:$0xff]  ;;  %v2333_v51 = vld [vmem:[%s5491_s19 + $0x358] sm:$0xff] }
 0x201   : > { %2644 = vmatprep.mubr.f32.mxu1 %v6014_v37  ;;  %v3927_v57 = vpack.c.bf16 %v2295_v53, %v2291_v52  ;;  %v2331_v49 = vld [vmem:[%s5491_s19 + $0x348] sm:$0xff]  ;;  %v2337_v52 = vld [vmem:[%s5491_s19 + $0x378] sm:$0xff] }
 0x202   : > { %3906 = vmatpush1.bf16.msra.mxu0 %v3905_v21  ;;  %v2290_v21 = vld [vmem:[%s5491_s19 + $0x200] sm:$0xff] }
 0x203   : > { %4006 = vmatpush1.bf16.msra.mxu1 %v4005_v58  ;;  %3908 = vmatprep.subr.bf16.mxu0 %v3907_v60  ;;  %v2294_v58 = vld [vmem:[%s5491_s19 + $0x220] sm:$0xff]  ;;  %v2292_v60 = vld [vmem:[%s5491_s19 + $0x210] sm:$0xff] }
 0x204   : > { %4008 = vmatprep.subr.bf16.mxu1 %v4007_v0  ;;  %v2303_v0 = vld [vmem:[%s5491_s19 + $0x268] sm:$0xff]  ;;  %v3929_v3 = vpack.c.bf16 %v2294_v58, %v2290_v21  ;;  %v4029_v4 = vpack.c.bf16 %v2296_v62, %v2292_v60  ;;  %v4047_v21 = vpack.c.bf16 %v2337_v52, %v2333_v51  ;;  %v2336_v58 = vld [vmem:[%s5491_s19 + $0x370] sm:$0xff]  ;;  %v2341_v62 = vld [vmem:[%s5491_s19 + $0x398] sm:$0xff] }
 0x205   : > { %v3931_v5 = vpack.c.bf16 %v2303_v0, %v2299_v63  ;;  %v2339_v60 = vld [vmem:[%s5491_s19 + $0x388] sm:$0xff]  ;;  %v2345_v63 = vld [vmem:[%s5491_s19 + $0x3b8] sm:$0xff] }
 0x206   : > { %3910 = vmatpush1.bf16.msra.mxu0 %v3909_v6  ;;  %v2298_v6 = vld [vmem:[%s5491_s19 + $0x240] sm:$0xff] }
 0x207   : > { %4010 = vmatpush1.bf16.msra.mxu1 %v4009_v7  ;;  %3912 = vmatprep.subr.bf16.mxu0 %v3911_v31  ;;  %v2302_v7 = vld [vmem:[%s5491_s19 + $0x260] sm:$0xff]  ;;  %v2300_v31 = vld [vmem:[%s5491_s19 + $0x250] sm:$0xff] }
 0x208   : > { %4012 = vmatprep.subr.bf16.mxu1 %v4011_v10  ;;  %v2311_v10 = vld [vmem:[%s5491_s19 + $0x2a8] sm:$0xff]  ;;  %v3933_v13 = vpack.c.bf16 %v2302_v7, %v2298_v6  ;;  %v4033_v45 = vpack.c.bf16 %v2304_v9, %v2300_v31  ;;  %v4051_v6 = vpack.c.bf16 %v2345_v63, %v2341_v62  ;;  %v2344_v7 = vld [vmem:[%s5491_s19 + $0x3b0] sm:$0xff]  ;;  %v2349_v9 = vld [vmem:[%s5491_s19 + $0x3d8] sm:$0xff] }
 0x209   : > { %v3935_v14 = vpack.c.bf16 %v2311_v10, %v2307_v32  ;;  %v2347_v31 = vld [vmem:[%s5491_s19 + $0x3c8] sm:$0xff]  ;;  %v2353_v32 = vld [vmem:[%s5491_s19 + $0x3f8] sm:$0xff]  ;;  %v6157_v63 = vld [vmem:[%s6528_s0 + $0x20] sm:$0xff] }
 0x20a   : > { %3914 = vmatpush1.bf16.msra.mxu0 %v3913_v15  ;;  %v2306_v15 = vld [vmem:[%s5491_s19 + $0x280] sm:$0xff]  ;;  %v2385_v62 = vld [vmem:[%s5491_s19 + $0x4f8] sm:$0xff] }
 0x20b   : > { %4014 = vmatpush1.bf16.msra.mxu1 %v4013_v16  ;;  %3916 = vmatprep.subr.bf16.mxu0 %v3915_v47  ;;  %v2310_v16 = vld [vmem:[%s5491_s19 + $0x2a0] sm:$0xff]  ;;  %v2308_v47 = vld [vmem:[%s5491_s19 + $0x290] sm:$0xff] }
 0x20c   : > { %4016 = vmatprep.subr.bf16.mxu1 %v4015_v22  ;;  %v2319_v22 = vld [vmem:[%s5491_s19 + $0x2e8] sm:$0xff]  ;;  %v3937_v25 = vpack.c.bf16 %v2310_v16, %v2306_v15  ;;  %v4037_v26 = vpack.c.bf16 %v2312_v19, %v2308_v47  ;;  %v4055_v15 = vpack.c.bf16 %v2353_v32, %v2349_v9  ;;  %v2352_v16 = vld [vmem:[%s5491_s19 + $0x3f0] sm:$0xff]  ;;  %v2357_v19 = vld [vmem:[%s5491_s19 + $0x418] sm:$0xff] }
 0x20d   : > { %v3939_v27 = vpack.c.bf16 %v2319_v22, %v2315_v20  ;;  %v2355_v47 = vld [vmem:[%s5491_s19 + $0x408] sm:$0xff]  ;;  %v2361_v20 = vld [vmem:[%s5491_s19 + $0x438] sm:$0xff] }
 0x20e   : > { %3918 = vmatpush1.bf16.msra.mxu0 %v3917_v28  ;;  %v2314_v28 = vld [vmem:[%s5491_s19 + $0x2c0] sm:$0xff]  ;;  %v6170_v9 = vld [vmem:[%s6528_s0 + $0x18] sm:$0xff] }
 0x20f   : > { %4018 = vmatpush1.bf16.msra.mxu1 %v4017_v59  ;;  %3920 = vmatprep.subr.bf16.mxu0 %v3919_v29  ;;  %v2318_v59 = vld [vmem:[%s5491_s19 + $0x2e0] sm:$0xff]  ;;  %v2316_v29 = vld [vmem:[%s5491_s19 + $0x2d0] sm:$0xff]  ;;  %v2389_v32 = vld [vmem:[%s5491_s19 + $0x518] sm:$0xff] }
 0x210   : > { %4020 = vmatprep.subr.bf16.mxu1 %v4019_v35  ;;  %v2327_v35 = vld [vmem:[%s5491_s19 + $0x328] sm:$0xff]  ;;  %v3941_v39 = vpack.c.bf16 %v2318_v59, %v2314_v28  ;;  %v4041_v40 = vpack.c.bf16 %v2320_v33, %v2316_v29  ;;  %v4059_v28 = vpack.c.bf16 %v2361_v20, %v2357_v19  ;;  %v2360_v59 = vld [vmem:[%s5491_s19 + $0x430] sm:$0xff]  ;;  %v2365_v33 = vld [vmem:[%s5491_s19 + $0x458] sm:$0xff] }
 0x211   : > { %v3943_v41 = vpack.c.bf16 %v2327_v35, %v2323_v34  ;;  %v2363_v29 = vld [vmem:[%s5491_s19 + $0x448] sm:$0xff]  ;;  %v2369_v34 = vld [vmem:[%s5491_s19 + $0x478] sm:$0xff] }
 0x212   : > { %3922 = vmatpush1.bf16.msra.mxu0 %v3921_v42  ;;  %v2322_v42 = vld [vmem:[%s5491_s19 + $0x300] sm:$0xff]  ;;  %v2399_v19 = vld [vmem:[%s5491_s19 + $0x568] sm:$0xff]  ;;  %v2397_v20 = vld [vmem:[%s5491_s19 + $0x558] sm:$0xff] }
 0x213   : > { %4022 = vmatpush1.bf16.msra.mxu1 %v4021_v43  ;;  %3924 = vmatprep.subr.bf16.mxu0 %v3923_v44  ;;  %v2326_v43 = vld [vmem:[%s5491_s19 + $0x320] sm:$0xff]  ;;  %v2324_v44 = vld [vmem:[%s5491_s19 + $0x310] sm:$0xff] }
 0x214   : > { %4024 = vmatprep.subr.bf16.mxu1 %v4023_v50  ;;  %v2335_v50 = vld [vmem:[%s5491_s19 + $0x368] sm:$0xff]  ;;  %v3945_v53 = vpack.c.bf16 %v2326_v43, %v2322_v42  ;;  %v4045_v17 = vpack.c.bf16 %v2328_v48, %v2324_v44  ;;  %v4063_v42 = vpack.c.bf16 %v2369_v34, %v2365_v33  ;;  %v2368_v43 = vld [vmem:[%s5491_s19 + $0x470] sm:$0xff]  ;;  %v6133_v48 = vld [vmem:[%s6528_s0] sm:$0xff] }
 0x215   : > { %v3947_v54 = vpack.c.bf16 %v2335_v50, %v2331_v49  ;;  %v2371_v44 = vld [vmem:[%s5491_s19 + $0x488] sm:$0xff]  ;;  %v2373_v49 = vld [vmem:[%s5491_s19 + $0x498] sm:$0xff] }
 0x216   : > { %3926 = vmatpush1.bf16.msra.mxu0 %v3925_v55  ;;  %v2330_v55 = vld [vmem:[%s5491_s19 + $0x340] sm:$0xff]  ;;  %v2377_v50 = vld [vmem:[%s5491_s19 + $0x4b8] sm:$0xff]  ;;  %v2407_v33 = vld [vmem:[%s5491_s19 + $0x5a8] sm:$0xff] }
 0x217   : > { %4026 = vmatpush1.bf16.msra.mxu1 %v4025_v56  ;;  %3928 = vmatprep.subr.bf16.mxu0 %v3927_v57  ;;  %v2334_v56 = vld [vmem:[%s5491_s19 + $0x360] sm:$0xff]  ;;  %v2332_v57 = vld [vmem:[%s5491_s19 + $0x350] sm:$0xff]  ;;  %v2405_v34 = vld [vmem:[%s5491_s19 + $0x598] sm:$0xff] }
 0x218   : > { %4028 = vmatprep.subr.bf16.mxu1 %v4027_v61  ;;  %v2343_v61 = vld [vmem:[%s5491_s19 + $0x3a8] sm:$0xff]  ;;  %v3949_v0 = vpack.c.bf16 %v2334_v56, %v2330_v55  ;;  %v4049_v1 = vpack.c.bf16 %v2336_v58, %v2332_v57  ;;  %v2372_v55 = vld [vmem:[%s5491_s19 + $0x490] sm:$0xff]  ;;  %v4067_v56 = vpack.c.bf16 %v2377_v50, %v2373_v49  ;;  %v2413_v50 = vld [vmem:[%s5491_s19 + $0x5d8] sm:$0xff] }
 0x219   : > { %v3951_v2 = vpack.c.bf16 %v2343_v61, %v2339_v60  ;;  %v2376_v57 = vld [vmem:[%s5491_s19 + $0x4b0] sm:$0xff]  ;;  %v2383_v58 = vld [vmem:[%s5491_s19 + $0x4e8] sm:$0xff]  ;;  %v2381_v61 = vld [vmem:[%s5491_s19 + $0x4d8] sm:$0xff] }
 0x21a   : > { %3930 = vmatpush1.bf16.msra.mxu0 %v3929_v3  ;;  %v2338_v3 = vld [vmem:[%s5491_s19 + $0x380] sm:$0xff]  ;;  %v6148_v60 = vld [vmem:[%s6528_s0 + $0x28] sm:$0xff] }
 0x21b   : > { %4030 = vmatpush1.bf16.msra.mxu1 %v4029_v4  ;;  %3932 = vmatprep.subr.bf16.mxu0 %v3931_v5  ;;  %v2342_v4 = vld [vmem:[%s5491_s19 + $0x3a0] sm:$0xff]  ;;  %v2340_v5 = vld [vmem:[%s5491_s19 + $0x390] sm:$0xff]  ;;  %v2415_v49 = vld [vmem:[%s5491_s19 + $0x5e8] sm:$0xff] }
 0x21c   : > { %4032 = vmatprep.subr.bf16.mxu1 %v4031_v8  ;;  %v2351_v8 = vld [vmem:[%s5491_s19 + $0x3e8] sm:$0xff]  ;;  %v3953_v10 = vpack.c.bf16 %v2342_v4, %v2338_v3  ;;  %v4053_v11 = vpack.c.bf16 %v2344_v7, %v2340_v5  ;;  %v2378_v3 = vld [vmem:[%s5491_s19 + $0x4c0] sm:$0xff]  ;;  %v2380_v5 = vld [vmem:[%s5491_s19 + $0x4d0] sm:$0xff] }
 0x21d   : > { %v3955_v12 = vpack.c.bf16 %v2351_v8, %v2347_v31  ;;  %v2382_v4 = vld [vmem:[%s5491_s19 + $0x4e0] sm:$0xff]  ;;  %v2384_v7 = vld [vmem:[%s5491_s19 + $0x4f0] sm:$0xff]  ;;  %v2387_v31 = vld [vmem:[%s5491_s19 + $0x508] sm:$0xff] }
 0x21e   : > { %3934 = vmatpush1.bf16.msra.mxu0 %v3933_v13  ;;  %v2346_v13 = vld [vmem:[%s5491_s19 + $0x3c0] sm:$0xff]  ;;  %v2391_v8 = vld [vmem:[%s5491_s19 + $0x528] sm:$0xff] }
 0x21f   : > { %4034 = vmatpush1.bf16.msra.mxu1 %v4033_v45  ;;  %3936 = vmatprep.subr.bf16.mxu0 %v3935_v14  ;;  %v2350_v45 = vld [vmem:[%s5491_s19 + $0x3e0] sm:$0xff]  ;;  %v2348_v14 = vld [vmem:[%s5491_s19 + $0x3d0] sm:$0xff] }
 0x220   : > { %4036 = vmatprep.subr.bf16.mxu1 %v4035_v18  ;;  %v2359_v18 = vld [vmem:[%s5491_s19 + $0x428] sm:$0xff]  ;;  %v3957_v22 = vpack.c.bf16 %v2350_v45, %v2346_v13  ;;  %v4057_v23 = vpack.c.bf16 %v2352_v16, %v2348_v14  ;;  %v3975_v13 = vpack.c.bf16 %v2391_v8, %v2387_v31  ;;  %v2386_v45 = vld [vmem:[%s5491_s19 + $0x500] sm:$0xff]  ;;  %v2424_v8 = vld [vmem:[%s5491_s19 + $0x630] sm:$0xff] }
 0x221   : > { %v3959_v24 = vpack.c.bf16 %v2359_v18, %v2355_v47  ;;  %v2390_v14 = vld [vmem:[%s5491_s19 + $0x520] sm:$0xff]  ;;  %v2392_v47 = vld [vmem:[%s5491_s19 + $0x530] sm:$0xff]  ;;  %v2395_v18 = vld [vmem:[%s5491_s19 + $0x548] sm:$0xff] }
 0x222   : > { %3938 = vmatpush1.bf16.msra.mxu0 %v3937_v25  ;;  %v2354_v25 = vld [vmem:[%s5491_s19 + $0x400] sm:$0xff] }
 0x223   : > { %4038 = vmatpush1.bf16.msra.mxu1 %v4037_v26  ;;  %3940 = vmatprep.subr.bf16.mxu0 %v3939_v27  ;;  %v2358_v26 = vld [vmem:[%s5491_s19 + $0x420] sm:$0xff]  ;;  %v2356_v27 = vld [vmem:[%s5491_s19 + $0x410] sm:$0xff] }
 0x224   : > { %4040 = vmatprep.subr.bf16.mxu1 %v4039_v30  ;;  %v2367_v30 = vld [vmem:[%s5491_s19 + $0x468] sm:$0xff]  ;;  %v3961_v35 = vpack.c.bf16 %v2358_v26, %v2354_v25  ;;  %v4061_v36 = vpack.c.bf16 %v2360_v59, %v2356_v27  ;;  %v3979_v25 = vpack.c.bf16 %v2399_v19, %v2395_v18  ;;  %v2394_v26 = vld [vmem:[%s5491_s19 + $0x540] sm:$0xff] }
 0x225   : > { %v3963_v38 = vpack.c.bf16 %v2367_v30, %v2363_v29  ;;  %v2398_v27 = vld [vmem:[%s5491_s19 + $0x560] sm:$0xff]  ;;  %v2400_v29 = vld [vmem:[%s5491_s19 + $0x570] sm:$0xff]  ;;  %v2403_v30 = vld [vmem:[%s5491_s19 + $0x588] sm:$0xff] }
 0x226   : > { %3942 = vmatpush1.bf16.msra.mxu0 %v3941_v39  ;;  %v2362_v39 = vld [vmem:[%s5491_s19 + $0x440] sm:$0xff] }
 0x227   : > { %4042 = vmatpush1.bf16.msra.mxu1 %v4041_v40  ;;  %3944 = vmatprep.subr.bf16.mxu0 %v3943_v41  ;;  %v2366_v40 = vld [vmem:[%s5491_s19 + $0x460] sm:$0xff]  ;;  %v2364_v41 = vld [vmem:[%s5491_s19 + $0x450] sm:$0xff] }
 0x228   : > { %4044 = vmatprep.subr.bf16.mxu1 %v4043_v46  ;;  %v2375_v46 = vld [vmem:[%s5491_s19 + $0x4a8] sm:$0xff]  ;;  %v3965_v51 = vpack.c.bf16 %v2366_v40, %v2362_v39  ;;  %v4065_v52 = vpack.c.bf16 %v2368_v43, %v2364_v41  ;;  %v3983_v39 = vpack.c.bf16 %v2407_v33, %v2403_v30  ;;  %v2402_v40 = vld [vmem:[%s5491_s19 + $0x580] sm:$0xff]  ;;  %v2752_v30 = vld [vmem:[%s6218_s10 + $0x50] sm:$0xff] }
 0x229   : > { %v2406_v41 = vld [vmem:[%s5491_s19 + $0x5a0] sm:$0xff] }
 0x22a   : > { %3946 = vmatpush1.bf16.msra.mxu0 %v3945_v53  ;;  %v3967_v53 = vpack.c.bf16 %v2375_v46, %v2371_v44  ;;  %v2408_v44 = vld [vmem:[%s5491_s19 + $0x5b0] sm:$0xff]  ;;  %v2411_v46 = vld [vmem:[%s5491_s19 + $0x5c8] sm:$0xff]  ;;  %v2746_v18 = vld [vmem:[%s6218_s10 + $0x20] sm:$0xff] }
 0x22b   : > { %4046 = vmatpush1.bf16.msra.mxu1 %v4045_v17  ;;  %3948 = vmatprep.subr.bf16.mxu0 %v3947_v54  ;;  %v2370_v17 = vld [vmem:[%s5491_s19 + $0x480] sm:$0xff] }
 0x22c   : > { %4048 = vmatprep.subr.bf16.mxu1 %v4047_v21  ;;  %v2374_v54 = vld [vmem:[%s5491_s19 + $0x4a0] sm:$0xff]  ;;  %v2379_v21 = vld [vmem:[%s5491_s19 + $0x4c8] sm:$0xff] }
 0x22e   : > { %3950 = vmatpush1.bf16.msra.mxu0 %v3949_v0  ;;  %v3969_v0 = vpack.c.bf16 %v2374_v54, %v2370_v17  ;;  %v3987_v17 = vpack.c.bf16 %v2415_v49, %v2411_v46  ;;  %v2410_v54 = vld [vmem:[%s5491_s19 + $0x5c0] sm:$0xff] }
 0x22f   : > { %4050 = vmatpush1.bf16.msra.mxu1 %v4049_v1  ;;  %3952 = vmatprep.subr.bf16.mxu0 %v3951_v2  ;;  %v4069_v1 = vpack.c.bf16 %v2376_v57, %v2372_v55  ;;  %v3971_v2 = vpack.c.bf16 %v2383_v58, %v2379_v21  ;;  %v2414_v55 = vld [vmem:[%s5491_s19 + $0x5e0] sm:$0xff]  ;;  %v2416_v21 = vld [vmem:[%s5491_s19 + $0x5f0] sm:$0xff]  ;;  %v2419_v58 = vld [vmem:[%s5491_s19 + $0x608] sm:$0xff] }
 0x230   : > { %4052 = vmatprep.subr.bf16.mxu1 %v4051_v6  ;;  %v4071_v6 = vpack.c.bf16 %v2385_v62, %v2381_v61  ;;  %v2423_v61 = vld [vmem:[%s5491_s19 + $0x628] sm:$0xff]  ;;  %v2421_v62 = vld [vmem:[%s5491_s19 + $0x618] sm:$0xff]  ;;  %v2758_v49 = vld [vmem:[%s6218_s10 + $0x80] sm:$0xff] }
 0x232   : > { %3954 = vmatpush1.bf16.msra.mxu0 %v3953_v10  ;;  %v2393_v10 = vld [vmem:[%s5491_s19 + $0x538] sm:$0xff] }
 0x233   : > { %4054 = vmatpush1.bf16.msra.mxu1 %v4053_v11  ;;  %3956 = vmatprep.subr.bf16.mxu0 %v3955_v12  ;;  %v3973_v11 = vpack.c.bf16 %v2382_v4, %v2378_v3  ;;  %v4073_v12 = vpack.c.bf16 %v2384_v7, %v2380_v5  ;;  %v4075_v16 = vpack.c.bf16 %v2393_v10, %v2389_v32  ;;  %v2422_v5 = vld [vmem:[%s5491_s19 + $0x620] sm:$0xff]  ;;  %v2743_v32 = vld [vmem:[%s6218_s10 + $0x8] sm:$0xff] }
 0x234   : > { %4056 = vmatprep.subr.bf16.mxu1 %v4055_v15  ;;  %v2388_v15 = vld [vmem:[%s5491_s19 + $0x510] sm:$0xff]  ;;  %v3991_v4 = vpack.c.bf16 %v2423_v61, %v2419_v58  ;;  %v3258_v7 = vld [vmem:[%s6529_s1] sm:$0xff]  ;;  %v2747_v10 = vld [vmem:[%s6218_s10 + $0x28] sm:$0xff] }
 0x236   : > { %3958 = vmatpush1.bf16.msra.mxu0 %v3957_v22  ;;  %v2401_v22 = vld [vmem:[%s5491_s19 + $0x578] sm:$0xff] }
 0x237   : > { %4058 = vmatpush1.bf16.msra.mxu1 %v4057_v23  ;;  %3960 = vmatprep.subr.bf16.mxu0 %v3959_v24  ;;  %v3977_v23 = vpack.c.bf16 %v2390_v14, %v2386_v45  ;;  %v4077_v24 = vpack.c.bf16 %v2392_v47, %v2388_v15  ;;  %v4079_v59 = vpack.c.bf16 %v2401_v22, %v2397_v20  ;;  %v3259_v14 = vld [vmem:[%s6529_s1 + $0x8] sm:$0xff]  ;;  %v2742_v47 = vld [vmem:[%s6218_s10] sm:$0xff]  ;;  %v2744_v20 = vld [vmem:[%s6218_s10 + $0x10] sm:$0xff] }
 0x238   : > { %4060 = vmatprep.subr.bf16.mxu1 %v4059_v28  ;;  %v2396_v28 = vld [vmem:[%s5491_s19 + $0x550] sm:$0xff] }
 0x239   : > { %2491 = vmatmul.mubr.f32.vlgmr.msra.gmra.mrb[8].mxu0 %v6133_v48  ;;  %v2748_v22 = vld [vmem:[%s6218_s10 + $0x30] sm:$0xff] }
 0x23a   : > { %3962 = vmatpush1.bf16.msra.mxu0 %v3961_v35  ;;  %2645 = vmatmul.mubr.f32.vlgmr.msra.gmra.mrb[8].mxu1 %v6133_v48  ;;  %v2409_v35 = vld [vmem:[%s5491_s19 + $0x5b8] sm:$0xff] }
 0x23b   : > { %4062 = vmatpush1.bf16.msra.mxu1 %v4061_v36  ;;  %3964 = vmatprep.subr.bf16.mxu0 %v3963_v38  ;;  %v3981_v36 = vpack.c.bf16 %v2398_v27, %v2394_v26  ;;  %v4081_v38 = vpack.c.bf16 %v2400_v29, %v2396_v28  ;;  %v4083_v43 = vpack.c.bf16 %v2409_v35, %v2405_v34  ;;  %v2753_v26 = vld [vmem:[%s6218_s10 + $0x58] sm:$0xff]  ;;  %v2754_v29 = vld [vmem:[%s6218_s10 + $0x60] sm:$0xff]  ;;  %v2756_v34 = vld [vmem:[%s6218_s10 + $0x70] sm:$0xff] }
 0x23c   : > { %4064 = vmatprep.subr.bf16.mxu1 %v4063_v42  ;;  %2496 = vmatprep.mubr.f32.mxu0 %v6148_v60  ;;  %v2404_v42 = vld [vmem:[%s5491_s19 + $0x590] sm:$0xff]  ;;  %v2757_v27 = vld [vmem:[%s6218_s10 + $0x78] sm:$0xff]  ;;  %v4197_v28 = vpack.c.bf16 %v2748_v22, %v2744_v20  ;;  %v2759_v35 = vld [vmem:[%s6218_s10 + $0x88] sm:$0xff] }
 0x23d   : > { %2650 = vmatprep.mubr.f32.mxu1 %v6148_v60  ;;  %2497 = vmatmul.mubr.f32.gmra.mrb[10].mxu0 %v6157_v63 }
 0x23e   : > { %3966 = vmatpush1.bf16.msra.mxu0 %v3965_v51  ;;  %2651 = vmatmul.mubr.f32.gmra.mrb[10].mxu1 %v6157_v63  ;;  %v2417_v51 = vld [vmem:[%s5491_s19 + $0x5f8] sm:$0xff] }
 0x23f   : > { %4066 = vmatpush1.bf16.msra.mxu1 %v4065_v52  ;;  %3968 = vmatprep.subr.bf16.mxu0 %v3967_v53  ;;  %v3985_v52 = vpack.c.bf16 %v2406_v41, %v2402_v40  ;;  %v4085_v53 = vpack.c.bf16 %v2408_v44, %v2404_v42  ;;  %v4087_v57 = vpack.c.bf16 %v2417_v51, %v2413_v50  ;;  %v2761_v40 = vld [vmem:[%s6218_s10 + $0x98] sm:$0xff]  ;;  %v2762_v50 = vld [vmem:[%s6218_s10 + $0xa0] sm:$0xff]  ;;  %v2760_v51 = vld [vmem:[%s6218_s10 + $0x90] sm:$0xff] }
 0x240   : > { %4068 = vmatprep.subr.bf16.mxu1 %v4067_v56  ;;  %3477 = vmatprep.mubr.msk.f32.mxu0 %vm1395_vm0, %v6170_v9  ;;  %v2412_v56 = vld [vmem:[%s5491_s19 + $0x5d0] sm:$0xff]  ;;  %v2765_v41 = vld [vmem:[%s6218_s10 + $0xb8] sm:$0xff]  ;;  %v4201_v44 = vpack.c.bf16 %v2756_v34, %v2752_v30  ;;  %v2791_v30 = vld [vmem:[%s6218_s10 + $0x188] sm:$0xff] }
 0x241   : > { %3479 = vmatprep.mubr.msk.f32.mxu1 %vm1395_vm0, %v6170_v9  ;;  %v4089_v3 = vpack.c.bf16 %v2416_v21, %v2412_v56  ;;  %v2769_v56 = vld [vmem:[%s6218_s10 + $0xd8] sm:$0xff]  ;;  %v4105_v21 = vpack.c.bf16 %v2762_v50, %v2758_v49  ;;  %v2794_v49 = vld [vmem:[%s6218_s10 + $0x1a0] sm:$0xff]  ;;  %v2792_v50 = vld [vmem:[%s6218_s10 + $0x190] sm:$0xff] }
 0x242   : > { %3970 = vmatpush1.bf16.msra.mxu0 %v3969_v0  ;;  %v2425_v0 = vld [vmem:[%s5491_s19 + $0x638] sm:$0xff] }
 0x243   : > { %4070 = vmatpush1.bf16.msra.mxu1 %v4069_v1  ;;  %3972 = vmatprep.subr.bf16.mxu0 %v3971_v2  ;;  %v3989_v1 = vpack.c.bf16 %v2414_v55, %v2410_v54  ;;  %v2418_v2 = vld [vmem:[%s5491_s19 + $0x600] sm:$0xff]  ;;  %v4091_v31 = vpack.c.bf16 %v2425_v0, %v2421_v62  ;;  %v2771_v54 = vld [vmem:[%s6218_s10 + $0xe8] sm:$0xff]  ;;  %v6268_v55 = vld [vmem:[%s6528_s0 + $0x30] sm:$0xff] }
 0x244   : > { %4072 = vmatprep.subr.bf16.mxu1 %v4071_v6  ;;  %v2420_v6 = vld [vmem:[%s5491_s19 + $0x610] sm:$0xff]  ;;  %v3993_v45 = vpack.c.bf16 %v2422_v5, %v2418_v2  ;;  %v2766_v62 = vld [vmem:[%s6218_s10 + $0xc0] sm:$0xff]  ;;  %v2779_v5 = vld [vmem:[%s6218_s10 + $0x128] sm:$0xff] }
 0x245   : > { %v4093_v15 = vpack.c.bf16 %v2424_v8, %v2420_v6  ;;  %v2770_v0 = vld [vmem:[%s6218_s10 + $0xe0] sm:$0xff]  ;;  %v2777_v6 = vld [vmem:[%s6218_s10 + $0x118] sm:$0xff] }
 0x246   : > { %3974 = vmatpush1.bf16.msra.mxu0 %v3973_v11  ;;  %v4482_v11 = vmov 0  }
 0x247   : > { %4074 = vmatpush1.bf16.msra.mxu1 %v4073_v12  ;;  %3976 = vmatprep.subr.bf16.mxu0 %v3975_v13  ;;  %v2745_v12 = vld [vmem:[%s6218_s10 + $0x18] sm:$0xff] }
 0x248   : > { %4076 = vmatprep.subr.bf16.mxu1 %v4075_v16  ;;  %4372 = vset.pattern.permute.xlu0 %v4482_v11  ;;  %v2749_v13 = vld [vmem:[%s6218_s10 + $0x38] sm:$0xff]  ;;  %v4095_v16 = vpack.c.bf16 %v2747_v10, %v2743_v32  ;;  %v2774_v10 = vld [vmem:[%s6218_s10 + $0x100] sm:$0xff] }
 0x249   : > { %3262 = vperm.xlu0 %4372, %v3258_v7   ;;  %v4195_v19 = vpack.c.bf16 %v2749_v13, %v2745_v12  ;;  %v2781_v7 = vld [vmem:[%s6218_s10 + $0x138] sm:$0xff]  ;;  %v2778_v11 = vld [vmem:[%s6218_s10 + $0x120] sm:$0xff]  ;;  %v2776_v12 = vld [vmem:[%s6218_s10 + $0x110] sm:$0xff] }
 0x24a   : > { %3978 = vmatpush1.bf16.msra.mxu0 %v3977_v23  ;;  %v2751_v23 = vld [vmem:[%s6218_s10 + $0x48] sm:$0xff]  ;;  %v4113_v22 = vpack.c.bf16 %v2778_v11, %v2774_v10  ;;  %v2810_v10 = vld [vmem:[%s6218_s10 + $0x220] sm:$0xff]  ;;  %v2808_v11 = vld [vmem:[%s6218_s10 + $0x210] sm:$0xff] }
 0x24b   : > { %4078 = vmatpush1.bf16.msra.mxu1 %v4077_v24  ;;  %3980 = vmatprep.subr.bf16.mxu0 %v3979_v25  ;;  %v2755_v24 = vld [vmem:[%s6218_s10 + $0x68] sm:$0xff]  ;;  %v4097_v25 = vpack.c.bf16 %v2746_v18, %v2742_v47  ;;  %v2785_v18 = vld [vmem:[%s6218_s10 + $0x158] sm:$0xff] }
 0x24c   : > { %4080 = vmatprep.subr.bf16.mxu1 %v4079_v59  ;;  %v2750_v59 = vld [vmem:[%s6218_s10 + $0x40] sm:$0xff]  ;;  %v4099_v33 = vpack.c.bf16 %v2755_v24, %v2751_v23 }
 0x24d   : > { %3267 = vperm.xlu0 %4372, %v3259_v14   ;;  %v4101_v42 = vpack.c.bf16 %v2754_v29, %v2750_v59  ;;  %v2780_v14 = vld [vmem:[%s6218_s10 + $0x130] sm:$0xff] }
 0x24e   : > { %3982 = vmatpush1.bf16.msra.mxu0 %v3981_v36  ;;  %v2763_v36 = vld [vmem:[%s6218_s10 + $0xa8] sm:$0xff]  ;;  %v4213_v23 = vpack.c.bf16 %v2780_v14, %v2776_v12  ;;  %v2788_v29 = vld [vmem:[%s6218_s10 + $0x170] sm:$0xff] }
 0x24f   : > { %4082 = vmatpush1.bf16.msra.mxu1 %v4081_v38  ;;  %3984 = vmatprep.subr.bf16.mxu0 %v3983_v39  ;;  %v6244_v38 = vld [vmem:[%s6528_s0 + $0x10] sm:$0xff]  ;;  %v4199_v39 = vpack.c.bf16 %v2757_v27, %v2753_v26  ;;  %v4103_v46 = vpack.c.bf16 %v2763_v36, %v2759_v35  ;;  %v2786_v26 = vld [vmem:[%s6218_s10 + $0x160] sm:$0xff]  ;;  %v2793_v36 = vld [vmem:[%s6218_s10 + $0x198] sm:$0xff] }
 0x250   : > { %4084 = vmatprep.subr.bf16.mxu1 %v4083_v43  ;;  %v6253_v43 = vld [vmem:[%s6528_s0 + $0x38] sm:$0xff]  ;;  %v2784_v27 = vld [vmem:[%s6218_s10 + $0x150] sm:$0xff]  ;;  %v2815_v14 = vld [vmem:[%s6218_s10 + $0x248] sm:$0xff] }
 0x252   : > { %3986 = vmatpush1.bf16.msra.mxu0 %v3985_v52  ;;  %v4203_v52 = vpack.c.bf16 %v2765_v41, %v2761_v40 }
 0x253   : > { %4086 = vmatpush1.bf16.msra.mxu1 %v4085_v53  ;;  %3988 = vmatprep.subr.bf16.mxu0 %v3987_v17  ;;  %v2764_v53 = vld [vmem:[%s6218_s10 + $0xb0] sm:$0xff]  ;;  %v2767_v17 = vld [vmem:[%s6218_s10 + $0xc8] sm:$0xff] }
 0x254   : > { %4088 = vmatprep.subr.bf16.mxu1 %v4087_v57  ;;  %v2773_v57 = vld [vmem:[%s6218_s10 + $0xf8] sm:$0xff]  ;;  %v4205_v58 = vpack.c.bf16 %v2764_v53, %v2760_v51  ;;  %v4107_v61 = vpack.c.bf16 %v2771_v54, %v2767_v17  ;;  %v2799_v53 = vld [vmem:[%s6218_s10 + $0x1c8] sm:$0xff] }
 0x255   : > { %v4207_v2 = vpack.c.bf16 %v2773_v57, %v2769_v56  ;;  %v2803_v17 = vld [vmem:[%s6218_s10 + $0x1e8] sm:$0xff]  ;;  %v2801_v54 = vld [vmem:[%s6218_s10 + $0x1d8] sm:$0xff] }
 0x256   : > { %3990 = vmatpush1.bf16.msra.mxu0 %v3989_v1  ;;  %v2768_v1 = vld [vmem:[%s6218_s10 + $0xd0] sm:$0xff]  ;;  %v2805_v56 = vld [vmem:[%s6218_s10 + $0x1f8] sm:$0xff] }
 0x257   : > { %4090 = vmatpush1.bf16.msra.mxu1 %v4089_v3  ;;  %3992 = vmatprep.subr.bf16.mxu0 %v3991_v4  ;;  %v2772_v3 = vld [vmem:[%s6218_s10 + $0xf0] sm:$0xff]  ;;  %v2775_v4 = vld [vmem:[%s6218_s10 + $0x108] sm:$0xff] }
 0x258   : > { %4092 = vmatprep.subr.bf16.mxu1 %v4091_v31  ;;  %v4109_v31 = vpack.c.bf16 %v2770_v0, %v2766_v62  ;;  %v4209_v8 = vpack.c.bf16 %v2772_v3, %v2768_v1  ;;  %v4111_v32 = vpack.c.bf16 %v2779_v5, %v2775_v4  ;;  %v2802_v62 = vld [vmem:[%s6218_s10 + $0x1e0] sm:$0xff]  ;;  %v2800_v0 = vld [vmem:[%s6218_s10 + $0x1d0] sm:$0xff]  ;;  %v4223_v1 = vpack.c.bf16 %v2805_v56, %v2801_v54  ;;  %v2807_v3 = vld [vmem:[%s6218_s10 + $0x208] sm:$0xff] }
 0x259   : > { %v2811_v4 = vld [vmem:[%s6218_s10 + $0x228] sm:$0xff]  ;;  %v2809_v5 = vld [vmem:[%s6218_s10 + $0x218] sm:$0xff] }
 0x25a   : > { %3994 = vmatpush1.bf16.msra.mxu0 %v3993_v45  ;;  %v4211_v45 = vpack.c.bf16 %v2781_v7, %v2777_v6  ;;  %v2813_v6 = vld [vmem:[%s6218_s10 + $0x238] sm:$0xff] }
 0x25b   : > { %4094 = vmatpush1.bf16.msra.mxu1 %v4093_v15  ;;  %4096 = vmatprep.subr.bf16.mxu0 %v4095_v16  ;;  %v2787_v15 = vld [vmem:[%s6218_s10 + $0x168] sm:$0xff]  ;;  %v4227_v12 = vpack.c.bf16 %v2813_v6, %v2809_v5  ;;  %v2837_v54 = vld [vmem:[%s6218_s10 + $0x2f8] sm:$0xff] }
 0x25c   : > { %4196 = vmatprep.subr.bf16.mxu1 %v4195_v19  ;;  %v2789_v19 = vld [vmem:[%s6218_s10 + $0x178] sm:$0xff] }
 0x25d   : > { %2568 = vmatmul.mubr.f32.vlgmr.msra.gmra.mrb[8].mxu0 %v6244_v38  ;;  %v4215_v59 = vpack.c.bf16 %v2789_v19, %v2785_v18  ;;  %v2821_v18 = vld [vmem:[%s6218_s10 + $0x278] sm:$0xff] }
 0x25e   : > { %2722 = vmatmul.mubr.f32.vlgmr.msra.gmra.mrb[8].mxu1 %v6244_v38  ;;  %4098 = vmatpush1.bf16.msra.mxu0 %v4097_v25  ;;  %v2782_v25 = vld [vmem:[%s6218_s10 + $0x140] sm:$0xff]  ;;  %v2845_v5 = vld [vmem:[%s6218_s10 + $0x338] sm:$0xff] }
 0x25f   : > { %4198 = vmatpush1.bf16.msra.mxu1 %v4197_v28  ;;  %3478 = vmatprep.mubr.msk.f32.mxu0 %vm1395_vm0, %v6253_v43  ;;  %v4117_v41 = vpack.c.bf16 %v2786_v26, %v2782_v25  ;;  %v2818_v25 = vld [vmem:[%s6218_s10 + $0x260] sm:$0xff]  ;;  %v2816_v26 = vld [vmem:[%s6218_s10 + $0x250] sm:$0xff] }
 0x260   : > { %3480 = vmatprep.mubr.msk.f32.mxu1 %vm1395_vm0, %v6253_v43  ;;  %4100 = vmatprep.subr.bf16.mxu0 %v4099_v33  ;;  %v2795_v33 = vld [vmem:[%s6218_s10 + $0x1a8] sm:$0xff] }
 0x261   : > { %2574 = vmatmul.mubr.f32.gmra.mrb[10].mxu0 %v6268_v55  ;;  %4200 = vmatprep.subr.bf16.mxu1 %v4199_v39  ;;  %v2797_v39 = vld [vmem:[%s6218_s10 + $0x1b8] sm:$0xff] }
 0x262   : > { %2728 = vmatmul.mubr.f32.gmra.mrb[10].mxu1 %v6268_v55  ;;  %4102 = vmatpush1.bf16.msra.mxu0 %v4101_v42  ;;  %v4217_v42 = vpack.c.bf16 %v2788_v29, %v2784_v27  ;;  %v4219_v51 = vpack.c.bf16 %v2797_v39, %v2793_v36  ;;  %v2823_v29 = vld [vmem:[%s6218_s10 + $0x288] sm:$0xff]  ;;  %v2829_v36 = vld [vmem:[%s6218_s10 + $0x2b8] sm:$0xff] }
 0x263   : > { %4202 = vmatpush1.bf16.msra.mxu1 %v4201_v44  ;;  %4104 = vmatprep.subr.bf16.mxu0 %v4103_v46  ;;  %v4119_v44 = vpack.c.bf16 %v2795_v33, %v2791_v30  ;;  %v2790_v46 = vld [vmem:[%s6218_s10 + $0x180] sm:$0xff]  ;;  %v2827_v30 = vld [vmem:[%s6218_s10 + $0x2a8] sm:$0xff]  ;;  %v2825_v33 = vld [vmem:[%s6218_s10 + $0x298] sm:$0xff] }
 0x264   : > { %4204 = vmatprep.subr.bf16.mxu1 %v4203_v52  ;;  %3006 = vmatprep.mubr.f32.mxu0 %v6014_v37  ;;  %v2796_v52 = vld [vmem:[%s6218_s10 + $0x1b0] sm:$0xff]  ;;  %v4121_v57 = vpack.c.bf16 %v2794_v49, %v2790_v46  ;;  %v2826_v46 = vld [vmem:[%s6218_s10 + $0x2a0] sm:$0xff] }
 0x265   : > { %3160 = vmatprep.mubr.f32.mxu1 %v6014_v37  ;;  %v2783_v37 = vld [vmem:[%s6218_s10 + $0x148] sm:$0xff]  ;;  %v2824_v49 = vld [vmem:[%s6218_s10 + $0x290] sm:$0xff] }
 0x266   : > { %4106 = vmatpush1.bf16.msra.mxu0 %v4105_v21  ;;  %v4115_v24 = vpack.c.bf16 %v2787_v15, %v2783_v37  ;;  %v4221_v21 = vpack.c.bf16 %v2796_v52, %v2792_v50  ;;  %v2819_v37 = vld [vmem:[%s6218_s10 + $0x268] sm:$0xff]  ;;  %v2817_v15 = vld [vmem:[%s6218_s10 + $0x258] sm:$0xff]  ;;  %v4235_v50 = vpack.c.bf16 %v2829_v36, %v2825_v33 }
 0x267   : > { %4206 = vmatpush1.bf16.msra.mxu1 %v4205_v58  ;;  %4108 = vmatprep.subr.bf16.mxu0 %v4107_v61  ;;  %v4123_v58 = vpack.c.bf16 %v2803_v17, %v2799_v53  ;;  %v2798_v61 = vld [vmem:[%s6218_s10 + $0x1c0] sm:$0xff]  ;;  %v4231_v27 = vpack.c.bf16 %v2821_v18, %v2817_v15  ;;  %v2831_v52 = vld [vmem:[%s6218_s10 + $0x2c8] sm:$0xff]  ;;  %v2833_v17 = vld [vmem:[%s6218_s10 + $0x2d8] sm:$0xff] }
 0x268   : > { %v6287_v13 = vpop.f32.mrb[0].mxu0  ;;  %4208 = vmatprep.subr.bf16.mxu1 %v4207_v2  ;;  %v2804_v2 = vld [vmem:[%s6218_s10 + $0x1f0] sm:$0xff]  ;;  %v4125_v7 = vpack.c.bf16 %v2802_v62, %v2798_v61  ;;  %v2835_v53 = vld [vmem:[%s6218_s10 + $0x2e8] sm:$0xff]  ;;  %v2834_v61 = vld [vmem:[%s6218_s10 + $0x2e0] sm:$0xff] }
 0x269   : > { %v6292_v16 = vpop.f32.mrb[0].mxu1  ;;  %v6294_v47 = vpop.f32.mrb[1].mxu0  ;;  %v2832_v62 = vld [vmem:[%s6218_s10 + $0x2d0] sm:$0xff]  ;;  %v2853_v15 = vld [vmem:[%s6218_s10 + $0x378] sm:$0xff] }
 0x26a   : > { %v6298_v20 = vpop.f32.mrb[1].mxu1  ;;  %4110 = vmatpush1.bf16.msra.mxu0 %v4109_v31  ;;  %v4225_v31 = vpack.c.bf16 %v2804_v2, %v2800_v0  ;;  %v4239_v0 = vpack.c.bf16 %v2837_v54, %v2833_v17  ;;  %v2839_v2 = vld [vmem:[%s6218_s10 + $0x308] sm:$0xff]  ;;  %v2861_v33 = vld [vmem:[%s6218_s10 + $0x3b8] sm:$0xff] }
 0x26b   : > { %4210 = vmatpush1.bf16.msra.mxu1 %v4209_v8  ;;  %4112 = vmatprep.subr.bf16.mxu0 %v4111_v32  ;;  %v4127_v8 = vpack.c.bf16 %v2811_v4, %v2807_v3  ;;  %v2806_v32 = vld [vmem:[%s6218_s10 + $0x200] sm:$0xff]  ;;  %v2843_v3 = vld [vmem:[%s6218_s10 + $0x328] sm:$0xff]  ;;  %v2841_v4 = vld [vmem:[%s6218_s10 + $0x318] sm:$0xff] }
 0x26c   : > { %v6303_v28 = vpop.f32.mrb[2].mxu0  ;;  %4212 = vmatprep.subr.bf16.mxu1 %v4211_v45  ;;  %v2812_v45 = vld [vmem:[%s6218_s10 + $0x230] sm:$0xff]  ;;  %v4129_v19 = vpack.c.bf16 %v2810_v10, %v2806_v32  ;;  %v2842_v32 = vld [vmem:[%s6218_s10 + $0x320] sm:$0xff]  ;;  %v2869_v17 = vld [vmem:[%s6218_s10 + $0x3f8] sm:$0xff] }
 0x26d   : > { %v6308_v34 = vpop.f32.mrb[2].mxu1  ;;  %v6310_v35 = vpop.f32.mrb[3].mxu0  ;;  %v2840_v10 = vld [vmem:[%s6218_s10 + $0x310] sm:$0xff] }
 0x26e   : > { %v6314_v40 = vpop.f32.mrb[3].mxu1  ;;  %4114 = vmatpush1.bf16.msra.mxu0 %v4113_v22  ;;  %v4229_v22 = vpack.c.bf16 %v2812_v45, %v2808_v11  ;;  %v4243_v11 = vpack.c.bf16 %v2845_v5, %v2841_v4  ;;  %v2847_v45 = vld [vmem:[%s6218_s10 + $0x348] sm:$0xff]  ;;  %v2877_v4 = vld [vmem:[%s6218_s10 + $0x438] sm:$0xff] }
 0x26f   : > { %4214 = vmatpush1.bf16.msra.mxu1 %v4213_v23  ;;  %4116 = vmatprep.subr.bf16.mxu0 %v4115_v24  ;;  %v4131_v23 = vpack.c.bf16 %v2819_v37, %v2815_v14  ;;  %v2814_v24 = vld [vmem:[%s6218_s10 + $0x240] sm:$0xff]  ;;  %v2851_v14 = vld [vmem:[%s6218_s10 + $0x368] sm:$0xff]  ;;  %v2849_v37 = vld [vmem:[%s6218_s10 + $0x358] sm:$0xff] }
 0x270   : > { %4216 = vmatprep.subr.bf16.mxu1 %v4215_v59  ;;  %v2820_v59 = vld [vmem:[%s6218_s10 + $0x270] sm:$0xff]  ;;  %v4133_v39 = vpack.c.bf16 %v2818_v25, %v2814_v24  ;;  %v2850_v24 = vld [vmem:[%s6218_s10 + $0x360] sm:$0xff] }
 0x271   : > { %v2848_v25 = vld [vmem:[%s6218_s10 + $0x350] sm:$0xff] }
 0x272   : > { %4118 = vmatpush1.bf16.msra.mxu0 %v4117_v41  ;;  %v4233_v41 = vpack.c.bf16 %v2820_v59, %v2816_v26  ;;  %v4247_v26 = vpack.c.bf16 %v2853_v15, %v2849_v37  ;;  %v2855_v59 = vld [vmem:[%s6218_s10 + $0x388] sm:$0xff]  ;;  %v2885_v37 = vld [vmem:[%s6218_s10 + $0x478] sm:$0xff] }
 0x273   : > { %4218 = vmatpush1.bf16.msra.mxu1 %v4217_v42  ;;  %4120 = vmatprep.subr.bf16.mxu0 %v4119_v44  ;;  %v4135_v42 = vpack.c.bf16 %v2827_v30, %v2823_v29  ;;  %v2822_v44 = vld [vmem:[%s6218_s10 + $0x280] sm:$0xff]  ;;  %v2859_v29 = vld [vmem:[%s6218_s10 + $0x3a8] sm:$0xff]  ;;  %v2857_v30 = vld [vmem:[%s6218_s10 + $0x398] sm:$0xff] }
 0x274   : > { %4220 = vmatprep.subr.bf16.mxu1 %v4219_v51  ;;  %v2828_v51 = vld [vmem:[%s6218_s10 + $0x2b0] sm:$0xff]  ;;  %v4137_v56 = vpack.c.bf16 %v2826_v46, %v2822_v44  ;;  %v2858_v44 = vld [vmem:[%s6218_s10 + $0x3a0] sm:$0xff] }
 0x275   : > { %v2856_v46 = vld [vmem:[%s6218_s10 + $0x390] sm:$0xff] }
 0x276   : > { %4122 = vmatpush1.bf16.msra.mxu0 %v4121_v57  ;;  %v4237_v57 = vpack.c.bf16 %v2828_v51, %v2824_v49  ;;  %v4251_v49 = vpack.c.bf16 %v2861_v33, %v2857_v30  ;;  %v2863_v51 = vld [vmem:[%s6218_s10 + $0x3c8] sm:$0xff]  ;;  %v2893_v30 = vld [vmem:[%s6218_s10 + $0x4b8] sm:$0xff] }
 0x277   : > { %4222 = vmatpush1.bf16.msra.mxu1 %v4221_v21  ;;  %4124 = vmatprep.subr.bf16.mxu0 %v4123_v58  ;;  %v4139_v21 = vpack.c.bf16 %v2835_v53, %v2831_v52  ;;  %v2830_v58 = vld [vmem:[%s6218_s10 + $0x2c0] sm:$0xff]  ;;  %v2867_v52 = vld [vmem:[%s6218_s10 + $0x3e8] sm:$0xff]  ;;  %v2865_v53 = vld [vmem:[%s6218_s10 + $0x3d8] sm:$0xff] }
 0x278   : > { %4224 = vmatprep.subr.bf16.mxu1 %v4223_v1  ;;  %v2836_v1 = vld [vmem:[%s6218_s10 + $0x2f0] sm:$0xff]  ;;  %v4141_v6 = vpack.c.bf16 %v2834_v61, %v2830_v58  ;;  %v2866_v58 = vld [vmem:[%s6218_s10 + $0x3e0] sm:$0xff] }
 0x279   : > { %v2864_v61 = vld [vmem:[%s6218_s10 + $0x3d0] sm:$0xff] }
 0x27a   : > { %4126 = vmatpush1.bf16.msra.mxu0 %v4125_v7  ;;  %v4241_v7 = vpack.c.bf16 %v2836_v1, %v2832_v62  ;;  %v4255_v62 = vpack.c.bf16 %v2869_v17, %v2865_v53  ;;  %v2871_v1 = vld [vmem:[%s6218_s10 + $0x408] sm:$0xff] }
 0x27b   : > { %4226 = vmatpush1.bf16.msra.mxu1 %v4225_v31  ;;  %4128 = vmatprep.subr.bf16.mxu0 %v4127_v8  ;;  %v4143_v31 = vpack.c.bf16 %v2843_v3, %v2839_v2  ;;  %v2838_v8 = vld [vmem:[%s6218_s10 + $0x300] sm:$0xff]  ;;  %v2875_v2 = vld [vmem:[%s6218_s10 + $0x428] sm:$0xff]  ;;  %v2873_v3 = vld [vmem:[%s6218_s10 + $0x418] sm:$0xff] }
 0x27c   : > { %4228 = vmatprep.subr.bf16.mxu1 %v4227_v12  ;;  %v2844_v12 = vld [vmem:[%s6218_s10 + $0x330] sm:$0xff]  ;;  %v4145_v18 = vpack.c.bf16 %v2842_v32, %v2838_v8  ;;  %v2874_v8 = vld [vmem:[%s6218_s10 + $0x420] sm:$0xff] }
 0x27d   : > { %v2872_v32 = vld [vmem:[%s6218_s10 + $0x410] sm:$0xff] }
 0x27e   : > { %4130 = vmatpush1.bf16.msra.mxu0 %v4129_v19  ;;  %v4245_v19 = vpack.c.bf16 %v2844_v12, %v2840_v10  ;;  %v4259_v10 = vpack.c.bf16 %v2877_v4, %v2873_v3  ;;  %v2879_v12 = vld [vmem:[%s6218_s10 + $0x448] sm:$0xff]  ;;  %v2902_v4 = vld [vmem:[%s6218_s10 + $0x500] sm:$0xff] }
 0x27f   : > { %4230 = vmatpush1.bf16.msra.mxu1 %v4229_v22  ;;  %4132 = vmatprep.subr.bf16.mxu0 %v4131_v23  ;;  %v4147_v22 = vpack.c.bf16 %v2851_v14, %v2847_v45  ;;  %v2846_v23 = vld [vmem:[%s6218_s10 + $0x340] sm:$0xff]  ;;  %v2883_v45 = vld [vmem:[%s6218_s10 + $0x468] sm:$0xff]  ;;  %v2881_v14 = vld [vmem:[%s6218_s10 + $0x458] sm:$0xff] }
 0x280   : > { %4232 = vmatprep.subr.bf16.mxu1 %v4231_v27  ;;  %v2852_v27 = vld [vmem:[%s6218_s10 + $0x370] sm:$0xff]  ;;  %v4149_v36 = vpack.c.bf16 %v2850_v24, %v2846_v23  ;;  %v2882_v23 = vld [vmem:[%s6218_s10 + $0x460] sm:$0xff] }
 0x281   : > { %v2880_v24 = vld [vmem:[%s6218_s10 + $0x450] sm:$0xff] }
 0x282   : > { %4134 = vmatpush1.bf16.msra.mxu0 %v4133_v39  ;;  %v4249_v39 = vpack.c.bf16 %v2852_v27, %v2848_v25  ;;  %v4263_v25 = vpack.c.bf16 %v2885_v37, %v2881_v14  ;;  %v2887_v27 = vld [vmem:[%s6218_s10 + $0x488] sm:$0xff]  ;;  %v2910_v14 = vld [vmem:[%s6218_s10 + $0x540] sm:$0xff] }
 0x283   : > { %4234 = vmatpush1.bf16.msra.mxu1 %v4233_v41  ;;  %4136 = vmatprep.subr.bf16.mxu0 %v4135_v42  ;;  %v4151_v41 = vpack.c.bf16 %v2859_v29, %v2855_v59  ;;  %v2854_v42 = vld [vmem:[%s6218_s10 + $0x380] sm:$0xff]  ;;  %v2891_v59 = vld [vmem:[%s6218_s10 + $0x4a8] sm:$0xff]  ;;  %v2889_v29 = vld [vmem:[%s6218_s10 + $0x498] sm:$0xff] }
 0x284   : > { %4236 = vmatprep.subr.bf16.mxu1 %v4235_v50  ;;  %v2860_v50 = vld [vmem:[%s6218_s10 + $0x3b0] sm:$0xff]  ;;  %v4153_v54 = vpack.c.bf16 %v2858_v44, %v2854_v42  ;;  %v2890_v42 = vld [vmem:[%s6218_s10 + $0x4a0] sm:$0xff] }
 0x285   : > { %v2888_v44 = vld [vmem:[%s6218_s10 + $0x490] sm:$0xff]  ;;  %v2914_v37 = vld [vmem:[%s6218_s10 + $0x560] sm:$0xff] }
 0x286   : > { %4138 = vmatpush1.bf16.msra.mxu0 %v4137_v56  ;;  %v4253_v56 = vpack.c.bf16 %v2860_v50, %v2856_v46  ;;  %v4267_v46 = vpack.c.bf16 %v2893_v30, %v2889_v29  ;;  %v2895_v50 = vld [vmem:[%s6218_s10 + $0x4c8] sm:$0xff]  ;;  %v2918_v29 = vld [vmem:[%s6218_s10 + $0x580] sm:$0xff] }
 0x287   : > { %4238 = vmatpush1.bf16.msra.mxu1 %v4237_v57  ;;  %4140 = vmatprep.subr.bf16.mxu0 %v4139_v21  ;;  %v4155_v57 = vpack.c.bf16 %v2867_v52, %v2863_v51  ;;  %v2862_v21 = vld [vmem:[%s6218_s10 + $0x3c0] sm:$0xff]  ;;  %v2899_v51 = vld [vmem:[%s6218_s10 + $0x4e8] sm:$0xff]  ;;  %v2901_v52 = vld [vmem:[%s6218_s10 + $0x4f8] sm:$0xff] }
 0x288   : > { %4240 = vmatprep.subr.bf16.mxu1 %v4239_v0  ;;  %v2868_v0 = vld [vmem:[%s6218_s10 + $0x3f0] sm:$0xff]  ;;  %v4157_v5 = vpack.c.bf16 %v2866_v58, %v2862_v21  ;;  %v2922_v30 = vld [vmem:[%s6218_s10 + $0x5a0] sm:$0xff] }
 0x289   : > { %v2896_v21 = vld [vmem:[%s6218_s10 + $0x4d0] sm:$0xff] }
 0x28a   : > { %4142 = vmatpush1.bf16.msra.mxu0 %v4141_v6  ;;  %v4257_v6 = vpack.c.bf16 %v2868_v0, %v2864_v61  ;;  %v2900_v58 = vld [vmem:[%s6218_s10 + $0x4f0] sm:$0xff]  ;;  %v2903_v61 = vld [vmem:[%s6218_s10 + $0x508] sm:$0xff]  ;;  %v2909_v0 = vld [vmem:[%s6218_s10 + $0x538] sm:$0xff] }
 0x28b   : > { %4242 = vmatpush1.bf16.msra.mxu1 %v4241_v7  ;;  %4144 = vmatprep.subr.bf16.mxu0 %v4143_v31  ;;  %v4159_v7 = vpack.c.bf16 %v2875_v2, %v2871_v1  ;;  %v2870_v31 = vld [vmem:[%s6218_s10 + $0x400] sm:$0xff]  ;;  %v4273_v2 = vpack.c.bf16 %v2900_v58, %v2896_v21  ;;  %v2937_v21 = vld [vmem:[%s6218_s10 + $0x618] sm:$0xff] }
 0x28c   : > { %4244 = vmatprep.subr.bf16.mxu1 %v4243_v11  ;;  %v2876_v11 = vld [vmem:[%s6218_s10 + $0x430] sm:$0xff]  ;;  %v4161_v15 = vpack.c.bf16 %v2874_v8, %v2870_v31  ;;  %v2911_v8 = vld [vmem:[%s6218_s10 + $0x548] sm:$0xff] }
 0x28d   : > { %v2908_v31 = vld [vmem:[%s6218_s10 + $0x530] sm:$0xff] }
 0x28e   : > { %4146 = vmatpush1.bf16.msra.mxu0 %v4145_v18  ;;  %v4261_v18 = vpack.c.bf16 %v2876_v11, %v2872_v32  ;;  %v2913_v32 = vld [vmem:[%s6218_s10 + $0x558] sm:$0xff] }
 0x28f   : > { %4246 = vmatpush1.bf16.msra.mxu1 %v4245_v19  ;;  %4148 = vmatprep.subr.bf16.mxu0 %v4147_v22  ;;  %v4163_v19 = vpack.c.bf16 %v2883_v45, %v2879_v12  ;;  %v2878_v22 = vld [vmem:[%s6218_s10 + $0x440] sm:$0xff] }
 0x290   : > { %4248 = vmatprep.subr.bf16.mxu1 %v4247_v26  ;;  %v2884_v26 = vld [vmem:[%s6218_s10 + $0x470] sm:$0xff]  ;;  %v4165_v33 = vpack.c.bf16 %v2882_v23, %v2878_v22  ;;  %v2919_v22 = vld [vmem:[%s6218_s10 + $0x588] sm:$0xff] }
 0x291   : > { %v2923_v23 = vld [vmem:[%s6218_s10 + $0x5a8] sm:$0xff] }
 0x292   : > { %4150 = vmatpush1.bf16.msra.mxu0 %v4149_v36  ;;  %v4265_v36 = vpack.c.bf16 %v2884_v26, %v2880_v24  ;;  %v2921_v24 = vld [vmem:[%s6218_s10 + $0x598] sm:$0xff]  ;;  %v4181_v26 = vpack.c.bf16 %v2914_v37, %v2910_v14 }
 0x293   : > { %4250 = vmatpush1.bf16.msra.mxu1 %v4249_v39  ;;  %4152 = vmatprep.subr.bf16.mxu0 %v4151_v41  ;;  %v4167_v39 = vpack.c.bf16 %v2891_v59, %v2887_v27  ;;  %v2886_v41 = vld [vmem:[%s6218_s10 + $0x480] sm:$0xff]  ;;  %v4183_v59 = vpack.c.bf16 %v2923_v23, %v2919_v22 }
 0x294   : > { %4252 = vmatprep.subr.bf16.mxu1 %v4251_v49  ;;  %v2892_v49 = vld [vmem:[%s6218_s10 + $0x4b0] sm:$0xff]  ;;  %v4169_v53 = vpack.c.bf16 %v2890_v42, %v2886_v41  ;;  %v2927_v41 = vld [vmem:[%s6218_s10 + $0x5c8] sm:$0xff] }
 0x295   : > { %v4269_v17 = vpack.c.bf16 %v2892_v49, %v2888_v44  ;;  %v2931_v42 = vld [vmem:[%s6218_s10 + $0x5e8] sm:$0xff]  ;;  %v2929_v44 = vld [vmem:[%s6218_s10 + $0x5d8] sm:$0xff]  ;;  %v4185_v49 = vpack.c.bf16 %v2922_v30, %v2918_v29 }
 0x296   : > { %4154 = vmatpush1.bf16.msra.mxu0 %v4153_v54  ;;  %v4171_v54 = vpack.c.bf16 %v2899_v51, %v2895_v50  ;;  %v4187_v51 = vpack.c.bf16 %v2931_v42, %v2927_v41 }
 0x297   : > { %4254 = vmatpush1.bf16.msra.mxu1 %v4253_v56  ;;  %4156 = vmatprep.subr.bf16.mxu0 %v4155_v57  ;;  %v2894_v56 = vld [vmem:[%s6218_s10 + $0x4c0] sm:$0xff] }
 0x298   : > { %4256 = vmatprep.subr.bf16.mxu1 %v4255_v62  ;;  %v2898_v57 = vld [vmem:[%s6218_s10 + $0x4e0] sm:$0xff]  ;;  %v2907_v62 = vld [vmem:[%s6218_s10 + $0x528] sm:$0xff] }
 0x299   : > { %v4173_v1 = vpack.c.bf16 %v2898_v57, %v2894_v56  ;;  %v4175_v3 = vpack.c.bf16 %v2907_v62, %v2903_v61  ;;  %v2935_v56 = vld [vmem:[%s6218_s10 + $0x608] sm:$0xff] }
 0x29a   : > { %4158 = vmatpush1.bf16.msra.mxu0 %v4157_v5  ;;  %v2906_v5 = vld [vmem:[%s6218_s10 + $0x520] sm:$0xff]  ;;  %v2939_v57 = vld [vmem:[%s6218_s10 + $0x628] sm:$0xff] }
 0x29b   : > { %4258 = vmatpush1.bf16.msra.mxu1 %v4257_v6  ;;  %4160 = vmatprep.subr.bf16.mxu0 %v4159_v7  ;;  %v2904_v6 = vld [vmem:[%s6218_s10 + $0x510] sm:$0xff]  ;;  %v4177_v11 = vpack.c.bf16 %v2906_v5, %v2902_v4  ;;  %v4191_v62 = vpack.c.bf16 %v2939_v57, %v2935_v56 }
 0x29c   : > { %4260 = vmatprep.subr.bf16.mxu1 %v4259_v10  ;;  %v2917_v10 = vld [vmem:[%s6218_s10 + $0x578] sm:$0xff]  ;;  %v4277_v12 = vpack.c.bf16 %v2908_v31, %v2904_v6 }
 0x29d   : > { %3007 = vmatmul.mubr.f32.vlgmr.msra.gmra.mrb[12].mxu0 %v6133_v48 }
 0x29e   : > { %4162 = vmatpush1.bf16.msra.mxu0 %v4161_v15  ;;  %3161 = vmatmul.mubr.f32.vlgmr.msra.gmra.mrb[12].mxu1 %v6133_v48  ;;  %v2897_v48 = vld [vmem:[%s6218_s10 + $0x4d8] sm:$0xff]  ;;  %v2912_v15 = vld [vmem:[%s6218_s10 + $0x550] sm:$0xff] }
 0x29f   : > { %4262 = vmatpush1.bf16.msra.mxu1 %v4261_v18  ;;  %4164 = vmatprep.subr.bf16.mxu0 %v4163_v19  ;;  %v4279_v18 = vpack.c.bf16 %v2917_v10, %v2913_v32  ;;  %v2916_v19 = vld [vmem:[%s6218_s10 + $0x570] sm:$0xff] }
 0x2a0   : > { %4264 = vmatprep.subr.bf16.mxu1 %v4263_v25  ;;  %3012 = vmatprep.mubr.f32.mxu0 %v6148_v60  ;;  %v2925_v25 = vld [vmem:[%s6218_s10 + $0x5b8] sm:$0xff]  ;;  %v4281_v27 = vpack.c.bf16 %v2916_v19, %v2912_v15 }
 0x2a1   : > { %3166 = vmatprep.mubr.f32.mxu1 %v6148_v60  ;;  %3013 = vmatmul.mubr.f32.gmra.mrb[14].mxu0 %v6157_v63  ;;  %v4271_v60 = vpack.c.bf16 %v2901_v52, %v2897_v48  ;;  %v2926_v48 = vld [vmem:[%s6218_s10 + $0x5c0] sm:$0xff] }
 0x2a2   : > { %4166 = vmatpush1.bf16.msra.mxu0 %v4165_v33  ;;  %3167 = vmatmul.mubr.f32.gmra.mrb[14].mxu1 %v6157_v63  ;;  %v2905_v63 = vld [vmem:[%s6218_s10 + $0x518] sm:$0xff]  ;;  %v2920_v33 = vld [vmem:[%s6218_s10 + $0x590] sm:$0xff]  ;;  %v2930_v52 = vld [vmem:[%s6218_s10 + $0x5e0] sm:$0xff] }
 0x2a3   : > { %4266 = vmatpush1.bf16.msra.mxu1 %v4265_v36  ;;  %4168 = vmatprep.subr.bf16.mxu0 %v4167_v39  ;;  %v4275_v7 = vpack.c.bf16 %v2909_v0, %v2905_v63  ;;  %v4283_v36 = vpack.c.bf16 %v2925_v25, %v2921_v24  ;;  %v2924_v39 = vld [vmem:[%s6218_s10 + $0x5b0] sm:$0xff]  ;;  %v4189_v58 = vpack.c.bf16 %v2930_v52, %v2926_v48  ;;  %v2934_v63 = vld [vmem:[%s6218_s10 + $0x600] sm:$0xff] }
 0x2a4   : > { %4268 = vmatprep.subr.bf16.mxu1 %v4267_v46  ;;  %3481 = vmatprep.mubr.msk.f32.mxu0 %vm1395_vm0, %v6170_v9  ;;  %v2933_v46 = vld [vmem:[%s6218_s10 + $0x5f8] sm:$0xff]  ;;  %v4285_v50 = vpack.c.bf16 %v2924_v39, %v2920_v33  ;;  %v2938_v0 = vld [vmem:[%s6218_s10 + $0x620] sm:$0xff] }
 0x2a5   : > { %3483 = vmatprep.mubr.msk.f32.mxu1 %vm1395_vm0, %v6170_v9  ;;  %v2915_v9 = vld [vmem:[%s6218_s10 + $0x568] sm:$0xff]  ;;  %v4193_v4 = vpack.c.bf16 %v2938_v0, %v2934_v63 }
 0x2a6   : > { %4170 = vmatpush1.bf16.msra.mxu0 %v4169_v53  ;;  %v4179_v45 = vpack.c.bf16 %v2915_v9, %v2911_v8  ;;  %v2928_v53 = vld [vmem:[%s6218_s10 + $0x5d0] sm:$0xff] }
 0x2a7   : > { %4270 = vmatpush1.bf16.msra.mxu1 %v4269_v17  ;;  %4172 = vmatprep.subr.bf16.mxu0 %v4171_v54  ;;  %v4287_v17 = vpack.c.bf16 %v2933_v46, %v2929_v44  ;;  %v2932_v54 = vld [vmem:[%s6218_s10 + $0x5f0] sm:$0xff] }
 0x2a8   : > { %4272 = vmatprep.subr.bf16.mxu1 %v4271_v60  ;;  %v2941_v60 = vld [vmem:[%s6218_s10 + $0x638] sm:$0xff]  ;;  %v4289_v61 = vpack.c.bf16 %v2932_v54, %v2928_v53 }
 0x2aa   : > { %4174 = vmatpush1.bf16.msra.mxu0 %v4173_v1  ;;  %v4291_v1 = vpack.c.bf16 %v2941_v60, %v2937_v21 }
 0x2ab   : > { %4274 = vmatpush1.bf16.msra.mxu1 %v4273_v2  ;;  %4176 = vmatprep.subr.bf16.mxu0 %v4175_v3  ;;  %v2936_v2 = vld [vmem:[%s6218_s10 + $0x610] sm:$0xff] }
 0x2ac   : > { %4276 = vmatprep.subr.bf16.mxu1 %v4275_v7  ;;  %v2940_v3 = vld [vmem:[%s6218_s10 + $0x630] sm:$0xff] }
 0x2ad   : > { %v4293_v5 = vpack.c.bf16 %v2940_v3, %v2936_v2 }
 0x2ae   : > { %4178 = vmatpush1.bf16.msra.mxu0 %v4177_v11 }
 0x2af   : > { %4278 = vmatpush1.bf16.msra.mxu1 %v4277_v12  ;;  %4180 = vmatprep.subr.bf16.mxu0 %v4179_v45 }
 0x2b0   : > { %4280 = vmatprep.subr.bf16.mxu1 %v4279_v18 }
 0x2b2   : > { %4182 = vmatpush1.bf16.msra.mxu0 %v4181_v26 }
 0x2b3   : > { %4282 = vmatpush1.bf16.msra.mxu1 %v4281_v27  ;;  %4184 = vmatprep.subr.bf16.mxu0 %v4183_v59 }
 0x2b4   : > { %4284 = vmatprep.subr.bf16.mxu1 %v4283_v36 }
 0x2b6   : > { %4186 = vmatpush1.bf16.msra.mxu0 %v4185_v49 }
 0x2b7   : > { %4286 = vmatpush1.bf16.msra.mxu1 %v4285_v50  ;;  %4188 = vmatprep.subr.bf16.mxu0 %v4187_v51 }
 0x2b8   : > { %4288 = vmatprep.subr.bf16.mxu1 %v4287_v17 }
 0x2ba   : > { %4190 = vmatpush1.bf16.msra.mxu0 %v4189_v58 }
 0x2bb   : > { %4290 = vmatpush1.bf16.msra.mxu1 %v4289_v61  ;;  %4192 = vmatprep.subr.bf16.mxu0 %v4191_v62 }
 0x2bc   : > { %4292 = vmatprep.subr.bf16.mxu1 %v4291_v1 }
 0x2be   : > { %4194 = vmatpush1.bf16.msra.mxu0 %v4193_v4 }
 0x2bf   : > { %4294 = vmatpush1.bf16.msra.mxu1 %v4293_v5 }
 0x2c1   : > { %3084 = vmatmul.mubr.f32.vlgmr.msra.gmra.mrb[12].mxu0 %v6244_v38 }
 0x2c2   : > { %3238 = vmatmul.mubr.f32.vlgmr.msra.gmra.mrb[12].mxu1 %v6244_v38  ;;  %3482 = vmatprep.mubr.msk.f32.mxu0 %vm1395_vm0, %v6253_v43 }
 0x2c3   : > { %3484 = vmatprep.mubr.msk.f32.mxu1 %vm1395_vm0, %v6253_v43 }
 0x2c5   : > { %3090 = vmatmul.mubr.f32.gmra.mrb[14].mxu0 %v6268_v55 }
 0x2c6   : > { %3244 = vmatmul.mubr.f32.gmra.mrb[14].mxu1 %v6268_v55 }
 0x2c8   : > { %v3263_v29 = vpop.permute.xlu0 %3262 }
 0x2cc   : > { %v2053_v6 = vpop.f32.mrb[4].mxu0  ;;  %v3268_v21 = vpop.permute.xlu0 %3267 }
 0x2cd   : > { %v2218_v7 = vmax.f32 %v6287_v13, %v2053_v6  ;;  %v2207_v31 = vpop.f32.mrb[4].mxu1  ;;  %v2055_v8 = vpop.f32.mrb[5].mxu0 }
 0x2ce   : > { %v2220_v9 = vmax.f32 %v6292_v16, %v2207_v31  ;;  %v2219_v32 = vmax.f32 %v6294_v47, %v2055_v8  ;;  %v2209_v38 = vpop.f32.mrb[5].mxu1 }
 0x2cf   : > { %v2221_v10 = vmax.f32 %v6298_v20, %v2209_v38 }
 0x2d0   : > { %v2059_v11 = vpop.f32.mrb[6].mxu0 }
 0x2d1   : > { %v2222_v12 = vmax.f32 %v6303_v28, %v2059_v11  ;;  %v2213_v43 = vpop.f32.mrb[6].mxu1  ;;  %v2061_v45 = vpop.f32.mrb[7].mxu0 }
 0x2d2   : > { %v2224_v14 = vmax.f32 %v6308_v34, %v2213_v43  ;;  %v2223_v55 = vmax.f32 %v6310_v35, %v2061_v45  ;;  %v2215_v37 = vpop.f32.mrb[7].mxu1 }
 0x2d3   : > { %v2225_v13 = vmax.f32 %v6314_v40, %v2215_v37 }
 0x330   : > { %v2569_v15 = vpop.f32.mrb[8].mxu0 }
 0x331   : > { %v2734_v18 = vmax.f32 %v2218_v7, %v2569_v15  ;;  %v2723_v16 = vpop.f32.mrb[8].mxu1  ;;  %v2571_v47 = vpop.f32.mrb[9].mxu0 }
 0x332   : > { %v2736_v19 = vmax.f32 %v2220_v9, %v2723_v16  ;;  %v2735_v22 = vmax.f32 %v2219_v32, %v2571_v47  ;;  %v2725_v20 = vpop.f32.mrb[9].mxu1 }
 0x333   : > { %v2737_v23 = vmax.f32 %v2221_v10, %v2725_v20 }
 0x334   : > { %v2575_v24 = vpop.f32.mrb[10].mxu0 }
 0x335   : > { %v2738_v28 = vmax.f32 %v2222_v12, %v2575_v24  ;;  %v2729_v25 = vpop.f32.mrb[10].mxu1  ;;  %v2577_v26 = vpop.f32.mrb[11].mxu0 }
 0x336   : > { %v2740_v27 = vmax.f32 %v2224_v14, %v2729_v25  ;;  %v2739_v34 = vmax.f32 %v2223_v55, %v2577_v26  ;;  %v2731_v59 = vpop.f32.mrb[11].mxu1 }
 0x337   : > { %v2741_v35 = vmax.f32 %v2225_v13, %v2731_v59 }
 0x394   : > { %v3085_v30 = vpop.f32.mrb[12].mxu0 }
 0x395   : > { %v3250_v40 = vmax.f32 %v2734_v18, %v3085_v30  ;;  %v3239_v33 = vpop.f32.mrb[12].mxu1  ;;  %v3087_v36 = vpop.f32.mrb[13].mxu0 }
 0x396   : > { %v3252_v39 = vmax.f32 %v2736_v19, %v3239_v33  ;;  %v3251_v41 = vmax.f32 %v2735_v22, %v3087_v36  ;;  %v3241_v42 = vpop.f32.mrb[13].mxu1 }
 0x397   : > { %v3270_v44 = vadd.f32 %v3263_v29, %v3250_v40  ;;  %v3253_v46 = vmax.f32 %v2737_v23, %v3241_v42 }
 0x398   : > { %v3272_v49 = vadd.f32 %v3263_v29, %v3252_v39  ;;  %v3271_v50 = vadd.f32 %v3263_v29, %v3251_v41  ;;  %v3091_v51 = vpop.f32.mrb[14].mxu0 }
 0x399   : > { %v3278_v48 = vmax.f32 %v3270_v44, 0.0  ;;  %v3273_v52 = vadd.f32 %v3263_v29, %v3253_v46  ;;  %v3254_v53 = vmax.f32 %v2738_v28, %v3091_v51  ;;  %v3245_v17 = vpop.f32.mrb[14].mxu1  ;;  %v3093_v54 = vpop.f32.mrb[15].mxu0 }
 0x39a   : > { %v3280_v56 = vmax.f32 %v3272_v49, 0.0  ;;  %v3279_v57 = vmax.f32 %v3271_v50, 0.0  ;;  %v3256_v60 = vmax.f32 %v2740_v27, %v3245_v17  ;;  %v3255_v58 = vmax.f32 %v2739_v34, %v3093_v54  ;;  %v3247_v61 = vpop.f32.mrb[15].mxu1 }
 0x39b   : > { %3286 = vst [vmem:[%s6491_s16] sm:$0xff] %v3278_v48  ;;  %v3281_v62 = vmax.f32 %v3273_v52, 0.0  ;;  %v3274_v63 = vadd.f32 %v3268_v21, %v3254_v53  ;;  %v3257_v0 = vmax.f32 %v2741_v35, %v3247_v61  ;;  %3300 = sbr.rel (!%p6540_p7) target bundleno = 938 (0x3aa), region = 102 }
 0x39c   : > { %3288 = vst [vmem:[%s6491_s16 + $0x10] sm:$0xff] %v3280_v56  ;;  %3287 = vst [vmem:[%s6491_s16 + $0x8] sm:$0xff] %v3279_v57  ;;  %v3276_v1 = vadd.f32 %v3268_v21, %v3256_v60  ;;  %v3275_v2 = vadd.f32 %v3268_v21, %v3255_v58 }
 0x39d   : > { %3289 = vst [vmem:[%s6491_s16 + $0x18] sm:$0xff] %v3281_v62  ;;  %v3282_v3 = vmax.f32 %v3274_v63, 0.0  ;;  %v3277_v4 = vadd.f32 %v3268_v21, %v3257_v0 }
 0x39e   : > { %v3284_v5 = vmax.f32 %v3276_v1, 0.0  ;;  %v3283_v6 = vmax.f32 %v3275_v2, 0.0 }
 0x39f   : > { %3290 = vst [vmem:[%s6491_s16 + $0x20] sm:$0xff] %v3282_v3  ;;  %v3285_v7 = vmax.f32 %v3277_v4, 0.0 }
 0x3a0   : > { %3292 = vst [vmem:[%s6491_s16 + $0x30] sm:$0xff] %v3284_v5  ;;  %3291 = vst [vmem:[%s6491_s16 + $0x28] sm:$0xff] %v3283_v6 }
 0x3a1   : > { %3293 = vst [vmem:[%s6491_s16 + $0x38] sm:$0xff] %v3285_v7 }
 0x3a2   : > { %v3316_v31 = vld [vmem:[%s6491_s16] sm:$0xff] }
 0x3a3   : > { %v3318_v8 = vld [vmem:[%s6491_s16 + $0x8] sm:$0xff]  ;;  %v3320_v9 = vld [vmem:[%s6491_s16 + $0x10] sm:$0xff]  ;;  %3317 = vst [vmem:[%s3303_s2] sm:$0xff] %v3316_v31 }
 0x3a4   : > { %v3322_v32 = vld [vmem:[%s6491_s16 + $0x18] sm:$0xff]  ;;  %3319 = vst [vmem:[%s3303_s2 + $0x8] sm:$0xff] %v3318_v8  ;;  %3321 = vst [vmem:[%s3303_s2 + $0x10] sm:$0xff] %v3320_v9 }
 0x3a5   : > { %3323 = vst [vmem:[%s3303_s2 + $0x18] sm:$0xff] %v3322_v32 }
 0x3a6   : > { %v3324_v38 = vld [vmem:[%s6491_s16 + $0x20] sm:$0xff] }
 0x3a7   : > { %v3326_v10 = vld [vmem:[%s6491_s16 + $0x28] sm:$0xff]  ;;  %3325 = vst [vmem:[%s3303_s2 + $0x160] sm:$0xff] %v3324_v38  ;;  %v3328_v11 = vld [vmem:[%s6491_s16 + $0x30] sm:$0xff] }
 0x3a8   : > { %3327 = vst [vmem:[%s3303_s2 + $0x168] sm:$0xff] %v3326_v10  ;;  %v3330_v12 = vld [vmem:[%s6491_s16 + $0x38] sm:$0xff]  ;;  %3329 = vst [vmem:[%s3303_s2 + $0x170] sm:$0xff] %v3328_v11 }
 0x3a9   : > { %3331 = vst [vmem:[%s3303_s2 + $0x178] sm:$0xff] %v3330_v12 }
 0x3aa PF: > { %p19_p6 = scmp.ge.s32.totalorder %s4540_s26, 13   ;;  %s6541_s21 = smov %s4467_s22 }
 0x3ab   : > { %s6542_s22 = smov %s4471_s23  ;;  %s6543_s23 = smov %s4550_s29 }
 0x3ac   : > { %s6544_s24 = smov %s4540_s26  ;;  %21 = sbr.rel (!%p19_p6) target bundleno = 7 (0x7), region = 182 }
 0x3b3   :  { %3347 = vsyncpa [#allocation4], 1 }
 0x3b4   :  { %3349 = vsyncpa [#allocation4 + $0x1], 1 }
 0x3b5   :  { %3350 = vsyncpa [#allocation6], 1 }
 0x3b6   :  { %3352 = vsyncpa [#allocation6 + $0x1], 1 }

// kernel: embedding_net_forward.5
= control target key start
LH: loop header
LB: loop body
LE: loop exit
PB: predicated region body
PF: predicated region fallthrough
CT: control target
= control target key end

     0   :  { %12 = vsyncpa [#allocation4], 0  ;;  %s5681_s0 = inlined_call_operand.vmem [shape: f32[8,45056], index: 0, kind: input, shape index: {}]   ;;  %s5682_s1 = inlined_call_operand.hbm [shape: f32[45056,256], index: 1, kind: input, shape index: {}]   ;;  %s5683_s2 = inlined_call_operand.vmem [shape: f32[1,256], index: 2, kind: input, shape index: {}]   ;;  %s5684_s3 = inlined_call_operand.vmem [shape: f32[256,256], index: 3, kind: input, shape index: {}]   ;;  %s5685_s4 = inlined_call_operand.vmem [shape: f32[1,256], index: 4, kind: input, shape index: {}]   ;;  %s5686_s5 = inlined_call_operand.vmem [shape: f32[256,32], index: 5, kind: input, shape index: {}]   ;;  %s5687_s6 = inlined_call_operand.vmem [shape: f32[1,32], index: 6, kind: input, shape index: {}]   ;;  %s5688_s7 = inlined_call_operand.vmem [shape: f32[8,32], index: 7, kind: output, shape index: {}]  }
   0x1   :  { %14 = vsyncpa [#allocation4 + $0x1], 0  ;;  %s4200_s24 = smov 0   ;;  %s4202_s25 = smov 0  }
   0x2   :  { %s4204_s26 = smov 0   ;;  %s4206_s27 = smov 0  }
   0x3 LB: > { %s4219_s28 = sadd.s32 4294967295, %s4154_s27   ;;  %s4222_s29 = sadd.s32 1, %s4154_s27   ;;  %s4154_s27 = sphi %s4206_s27, %s5695_s27   ;;  %s4150_s26 = sphi %s4204_s26, %s5694_s26   ;;  %s4146_s25 = sphi %s4202_s25, %s5693_s25   ;;  %s4142_s24 = sphi %s4200_s24, %s5692_s24  }
   0x4   : > { %s50_s30 = ssub.s32 %s4154_s27, %s4222_s29  ;;  %s53_s8 = sadd.s32 1, %s4150_s26 }
   0x5   : > { %p51_p0 = scmp.eq.s32.totalorder %s50_s30, 0  ;;  %p60_p1 = scmp.ne.s32.totalorder %s4150_s26, %s4146_s25 }
   0x6   : > { %p61_p2 = scmp.eq.s32.totalorder %s4154_s27, 0  ;;  %p66_p3 = scmp.ne.s32.totalorder %s4146_s25, %s4142_s24 }
   0x7   : > { %s4232_s9 = scalar_select %p51_p0, %s4150_s26, %s53_s8  }
   0x8   : > { %p62_p4 = por %p61_p2, %p60_p1  ;;  %p67_p5 = scmp.eq.s32.totalorder %s4219_s28, 0 }
   0x9   : > { %p4054_p6 = scmp.lt.s32.totalorder %s4154_s27, 11  ;;  %s240_s11 = sand.u32 1, %s4150_s26  }
   0xa   : > { %p4236_p7 = por %p67_p5, %p66_p3  ;;  %s2848_s12 = sshll.u32 %s240_s11, 13 }
   0xb   : > { %s2862_s13 = sshll.u32 %s4154_s27, 17  ;;  %s244_s17 = scalar_lea.vmem [#allocation3], %s2848_s12 }
   0xc   : > { %s4245_s16 = scalar_lea.hbm %s5682_s1, %s2862_s13  ;;  %s252_s18 = sshll.u32 %s244_s17, 4  ;;  %s4247_s18 = int_to_ptr.vmem [resolvable:$true] %s252_s18 }
   0xd   : > { %p4249_p8 = pnand %p4054_p6, %p62_p4  ;;  %s4254_s20 = scalar_lea.sflag [#allocation4], %s240_s11 }
   0xe   : > { %s4090_s21 = scalar_lea.hbm %s4245_s16, 131072  ;;  %s4095_s24 = scalar_lea.hbm %s5682_s1, 1441792 }
   0xf   : > { %p4091_p10 = scmp.ne.s32.totalorder %s4245_s16, %s4090_s21  ;;  %p4092_p11 = pneg %p4249_p8 }
  0x10   : > { %p4096_p0 = scmp.lt.u32.totalorder %s4245_s16, %s5682_s1  ;;  %p4097_p1 = scmp.lt.u32.totalorder %s4095_s24, %s4090_s21 }
  0x11   : > { %p4093_p12 = pnand %p4092_p11, %p4091_p10  ;;  %p4099_p3 = scmp.lt.u32.totalorder %s4090_s21, %s4245_s16 }
  0x12   : > { %p4098_p2 = por %p4097_p1, %p4096_p0 }
  0x13   : > { %p4094_p13 = pneg %p4093_p12 }
  0x14   : > { %p4100_p4 = por %p4099_p3, %p4098_p2 }
  0x16   : > { %p4101_p5 = pnand %p4100_p4, %p4094_p13 }
  0x18   : > { %4104 = shalt.err (!%p4101_p5)
}
  0x19   : > { %s4105_s11 = scalar_lea.vmem %s4247_s18, 131072  ;;  %s4156_s12 = smov [#allocation3]  }
  0x1a   : > { %p4106_p6 = scmp.ne.s32.totalorder %s4247_s18, %s4105_s11  ;;  %s4110_s13 = sshll.u32 %s4156_s12, 4  ;;  %s4111_s13 = int_to_ptr.vmem [resolvable:$false] %s4110_s13 }
  0x1b   : > { %s4112_s14 = scalar_lea.vmem %s4111_s13, 262144  ;;  %p4113_p9 = scmp.lt.s32.totalorder %s4247_s18, %s4111_s13 }
  0x1c   : > { %p4108_p10 = pnand %p4106_p6, %p4092_p11  ;;  %p4114_p0 = scmp.lt.s32.totalorder %s4112_s14, %s4105_s11 }
  0x1e   : > { %p4109_p12 = pneg %p4108_p10  ;;  %p4115_p1 = por %p4114_p0, %p4113_p9 }
  0x20   : > { %p4116_p2 = pnand %p4115_p1, %p4109_p12 }
  0x22   : > { %4119 = shalt.err (!%p4116_p2)
}
  0x23   : > { %s4157_s15 = smov 256   ;;  %s4158_s17 = smov 16  }
  0x24   : > { %4053 = dma.hbm_to_vmem [thread:$0]  (!%p4249_p8), %s4245_s16, 131072, %s4247_s18, %s4254_s20, %s4157_s15, %s4157_s15, %s4158_s17  }
  0x25   : > { %p260_p11 = scmp.lt.s32.totalorder %s4154_s27, 12  ;;  %p5691_p13 = scmp.ge.s32.totalorder %s4154_s27, 1 }
  0x27   : > { %p261_p3 = pnand %p5691_p13, %p260_p11 }
  0x28   : > { %s266_s21 = sand.u32 (!%p261_p3), 1, %s4146_s25  }
  0x29   : > { %264 = sbr.rel (%p261_p3) target bundleno = 1265 (0x4f1), region = 48  ;;  %s2853_s22 = sshll.u32 (!%p261_p3), %s266_s21, 13 }
  0x2a   : > { %s267_s23 = scalar_lea.sflag (!%p261_p3), [#allocation4], %s266_s21  ;;  %s4286_s24 = scalar_lea.vmem (!%p261_p3), [#allocation3], %s2853_s22 }
  0x30   : > { %4137 = dma.done.wait (%p4236_p7), %s267_s23, 131072  }
  0x31   : > { %4139 = vsyncadd (%p4236_p7), %s267_s23, 4294836224  ;;  %s2854_s30 = sshll.u32 %s4219_s28, 5  ;;  %p2856_p8 = scmp.ne.s32.totalorder %s4219_s28, 0 }
  0x32   : > { %p302_p9 = scmp.lt.s32.totalorder %s2854_s30, 351  ;;  %v4159_v0 = vmov (!%p2856_p8), 0.0  }
  0x33   : > { %311 = sbr.rel (%p2856_p8) target bundleno = 58 (0x3a), region = 56  ;;  %312 = vst [vmem:[#allocation2] sm:$0xff] (!%p2856_p8), %v4159_v0  ;;  %313 = vst [vmem:[#allocation2 + $0x8] sm:$0xff] (!%p2856_p8), %v4159_v0 }
  0x34   : > { %s5697_s30 = smov (!%p302_p9, %s2854_s30), 351 }
  0x35   : > { %s2855_s16 = sshll.u32 %s5697_s30, 3 }
  0x36   : > { %s4296_s19 = scalar_lea.vmem %s5681_s0, %s2855_s16 }
  0x3a PF: > { %v349_v1 = vld [vmem:[%s4286_s24 + $0x8] sm:$0xff]  ;;  %v351_v2 = vld [vmem:[%s4286_s24 + $0x18] sm:$0xff]  ;;  %v348_v6 = vld [vmem:[%s4286_s24] sm:$0xff]  ;;  %p2857_p7 = scmp.ne.s32.totalorder %s4219_s28, 10 }
  0x3b   : > { %v861_v3 = vld [vmem:[%s4286_s24 + $0x1008] sm:$0xff]  ;;  %v2898_v4 = vpack.c.bf16 %v351_v2, %v349_v1  ;;  %v863_v5 = vld [vmem:[%s4286_s24 + $0x1018] sm:$0xff]  ;;  %v350_v7 = vld [vmem:[%s4286_s24 + $0x10] sm:$0xff]  ;;  %vm2792_vm0 = vcmask (!%p2857_p7), 261120  }
  0x3c   : > { %v3410_v8 = vpack.c.bf16 %v863_v5, %v861_v3  ;;  %v2900_v9 = vpack.c.bf16 %v350_v7, %v348_v6  ;;  %v860_v10 = vld [vmem:[%s4286_s24 + $0x1000] sm:$0xff]  ;;  %v862_v11 = vld [vmem:[%s4286_s24 + $0x1010] sm:$0xff]  ;;  %v353_v12 = vld [vmem:[%s4286_s24 + $0x28] sm:$0xff] }
  0x3d   : > { %2899 = vmatprep.subr.bf16.mxu1 %v2898_v4  ;;  %v3412_v13 = vpack.c.bf16 %v862_v11, %v860_v10  ;;  %v355_v14 = vld [vmem:[%s4286_s24 + $0x38] sm:$0xff]  ;;  %v865_v15 = vld [vmem:[%s4286_s24 + $0x1028] sm:$0xff]  ;;  %v352_v19 = vld [vmem:[%s4286_s24 + $0x20] sm:$0xff] }
  0x3e   : > { %v867_v16 = vld [vmem:[%s4286_s24 + $0x1038] sm:$0xff]  ;;  %3411 = vmatprep.subr.bf16.mxu0 %v3410_v8  ;;  %2901 = vmatpush1.bf16.msra.mxu1 %v2900_v9  ;;  %v2902_v17 = vpack.c.bf16 %v355_v14, %v353_v12  ;;  %v354_v20 = vld [vmem:[%s4286_s24 + $0x30] sm:$0xff]  ;;  %v864_v21 = vld [vmem:[%s4286_s24 + $0x1020] sm:$0xff] }
  0x3f   : > { %v3414_v18 = vpack.c.bf16 %v867_v16, %v865_v15  ;;  %3413 = vmatpush1.bf16.msra.mxu0 %v3412_v13  ;;  %v2904_v22 = vpack.c.bf16 %v354_v20, %v352_v19  ;;  %v866_v23 = vld [vmem:[%s4286_s24 + $0x1030] sm:$0xff]  ;;  %v357_v24 = vld [vmem:[%s4286_s24 + $0x48] sm:$0xff]  ;;  %v359_v25 = vld [vmem:[%s4286_s24 + $0x58] sm:$0xff] }
  0x40   : > { %2903 = vmatprep.subr.bf16.mxu1 %v2902_v17  ;;  %v3416_v26 = vpack.c.bf16 %v866_v23, %v864_v21  ;;  %v2906_v27 = vpack.c.bf16 %v359_v25, %v357_v24  ;;  %v869_v28 = vld [vmem:[%s4286_s24 + $0x1048] sm:$0xff]  ;;  %v871_v29 = vld [vmem:[%s4286_s24 + $0x1058] sm:$0xff]  ;;  %v356_v30 = vld [vmem:[%s4286_s24 + $0x40] sm:$0xff] }
  0x41   : > { %3415 = vmatprep.subr.bf16.mxu0 %v3414_v18  ;;  %v3418_v31 = vpack.c.bf16 %v871_v29, %v869_v28  ;;  %v358_v32 = vld [vmem:[%s4286_s24 + $0x50] sm:$0xff]  ;;  %v868_v33 = vld [vmem:[%s4286_s24 + $0x1040] sm:$0xff]  ;;  %v361_v36 = vld [vmem:[%s4286_s24 + $0x68] sm:$0xff] }
  0x42   : > { %v870_v34 = vld [vmem:[%s4286_s24 + $0x1050] sm:$0xff]  ;;  %2905 = vmatpush1.bf16.msra.mxu1 %v2904_v22  ;;  %v2908_v35 = vpack.c.bf16 %v358_v32, %v356_v30  ;;  %v363_v37 = vld [vmem:[%s4286_s24 + $0x78] sm:$0xff]  ;;  %v873_v38 = vld [vmem:[%s4286_s24 + $0x1068] sm:$0xff] }
  0x43   : > { %3417 = vmatpush1.bf16.msra.mxu0 %v3416_v26  ;;  %2907 = vmatprep.subr.bf16.mxu1 %v2906_v27  ;;  %v3420_v39 = vpack.c.bf16 %v870_v34, %v868_v33  ;;  %v2910_v40 = vpack.c.bf16 %v363_v37, %v361_v36  ;;  %v875_v41 = vld [vmem:[%s4286_s24 + $0x1078] sm:$0xff]  ;;  %v360_v42 = vld [vmem:[%s4286_s24 + $0x60] sm:$0xff]  ;;  %v362_v43 = vld [vmem:[%s4286_s24 + $0x70] sm:$0xff] }
  0x44   : > { %3419 = vmatprep.subr.bf16.mxu0 %v3418_v31  ;;  %v3422_v44 = vpack.c.bf16 %v875_v41, %v873_v38  ;;  %v872_v45 = vld [vmem:[%s4286_s24 + $0x1060] sm:$0xff]  ;;  %v874_v46 = vld [vmem:[%s4286_s24 + $0x1070] sm:$0xff]  ;;  %v365_v47 = vld [vmem:[%s4286_s24 + $0x88] sm:$0xff]  ;;  %v2912_v51 = vpack.c.bf16 %v362_v43, %v360_v42 }
  0x45   : > { %v367_v48 = vld [vmem:[%s4286_s24 + $0x98] sm:$0xff]  ;;  %v877_v49 = vld [vmem:[%s4286_s24 + $0x1088] sm:$0xff]  ;;  %v3424_v52 = vpack.c.bf16 %v874_v46, %v872_v45  ;;  %v364_v54 = vld [vmem:[%s4286_s24 + $0x80] sm:$0xff] }
  0x46   : > { %v879_v50 = vld [vmem:[%s4286_s24 + $0x1098] sm:$0xff]  ;;  %2909 = vmatpush1.bf16.msra.mxu1 %v2908_v35  ;;  %v2914_v53 = vpack.c.bf16 %v367_v48, %v365_v47  ;;  %v366_v55 = vld [vmem:[%s4286_s24 + $0x90] sm:$0xff]  ;;  %v876_v56 = vld [vmem:[%s4286_s24 + $0x1080] sm:$0xff] }
  0x47   : > { %3421 = vmatpush1.bf16.msra.mxu0 %v3420_v39  ;;  %2911 = vmatprep.subr.bf16.mxu1 %v2910_v40  ;;  %v3426_v57 = vpack.c.bf16 %v879_v50, %v877_v49  ;;  %v878_v58 = vld [vmem:[%s4286_s24 + $0x1090] sm:$0xff]  ;;  %v369_v59 = vld [vmem:[%s4286_s24 + $0xa8] sm:$0xff]  ;;  %v371_v60 = vld [vmem:[%s4286_s24 + $0xb8] sm:$0xff]  ;;  %v2916_v63 = vpack.c.bf16 %v366_v55, %v364_v54 }
  0x48   : > { %3423 = vmatprep.subr.bf16.mxu0 %v3422_v44  ;;  %v881_v61 = vld [vmem:[%s4286_s24 + $0x10a8] sm:$0xff]  ;;  %v883_v62 = vld [vmem:[%s4286_s24 + $0x10b8] sm:$0xff]  ;;  %v3428_v0 = vpack.c.bf16 %v878_v58, %v876_v56  ;;  %v2918_v1 = vpack.c.bf16 %v371_v60, %v369_v59  ;;  %v368_v2 = vld [vmem:[%s4286_s24 + $0xa0] sm:$0xff] }
  0x49   : > { %v370_v3 = vld [vmem:[%s4286_s24 + $0xb0] sm:$0xff]  ;;  %v880_v4 = vld [vmem:[%s4286_s24 + $0x10a0] sm:$0xff]  ;;  %v3430_v5 = vpack.c.bf16 %v883_v62, %v881_v61  ;;  %v373_v7 = vld [vmem:[%s4286_s24 + $0xc8] sm:$0xff] }
  0x4a   : > { %2913 = vmatpush1.bf16.msra.mxu1 %v2912_v51  ;;  %v882_v6 = vld [vmem:[%s4286_s24 + $0x10b0] sm:$0xff]  ;;  %v375_v8 = vld [vmem:[%s4286_s24 + $0xd8] sm:$0xff]  ;;  %v885_v9 = vld [vmem:[%s4286_s24 + $0x10c8] sm:$0xff]  ;;  %v2920_v11 = vpack.c.bf16 %v370_v3, %v368_v2 }
  0x4b   : > { %3425 = vmatpush1.bf16.msra.mxu0 %v3424_v52  ;;  %2915 = vmatprep.subr.bf16.mxu1 %v2914_v53  ;;  %v887_v10 = vld [vmem:[%s4286_s24 + $0x10d8] sm:$0xff]  ;;  %v3432_v12 = vpack.c.bf16 %v882_v6, %v880_v4  ;;  %v2922_v13 = vpack.c.bf16 %v375_v8, %v373_v7  ;;  %v372_v14 = vld [vmem:[%s4286_s24 + $0xc0] sm:$0xff]  ;;  %v374_v15 = vld [vmem:[%s4286_s24 + $0xd0] sm:$0xff] }
  0x4c   : > { %3427 = vmatprep.subr.bf16.mxu0 %v3426_v57  ;;  %v884_v16 = vld [vmem:[%s4286_s24 + $0x10c0] sm:$0xff]  ;;  %v3434_v17 = vpack.c.bf16 %v887_v10, %v885_v9  ;;  %v886_v18 = vld [vmem:[%s4286_s24 + $0x10d0] sm:$0xff]  ;;  %v377_v19 = vld [vmem:[%s4286_s24 + $0xe8] sm:$0xff]  ;;  %v2924_v23 = vpack.c.bf16 %v374_v15, %v372_v14 }
  0x4d   : > { %v379_v20 = vld [vmem:[%s4286_s24 + $0xf8] sm:$0xff]  ;;  %v889_v21 = vld [vmem:[%s4286_s24 + $0x10e8] sm:$0xff]  ;;  %v3436_v24 = vpack.c.bf16 %v886_v18, %v884_v16  ;;  %v376_v26 = vld [vmem:[%s4286_s24 + $0xe0] sm:$0xff] }
  0x4e   : > { %2917 = vmatpush1.bf16.msra.mxu1 %v2916_v63  ;;  %v891_v22 = vld [vmem:[%s4286_s24 + $0x10f8] sm:$0xff]  ;;  %v2926_v25 = vpack.c.bf16 %v379_v20, %v377_v19  ;;  %v378_v27 = vld [vmem:[%s4286_s24 + $0xf0] sm:$0xff]  ;;  %v888_v28 = vld [vmem:[%s4286_s24 + $0x10e0] sm:$0xff] }
  0x4f   : > { %3429 = vmatpush1.bf16.msra.mxu0 %v3428_v0  ;;  %2919 = vmatprep.subr.bf16.mxu1 %v2918_v1  ;;  %v3438_v29 = vpack.c.bf16 %v891_v22, %v889_v21  ;;  %v890_v30 = vld [vmem:[%s4286_s24 + $0x10f0] sm:$0xff]  ;;  %v381_v31 = vld [vmem:[%s4286_s24 + $0x108] sm:$0xff]  ;;  %v383_v32 = vld [vmem:[%s4286_s24 + $0x118] sm:$0xff]  ;;  %v2928_v35 = vpack.c.bf16 %v378_v27, %v376_v26 }
  0x50   : > { %3431 = vmatprep.subr.bf16.mxu0 %v3430_v5  ;;  %v893_v33 = vld [vmem:[%s4286_s24 + $0x1108] sm:$0xff]  ;;  %v895_v34 = vld [vmem:[%s4286_s24 + $0x1118] sm:$0xff]  ;;  %v3440_v36 = vpack.c.bf16 %v890_v30, %v888_v28  ;;  %v2930_v37 = vpack.c.bf16 %v383_v32, %v381_v31  ;;  %v380_v38 = vld [vmem:[%s4286_s24 + $0x100] sm:$0xff] }
  0x51   : > { %v382_v39 = vld [vmem:[%s4286_s24 + $0x110] sm:$0xff]  ;;  %v892_v40 = vld [vmem:[%s4286_s24 + $0x1100] sm:$0xff]  ;;  %v3442_v41 = vpack.c.bf16 %v895_v34, %v893_v33  ;;  %v385_v43 = vld [vmem:[%s4286_s24 + $0x128] sm:$0xff] }
  0x52   : > { %2921 = vmatpush1.bf16.msra.mxu1 %v2920_v11  ;;  %v894_v42 = vld [vmem:[%s4286_s24 + $0x1110] sm:$0xff]  ;;  %v387_v44 = vld [vmem:[%s4286_s24 + $0x138] sm:$0xff]  ;;  %v897_v45 = vld [vmem:[%s4286_s24 + $0x1128] sm:$0xff]  ;;  %v2932_v47 = vpack.c.bf16 %v382_v39, %v380_v38 }
  0x53   : > { %3433 = vmatpush1.bf16.msra.mxu0 %v3432_v12  ;;  %2923 = vmatprep.subr.bf16.mxu1 %v2922_v13  ;;  %v899_v46 = vld [vmem:[%s4286_s24 + $0x1138] sm:$0xff]  ;;  %v3444_v48 = vpack.c.bf16 %v894_v42, %v892_v40  ;;  %v2934_v49 = vpack.c.bf16 %v387_v44, %v385_v43  ;;  %v384_v50 = vld [vmem:[%s4286_s24 + $0x120] sm:$0xff]  ;;  %v386_v51 = vld [vmem:[%s4286_s24 + $0x130] sm:$0xff] }
  0x54   : > { %3435 = vmatprep.subr.bf16.mxu0 %v3434_v17  ;;  %v896_v52 = vld [vmem:[%s4286_s24 + $0x1120] sm:$0xff]  ;;  %v3446_v53 = vpack.c.bf16 %v899_v46, %v897_v45  ;;  %v898_v54 = vld [vmem:[%s4286_s24 + $0x1130] sm:$0xff]  ;;  %v389_v55 = vld [vmem:[%s4286_s24 + $0x148] sm:$0xff]  ;;  %v2936_v59 = vpack.c.bf16 %v386_v51, %v384_v50 }
  0x55   : > { %v391_v56 = vld [vmem:[%s4286_s24 + $0x158] sm:$0xff]  ;;  %v901_v57 = vld [vmem:[%s4286_s24 + $0x1148] sm:$0xff]  ;;  %v3448_v60 = vpack.c.bf16 %v898_v54, %v896_v52  ;;  %v388_v62 = vld [vmem:[%s4286_s24 + $0x140] sm:$0xff] }
  0x56   : > { %2925 = vmatpush1.bf16.msra.mxu1 %v2924_v23  ;;  %v903_v58 = vld [vmem:[%s4286_s24 + $0x1158] sm:$0xff]  ;;  %v2938_v61 = vpack.c.bf16 %v391_v56, %v389_v55  ;;  %v390_v63 = vld [vmem:[%s4286_s24 + $0x150] sm:$0xff]  ;;  %v900_v0 = vld [vmem:[%s4286_s24 + $0x1140] sm:$0xff] }
  0x57   : > { %3437 = vmatpush1.bf16.msra.mxu0 %v3436_v24  ;;  %2927 = vmatprep.subr.bf16.mxu1 %v2926_v25  ;;  %v3450_v1 = vpack.c.bf16 %v903_v58, %v901_v57  ;;  %v902_v2 = vld [vmem:[%s4286_s24 + $0x1150] sm:$0xff]  ;;  %v393_v3 = vld [vmem:[%s4286_s24 + $0x168] sm:$0xff]  ;;  %v395_v4 = vld [vmem:[%s4286_s24 + $0x178] sm:$0xff]  ;;  %v2940_v7 = vpack.c.bf16 %v390_v63, %v388_v62 }
  0x58   : > { %3439 = vmatprep.subr.bf16.mxu0 %v3438_v29  ;;  %v905_v5 = vld [vmem:[%s4286_s24 + $0x1168] sm:$0xff]  ;;  %v907_v6 = vld [vmem:[%s4286_s24 + $0x1178] sm:$0xff]  ;;  %v392_v8 = vld [vmem:[%s4286_s24 + $0x160] sm:$0xff]  ;;  %v3452_v9 = vpack.c.bf16 %v902_v2, %v900_v0  ;;  %v2942_v10 = vpack.c.bf16 %v395_v4, %v393_v3 }
  0x59   : > { %v394_v11 = vld [vmem:[%s4286_s24 + $0x170] sm:$0xff]  ;;  %v904_v12 = vld [vmem:[%s4286_s24 + $0x1160] sm:$0xff]  ;;  %v3454_v14 = vpack.c.bf16 %v907_v6, %v905_v5  ;;  %v397_v15 = vld [vmem:[%s4286_s24 + $0x188] sm:$0xff] }
  0x5a   : > { %2929 = vmatpush1.bf16.msra.mxu1 %v2928_v35  ;;  %v906_v13 = vld [vmem:[%s4286_s24 + $0x1170] sm:$0xff]  ;;  %v399_v16 = vld [vmem:[%s4286_s24 + $0x198] sm:$0xff]  ;;  %v909_v18 = vld [vmem:[%s4286_s24 + $0x1188] sm:$0xff]  ;;  %v2944_v21 = vpack.c.bf16 %v394_v11, %v392_v8 }
  0x5b   : > { %3441 = vmatpush1.bf16.msra.mxu0 %v3440_v36  ;;  %2931 = vmatprep.subr.bf16.mxu1 %v2930_v37  ;;  %v317_v17 = vld [vmem:[%s4296_s19 + $0x8] sm:$0xff]  ;;  %v3456_v22 = vpack.c.bf16 %v906_v13, %v904_v12  ;;  %v2946_v23 = vpack.c.bf16 %v399_v16, %v397_v15  ;;  %v396_v24 = vld [vmem:[%s4286_s24 + $0x180] sm:$0xff]  ;;  %v398_v25 = vld [vmem:[%s4286_s24 + $0x190] sm:$0xff] }
  0x5c   : > { %3443 = vmatprep.subr.bf16.mxu0 %v3442_v41  ;;  %v911_v19 = vld [vmem:[%s4286_s24 + $0x1198] sm:$0xff]  ;;  %1436 = vmatprep.mubr.f32.mxu1 %v317_v17  ;;  %v908_v26 = vld [vmem:[%s4286_s24 + $0x1180] sm:$0xff]  ;;  %v910_v28 = vld [vmem:[%s4286_s24 + $0x1190] sm:$0xff]  ;;  %v2948_v33 = vpack.c.bf16 %v398_v25, %v396_v24 }
  0x5d   : > { %v333_v20 = vld [vmem:[%s4296_s19 + $0x88] sm:$0xff]  ;;  %v3458_v27 = vpack.c.bf16 %v911_v19, %v909_v18  ;;  %v401_v29 = vld [vmem:[%s4286_s24 + $0x1a8] sm:$0xff]  ;;  %v3460_v34 = vpack.c.bf16 %v910_v28, %v908_v26  ;;  %v400_v36 = vld [vmem:[%s4286_s24 + $0x1a0] sm:$0xff] }
  0x5e   : > { %2933 = vmatpush1.bf16.msra.mxu1 %v2932_v47  ;;  %2004 = vmatprep.mubr.f32.mxu0 %v333_v20  ;;  %v403_v30 = vld [vmem:[%s4286_s24 + $0x1b8] sm:$0xff]  ;;  %v913_v31 = vld [vmem:[%s4286_s24 + $0x11a8] sm:$0xff]  ;;  %v402_v37 = vld [vmem:[%s4286_s24 + $0x1b0] sm:$0xff] }
  0x5f   : > { %3445 = vmatpush1.bf16.msra.mxu0 %v3444_v48  ;;  %2935 = vmatprep.subr.bf16.mxu1 %v2934_v49  ;;  %v915_v32 = vld [vmem:[%s4286_s24 + $0x11b8] sm:$0xff]  ;;  %v2950_v35 = vpack.c.bf16 %v403_v30, %v401_v29  ;;  %v912_v38 = vld [vmem:[%s4286_s24 + $0x11a0] sm:$0xff]  ;;  %v914_v40 = vld [vmem:[%s4286_s24 + $0x11b0] sm:$0xff]  ;;  %v2952_v45 = vpack.c.bf16 %v402_v37, %v400_v36 }
  0x60   : > { %3447 = vmatprep.subr.bf16.mxu0 %v3446_v53  ;;  %v3462_v39 = vpack.c.bf16 %v915_v32, %v913_v31  ;;  %v405_v41 = vld [vmem:[%s4286_s24 + $0x1c8] sm:$0xff]  ;;  %v407_v42 = vld [vmem:[%s4286_s24 + $0x1d8] sm:$0xff]  ;;  %v3464_v46 = vpack.c.bf16 %v914_v40, %v912_v38  ;;  %v404_v48 = vld [vmem:[%s4286_s24 + $0x1c0] sm:$0xff] }
  0x61   : > { %v917_v43 = vld [vmem:[%s4286_s24 + $0x11c8] sm:$0xff]  ;;  %v919_v44 = vld [vmem:[%s4286_s24 + $0x11d8] sm:$0xff]  ;;  %v2954_v47 = vpack.c.bf16 %v407_v42, %v405_v41  ;;  %v406_v49 = vld [vmem:[%s4286_s24 + $0x1d0] sm:$0xff] }
  0x62   : > { %2937 = vmatpush1.bf16.msra.mxu1 %v2936_v59  ;;  %v916_v50 = vld [vmem:[%s4286_s24 + $0x11c0] sm:$0xff]  ;;  %v3466_v51 = vpack.c.bf16 %v919_v44, %v917_v43  ;;  %v918_v52 = vld [vmem:[%s4286_s24 + $0x11d0] sm:$0xff]  ;;  %v409_v53 = vld [vmem:[%s4286_s24 + $0x1e8] sm:$0xff]  ;;  %v2956_v57 = vpack.c.bf16 %v406_v49, %v404_v48 }
  0x63   : > { %3449 = vmatpush1.bf16.msra.mxu0 %v3448_v60  ;;  %2939 = vmatprep.subr.bf16.mxu1 %v2938_v61  ;;  %v411_v54 = vld [vmem:[%s4286_s24 + $0x1f8] sm:$0xff]  ;;  %v921_v55 = vld [vmem:[%s4286_s24 + $0x11e8] sm:$0xff]  ;;  %v3468_v58 = vpack.c.bf16 %v918_v52, %v916_v50  ;;  %v408_v60 = vld [vmem:[%s4286_s24 + $0x1e0] sm:$0xff] }
  0x64   : > { %3451 = vmatprep.subr.bf16.mxu0 %v3450_v1  ;;  %v923_v56 = vld [vmem:[%s4286_s24 + $0x11f8] sm:$0xff]  ;;  %v2958_v59 = vpack.c.bf16 %v411_v54, %v409_v53  ;;  %v410_v61 = vld [vmem:[%s4286_s24 + $0x1f0] sm:$0xff]  ;;  %v920_v62 = vld [vmem:[%s4286_s24 + $0x11e0] sm:$0xff] }
  0x65   : > { %v3470_v63 = vpack.c.bf16 %v923_v56, %v921_v55  ;;  %v922_v0 = vld [vmem:[%s4286_s24 + $0x11f0] sm:$0xff]  ;;  %v413_v1 = vld [vmem:[%s4286_s24 + $0x208] sm:$0xff]  ;;  %v415_v2 = vld [vmem:[%s4286_s24 + $0x218] sm:$0xff]  ;;  %v2960_v5 = vpack.c.bf16 %v410_v61, %v408_v60 }
  0x66   : > { %2941 = vmatpush1.bf16.msra.mxu1 %v2940_v7  ;;  %v925_v3 = vld [vmem:[%s4286_s24 + $0x1208] sm:$0xff]  ;;  %v927_v4 = vld [vmem:[%s4286_s24 + $0x1218] sm:$0xff]  ;;  %v3472_v6 = vpack.c.bf16 %v922_v0, %v920_v62  ;;  %v2962_v7 = vpack.c.bf16 %v415_v2, %v413_v1  ;;  %v412_v8 = vld [vmem:[%s4286_s24 + $0x200] sm:$0xff] }
  0x67   : > { %3453 = vmatpush1.bf16.msra.mxu0 %v3452_v9  ;;  %2943 = vmatprep.subr.bf16.mxu1 %v2942_v10  ;;  %v414_v9 = vld [vmem:[%s4286_s24 + $0x210] sm:$0xff]  ;;  %v924_v10 = vld [vmem:[%s4286_s24 + $0x1200] sm:$0xff]  ;;  %v3474_v11 = vpack.c.bf16 %v927_v4, %v925_v3  ;;  %v417_v13 = vld [vmem:[%s4286_s24 + $0x228] sm:$0xff] }
  0x68   : > { %3455 = vmatprep.subr.bf16.mxu0 %v3454_v14  ;;  %v926_v12 = vld [vmem:[%s4286_s24 + $0x1210] sm:$0xff]  ;;  %v419_v14 = vld [vmem:[%s4286_s24 + $0x238] sm:$0xff]  ;;  %v929_v15 = vld [vmem:[%s4286_s24 + $0x1228] sm:$0xff]  ;;  %v2964_v18 = vpack.c.bf16 %v414_v9, %v412_v8 }
  0x69   : > { %v931_v16 = vld [vmem:[%s4286_s24 + $0x1238] sm:$0xff]  ;;  %v316_v17 = vld [vmem:[%s4296_s19] sm:$0xff]  ;;  %v3476_v20 = vpack.c.bf16 %v926_v12, %v924_v10  ;;  %v928_v24 = vld [vmem:[%s4286_s24 + $0x1220] sm:$0xff] }
  0x6a   : > { %2945 = vmatpush1.bf16.msra.mxu1 %v2944_v21  ;;  %v332_v19 = vld [vmem:[%s4296_s19 + $0x80] sm:$0xff]  ;;  %v2966_v21 = vpack.c.bf16 %v419_v14, %v417_v13  ;;  %v3478_v25 = vpack.c.bf16 %v931_v16, %v929_v15  ;;  %v423_v28 = vld [vmem:[%s4286_s24 + $0x258] sm:$0xff]  ;;  %v933_v29 = vld [vmem:[%s4286_s24 + $0x1248] sm:$0xff] }
  0x6b   : > { %3457 = vmatpush1.bf16.msra.mxu0 %v3456_v22  ;;  %2947 = vmatprep.subr.bf16.mxu1 %v2946_v23  ;;  %v416_v22 = vld [vmem:[%s4286_s24 + $0x220] sm:$0xff]  ;;  %v418_v23 = vld [vmem:[%s4286_s24 + $0x230] sm:$0xff]  ;;  %v935_v30 = vld [vmem:[%s4286_s24 + $0x1258] sm:$0xff] }
  0x6c   : > { %3459 = vmatprep.subr.bf16.mxu0 %v3458_v27  ;;  %v930_v26 = vld [vmem:[%s4286_s24 + $0x1230] sm:$0xff]  ;;  %v421_v27 = vld [vmem:[%s4286_s24 + $0x248] sm:$0xff]  ;;  %v2968_v31 = vpack.c.bf16 %v418_v23, %v416_v22  ;;  %v932_v36 = vld [vmem:[%s4286_s24 + $0x1240] sm:$0xff]  ;;  %v3482_v37 = vpack.c.bf16 %v935_v30, %v933_v29 }
  0x6d   : > { %v3480_v32 = vpack.c.bf16 %v930_v26, %v928_v24  ;;  %v934_v38 = vld [vmem:[%s4286_s24 + $0x1250] sm:$0xff]  ;;  %v427_v40 = vld [vmem:[%s4286_s24 + $0x278] sm:$0xff]  ;;  %v937_v41 = vld [vmem:[%s4286_s24 + $0x1268] sm:$0xff] }
  0x6e   : > { %2949 = vmatpush1.bf16.msra.mxu1 %v2948_v33  ;;  %v2970_v33 = vpack.c.bf16 %v423_v28, %v421_v27  ;;  %v939_v42 = vld [vmem:[%s4286_s24 + $0x1278] sm:$0xff]  ;;  %v3484_v44 = vpack.c.bf16 %v934_v38, %v932_v36  ;;  %v936_v48 = vld [vmem:[%s4286_s24 + $0x1260] sm:$0xff]  ;;  %v938_v50 = vld [vmem:[%s4286_s24 + $0x1270] sm:$0xff] }
  0x6f   : > { %3461 = vmatpush1.bf16.msra.mxu0 %v3460_v34  ;;  %2951 = vmatprep.subr.bf16.mxu1 %v2950_v35  ;;  %v420_v34 = vld [vmem:[%s4286_s24 + $0x240] sm:$0xff]  ;;  %v422_v35 = vld [vmem:[%s4286_s24 + $0x250] sm:$0xff]  ;;  %v3486_v49 = vpack.c.bf16 %v939_v42, %v937_v41  ;;  %v431_v52 = vld [vmem:[%s4286_s24 + $0x298] sm:$0xff]  ;;  %v3488_v56 = vpack.c.bf16 %v938_v50, %v936_v48 }
  0x70   : > { %3463 = vmatprep.subr.bf16.mxu0 %v3462_v39  ;;  %v425_v39 = vld [vmem:[%s4286_s24 + $0x268] sm:$0xff]  ;;  %v2972_v43 = vpack.c.bf16 %v422_v35, %v420_v34  ;;  %v943_v54 = vld [vmem:[%s4286_s24 + $0x1298] sm:$0xff]  ;;  %v940_v60 = vld [vmem:[%s4286_s24 + $0x1280] sm:$0xff] }
  0x71   : > { %v941_v53 = vld [vmem:[%s4286_s24 + $0x1288] sm:$0xff]  ;;  %v942_v62 = vld [vmem:[%s4286_s24 + $0x1290] sm:$0xff]  ;;  %v435_v0 = vld [vmem:[%s4286_s24 + $0x2b8] sm:$0xff] }
  0x72   : > { %2953 = vmatpush1.bf16.msra.mxu1 %v2952_v45  ;;  %v2974_v45 = vpack.c.bf16 %v427_v40, %v425_v39  ;;  %v3490_v61 = vpack.c.bf16 %v943_v54, %v941_v53  ;;  %v945_v1 = vld [vmem:[%s4286_s24 + $0x12a8] sm:$0xff]  ;;  %v947_v2 = vld [vmem:[%s4286_s24 + $0x12b8] sm:$0xff]  ;;  %v3492_v4 = vpack.c.bf16 %v942_v62, %v940_v60  ;;  %v944_v8 = vld [vmem:[%s4286_s24 + $0x12a0] sm:$0xff] }
  0x73   : > { %3465 = vmatpush1.bf16.msra.mxu0 %v3464_v46  ;;  %2955 = vmatprep.subr.bf16.mxu1 %v2954_v47  ;;  %v424_v46 = vld [vmem:[%s4286_s24 + $0x260] sm:$0xff]  ;;  %v426_v47 = vld [vmem:[%s4286_s24 + $0x270] sm:$0xff]  ;;  %v3494_v9 = vpack.c.bf16 %v947_v2, %v945_v1  ;;  %v439_v12 = vld [vmem:[%s4286_s24 + $0x2d8] sm:$0xff] }
  0x74   : > { %3467 = vmatprep.subr.bf16.mxu0 %v3466_v51  ;;  %v429_v51 = vld [vmem:[%s4286_s24 + $0x288] sm:$0xff]  ;;  %v2976_v55 = vpack.c.bf16 %v426_v47, %v424_v46  ;;  %v946_v10 = vld [vmem:[%s4286_s24 + $0x12b0] sm:$0xff]  ;;  %v951_v14 = vld [vmem:[%s4286_s24 + $0x12d8] sm:$0xff] }
  0x75   : > { %v949_v13 = vld [vmem:[%s4286_s24 + $0x12c8] sm:$0xff]  ;;  %v436_v16 = vld [vmem:[%s4286_s24 + $0x2c0] sm:$0xff]  ;;  %v443_v24 = vld [vmem:[%s4286_s24 + $0x2f8] sm:$0xff] }
  0x76   : > { %2957 = vmatpush1.bf16.msra.mxu1 %v2956_v57  ;;  %v2978_v57 = vpack.c.bf16 %v431_v52, %v429_v51  ;;  %v3498_v22 = vpack.c.bf16 %v951_v14, %v949_v13  ;;  %v441_v23 = vld [vmem:[%s4286_s24 + $0x2e8] sm:$0xff]  ;;  %v955_v27 = vld [vmem:[%s4286_s24 + $0x12f8] sm:$0xff]  ;;  %v952_v34 = vld [vmem:[%s4286_s24 + $0x12e0] sm:$0xff] }
  0x77   : > { %3469 = vmatpush1.bf16.msra.mxu0 %v3468_v58  ;;  %2959 = vmatprep.subr.bf16.mxu1 %v2958_v59  ;;  %v428_v58 = vld [vmem:[%s4286_s24 + $0x280] sm:$0xff]  ;;  %v430_v59 = vld [vmem:[%s4286_s24 + $0x290] sm:$0xff]  ;;  %v953_v26 = vld [vmem:[%s4286_s24 + $0x12e8] sm:$0xff] }
  0x78   : > { %3471 = vmatprep.subr.bf16.mxu0 %v3470_v63  ;;  %v433_v63 = vld [vmem:[%s4286_s24 + $0x2a8] sm:$0xff]  ;;  %v2980_v3 = vpack.c.bf16 %v430_v59, %v428_v58  ;;  %v3502_v35 = vpack.c.bf16 %v955_v27, %v953_v26  ;;  %v954_v36 = vld [vmem:[%s4286_s24 + $0x12f0] sm:$0xff]  ;;  %v447_v38 = vld [vmem:[%s4286_s24 + $0x318] sm:$0xff] }
  0x79   : > { %v335_v28 = vld [vmem:[%s4296_s19 + $0x98] sm:$0xff]  ;;  %v959_v40 = vld [vmem:[%s4286_s24 + $0x1318] sm:$0xff]  ;;  %v3504_v42 = vpack.c.bf16 %v954_v36, %v952_v34  ;;  %v956_v46 = vld [vmem:[%s4286_s24 + $0x1300] sm:$0xff] }
  0x7a   : > { %2961 = vmatpush1.bf16.msra.mxu1 %v2960_v5  ;;  %v2982_v5 = vpack.c.bf16 %v435_v0, %v433_v63  ;;  %v957_v39 = vld [vmem:[%s4286_s24 + $0x1308] sm:$0xff]  ;;  %v958_v48 = vld [vmem:[%s4286_s24 + $0x1310] sm:$0xff]  ;;  %v451_v50 = vld [vmem:[%s4286_s24 + $0x338] sm:$0xff] }
  0x7b   : > { %3473 = vmatpush1.bf16.msra.mxu0 %v3472_v6  ;;  %2963 = vmatprep.subr.bf16.mxu1 %v2962_v7  ;;  %v432_v6 = vld [vmem:[%s4286_s24 + $0x2a0] sm:$0xff]  ;;  %v434_v7 = vld [vmem:[%s4286_s24 + $0x2b0] sm:$0xff]  ;;  %v3506_v47 = vpack.c.bf16 %v959_v40, %v957_v39  ;;  %v961_v51 = vld [vmem:[%s4286_s24 + $0x1328] sm:$0xff]  ;;  %v3508_v54 = vpack.c.bf16 %v958_v48, %v956_v46 }
  0x7c   : > { %3475 = vmatprep.subr.bf16.mxu0 %v3474_v11  ;;  %v437_v11 = vld [vmem:[%s4286_s24 + $0x2c8] sm:$0xff]  ;;  %v2984_v15 = vpack.c.bf16 %v434_v7, %v432_v6  ;;  %v963_v52 = vld [vmem:[%s4286_s24 + $0x1338] sm:$0xff]  ;;  %v960_v58 = vld [vmem:[%s4286_s24 + $0x1320] sm:$0xff] }
  0x7d   : > { %1437 = vmatmul.mubr.f32.vlgmr.msra.gmra.mrb[0].mxu1 %v316_v17  ;;  %v3496_v17 = vpack.c.bf16 %v946_v10, %v944_v8  ;;  %v3510_v59 = vpack.c.bf16 %v963_v52, %v961_v51  ;;  %v962_v60 = vld [vmem:[%s4286_s24 + $0x1330] sm:$0xff]  ;;  %v455_v62 = vld [vmem:[%s4286_s24 + $0x358] sm:$0xff]  ;;  %v965_v63 = vld [vmem:[%s4286_s24 + $0x1348] sm:$0xff] }
  0x7e   : > { %2965 = vmatpush1.bf16.msra.mxu1 %v2964_v18  ;;  %2005 = vmatmul.mubr.f32.vlgmr.msra.gmra.mrb[0].mxu0 %v332_v19  ;;  %v2986_v18 = vpack.c.bf16 %v439_v12, %v437_v11  ;;  %v438_v19 = vld [vmem:[%s4286_s24 + $0x2d0] sm:$0xff]  ;;  %v967_v0 = vld [vmem:[%s4286_s24 + $0x1358] sm:$0xff]  ;;  %v3512_v2 = vpack.c.bf16 %v962_v60, %v960_v58  ;;  %v964_v6 = vld [vmem:[%s4286_s24 + $0x1340] sm:$0xff] }
  0x7f   : > { %3477 = vmatpush1.bf16.msra.mxu0 %v3476_v20  ;;  %2967 = vmatprep.subr.bf16.mxu1 %v2966_v21  ;;  %v948_v20 = vld [vmem:[%s4286_s24 + $0x12c0] sm:$0xff]  ;;  %v950_v21 = vld [vmem:[%s4286_s24 + $0x12d0] sm:$0xff]  ;;  %v2988_v29 = vpack.c.bf16 %v438_v19, %v436_v16  ;;  %v3514_v7 = vpack.c.bf16 %v967_v0, %v965_v63  ;;  %v459_v10 = vld [vmem:[%s4286_s24 + $0x378] sm:$0xff] }
  0x80   : > { %3479 = vmatprep.subr.bf16.mxu0 %v3478_v25  ;;  %v319_v25 = vld [vmem:[%s4296_s19 + $0x18] sm:$0xff]  ;;  %2075 = vmatprep.mubr.f32.mxu0 %v335_v28  ;;  %v3500_v30 = vpack.c.bf16 %v950_v21, %v948_v20  ;;  %v966_v8 = vld [vmem:[%s4286_s24 + $0x1350] sm:$0xff]  ;;  %v971_v12 = vld [vmem:[%s4286_s24 + $0x1378] sm:$0xff] }
  0x81   : > { %1507 = vmatprep.mubr.f32.mxu1 %v319_v25  ;;  %v969_v11 = vld [vmem:[%s4286_s24 + $0x1368] sm:$0xff]  ;;  %v3516_v14 = vpack.c.bf16 %v966_v8, %v964_v6  ;;  %v456_v16 = vld [vmem:[%s4286_s24 + $0x360] sm:$0xff]  ;;  %v970_v20 = vld [vmem:[%s4286_s24 + $0x1370] sm:$0xff] }
  0x82   : > { %2969 = vmatpush1.bf16.msra.mxu1 %v2968_v31  ;;  %v2990_v31 = vpack.c.bf16 %v443_v24, %v441_v23  ;;  %v3518_v19 = vpack.c.bf16 %v971_v12, %v969_v11  ;;  %v461_v21 = vld [vmem:[%s4286_s24 + $0x388] sm:$0xff]  ;;  %v975_v24 = vld [vmem:[%s4286_s24 + $0x1398] sm:$0xff]  ;;  %v460_v28 = vld [vmem:[%s4286_s24 + $0x380] sm:$0xff] }
  0x83   : > { %3481 = vmatpush1.bf16.msra.mxu0 %v3480_v32  ;;  %2971 = vmatprep.subr.bf16.mxu1 %v2970_v33  ;;  %v440_v32 = vld [vmem:[%s4286_s24 + $0x2e0] sm:$0xff]  ;;  %v442_v33 = vld [vmem:[%s4286_s24 + $0x2f0] sm:$0xff]  ;;  %v973_v23 = vld [vmem:[%s4286_s24 + $0x1388] sm:$0xff] }
  0x84   : > { %3483 = vmatprep.subr.bf16.mxu0 %v3482_v37  ;;  %v445_v37 = vld [vmem:[%s4286_s24 + $0x308] sm:$0xff]  ;;  %v2992_v41 = vpack.c.bf16 %v442_v33, %v440_v32  ;;  %v974_v32 = vld [vmem:[%s4286_s24 + $0x1390] sm:$0xff]  ;;  %v467_v34 = vld [vmem:[%s4286_s24 + $0x3b8] sm:$0xff] }
  0x85   : > { %v465_v33 = vld [vmem:[%s4286_s24 + $0x3a8] sm:$0xff]  ;;  %v979_v36 = vld [vmem:[%s4286_s24 + $0x13b8] sm:$0xff]  ;;  %v464_v40 = vld [vmem:[%s4286_s24 + $0x3a0] sm:$0xff] }
  0x86   : > { %2973 = vmatpush1.bf16.msra.mxu1 %v2972_v43  ;;  %v2994_v43 = vpack.c.bf16 %v447_v38, %v445_v37  ;;  %v3014_v39 = vpack.c.bf16 %v467_v34, %v465_v33  ;;  %v471_v46 = vld [vmem:[%s4286_s24 + $0x3d8] sm:$0xff]  ;;  %v468_v52 = vld [vmem:[%s4286_s24 + $0x3c0] sm:$0xff]  ;;  %v997_v33 = vld [vmem:[%s4286_s24 + $0x1448] sm:$0xff] }
  0x87   : > { %3485 = vmatpush1.bf16.msra.mxu0 %v3484_v44  ;;  %2975 = vmatprep.subr.bf16.mxu1 %v2974_v45  ;;  %v444_v44 = vld [vmem:[%s4286_s24 + $0x300] sm:$0xff]  ;;  %v446_v45 = vld [vmem:[%s4286_s24 + $0x310] sm:$0xff]  ;;  %v983_v48 = vld [vmem:[%s4286_s24 + $0x13d8] sm:$0xff] }
  0x88   : > { %3487 = vmatprep.subr.bf16.mxu0 %v3486_v49  ;;  %v449_v49 = vld [vmem:[%s4286_s24 + $0x328] sm:$0xff]  ;;  %v2996_v53 = vpack.c.bf16 %v446_v45, %v444_v44  ;;  %v978_v44 = vld [vmem:[%s4286_s24 + $0x13b0] sm:$0xff]  ;;  %v475_v58 = vld [vmem:[%s4286_s24 + $0x3f8] sm:$0xff] }
  0x89   : > { %v469_v45 = vld [vmem:[%s4286_s24 + $0x3c8] sm:$0xff]  ;;  %v987_v60 = vld [vmem:[%s4286_s24 + $0x13f8] sm:$0xff]  ;;  %v472_v0 = vld [vmem:[%s4286_s24 + $0x3e0] sm:$0xff] }
  0x8a   : > { %2977 = vmatpush1.bf16.msra.mxu1 %v2976_v55  ;;  %v2998_v55 = vpack.c.bf16 %v451_v50, %v449_v49  ;;  %v3018_v51 = vpack.c.bf16 %v471_v46, %v469_v45  ;;  %v479_v6 = vld [vmem:[%s4286_s24 + $0x418] sm:$0xff]  ;;  %v476_v12 = vld [vmem:[%s4286_s24 + $0x400] sm:$0xff]  ;;  %v489_v45 = vld [vmem:[%s4286_s24 + $0x468] sm:$0xff] }
  0x8b   : > { %3489 = vmatpush1.bf16.msra.mxu0 %v3488_v56  ;;  %2979 = vmatprep.subr.bf16.mxu1 %v2978_v57  ;;  %v448_v56 = vld [vmem:[%s4286_s24 + $0x320] sm:$0xff]  ;;  %v450_v57 = vld [vmem:[%s4286_s24 + $0x330] sm:$0xff]  ;;  %v991_v8 = vld [vmem:[%s4286_s24 + $0x1418] sm:$0xff] }
  0x8c   : > { %3491 = vmatprep.subr.bf16.mxu0 %v3490_v61  ;;  %v453_v61 = vld [vmem:[%s4286_s24 + $0x348] sm:$0xff]  ;;  %v3000_v1 = vpack.c.bf16 %v450_v57, %v448_v56  ;;  %v982_v56 = vld [vmem:[%s4286_s24 + $0x13d0] sm:$0xff]  ;;  %v999_v34 = vld [vmem:[%s4286_s24 + $0x1458] sm:$0xff] }
  0x8d   : > { %v473_v57 = vld [vmem:[%s4286_s24 + $0x3e8] sm:$0xff]  ;;  %v491_v46 = vld [vmem:[%s4286_s24 + $0x478] sm:$0xff] }
  0x8e   : > { %2981 = vmatpush1.bf16.msra.mxu1 %v2980_v3  ;;  %v3002_v3 = vpack.c.bf16 %v455_v62, %v453_v61  ;;  %v3022_v63 = vpack.c.bf16 %v475_v58, %v473_v57  ;;  %v493_v57 = vld [vmem:[%s4286_s24 + $0x488] sm:$0xff]  ;;  %v495_v58 = vld [vmem:[%s4286_s24 + $0x498] sm:$0xff] }
  0x8f   : > { %3493 = vmatpush1.bf16.msra.mxu0 %v3492_v4  ;;  %2983 = vmatprep.subr.bf16.mxu1 %v2982_v5  ;;  %v452_v4 = vld [vmem:[%s4286_s24 + $0x340] sm:$0xff]  ;;  %v454_v5 = vld [vmem:[%s4286_s24 + $0x350] sm:$0xff] }
  0x90   : > { %3495 = vmatprep.subr.bf16.mxu0 %v3494_v9  ;;  %v457_v9 = vld [vmem:[%s4286_s24 + $0x368] sm:$0xff]  ;;  %v3004_v13 = vpack.c.bf16 %v454_v5, %v452_v4  ;;  %v986_v4 = vld [vmem:[%s4286_s24 + $0x13f0] sm:$0xff] }
  0x91   : > { %v477_v5 = vld [vmem:[%s4286_s24 + $0x408] sm:$0xff] }
  0x92   : > { %2985 = vmatpush1.bf16.msra.mxu1 %v2984_v15  ;;  %v3006_v15 = vpack.c.bf16 %v459_v10, %v457_v9  ;;  %v3026_v11 = vpack.c.bf16 %v479_v6, %v477_v5  ;;  %v497_v5 = vld [vmem:[%s4286_s24 + $0x4a8] sm:$0xff]  ;;  %v499_v6 = vld [vmem:[%s4286_s24 + $0x4b8] sm:$0xff] }
  0x93   : > { %3497 = vmatpush1.bf16.msra.mxu0 %v3496_v17  ;;  %2987 = vmatprep.subr.bf16.mxu1 %v2986_v18  ;;  %v458_v17 = vld [vmem:[%s4286_s24 + $0x370] sm:$0xff]  ;;  %v968_v18 = vld [vmem:[%s4286_s24 + $0x1360] sm:$0xff] }
  0x94   : > { %3499 = vmatprep.subr.bf16.mxu0 %v3498_v22  ;;  %v463_v22 = vld [vmem:[%s4286_s24 + $0x398] sm:$0xff]  ;;  %v3008_v25 = vpack.c.bf16 %v458_v17, %v456_v16  ;;  %v3520_v26 = vpack.c.bf16 %v970_v20, %v968_v18  ;;  %v990_v16 = vld [vmem:[%s4286_s24 + $0x1410] sm:$0xff]  ;;  %v481_v17 = vld [vmem:[%s4286_s24 + $0x428] sm:$0xff] }
  0x95   : > { %v3010_v27 = vpack.c.bf16 %v463_v22, %v461_v21  ;;  %v483_v18 = vld [vmem:[%s4286_s24 + $0x438] sm:$0xff]  ;;  %v318_v21 = vld [vmem:[%s4296_s19 + $0x10] sm:$0xff] }
  0x96   : > { %2989 = vmatpush1.bf16.msra.mxu1 %v2988_v29  ;;  %v462_v29 = vld [vmem:[%s4286_s24 + $0x390] sm:$0xff]  ;;  %v995_v20 = vld [vmem:[%s4286_s24 + $0x1438] sm:$0xff] }
  0x97   : > { %3501 = vmatpush1.bf16.msra.mxu0 %v3500_v30  ;;  %2991 = vmatprep.subr.bf16.mxu1 %v2990_v31  ;;  %v972_v30 = vld [vmem:[%s4286_s24 + $0x1380] sm:$0xff]  ;;  %v3522_v31 = vpack.c.bf16 %v975_v24, %v973_v23  ;;  %v3012_v37 = vpack.c.bf16 %v462_v29, %v460_v28 }
  0x98   : > { %3503 = vmatprep.subr.bf16.mxu0 %v3502_v35  ;;  %v977_v35 = vld [vmem:[%s4286_s24 + $0x13a8] sm:$0xff]  ;;  %v3524_v38 = vpack.c.bf16 %v974_v32, %v972_v30  ;;  %v334_v23 = vld [vmem:[%s4296_s19 + $0x90] sm:$0xff]  ;;  %v994_v30 = vld [vmem:[%s4286_s24 + $0x1430] sm:$0xff] }
  0x99   : > { %v992_v28 = vld [vmem:[%s4286_s24 + $0x1420] sm:$0xff]  ;;  %v487_v32 = vld [vmem:[%s4286_s24 + $0x458] sm:$0xff] }
  0x9a   : > { %2993 = vmatpush1.bf16.msra.mxu1 %v2992_v41  ;;  %v466_v41 = vld [vmem:[%s4286_s24 + $0x3b0] sm:$0xff] }
  0x9b   : > { %3505 = vmatpush1.bf16.msra.mxu0 %v3504_v42  ;;  %2995 = vmatprep.subr.bf16.mxu1 %v2994_v43  ;;  %v976_v42 = vld [vmem:[%s4286_s24 + $0x13a0] sm:$0xff]  ;;  %v3526_v43 = vpack.c.bf16 %v979_v36, %v977_v35  ;;  %v3016_v49 = vpack.c.bf16 %v466_v41, %v464_v40  ;;  %v321_v35 = vld [vmem:[%s4296_s19 + $0x28] sm:$0xff]  ;;  %v486_v41 = vld [vmem:[%s4286_s24 + $0x450] sm:$0xff] }
  0x9c   : > { %3507 = vmatprep.subr.bf16.mxu0 %v3506_v47  ;;  %v981_v47 = vld [vmem:[%s4286_s24 + $0x13c8] sm:$0xff]  ;;  %v3528_v50 = vpack.c.bf16 %v978_v44, %v976_v42  ;;  %v484_v40 = vld [vmem:[%s4286_s24 + $0x440] sm:$0xff]  ;;  %v998_v44 = vld [vmem:[%s4286_s24 + $0x1450] sm:$0xff] }
  0x9d   : > { %v996_v42 = vld [vmem:[%s4286_s24 + $0x1440] sm:$0xff] }
  0x9e   : > { %2997 = vmatpush1.bf16.msra.mxu1 %v2996_v53  ;;  %v470_v53 = vld [vmem:[%s4286_s24 + $0x3d0] sm:$0xff] }
  0x9f   : > { %3509 = vmatpush1.bf16.msra.mxu0 %v3508_v54  ;;  %2999 = vmatprep.subr.bf16.mxu1 %v2998_v55  ;;  %v980_v54 = vld [vmem:[%s4286_s24 + $0x13c0] sm:$0xff]  ;;  %v3530_v55 = vpack.c.bf16 %v983_v48, %v981_v47  ;;  %v3020_v61 = vpack.c.bf16 %v470_v53, %v468_v52  ;;  %v1001_v47 = vld [vmem:[%s4286_s24 + $0x1468] sm:$0xff]  ;;  %v1003_v48 = vld [vmem:[%s4286_s24 + $0x1478] sm:$0xff] }
  0xa0   : > { %3511 = vmatprep.subr.bf16.mxu0 %v3510_v59  ;;  %v985_v59 = vld [vmem:[%s4286_s24 + $0x13e8] sm:$0xff]  ;;  %v3532_v62 = vpack.c.bf16 %v982_v56, %v980_v54  ;;  %v488_v52 = vld [vmem:[%s4286_s24 + $0x460] sm:$0xff]  ;;  %v490_v53 = vld [vmem:[%s4286_s24 + $0x470] sm:$0xff] }
  0xa1   : > { %v1000_v54 = vld [vmem:[%s4286_s24 + $0x1460] sm:$0xff]  ;;  %v1002_v56 = vld [vmem:[%s4286_s24 + $0x1470] sm:$0xff] }
  0xa2   : > { %3001 = vmatpush1.bf16.msra.mxu1 %v3000_v1  ;;  %v474_v1 = vld [vmem:[%s4286_s24 + $0x3f0] sm:$0xff] }
  0xa3   : > { %3513 = vmatpush1.bf16.msra.mxu0 %v3512_v2  ;;  %3003 = vmatprep.subr.bf16.mxu1 %v3002_v3  ;;  %v984_v2 = vld [vmem:[%s4286_s24 + $0x13e0] sm:$0xff]  ;;  %v3534_v3 = vpack.c.bf16 %v987_v60, %v985_v59  ;;  %v3024_v9 = vpack.c.bf16 %v474_v1, %v472_v0  ;;  %v1005_v59 = vld [vmem:[%s4286_s24 + $0x1488] sm:$0xff]  ;;  %v1007_v60 = vld [vmem:[%s4286_s24 + $0x1498] sm:$0xff] }
  0xa4   : > { %3515 = vmatprep.subr.bf16.mxu0 %v3514_v7  ;;  %v989_v7 = vld [vmem:[%s4286_s24 + $0x1408] sm:$0xff]  ;;  %v3536_v10 = vpack.c.bf16 %v986_v4, %v984_v2  ;;  %v492_v0 = vld [vmem:[%s4286_s24 + $0x480] sm:$0xff]  ;;  %v494_v1 = vld [vmem:[%s4286_s24 + $0x490] sm:$0xff] }
  0xa5   : > { %v1004_v2 = vld [vmem:[%s4286_s24 + $0x1480] sm:$0xff]  ;;  %v1006_v4 = vld [vmem:[%s4286_s24 + $0x1490] sm:$0xff] }
  0xa6   : > { %3005 = vmatpush1.bf16.msra.mxu1 %v3004_v13  ;;  %v478_v13 = vld [vmem:[%s4286_s24 + $0x410] sm:$0xff] }
  0xa7   : > { %3517 = vmatpush1.bf16.msra.mxu0 %v3516_v14  ;;  %3007 = vmatprep.subr.bf16.mxu1 %v3006_v15  ;;  %v988_v14 = vld [vmem:[%s4286_s24 + $0x1400] sm:$0xff]  ;;  %v3538_v15 = vpack.c.bf16 %v991_v8, %v989_v7  ;;  %v3028_v22 = vpack.c.bf16 %v478_v13, %v476_v12  ;;  %v1009_v7 = vld [vmem:[%s4286_s24 + $0x14a8] sm:$0xff]  ;;  %v1011_v8 = vld [vmem:[%s4286_s24 + $0x14b8] sm:$0xff] }
  0xa8   : > { %3519 = vmatprep.subr.bf16.mxu0 %v3518_v19  ;;  %v993_v19 = vld [vmem:[%s4286_s24 + $0x1428] sm:$0xff]  ;;  %v3540_v24 = vpack.c.bf16 %v990_v16, %v988_v14  ;;  %v496_v12 = vld [vmem:[%s4286_s24 + $0x4a0] sm:$0xff]  ;;  %v498_v13 = vld [vmem:[%s4286_s24 + $0x4b0] sm:$0xff] }
  0xa9   : > { %v3542_v29 = vpack.c.bf16 %v995_v20, %v993_v19  ;;  %v1008_v14 = vld [vmem:[%s4286_s24 + $0x14a0] sm:$0xff]  ;;  %v1010_v16 = vld [vmem:[%s4286_s24 + $0x14b0] sm:$0xff]  ;;  %v1013_v19 = vld [vmem:[%s4286_s24 + $0x14c8] sm:$0xff] }
  0xaa   : > { %3009 = vmatpush1.bf16.msra.mxu1 %v3008_v25  ;;  %v3030_v25 = vpack.c.bf16 %v483_v18, %v481_v17  ;;  %v501_v17 = vld [vmem:[%s4286_s24 + $0x4c8] sm:$0xff]  ;;  %v503_v18 = vld [vmem:[%s4286_s24 + $0x4d8] sm:$0xff] }
  0xab   : > { %3521 = vmatpush1.bf16.msra.mxu0 %v3520_v26  ;;  %3011 = vmatprep.subr.bf16.mxu1 %v3010_v27  ;;  %v480_v26 = vld [vmem:[%s4286_s24 + $0x420] sm:$0xff]  ;;  %v482_v27 = vld [vmem:[%s4286_s24 + $0x430] sm:$0xff]  ;;  %v1015_v20 = vld [vmem:[%s4286_s24 + $0x14d8] sm:$0xff] }
  0xac   : > { %3523 = vmatprep.subr.bf16.mxu0 %v3522_v31  ;;  %v485_v31 = vld [vmem:[%s4286_s24 + $0x448] sm:$0xff]  ;;  %v3032_v36 = vpack.c.bf16 %v482_v27, %v480_v26  ;;  %v1012_v26 = vld [vmem:[%s4286_s24 + $0x14c0] sm:$0xff]  ;;  %v3562_v27 = vpack.c.bf16 %v1015_v20, %v1013_v19 }
  0xad   : > { %v520_v20 = vld [vmem:[%s4286_s24 + $0x560] sm:$0xff] }
  0xae   : > { %3013 = vmatpush1.bf16.msra.mxu1 %v3012_v37  ;;  %v337_v37 = vld [vmem:[%s4296_s19 + $0xa8] sm:$0xff] }
  0xaf   : > { %3525 = vmatpush1.bf16.msra.mxu0 %v3524_v38  ;;  %3015 = vmatprep.subr.bf16.mxu1 %v3014_v39  ;;  %v3544_v38 = vpack.c.bf16 %v994_v30, %v992_v28  ;;  %v3034_v39 = vpack.c.bf16 %v487_v32, %v485_v31  ;;  %v1014_v28 = vld [vmem:[%s4286_s24 + $0x14d0] sm:$0xff]  ;;  %v507_v30 = vld [vmem:[%s4286_s24 + $0x4f8] sm:$0xff]  ;;  %v1017_v31 = vld [vmem:[%s4286_s24 + $0x14e8] sm:$0xff] }
  0xb0   : > { %3527 = vmatprep.subr.bf16.mxu0 %v3526_v43  ;;  %v3546_v43 = vpack.c.bf16 %v999_v34, %v997_v33  ;;  %v1019_v32 = vld [vmem:[%s4286_s24 + $0x14f8] sm:$0xff]  ;;  %v3564_v34 = vpack.c.bf16 %v1014_v28, %v1012_v26 }
  0xb1   : > { %v527_v26 = vld [vmem:[%s4286_s24 + $0x598] sm:$0xff] }
  0xb2   : > { %3017 = vmatpush1.bf16.msra.mxu1 %v3016_v49  ;;  %v3036_v49 = vpack.c.bf16 %v486_v41, %v484_v40  ;;  %v1018_v40 = vld [vmem:[%s4286_s24 + $0x14f0] sm:$0xff]  ;;  %v509_v41 = vld [vmem:[%s4286_s24 + $0x508] sm:$0xff]  ;;  %v1039_v28 = vld [vmem:[%s4286_s24 + $0x1598] sm:$0xff] }
  0xb3   : > { %3529 = vmatpush1.bf16.msra.mxu0 %v3528_v50  ;;  %3019 = vmatprep.subr.bf16.mxu1 %v3018_v51  ;;  %v3548_v50 = vpack.c.bf16 %v998_v44, %v996_v42  ;;  %v3038_v51 = vpack.c.bf16 %v491_v46, %v489_v45  ;;  %v511_v42 = vld [vmem:[%s4286_s24 + $0x518] sm:$0xff] }
  0xb4   : > { %3531 = vmatprep.subr.bf16.mxu0 %v3530_v55  ;;  %v3550_v55 = vpack.c.bf16 %v1003_v48, %v1001_v47  ;;  %v1023_v44 = vld [vmem:[%s4286_s24 + $0x1518] sm:$0xff]  ;;  %v3058_v47 = vpack.c.bf16 %v511_v42, %v509_v41  ;;  %v508_v48 = vld [vmem:[%s4286_s24 + $0x500] sm:$0xff] }
  0xb6   : > { %3021 = vmatpush1.bf16.msra.mxu1 %v3020_v61  ;;  %v3040_v61 = vpack.c.bf16 %v490_v53, %v488_v52  ;;  %v1022_v52 = vld [vmem:[%s4286_s24 + $0x1510] sm:$0xff]  ;;  %v513_v53 = vld [vmem:[%s4286_s24 + $0x528] sm:$0xff] }
  0xb7   : > { %3533 = vmatpush1.bf16.msra.mxu0 %v3532_v62  ;;  %3023 = vmatprep.subr.bf16.mxu1 %v3022_v63  ;;  %v3552_v62 = vpack.c.bf16 %v1002_v56, %v1000_v54  ;;  %v3042_v63 = vpack.c.bf16 %v495_v58, %v493_v57  ;;  %v515_v54 = vld [vmem:[%s4286_s24 + $0x538] sm:$0xff] }
  0xb8   : > { %3535 = vmatprep.subr.bf16.mxu0 %v3534_v3  ;;  %v3554_v3 = vpack.c.bf16 %v1007_v60, %v1005_v59  ;;  %v1027_v56 = vld [vmem:[%s4286_s24 + $0x1538] sm:$0xff]  ;;  %v3062_v59 = vpack.c.bf16 %v515_v54, %v513_v53  ;;  %v512_v60 = vld [vmem:[%s4286_s24 + $0x520] sm:$0xff] }
  0xba   : > { %3025 = vmatpush1.bf16.msra.mxu1 %v3024_v9  ;;  %v3044_v9 = vpack.c.bf16 %v494_v1, %v492_v0  ;;  %v1026_v0 = vld [vmem:[%s4286_s24 + $0x1530] sm:$0xff]  ;;  %v517_v1 = vld [vmem:[%s4286_s24 + $0x548] sm:$0xff] }
  0xbb   : > { %3537 = vmatpush1.bf16.msra.mxu0 %v3536_v10  ;;  %3027 = vmatprep.subr.bf16.mxu1 %v3026_v11  ;;  %v3556_v10 = vpack.c.bf16 %v1006_v4, %v1004_v2  ;;  %v3046_v11 = vpack.c.bf16 %v499_v6, %v497_v5  ;;  %v519_v2 = vld [vmem:[%s4286_s24 + $0x558] sm:$0xff] }
  0xbc   : > { %3539 = vmatprep.subr.bf16.mxu0 %v3538_v15  ;;  %v3558_v15 = vpack.c.bf16 %v1011_v8, %v1009_v7  ;;  %v1031_v4 = vld [vmem:[%s4286_s24 + $0x1558] sm:$0xff]  ;;  %v3066_v7 = vpack.c.bf16 %v519_v2, %v517_v1  ;;  %v516_v8 = vld [vmem:[%s4286_s24 + $0x540] sm:$0xff] }
  0xbd   : > { %1508 = vmatmul.mubr.f32.vlgmr.msra.gmra.mrb[0].mxu1 %v318_v21  ;;  %v3048_v21 = vpack.c.bf16 %v498_v13, %v496_v12  ;;  %v1030_v12 = vld [vmem:[%s4286_s24 + $0x1550] sm:$0xff]  ;;  %v521_v13 = vld [vmem:[%s4286_s24 + $0x568] sm:$0xff] }
  0xbe   : > { %3029 = vmatpush1.bf16.msra.mxu1 %v3028_v22  ;;  %2076 = vmatmul.mubr.f32.vlgmr.msra.gmra.mrb[0].mxu0 %v334_v23  ;;  %v3560_v22 = vpack.c.bf16 %v1010_v16, %v1008_v14  ;;  %v3050_v23 = vpack.c.bf16 %v503_v18, %v501_v17  ;;  %v523_v14 = vld [vmem:[%s4286_s24 + $0x578] sm:$0xff] }
  0xbf   : > { %3541 = vmatpush1.bf16.msra.mxu0 %v3540_v24  ;;  %3031 = vmatprep.subr.bf16.mxu1 %v3030_v25  ;;  %v500_v24 = vld [vmem:[%s4286_s24 + $0x4c0] sm:$0xff]  ;;  %v502_v25 = vld [vmem:[%s4286_s24 + $0x4d0] sm:$0xff]  ;;  %v1035_v16 = vld [vmem:[%s4286_s24 + $0x1578] sm:$0xff]  ;;  %v3070_v19 = vpack.c.bf16 %v523_v14, %v521_v13 }
  0xc0   : > { %3543 = vmatprep.subr.bf16.mxu0 %v3542_v29  ;;  %1578 = vmatprep.mubr.f32.mxu1 %v321_v35  ;;  %v505_v29 = vld [vmem:[%s4286_s24 + $0x4e8] sm:$0xff]  ;;  %v3052_v33 = vpack.c.bf16 %v502_v25, %v500_v24  ;;  %v1034_v24 = vld [vmem:[%s4286_s24 + $0x1570] sm:$0xff] }
  0xc1   : > { %2146 = vmatprep.mubr.f32.mxu0 %v337_v37  ;;  %v3054_v35 = vpack.c.bf16 %v507_v30, %v505_v29  ;;  %v506_v37 = vld [vmem:[%s4286_s24 + $0x4f0] sm:$0xff]  ;;  %v525_v25 = vld [vmem:[%s4286_s24 + $0x588] sm:$0xff] }
  0xc2   : > { %3033 = vmatpush1.bf16.msra.mxu1 %v3032_v36  ;;  %v504_v36 = vld [vmem:[%s4286_s24 + $0x4e0] sm:$0xff] }
  0xc3   : > { %3545 = vmatpush1.bf16.msra.mxu0 %v3544_v38  ;;  %3035 = vmatprep.subr.bf16.mxu1 %v3034_v39  ;;  %v1016_v38 = vld [vmem:[%s4286_s24 + $0x14e0] sm:$0xff]  ;;  %v3566_v39 = vpack.c.bf16 %v1019_v32, %v1017_v31  ;;  %v3056_v45 = vpack.c.bf16 %v506_v37, %v504_v36  ;;  %v3074_v31 = vpack.c.bf16 %v527_v26, %v525_v25  ;;  %v1038_v36 = vld [vmem:[%s4286_s24 + $0x1590] sm:$0xff]  ;;  %v529_v37 = vld [vmem:[%s4286_s24 + $0x5a8] sm:$0xff] }
  0xc4   : > { %3547 = vmatprep.subr.bf16.mxu0 %v3546_v43  ;;  %v1021_v43 = vld [vmem:[%s4286_s24 + $0x1508] sm:$0xff]  ;;  %v3568_v46 = vpack.c.bf16 %v1018_v40, %v1016_v38  ;;  %v524_v32 = vld [vmem:[%s4286_s24 + $0x580] sm:$0xff]  ;;  %v531_v38 = vld [vmem:[%s4286_s24 + $0x5b8] sm:$0xff] }
  0xc5   : > { %v1043_v40 = vld [vmem:[%s4286_s24 + $0x15b8] sm:$0xff]  ;;  %v320_v25 = vld [vmem:[%s4296_s19 + $0x20] sm:$0xff] }
  0xc6   : > { %3037 = vmatpush1.bf16.msra.mxu1 %v3036_v49  ;;  %v510_v49 = vld [vmem:[%s4286_s24 + $0x510] sm:$0xff] }
  0xc7   : > { %3549 = vmatpush1.bf16.msra.mxu0 %v3548_v50  ;;  %3039 = vmatprep.subr.bf16.mxu1 %v3038_v51  ;;  %v1020_v50 = vld [vmem:[%s4286_s24 + $0x1500] sm:$0xff]  ;;  %v3570_v51 = vpack.c.bf16 %v1023_v44, %v1021_v43  ;;  %v3060_v57 = vpack.c.bf16 %v510_v49, %v508_v48  ;;  %v3078_v43 = vpack.c.bf16 %v531_v38, %v529_v37  ;;  %v1042_v48 = vld [vmem:[%s4286_s24 + $0x15b0] sm:$0xff]  ;;  %v533_v49 = vld [vmem:[%s4286_s24 + $0x5c8] sm:$0xff] }
  0xc8   : > { %3551 = vmatprep.subr.bf16.mxu0 %v3550_v55  ;;  %v1025_v55 = vld [vmem:[%s4286_s24 + $0x1528] sm:$0xff]  ;;  %v3572_v58 = vpack.c.bf16 %v1022_v52, %v1020_v50  ;;  %v528_v44 = vld [vmem:[%s4286_s24 + $0x5a0] sm:$0xff]  ;;  %v535_v50 = vld [vmem:[%s4286_s24 + $0x5d8] sm:$0xff] }
  0xc9   : > { %v1047_v52 = vld [vmem:[%s4286_s24 + $0x15d8] sm:$0xff]  ;;  %v1061_v37 = vld [vmem:[%s4286_s24 + $0x1648] sm:$0xff] }
  0xca   : > { %3041 = vmatpush1.bf16.msra.mxu1 %v3040_v61  ;;  %v514_v61 = vld [vmem:[%s4286_s24 + $0x530] sm:$0xff]  ;;  %v1063_v38 = vld [vmem:[%s4286_s24 + $0x1658] sm:$0xff] }
  0xcb   : > { %3553 = vmatpush1.bf16.msra.mxu0 %v3552_v62  ;;  %3043 = vmatprep.subr.bf16.mxu1 %v3042_v63  ;;  %v1024_v62 = vld [vmem:[%s4286_s24 + $0x1520] sm:$0xff]  ;;  %v3574_v63 = vpack.c.bf16 %v1027_v56, %v1025_v55  ;;  %v3064_v5 = vpack.c.bf16 %v514_v61, %v512_v60  ;;  %v3082_v55 = vpack.c.bf16 %v535_v50, %v533_v49  ;;  %v1046_v60 = vld [vmem:[%s4286_s24 + $0x15d0] sm:$0xff]  ;;  %v537_v61 = vld [vmem:[%s4286_s24 + $0x5e8] sm:$0xff] }
  0xcc   : > { %3555 = vmatprep.subr.bf16.mxu0 %v3554_v3  ;;  %v1029_v3 = vld [vmem:[%s4286_s24 + $0x1548] sm:$0xff]  ;;  %v3576_v6 = vpack.c.bf16 %v1026_v0, %v1024_v62  ;;  %v532_v56 = vld [vmem:[%s4286_s24 + $0x5c0] sm:$0xff]  ;;  %v539_v62 = vld [vmem:[%s4286_s24 + $0x5f8] sm:$0xff] }
  0xcd   : > { %v1051_v0 = vld [vmem:[%s4286_s24 + $0x15f8] sm:$0xff]  ;;  %v553_v49 = vld [vmem:[%s4286_s24 + $0x668] sm:$0xff] }
  0xce   : > { %3045 = vmatpush1.bf16.msra.mxu1 %v3044_v9  ;;  %v518_v9 = vld [vmem:[%s4286_s24 + $0x550] sm:$0xff]  ;;  %v555_v50 = vld [vmem:[%s4286_s24 + $0x678] sm:$0xff] }
  0xcf   : > { %3557 = vmatpush1.bf16.msra.mxu0 %v3556_v10  ;;  %3047 = vmatprep.subr.bf16.mxu1 %v3046_v11  ;;  %v1028_v10 = vld [vmem:[%s4286_s24 + $0x1540] sm:$0xff]  ;;  %v3578_v11 = vpack.c.bf16 %v1031_v4, %v1029_v3  ;;  %v3068_v17 = vpack.c.bf16 %v518_v9, %v516_v8  ;;  %v3086_v3 = vpack.c.bf16 %v539_v62, %v537_v61  ;;  %v1050_v8 = vld [vmem:[%s4286_s24 + $0x15f0] sm:$0xff]  ;;  %v541_v9 = vld [vmem:[%s4286_s24 + $0x608] sm:$0xff] }
  0xd0   : > { %3559 = vmatprep.subr.bf16.mxu0 %v3558_v15  ;;  %v1033_v15 = vld [vmem:[%s4286_s24 + $0x1568] sm:$0xff]  ;;  %v3580_v18 = vpack.c.bf16 %v1030_v12, %v1028_v10  ;;  %v536_v4 = vld [vmem:[%s4286_s24 + $0x5e0] sm:$0xff]  ;;  %v543_v10 = vld [vmem:[%s4286_s24 + $0x618] sm:$0xff] }
  0xd1   : > { %v1055_v12 = vld [vmem:[%s4286_s24 + $0x1618] sm:$0xff]  ;;  %v557_v61 = vld [vmem:[%s4286_s24 + $0x688] sm:$0xff] }
  0xd2   : > { %3049 = vmatpush1.bf16.msra.mxu1 %v3048_v21  ;;  %v522_v21 = vld [vmem:[%s4286_s24 + $0x570] sm:$0xff]  ;;  %v559_v62 = vld [vmem:[%s4286_s24 + $0x698] sm:$0xff] }
  0xd3   : > { %3561 = vmatpush1.bf16.msra.mxu0 %v3560_v22  ;;  %3051 = vmatprep.subr.bf16.mxu1 %v3050_v23  ;;  %v1032_v22 = vld [vmem:[%s4286_s24 + $0x1560] sm:$0xff]  ;;  %v3582_v23 = vpack.c.bf16 %v1035_v16, %v1033_v15  ;;  %v3072_v29 = vpack.c.bf16 %v522_v21, %v520_v20  ;;  %v3090_v15 = vpack.c.bf16 %v543_v10, %v541_v9  ;;  %v1054_v20 = vld [vmem:[%s4286_s24 + $0x1610] sm:$0xff]  ;;  %v545_v21 = vld [vmem:[%s4286_s24 + $0x628] sm:$0xff] }
  0xd4   : > { %3563 = vmatprep.subr.bf16.mxu0 %v3562_v27  ;;  %v1037_v27 = vld [vmem:[%s4286_s24 + $0x1588] sm:$0xff]  ;;  %v3584_v30 = vpack.c.bf16 %v1034_v24, %v1032_v22  ;;  %v540_v16 = vld [vmem:[%s4286_s24 + $0x600] sm:$0xff]  ;;  %v547_v22 = vld [vmem:[%s4286_s24 + $0x638] sm:$0xff] }
  0xd5   : > { %v1059_v24 = vld [vmem:[%s4286_s24 + $0x1638] sm:$0xff]  ;;  %v561_v9 = vld [vmem:[%s4286_s24 + $0x6a8] sm:$0xff] }
  0xd6   : > { %3053 = vmatpush1.bf16.msra.mxu1 %v3052_v33  ;;  %v526_v33 = vld [vmem:[%s4286_s24 + $0x590] sm:$0xff]  ;;  %v563_v10 = vld [vmem:[%s4286_s24 + $0x6b8] sm:$0xff] }
  0xd7   : > { %3565 = vmatpush1.bf16.msra.mxu0 %v3564_v34  ;;  %3055 = vmatprep.subr.bf16.mxu1 %v3054_v35  ;;  %v1036_v34 = vld [vmem:[%s4286_s24 + $0x1580] sm:$0xff]  ;;  %v3586_v35 = vpack.c.bf16 %v1039_v28, %v1037_v27  ;;  %v3076_v41 = vpack.c.bf16 %v526_v33, %v524_v32  ;;  %v336_v27 = vld [vmem:[%s4296_s19 + $0xa0] sm:$0xff] }
  0xd8   : > { %3567 = vmatprep.subr.bf16.mxu0 %v3566_v39  ;;  %v1041_v39 = vld [vmem:[%s4286_s24 + $0x15a8] sm:$0xff]  ;;  %v3588_v42 = vpack.c.bf16 %v1038_v36, %v1036_v34  ;;  %v1056_v32 = vld [vmem:[%s4286_s24 + $0x1620] sm:$0xff]  ;;  %v1058_v34 = vld [vmem:[%s4286_s24 + $0x1630] sm:$0xff] }
  0xd9   : > { %v551_v36 = vld [vmem:[%s4286_s24 + $0x658] sm:$0xff] }
  0xda   : > { %3057 = vmatpush1.bf16.msra.mxu1 %v3056_v45  ;;  %v530_v45 = vld [vmem:[%s4286_s24 + $0x5b0] sm:$0xff] }
  0xdb   : > { %3569 = vmatpush1.bf16.msra.mxu0 %v3568_v46  ;;  %3059 = vmatprep.subr.bf16.mxu1 %v3058_v47  ;;  %v1040_v46 = vld [vmem:[%s4286_s24 + $0x15a0] sm:$0xff]  ;;  %v3590_v47 = vpack.c.bf16 %v1043_v40, %v1041_v39  ;;  %v3080_v53 = vpack.c.bf16 %v530_v45, %v528_v44  ;;  %v323_v39 = vld [vmem:[%s4296_s19 + $0x38] sm:$0xff]  ;;  %v550_v45 = vld [vmem:[%s4286_s24 + $0x650] sm:$0xff] }
  0xdc   : > { %3571 = vmatprep.subr.bf16.mxu0 %v3570_v51  ;;  %v1045_v51 = vld [vmem:[%s4286_s24 + $0x15c8] sm:$0xff]  ;;  %v3592_v54 = vpack.c.bf16 %v1042_v48, %v1040_v46  ;;  %v548_v44 = vld [vmem:[%s4286_s24 + $0x640] sm:$0xff]  ;;  %v1062_v48 = vld [vmem:[%s4286_s24 + $0x1650] sm:$0xff] }
  0xdd   : > { %v1060_v46 = vld [vmem:[%s4286_s24 + $0x1640] sm:$0xff] }
  0xde   : > { %3061 = vmatpush1.bf16.msra.mxu1 %v3060_v57  ;;  %v534_v57 = vld [vmem:[%s4286_s24 + $0x5d0] sm:$0xff] }
  0xdf   : > { %3573 = vmatpush1.bf16.msra.mxu0 %v3572_v58  ;;  %3063 = vmatprep.subr.bf16.mxu1 %v3062_v59  ;;  %v1044_v58 = vld [vmem:[%s4286_s24 + $0x15c0] sm:$0xff]  ;;  %v3594_v59 = vpack.c.bf16 %v1047_v52, %v1045_v51  ;;  %v3084_v1 = vpack.c.bf16 %v534_v57, %v532_v56  ;;  %v1065_v51 = vld [vmem:[%s4286_s24 + $0x1668] sm:$0xff]  ;;  %v1067_v52 = vld [vmem:[%s4286_s24 + $0x1678] sm:$0xff] }
  0xe0   : > { %3575 = vmatprep.subr.bf16.mxu0 %v3574_v63  ;;  %v1049_v63 = vld [vmem:[%s4286_s24 + $0x15e8] sm:$0xff]  ;;  %v3596_v2 = vpack.c.bf16 %v1046_v60, %v1044_v58  ;;  %v552_v56 = vld [vmem:[%s4286_s24 + $0x660] sm:$0xff]  ;;  %v554_v57 = vld [vmem:[%s4286_s24 + $0x670] sm:$0xff] }
  0xe1   : > { %v1064_v58 = vld [vmem:[%s4286_s24 + $0x1660] sm:$0xff]  ;;  %v1066_v60 = vld [vmem:[%s4286_s24 + $0x1670] sm:$0xff] }
  0xe2   : > { %3065 = vmatpush1.bf16.msra.mxu1 %v3064_v5  ;;  %v538_v5 = vld [vmem:[%s4286_s24 + $0x5f0] sm:$0xff] }
  0xe3   : > { %3577 = vmatpush1.bf16.msra.mxu0 %v3576_v6  ;;  %3067 = vmatprep.subr.bf16.mxu1 %v3066_v7  ;;  %v1048_v6 = vld [vmem:[%s4286_s24 + $0x15e0] sm:$0xff]  ;;  %v3598_v7 = vpack.c.bf16 %v1051_v0, %v1049_v63  ;;  %v3088_v13 = vpack.c.bf16 %v538_v5, %v536_v4  ;;  %v1069_v63 = vld [vmem:[%s4286_s24 + $0x1688] sm:$0xff]  ;;  %v1071_v0 = vld [vmem:[%s4286_s24 + $0x1698] sm:$0xff] }
  0xe4   : > { %3579 = vmatprep.subr.bf16.mxu0 %v3578_v11  ;;  %v1053_v11 = vld [vmem:[%s4286_s24 + $0x1608] sm:$0xff]  ;;  %v3600_v14 = vpack.c.bf16 %v1050_v8, %v1048_v6  ;;  %v556_v4 = vld [vmem:[%s4286_s24 + $0x680] sm:$0xff]  ;;  %v558_v5 = vld [vmem:[%s4286_s24 + $0x690] sm:$0xff] }
  0xe5   : > { %v1068_v6 = vld [vmem:[%s4286_s24 + $0x1680] sm:$0xff]  ;;  %v1070_v8 = vld [vmem:[%s4286_s24 + $0x1690] sm:$0xff] }
  0xe6   : > { %3069 = vmatpush1.bf16.msra.mxu1 %v3068_v17  ;;  %v542_v17 = vld [vmem:[%s4286_s24 + $0x610] sm:$0xff] }
  0xe7   : > { %3581 = vmatpush1.bf16.msra.mxu0 %v3580_v18  ;;  %3071 = vmatprep.subr.bf16.mxu1 %v3070_v19  ;;  %v1052_v18 = vld [vmem:[%s4286_s24 + $0x1600] sm:$0xff]  ;;  %v3602_v19 = vpack.c.bf16 %v1055_v12, %v1053_v11  ;;  %v3092_v26 = vpack.c.bf16 %v542_v17, %v540_v16  ;;  %v1073_v11 = vld [vmem:[%s4286_s24 + $0x16a8] sm:$0xff]  ;;  %v1075_v12 = vld [vmem:[%s4286_s24 + $0x16b8] sm:$0xff] }
  0xe8   : > { %3583 = vmatprep.subr.bf16.mxu0 %v3582_v23  ;;  %v1057_v23 = vld [vmem:[%s4286_s24 + $0x1628] sm:$0xff]  ;;  %v3604_v28 = vpack.c.bf16 %v1054_v20, %v1052_v18  ;;  %v560_v16 = vld [vmem:[%s4286_s24 + $0x6a0] sm:$0xff]  ;;  %v562_v17 = vld [vmem:[%s4286_s24 + $0x6b0] sm:$0xff] }
  0xe9   : > { %v3606_v33 = vpack.c.bf16 %v1059_v24, %v1057_v23  ;;  %v1072_v18 = vld [vmem:[%s4286_s24 + $0x16a0] sm:$0xff]  ;;  %v1074_v20 = vld [vmem:[%s4286_s24 + $0x16b0] sm:$0xff]  ;;  %v1077_v23 = vld [vmem:[%s4286_s24 + $0x16c8] sm:$0xff] }
  0xea   : > { %3073 = vmatpush1.bf16.msra.mxu1 %v3072_v29  ;;  %v3094_v29 = vpack.c.bf16 %v547_v22, %v545_v21  ;;  %v565_v21 = vld [vmem:[%s4286_s24 + $0x6c8] sm:$0xff]  ;;  %v567_v22 = vld [vmem:[%s4286_s24 + $0x6d8] sm:$0xff] }
  0xeb   : > { %3585 = vmatpush1.bf16.msra.mxu0 %v3584_v30  ;;  %3075 = vmatprep.subr.bf16.mxu1 %v3074_v31  ;;  %v544_v30 = vld [vmem:[%s4286_s24 + $0x620] sm:$0xff]  ;;  %v546_v31 = vld [vmem:[%s4286_s24 + $0x630] sm:$0xff]  ;;  %v1079_v24 = vld [vmem:[%s4286_s24 + $0x16d8] sm:$0xff] }
  0xec   : > { %3587 = vmatprep.subr.bf16.mxu0 %v3586_v35  ;;  %v549_v35 = vld [vmem:[%s4286_s24 + $0x648] sm:$0xff]  ;;  %v3096_v40 = vpack.c.bf16 %v546_v31, %v544_v30  ;;  %v1076_v30 = vld [vmem:[%s4286_s24 + $0x16c0] sm:$0xff]  ;;  %v3626_v31 = vpack.c.bf16 %v1079_v24, %v1077_v23 }
  0xed   : > { %v584_v24 = vld [vmem:[%s4286_s24 + $0x760] sm:$0xff] }
  0xee   : > { %3077 = vmatpush1.bf16.msra.mxu1 %v3076_v41  ;;  %v339_v41 = vld [vmem:[%s4296_s19 + $0xb8] sm:$0xff] }
  0xef   : > { %3589 = vmatpush1.bf16.msra.mxu0 %v3588_v42  ;;  %3079 = vmatprep.subr.bf16.mxu1 %v3078_v43  ;;  %v3608_v42 = vpack.c.bf16 %v1058_v34, %v1056_v32  ;;  %v3098_v43 = vpack.c.bf16 %v551_v36, %v549_v35  ;;  %v1078_v32 = vld [vmem:[%s4286_s24 + $0x16d0] sm:$0xff]  ;;  %v571_v34 = vld [vmem:[%s4286_s24 + $0x6f8] sm:$0xff]  ;;  %v1081_v35 = vld [vmem:[%s4286_s24 + $0x16e8] sm:$0xff] }
  0xf0   : > { %3591 = vmatprep.subr.bf16.mxu0 %v3590_v47  ;;  %v3610_v47 = vpack.c.bf16 %v1063_v38, %v1061_v37  ;;  %v1083_v36 = vld [vmem:[%s4286_s24 + $0x16f8] sm:$0xff]  ;;  %v3628_v38 = vpack.c.bf16 %v1078_v32, %v1076_v30 }
  0xf1   : > { %v591_v30 = vld [vmem:[%s4286_s24 + $0x798] sm:$0xff] }
  0xf2   : > { %3081 = vmatpush1.bf16.msra.mxu1 %v3080_v53  ;;  %v3100_v53 = vpack.c.bf16 %v550_v45, %v548_v44  ;;  %v1082_v44 = vld [vmem:[%s4286_s24 + $0x16f0] sm:$0xff]  ;;  %v573_v45 = vld [vmem:[%s4286_s24 + $0x708] sm:$0xff]  ;;  %v1103_v32 = vld [vmem:[%s4286_s24 + $0x1798] sm:$0xff] }
  0xf3   : > { %3593 = vmatpush1.bf16.msra.mxu0 %v3592_v54  ;;  %3083 = vmatprep.subr.bf16.mxu1 %v3082_v55  ;;  %v3612_v54 = vpack.c.bf16 %v1062_v48, %v1060_v46  ;;  %v3102_v55 = vpack.c.bf16 %v555_v50, %v553_v49  ;;  %v575_v46 = vld [vmem:[%s4286_s24 + $0x718] sm:$0xff] }
  0xf4   : > { %3595 = vmatprep.subr.bf16.mxu0 %v3594_v59  ;;  %v3614_v59 = vpack.c.bf16 %v1067_v52, %v1065_v51  ;;  %v1087_v48 = vld [vmem:[%s4286_s24 + $0x1718] sm:$0xff]  ;;  %v3122_v51 = vpack.c.bf16 %v575_v46, %v573_v45  ;;  %v572_v52 = vld [vmem:[%s4286_s24 + $0x700] sm:$0xff] }
  0xf6   : > { %3085 = vmatpush1.bf16.msra.mxu1 %v3084_v1  ;;  %v3104_v1 = vpack.c.bf16 %v554_v57, %v552_v56  ;;  %v1086_v56 = vld [vmem:[%s4286_s24 + $0x1710] sm:$0xff]  ;;  %v577_v57 = vld [vmem:[%s4286_s24 + $0x728] sm:$0xff] }
  0xf7   : > { %3597 = vmatpush1.bf16.msra.mxu0 %v3596_v2  ;;  %3087 = vmatprep.subr.bf16.mxu1 %v3086_v3  ;;  %v3616_v2 = vpack.c.bf16 %v1066_v60, %v1064_v58  ;;  %v3106_v3 = vpack.c.bf16 %v559_v62, %v557_v61  ;;  %v579_v58 = vld [vmem:[%s4286_s24 + $0x738] sm:$0xff] }
  0xf8   : > { %3599 = vmatprep.subr.bf16.mxu0 %v3598_v7  ;;  %v3618_v7 = vpack.c.bf16 %v1071_v0, %v1069_v63  ;;  %v1091_v60 = vld [vmem:[%s4286_s24 + $0x1738] sm:$0xff]  ;;  %v3126_v63 = vpack.c.bf16 %v579_v58, %v577_v57  ;;  %v576_v0 = vld [vmem:[%s4286_s24 + $0x720] sm:$0xff] }
  0xfa   : > { %3089 = vmatpush1.bf16.msra.mxu1 %v3088_v13  ;;  %v3108_v13 = vpack.c.bf16 %v558_v5, %v556_v4  ;;  %v1090_v4 = vld [vmem:[%s4286_s24 + $0x1730] sm:$0xff]  ;;  %v581_v5 = vld [vmem:[%s4286_s24 + $0x748] sm:$0xff] }
  0xfb   : > { %3601 = vmatpush1.bf16.msra.mxu0 %v3600_v14  ;;  %3091 = vmatprep.subr.bf16.mxu1 %v3090_v15  ;;  %v3620_v14 = vpack.c.bf16 %v1070_v8, %v1068_v6  ;;  %v3110_v15 = vpack.c.bf16 %v563_v10, %v561_v9  ;;  %v583_v6 = vld [vmem:[%s4286_s24 + $0x758] sm:$0xff] }
  0xfc   : > { %3603 = vmatprep.subr.bf16.mxu0 %v3602_v19  ;;  %v3622_v19 = vpack.c.bf16 %v1075_v12, %v1073_v11  ;;  %v1095_v8 = vld [vmem:[%s4286_s24 + $0x1758] sm:$0xff]  ;;  %v3130_v11 = vpack.c.bf16 %v583_v6, %v581_v5  ;;  %v580_v12 = vld [vmem:[%s4286_s24 + $0x740] sm:$0xff] }
  0xfd   : > { %1579 = vmatmul.mubr.f32.vlgmr.msra.gmra.mrb[0].mxu1 %v320_v25  ;;  %v3112_v25 = vpack.c.bf16 %v562_v17, %v560_v16  ;;  %v1094_v16 = vld [vmem:[%s4286_s24 + $0x1750] sm:$0xff]  ;;  %v585_v17 = vld [vmem:[%s4286_s24 + $0x768] sm:$0xff] }
  0xfe   : > { %3093 = vmatpush1.bf16.msra.mxu1 %v3092_v26  ;;  %2147 = vmatmul.mubr.f32.vlgmr.msra.gmra.mrb[0].mxu0 %v336_v27  ;;  %v3624_v26 = vpack.c.bf16 %v1074_v20, %v1072_v18  ;;  %v3114_v27 = vpack.c.bf16 %v567_v22, %v565_v21  ;;  %v587_v18 = vld [vmem:[%s4286_s24 + $0x778] sm:$0xff] }
  0xff   : > { %3605 = vmatpush1.bf16.msra.mxu0 %v3604_v28  ;;  %3095 = vmatprep.subr.bf16.mxu1 %v3094_v29  ;;  %v564_v28 = vld [vmem:[%s4286_s24 + $0x6c0] sm:$0xff]  ;;  %v566_v29 = vld [vmem:[%s4286_s24 + $0x6d0] sm:$0xff]  ;;  %v1099_v20 = vld [vmem:[%s4286_s24 + $0x1778] sm:$0xff]  ;;  %v3134_v23 = vpack.c.bf16 %v587_v18, %v585_v17 }
 0x100   : > { %3607 = vmatprep.subr.bf16.mxu0 %v3606_v33  ;;  %1649 = vmatprep.mubr.f32.mxu1 %v323_v39  ;;  %v569_v33 = vld [vmem:[%s4286_s24 + $0x6e8] sm:$0xff]  ;;  %v3116_v37 = vpack.c.bf16 %v566_v29, %v564_v28  ;;  %v1098_v28 = vld [vmem:[%s4286_s24 + $0x1770] sm:$0xff] }
 0x101   : > { %2217 = vmatprep.mubr.f32.mxu0 %v339_v41  ;;  %v3118_v39 = vpack.c.bf16 %v571_v34, %v569_v33  ;;  %v570_v41 = vld [vmem:[%s4286_s24 + $0x6f0] sm:$0xff]  ;;  %v589_v29 = vld [vmem:[%s4286_s24 + $0x788] sm:$0xff] }
 0x102   : > { %3097 = vmatpush1.bf16.msra.mxu1 %v3096_v40  ;;  %v568_v40 = vld [vmem:[%s4286_s24 + $0x6e0] sm:$0xff] }
 0x103   : > { %3609 = vmatpush1.bf16.msra.mxu0 %v3608_v42  ;;  %3099 = vmatprep.subr.bf16.mxu1 %v3098_v43  ;;  %v1080_v42 = vld [vmem:[%s4286_s24 + $0x16e0] sm:$0xff]  ;;  %v3630_v43 = vpack.c.bf16 %v1083_v36, %v1081_v35  ;;  %v3120_v49 = vpack.c.bf16 %v570_v41, %v568_v40  ;;  %v3138_v35 = vpack.c.bf16 %v591_v30, %v589_v29  ;;  %v1102_v40 = vld [vmem:[%s4286_s24 + $0x1790] sm:$0xff]  ;;  %v593_v41 = vld [vmem:[%s4286_s24 + $0x7a8] sm:$0xff] }
 0x104   : > { %3611 = vmatprep.subr.bf16.mxu0 %v3610_v47  ;;  %v1085_v47 = vld [vmem:[%s4286_s24 + $0x1708] sm:$0xff]  ;;  %v3632_v50 = vpack.c.bf16 %v1082_v44, %v1080_v42  ;;  %v588_v36 = vld [vmem:[%s4286_s24 + $0x780] sm:$0xff]  ;;  %v595_v42 = vld [vmem:[%s4286_s24 + $0x7b8] sm:$0xff] }
 0x105   : > { %v1107_v44 = vld [vmem:[%s4286_s24 + $0x17b8] sm:$0xff]  ;;  %v322_v29 = vld [vmem:[%s4296_s19 + $0x30] sm:$0xff] }
 0x106   : > { %3101 = vmatpush1.bf16.msra.mxu1 %v3100_v53  ;;  %v574_v53 = vld [vmem:[%s4286_s24 + $0x710] sm:$0xff] }
 0x107   : > { %3613 = vmatpush1.bf16.msra.mxu0 %v3612_v54  ;;  %3103 = vmatprep.subr.bf16.mxu1 %v3102_v55  ;;  %v1084_v54 = vld [vmem:[%s4286_s24 + $0x1700] sm:$0xff]  ;;  %v3634_v55 = vpack.c.bf16 %v1087_v48, %v1085_v47  ;;  %v3124_v61 = vpack.c.bf16 %v574_v53, %v572_v52  ;;  %v3142_v47 = vpack.c.bf16 %v595_v42, %v593_v41  ;;  %v1106_v52 = vld [vmem:[%s4286_s24 + $0x17b0] sm:$0xff]  ;;  %v597_v53 = vld [vmem:[%s4286_s24 + $0x7c8] sm:$0xff] }
 0x108   : > { %3615 = vmatprep.subr.bf16.mxu0 %v3614_v59  ;;  %v1089_v59 = vld [vmem:[%s4286_s24 + $0x1728] sm:$0xff]  ;;  %v3636_v62 = vpack.c.bf16 %v1086_v56, %v1084_v54  ;;  %v592_v48 = vld [vmem:[%s4286_s24 + $0x7a0] sm:$0xff]  ;;  %v599_v54 = vld [vmem:[%s4286_s24 + $0x7d8] sm:$0xff] }
 0x109   : > { %v1111_v56 = vld [vmem:[%s4286_s24 + $0x17d8] sm:$0xff]  ;;  %v1125_v41 = vld [vmem:[%s4286_s24 + $0x1848] sm:$0xff] }
 0x10a   : > { %3105 = vmatpush1.bf16.msra.mxu1 %v3104_v1  ;;  %v578_v1 = vld [vmem:[%s4286_s24 + $0x730] sm:$0xff]  ;;  %v1127_v42 = vld [vmem:[%s4286_s24 + $0x1858] sm:$0xff] }
 0x10b   : > { %3617 = vmatpush1.bf16.msra.mxu0 %v3616_v2  ;;  %3107 = vmatprep.subr.bf16.mxu1 %v3106_v3  ;;  %v1088_v2 = vld [vmem:[%s4286_s24 + $0x1720] sm:$0xff]  ;;  %v3638_v3 = vpack.c.bf16 %v1091_v60, %v1089_v59  ;;  %v3128_v9 = vpack.c.bf16 %v578_v1, %v576_v0  ;;  %v3146_v59 = vpack.c.bf16 %v599_v54, %v597_v53  ;;  %v1110_v0 = vld [vmem:[%s4286_s24 + $0x17d0] sm:$0xff]  ;;  %v601_v1 = vld [vmem:[%s4286_s24 + $0x7e8] sm:$0xff] }
 0x10c   : > { %3619 = vmatprep.subr.bf16.mxu0 %v3618_v7  ;;  %v1093_v7 = vld [vmem:[%s4286_s24 + $0x1748] sm:$0xff]  ;;  %v3640_v10 = vpack.c.bf16 %v1090_v4, %v1088_v2  ;;  %v596_v60 = vld [vmem:[%s4286_s24 + $0x7c0] sm:$0xff]  ;;  %v603_v2 = vld [vmem:[%s4286_s24 + $0x7f8] sm:$0xff] }
 0x10d   : > { %v1115_v4 = vld [vmem:[%s4286_s24 + $0x17f8] sm:$0xff]  ;;  %v617_v53 = vld [vmem:[%s4286_s24 + $0x868] sm:$0xff] }
 0x10e   : > { %3109 = vmatpush1.bf16.msra.mxu1 %v3108_v13  ;;  %v582_v13 = vld [vmem:[%s4286_s24 + $0x750] sm:$0xff]  ;;  %v619_v54 = vld [vmem:[%s4286_s24 + $0x878] sm:$0xff] }
 0x10f   : > { %3621 = vmatpush1.bf16.msra.mxu0 %v3620_v14  ;;  %3111 = vmatprep.subr.bf16.mxu1 %v3110_v15  ;;  %v1092_v14 = vld [vmem:[%s4286_s24 + $0x1740] sm:$0xff]  ;;  %v3642_v15 = vpack.c.bf16 %v1095_v8, %v1093_v7  ;;  %v3132_v21 = vpack.c.bf16 %v582_v13, %v580_v12  ;;  %v3150_v7 = vpack.c.bf16 %v603_v2, %v601_v1  ;;  %v1114_v12 = vld [vmem:[%s4286_s24 + $0x17f0] sm:$0xff]  ;;  %v605_v13 = vld [vmem:[%s4286_s24 + $0x808] sm:$0xff] }
 0x110   : > { %3623 = vmatprep.subr.bf16.mxu0 %v3622_v19  ;;  %v1097_v19 = vld [vmem:[%s4286_s24 + $0x1768] sm:$0xff]  ;;  %v3644_v22 = vpack.c.bf16 %v1094_v16, %v1092_v14  ;;  %v600_v8 = vld [vmem:[%s4286_s24 + $0x7e0] sm:$0xff]  ;;  %v607_v14 = vld [vmem:[%s4286_s24 + $0x818] sm:$0xff] }
 0x111   : > { %v1119_v16 = vld [vmem:[%s4286_s24 + $0x1818] sm:$0xff]  ;;  %v621_v1 = vld [vmem:[%s4286_s24 + $0x888] sm:$0xff] }
 0x112   : > { %3113 = vmatpush1.bf16.msra.mxu1 %v3112_v25  ;;  %v586_v25 = vld [vmem:[%s4286_s24 + $0x770] sm:$0xff]  ;;  %v623_v2 = vld [vmem:[%s4286_s24 + $0x898] sm:$0xff] }
 0x113   : > { %3625 = vmatpush1.bf16.msra.mxu0 %v3624_v26  ;;  %3115 = vmatprep.subr.bf16.mxu1 %v3114_v27  ;;  %v1096_v26 = vld [vmem:[%s4286_s24 + $0x1760] sm:$0xff]  ;;  %v3646_v27 = vpack.c.bf16 %v1099_v20, %v1097_v19  ;;  %v3136_v33 = vpack.c.bf16 %v586_v25, %v584_v24  ;;  %v3154_v19 = vpack.c.bf16 %v607_v14, %v605_v13  ;;  %v1118_v24 = vld [vmem:[%s4286_s24 + $0x1810] sm:$0xff]  ;;  %v609_v25 = vld [vmem:[%s4286_s24 + $0x828] sm:$0xff] }
 0x114   : > { %3627 = vmatprep.subr.bf16.mxu0 %v3626_v31  ;;  %v1101_v31 = vld [vmem:[%s4286_s24 + $0x1788] sm:$0xff]  ;;  %v3648_v34 = vpack.c.bf16 %v1098_v28, %v1096_v26  ;;  %v604_v20 = vld [vmem:[%s4286_s24 + $0x800] sm:$0xff]  ;;  %v611_v26 = vld [vmem:[%s4286_s24 + $0x838] sm:$0xff] }
 0x115   : > { %v1123_v28 = vld [vmem:[%s4286_s24 + $0x1838] sm:$0xff]  ;;  %v625_v13 = vld [vmem:[%s4286_s24 + $0x8a8] sm:$0xff] }
 0x116   : > { %3117 = vmatpush1.bf16.msra.mxu1 %v3116_v37  ;;  %v590_v37 = vld [vmem:[%s4286_s24 + $0x790] sm:$0xff]  ;;  %v627_v14 = vld [vmem:[%s4286_s24 + $0x8b8] sm:$0xff] }
 0x117   : > { %3629 = vmatpush1.bf16.msra.mxu0 %v3628_v38  ;;  %3119 = vmatprep.subr.bf16.mxu1 %v3118_v39  ;;  %v1100_v38 = vld [vmem:[%s4286_s24 + $0x1780] sm:$0xff]  ;;  %v3650_v39 = vpack.c.bf16 %v1103_v32, %v1101_v31  ;;  %v3140_v45 = vpack.c.bf16 %v590_v37, %v588_v36 }
 0x118   : > { %3631 = vmatprep.subr.bf16.mxu0 %v3630_v43  ;;  %v1105_v43 = vld [vmem:[%s4286_s24 + $0x17a8] sm:$0xff]  ;;  %v3652_v46 = vpack.c.bf16 %v1102_v40, %v1100_v38  ;;  %v338_v31 = vld [vmem:[%s4296_s19 + $0xb0] sm:$0xff]  ;;  %v1122_v38 = vld [vmem:[%s4286_s24 + $0x1830] sm:$0xff] }
 0x119   : > { %v1120_v36 = vld [vmem:[%s4286_s24 + $0x1820] sm:$0xff]  ;;  %v615_v40 = vld [vmem:[%s4286_s24 + $0x858] sm:$0xff] }
 0x11a   : > { %3121 = vmatpush1.bf16.msra.mxu1 %v3120_v49  ;;  %v594_v49 = vld [vmem:[%s4286_s24 + $0x7b0] sm:$0xff] }
 0x11b   : > { %3633 = vmatpush1.bf16.msra.mxu0 %v3632_v50  ;;  %3123 = vmatprep.subr.bf16.mxu1 %v3122_v51  ;;  %v1104_v50 = vld [vmem:[%s4286_s24 + $0x17a0] sm:$0xff]  ;;  %v3654_v51 = vpack.c.bf16 %v1107_v44, %v1105_v43  ;;  %v3144_v57 = vpack.c.bf16 %v594_v49, %v592_v48  ;;  %v325_v43 = vld [vmem:[%s4296_s19 + $0x48] sm:$0xff]  ;;  %v614_v49 = vld [vmem:[%s4286_s24 + $0x850] sm:$0xff] }
 0x11c   : > { %3635 = vmatprep.subr.bf16.mxu0 %v3634_v55  ;;  %v1109_v55 = vld [vmem:[%s4286_s24 + $0x17c8] sm:$0xff]  ;;  %v3656_v58 = vpack.c.bf16 %v1106_v52, %v1104_v50  ;;  %v612_v48 = vld [vmem:[%s4286_s24 + $0x840] sm:$0xff]  ;;  %v1126_v52 = vld [vmem:[%s4286_s24 + $0x1850] sm:$0xff] }
 0x11d   : > { %v1124_v50 = vld [vmem:[%s4286_s24 + $0x1840] sm:$0xff] }
 0x11e   : > { %3125 = vmatpush1.bf16.msra.mxu1 %v3124_v61  ;;  %v598_v61 = vld [vmem:[%s4286_s24 + $0x7d0] sm:$0xff] }
 0x11f   : > { %3637 = vmatpush1.bf16.msra.mxu0 %v3636_v62  ;;  %3127 = vmatprep.subr.bf16.mxu1 %v3126_v63  ;;  %v1108_v62 = vld [vmem:[%s4286_s24 + $0x17c0] sm:$0xff]  ;;  %v3658_v63 = vpack.c.bf16 %v1111_v56, %v1109_v55  ;;  %v3148_v5 = vpack.c.bf16 %v598_v61, %v596_v60  ;;  %v1129_v55 = vld [vmem:[%s4286_s24 + $0x1868] sm:$0xff]  ;;  %v1131_v56 = vld [vmem:[%s4286_s24 + $0x1878] sm:$0xff] }
 0x120   : > { %3639 = vmatprep.subr.bf16.mxu0 %v3638_v3  ;;  %v1113_v3 = vld [vmem:[%s4286_s24 + $0x17e8] sm:$0xff]  ;;  %v3660_v6 = vpack.c.bf16 %v1110_v0, %v1108_v62  ;;  %v616_v60 = vld [vmem:[%s4286_s24 + $0x860] sm:$0xff]  ;;  %v618_v61 = vld [vmem:[%s4286_s24 + $0x870] sm:$0xff] }
 0x121   : > { %v1128_v62 = vld [vmem:[%s4286_s24 + $0x1860] sm:$0xff]  ;;  %v1130_v0 = vld [vmem:[%s4286_s24 + $0x1870] sm:$0xff] }
 0x122   : > { %3129 = vmatpush1.bf16.msra.mxu1 %v3128_v9  ;;  %v602_v9 = vld [vmem:[%s4286_s24 + $0x7f0] sm:$0xff] }
 0x123   : > { %3641 = vmatpush1.bf16.msra.mxu0 %v3640_v10  ;;  %3131 = vmatprep.subr.bf16.mxu1 %v3130_v11  ;;  %v1112_v10 = vld [vmem:[%s4286_s24 + $0x17e0] sm:$0xff]  ;;  %v3662_v11 = vpack.c.bf16 %v1115_v4, %v1113_v3  ;;  %v3152_v17 = vpack.c.bf16 %v602_v9, %v600_v8  ;;  %v1133_v3 = vld [vmem:[%s4286_s24 + $0x1888] sm:$0xff]  ;;  %v1135_v4 = vld [vmem:[%s4286_s24 + $0x1898] sm:$0xff] }
 0x124   : > { %3643 = vmatprep.subr.bf16.mxu0 %v3642_v15  ;;  %v1117_v15 = vld [vmem:[%s4286_s24 + $0x1808] sm:$0xff]  ;;  %v3664_v18 = vpack.c.bf16 %v1114_v12, %v1112_v10  ;;  %v620_v8 = vld [vmem:[%s4286_s24 + $0x880] sm:$0xff]  ;;  %v622_v9 = vld [vmem:[%s4286_s24 + $0x890] sm:$0xff] }
 0x125   : > { %v1132_v10 = vld [vmem:[%s4286_s24 + $0x1880] sm:$0xff]  ;;  %v1134_v12 = vld [vmem:[%s4286_s24 + $0x1890] sm:$0xff] }
 0x126   : > { %3133 = vmatpush1.bf16.msra.mxu1 %v3132_v21  ;;  %v606_v21 = vld [vmem:[%s4286_s24 + $0x810] sm:$0xff] }
 0x127   : > { %3645 = vmatpush1.bf16.msra.mxu0 %v3644_v22  ;;  %3135 = vmatprep.subr.bf16.mxu1 %v3134_v23  ;;  %v1116_v22 = vld [vmem:[%s4286_s24 + $0x1800] sm:$0xff]  ;;  %v3666_v23 = vpack.c.bf16 %v1119_v16, %v1117_v15  ;;  %v3156_v30 = vpack.c.bf16 %v606_v21, %v604_v20  ;;  %v1137_v15 = vld [vmem:[%s4286_s24 + $0x18a8] sm:$0xff]  ;;  %v1139_v16 = vld [vmem:[%s4286_s24 + $0x18b8] sm:$0xff] }
 0x128   : > { %3647 = vmatprep.subr.bf16.mxu0 %v3646_v27  ;;  %v1121_v27 = vld [vmem:[%s4286_s24 + $0x1828] sm:$0xff]  ;;  %v3668_v32 = vpack.c.bf16 %v1118_v24, %v1116_v22  ;;  %v624_v20 = vld [vmem:[%s4286_s24 + $0x8a0] sm:$0xff]  ;;  %v626_v21 = vld [vmem:[%s4286_s24 + $0x8b0] sm:$0xff] }
 0x129   : > { %v3670_v37 = vpack.c.bf16 %v1123_v28, %v1121_v27  ;;  %v1136_v22 = vld [vmem:[%s4286_s24 + $0x18a0] sm:$0xff]  ;;  %v1138_v24 = vld [vmem:[%s4286_s24 + $0x18b0] sm:$0xff]  ;;  %v1141_v27 = vld [vmem:[%s4286_s24 + $0x18c8] sm:$0xff] }
 0x12a   : > { %3137 = vmatpush1.bf16.msra.mxu1 %v3136_v33  ;;  %v3158_v33 = vpack.c.bf16 %v611_v26, %v609_v25  ;;  %v629_v25 = vld [vmem:[%s4286_s24 + $0x8c8] sm:$0xff]  ;;  %v631_v26 = vld [vmem:[%s4286_s24 + $0x8d8] sm:$0xff] }
 0x12b   : > { %3649 = vmatpush1.bf16.msra.mxu0 %v3648_v34  ;;  %3139 = vmatprep.subr.bf16.mxu1 %v3138_v35  ;;  %v608_v34 = vld [vmem:[%s4286_s24 + $0x820] sm:$0xff]  ;;  %v610_v35 = vld [vmem:[%s4286_s24 + $0x830] sm:$0xff]  ;;  %v1143_v28 = vld [vmem:[%s4286_s24 + $0x18d8] sm:$0xff] }
 0x12c   : > { %3651 = vmatprep.subr.bf16.mxu0 %v3650_v39  ;;  %v613_v39 = vld [vmem:[%s4286_s24 + $0x848] sm:$0xff]  ;;  %v3160_v44 = vpack.c.bf16 %v610_v35, %v608_v34  ;;  %v1140_v34 = vld [vmem:[%s4286_s24 + $0x18c0] sm:$0xff]  ;;  %v3690_v35 = vpack.c.bf16 %v1143_v28, %v1141_v27 }
 0x12d   : > { %v648_v28 = vld [vmem:[%s4286_s24 + $0x960] sm:$0xff] }
 0x12e   : > { %3141 = vmatpush1.bf16.msra.mxu1 %v3140_v45  ;;  %v341_v45 = vld [vmem:[%s4296_s19 + $0xc8] sm:$0xff] }
 0x12f   : > { %3653 = vmatpush1.bf16.msra.mxu0 %v3652_v46  ;;  %3143 = vmatprep.subr.bf16.mxu1 %v3142_v47  ;;  %v3672_v46 = vpack.c.bf16 %v1122_v38, %v1120_v36  ;;  %v3162_v47 = vpack.c.bf16 %v615_v40, %v613_v39  ;;  %v1142_v36 = vld [vmem:[%s4286_s24 + $0x18d0] sm:$0xff]  ;;  %v635_v38 = vld [vmem:[%s4286_s24 + $0x8f8] sm:$0xff]  ;;  %v1145_v39 = vld [vmem:[%s4286_s24 + $0x18e8] sm:$0xff] }
 0x130   : > { %3655 = vmatprep.subr.bf16.mxu0 %v3654_v51  ;;  %v3674_v51 = vpack.c.bf16 %v1127_v42, %v1125_v41  ;;  %v1147_v40 = vld [vmem:[%s4286_s24 + $0x18f8] sm:$0xff]  ;;  %v3692_v42 = vpack.c.bf16 %v1142_v36, %v1140_v34 }
 0x131   : > { %v655_v34 = vld [vmem:[%s4286_s24 + $0x998] sm:$0xff] }
 0x132   : > { %3145 = vmatpush1.bf16.msra.mxu1 %v3144_v57  ;;  %v3164_v57 = vpack.c.bf16 %v614_v49, %v612_v48  ;;  %v1146_v48 = vld [vmem:[%s4286_s24 + $0x18f0] sm:$0xff]  ;;  %v637_v49 = vld [vmem:[%s4286_s24 + $0x908] sm:$0xff]  ;;  %v1167_v36 = vld [vmem:[%s4286_s24 + $0x1998] sm:$0xff] }
 0x133   : > { %3657 = vmatpush1.bf16.msra.mxu0 %v3656_v58  ;;  %3147 = vmatprep.subr.bf16.mxu1 %v3146_v59  ;;  %v3676_v58 = vpack.c.bf16 %v1126_v52, %v1124_v50  ;;  %v3166_v59 = vpack.c.bf16 %v619_v54, %v617_v53  ;;  %v639_v50 = vld [vmem:[%s4286_s24 + $0x918] sm:$0xff] }
 0x134   : > { %3659 = vmatprep.subr.bf16.mxu0 %v3658_v63  ;;  %v3678_v63 = vpack.c.bf16 %v1131_v56, %v1129_v55  ;;  %v1151_v52 = vld [vmem:[%s4286_s24 + $0x1918] sm:$0xff]  ;;  %v3186_v55 = vpack.c.bf16 %v639_v50, %v637_v49  ;;  %v636_v56 = vld [vmem:[%s4286_s24 + $0x900] sm:$0xff] }
 0x136   : > { %3149 = vmatpush1.bf16.msra.mxu1 %v3148_v5  ;;  %v3168_v5 = vpack.c.bf16 %v618_v61, %v616_v60  ;;  %v1150_v60 = vld [vmem:[%s4286_s24 + $0x1910] sm:$0xff]  ;;  %v641_v61 = vld [vmem:[%s4286_s24 + $0x928] sm:$0xff] }
 0x137   : > { %3661 = vmatpush1.bf16.msra.mxu0 %v3660_v6  ;;  %3151 = vmatprep.subr.bf16.mxu1 %v3150_v7  ;;  %v3680_v6 = vpack.c.bf16 %v1130_v0, %v1128_v62  ;;  %v3170_v7 = vpack.c.bf16 %v623_v2, %v621_v1  ;;  %v643_v62 = vld [vmem:[%s4286_s24 + $0x938] sm:$0xff] }
 0x138   : > { %3663 = vmatprep.subr.bf16.mxu0 %v3662_v11  ;;  %v3682_v11 = vpack.c.bf16 %v1135_v4, %v1133_v3  ;;  %v1155_v0 = vld [vmem:[%s4286_s24 + $0x1938] sm:$0xff]  ;;  %v3190_v3 = vpack.c.bf16 %v643_v62, %v641_v61  ;;  %v640_v4 = vld [vmem:[%s4286_s24 + $0x920] sm:$0xff] }
 0x13a   : > { %3153 = vmatpush1.bf16.msra.mxu1 %v3152_v17  ;;  %v3172_v17 = vpack.c.bf16 %v622_v9, %v620_v8  ;;  %v1154_v8 = vld [vmem:[%s4286_s24 + $0x1930] sm:$0xff]  ;;  %v645_v9 = vld [vmem:[%s4286_s24 + $0x948] sm:$0xff] }
 0x13b   : > { %3665 = vmatpush1.bf16.msra.mxu0 %v3664_v18  ;;  %3155 = vmatprep.subr.bf16.mxu1 %v3154_v19  ;;  %v3684_v18 = vpack.c.bf16 %v1134_v12, %v1132_v10  ;;  %v3174_v19 = vpack.c.bf16 %v627_v14, %v625_v13  ;;  %v647_v10 = vld [vmem:[%s4286_s24 + $0x958] sm:$0xff] }
 0x13c   : > { %3667 = vmatprep.subr.bf16.mxu0 %v3666_v23  ;;  %v3686_v23 = vpack.c.bf16 %v1139_v16, %v1137_v15  ;;  %v1159_v12 = vld [vmem:[%s4286_s24 + $0x1958] sm:$0xff]  ;;  %v3194_v15 = vpack.c.bf16 %v647_v10, %v645_v9  ;;  %v644_v16 = vld [vmem:[%s4286_s24 + $0x940] sm:$0xff] }
 0x13d   : > { %1650 = vmatmul.mubr.f32.vlgmr.msra.gmra.mrb[0].mxu1 %v322_v29  ;;  %v3176_v29 = vpack.c.bf16 %v626_v21, %v624_v20  ;;  %v1158_v20 = vld [vmem:[%s4286_s24 + $0x1950] sm:$0xff]  ;;  %v649_v21 = vld [vmem:[%s4286_s24 + $0x968] sm:$0xff] }
 0x13e   : > { %3157 = vmatpush1.bf16.msra.mxu1 %v3156_v30  ;;  %2218 = vmatmul.mubr.f32.vlgmr.msra.gmra.mrb[0].mxu0 %v338_v31  ;;  %v3688_v30 = vpack.c.bf16 %v1138_v24, %v1136_v22  ;;  %v3178_v31 = vpack.c.bf16 %v631_v26, %v629_v25  ;;  %v651_v22 = vld [vmem:[%s4286_s24 + $0x978] sm:$0xff] }
 0x13f   : > { %3669 = vmatpush1.bf16.msra.mxu0 %v3668_v32  ;;  %3159 = vmatprep.subr.bf16.mxu1 %v3158_v33  ;;  %v628_v32 = vld [vmem:[%s4286_s24 + $0x8c0] sm:$0xff]  ;;  %v630_v33 = vld [vmem:[%s4286_s24 + $0x8d0] sm:$0xff]  ;;  %v1163_v24 = vld [vmem:[%s4286_s24 + $0x1978] sm:$0xff]  ;;  %v3198_v27 = vpack.c.bf16 %v651_v22, %v649_v21 }
 0x140   : > { %3671 = vmatprep.subr.bf16.mxu0 %v3670_v37  ;;  %1720 = vmatprep.mubr.f32.mxu1 %v325_v43  ;;  %v633_v37 = vld [vmem:[%s4286_s24 + $0x8e8] sm:$0xff]  ;;  %v3180_v41 = vpack.c.bf16 %v630_v33, %v628_v32  ;;  %v1162_v32 = vld [vmem:[%s4286_s24 + $0x1970] sm:$0xff] }
 0x141   : > { %2288 = vmatprep.mubr.f32.mxu0 %v341_v45  ;;  %v3182_v43 = vpack.c.bf16 %v635_v38, %v633_v37  ;;  %v634_v45 = vld [vmem:[%s4286_s24 + $0x8f0] sm:$0xff]  ;;  %v653_v33 = vld [vmem:[%s4286_s24 + $0x988] sm:$0xff] }
 0x142   : > { %3161 = vmatpush1.bf16.msra.mxu1 %v3160_v44  ;;  %v632_v44 = vld [vmem:[%s4286_s24 + $0x8e0] sm:$0xff] }
 0x143   : > { %3673 = vmatpush1.bf16.msra.mxu0 %v3672_v46  ;;  %3163 = vmatprep.subr.bf16.mxu1 %v3162_v47  ;;  %v1144_v46 = vld [vmem:[%s4286_s24 + $0x18e0] sm:$0xff]  ;;  %v3694_v47 = vpack.c.bf16 %v1147_v40, %v1145_v39  ;;  %v3184_v53 = vpack.c.bf16 %v634_v45, %v632_v44  ;;  %v3202_v39 = vpack.c.bf16 %v655_v34, %v653_v33  ;;  %v1166_v44 = vld [vmem:[%s4286_s24 + $0x1990] sm:$0xff]  ;;  %v657_v45 = vld [vmem:[%s4286_s24 + $0x9a8] sm:$0xff] }
 0x144   : > { %3675 = vmatprep.subr.bf16.mxu0 %v3674_v51  ;;  %v1149_v51 = vld [vmem:[%s4286_s24 + $0x1908] sm:$0xff]  ;;  %v3696_v54 = vpack.c.bf16 %v1146_v48, %v1144_v46  ;;  %v652_v40 = vld [vmem:[%s4286_s24 + $0x980] sm:$0xff]  ;;  %v659_v46 = vld [vmem:[%s4286_s24 + $0x9b8] sm:$0xff] }
 0x145   : > { %v1171_v48 = vld [vmem:[%s4286_s24 + $0x19b8] sm:$0xff]  ;;  %v324_v33 = vld [vmem:[%s4296_s19 + $0x40] sm:$0xff] }
 0x146   : > { %3165 = vmatpush1.bf16.msra.mxu1 %v3164_v57  ;;  %v638_v57 = vld [vmem:[%s4286_s24 + $0x910] sm:$0xff] }
 0x147   : > { %3677 = vmatpush1.bf16.msra.mxu0 %v3676_v58  ;;  %3167 = vmatprep.subr.bf16.mxu1 %v3166_v59  ;;  %v1148_v58 = vld [vmem:[%s4286_s24 + $0x1900] sm:$0xff]  ;;  %v3698_v59 = vpack.c.bf16 %v1151_v52, %v1149_v51  ;;  %v3188_v1 = vpack.c.bf16 %v638_v57, %v636_v56  ;;  %v3206_v51 = vpack.c.bf16 %v659_v46, %v657_v45  ;;  %v1170_v56 = vld [vmem:[%s4286_s24 + $0x19b0] sm:$0xff]  ;;  %v661_v57 = vld [vmem:[%s4286_s24 + $0x9c8] sm:$0xff] }
 0x148   : > { %3679 = vmatprep.subr.bf16.mxu0 %v3678_v63  ;;  %v1153_v63 = vld [vmem:[%s4286_s24 + $0x1928] sm:$0xff]  ;;  %v3700_v2 = vpack.c.bf16 %v1150_v60, %v1148_v58  ;;  %v656_v52 = vld [vmem:[%s4286_s24 + $0x9a0] sm:$0xff]  ;;  %v663_v58 = vld [vmem:[%s4286_s24 + $0x9d8] sm:$0xff] }
 0x149   : > { %v1175_v60 = vld [vmem:[%s4286_s24 + $0x19d8] sm:$0xff]  ;;  %v1189_v45 = vld [vmem:[%s4286_s24 + $0x1a48] sm:$0xff] }
 0x14a   : > { %3169 = vmatpush1.bf16.msra.mxu1 %v3168_v5  ;;  %v642_v5 = vld [vmem:[%s4286_s24 + $0x930] sm:$0xff]  ;;  %v1191_v46 = vld [vmem:[%s4286_s24 + $0x1a58] sm:$0xff] }
 0x14b   : > { %3681 = vmatpush1.bf16.msra.mxu0 %v3680_v6  ;;  %3171 = vmatprep.subr.bf16.mxu1 %v3170_v7  ;;  %v1152_v6 = vld [vmem:[%s4286_s24 + $0x1920] sm:$0xff]  ;;  %v3702_v7 = vpack.c.bf16 %v1155_v0, %v1153_v63  ;;  %v3192_v13 = vpack.c.bf16 %v642_v5, %v640_v4  ;;  %v3210_v63 = vpack.c.bf16 %v663_v58, %v661_v57  ;;  %v1174_v4 = vld [vmem:[%s4286_s24 + $0x19d0] sm:$0xff]  ;;  %v665_v5 = vld [vmem:[%s4286_s24 + $0x9e8] sm:$0xff] }
 0x14c   : > { %3683 = vmatprep.subr.bf16.mxu0 %v3682_v11  ;;  %v1157_v11 = vld [vmem:[%s4286_s24 + $0x1948] sm:$0xff]  ;;  %v3704_v14 = vpack.c.bf16 %v1154_v8, %v1152_v6  ;;  %v660_v0 = vld [vmem:[%s4286_s24 + $0x9c0] sm:$0xff]  ;;  %v667_v6 = vld [vmem:[%s4286_s24 + $0x9f8] sm:$0xff] }
 0x14d   : > { %v1179_v8 = vld [vmem:[%s4286_s24 + $0x19f8] sm:$0xff]  ;;  %v681_v57 = vld [vmem:[%s4286_s24 + $0xa68] sm:$0xff] }
 0x14e   : > { %3173 = vmatpush1.bf16.msra.mxu1 %v3172_v17  ;;  %v646_v17 = vld [vmem:[%s4286_s24 + $0x950] sm:$0xff]  ;;  %v683_v58 = vld [vmem:[%s4286_s24 + $0xa78] sm:$0xff] }
 0x14f   : > { %3685 = vmatpush1.bf16.msra.mxu0 %v3684_v18  ;;  %3175 = vmatprep.subr.bf16.mxu1 %v3174_v19  ;;  %v1156_v18 = vld [vmem:[%s4286_s24 + $0x1940] sm:$0xff]  ;;  %v3706_v19 = vpack.c.bf16 %v1159_v12, %v1157_v11  ;;  %v3196_v25 = vpack.c.bf16 %v646_v17, %v644_v16  ;;  %v3214_v11 = vpack.c.bf16 %v667_v6, %v665_v5  ;;  %v1178_v16 = vld [vmem:[%s4286_s24 + $0x19f0] sm:$0xff]  ;;  %v669_v17 = vld [vmem:[%s4286_s24 + $0xa08] sm:$0xff] }
 0x150   : > { %3687 = vmatprep.subr.bf16.mxu0 %v3686_v23  ;;  %v1161_v23 = vld [vmem:[%s4286_s24 + $0x1968] sm:$0xff]  ;;  %v3708_v26 = vpack.c.bf16 %v1158_v20, %v1156_v18  ;;  %v664_v12 = vld [vmem:[%s4286_s24 + $0x9e0] sm:$0xff]  ;;  %v671_v18 = vld [vmem:[%s4286_s24 + $0xa18] sm:$0xff] }
 0x151   : > { %v1183_v20 = vld [vmem:[%s4286_s24 + $0x1a18] sm:$0xff]  ;;  %v685_v5 = vld [vmem:[%s4286_s24 + $0xa88] sm:$0xff] }
 0x152   : > { %3177 = vmatpush1.bf16.msra.mxu1 %v3176_v29  ;;  %v650_v29 = vld [vmem:[%s4286_s24 + $0x970] sm:$0xff]  ;;  %v687_v6 = vld [vmem:[%s4286_s24 + $0xa98] sm:$0xff] }
 0x153   : > { %3689 = vmatpush1.bf16.msra.mxu0 %v3688_v30  ;;  %3179 = vmatprep.subr.bf16.mxu1 %v3178_v31  ;;  %v1160_v30 = vld [vmem:[%s4286_s24 + $0x1960] sm:$0xff]  ;;  %v3710_v31 = vpack.c.bf16 %v1163_v24, %v1161_v23  ;;  %v3200_v37 = vpack.c.bf16 %v650_v29, %v648_v28  ;;  %v3218_v23 = vpack.c.bf16 %v671_v18, %v669_v17  ;;  %v1182_v28 = vld [vmem:[%s4286_s24 + $0x1a10] sm:$0xff]  ;;  %v673_v29 = vld [vmem:[%s4286_s24 + $0xa28] sm:$0xff] }
 0x154   : > { %3691 = vmatprep.subr.bf16.mxu0 %v3690_v35  ;;  %v1165_v35 = vld [vmem:[%s4286_s24 + $0x1988] sm:$0xff]  ;;  %v3712_v38 = vpack.c.bf16 %v1162_v32, %v1160_v30  ;;  %v668_v24 = vld [vmem:[%s4286_s24 + $0xa00] sm:$0xff]  ;;  %v675_v30 = vld [vmem:[%s4286_s24 + $0xa38] sm:$0xff] }
 0x155   : > { %v1187_v32 = vld [vmem:[%s4286_s24 + $0x1a38] sm:$0xff]  ;;  %v689_v17 = vld [vmem:[%s4286_s24 + $0xaa8] sm:$0xff] }
 0x156   : > { %3181 = vmatpush1.bf16.msra.mxu1 %v3180_v41  ;;  %v654_v41 = vld [vmem:[%s4286_s24 + $0x990] sm:$0xff]  ;;  %v691_v18 = vld [vmem:[%s4286_s24 + $0xab8] sm:$0xff] }
 0x157   : > { %3693 = vmatpush1.bf16.msra.mxu0 %v3692_v42  ;;  %3183 = vmatprep.subr.bf16.mxu1 %v3182_v43  ;;  %v1164_v42 = vld [vmem:[%s4286_s24 + $0x1980] sm:$0xff]  ;;  %v3714_v43 = vpack.c.bf16 %v1167_v36, %v1165_v35  ;;  %v3204_v49 = vpack.c.bf16 %v654_v41, %v652_v40  ;;  %v340_v35 = vld [vmem:[%s4296_s19 + $0xc0] sm:$0xff] }
 0x158   : > { %3695 = vmatprep.subr.bf16.mxu0 %v3694_v47  ;;  %v1169_v47 = vld [vmem:[%s4286_s24 + $0x19a8] sm:$0xff]  ;;  %v3716_v50 = vpack.c.bf16 %v1166_v44, %v1164_v42  ;;  %v1184_v40 = vld [vmem:[%s4286_s24 + $0x1a20] sm:$0xff]  ;;  %v1186_v42 = vld [vmem:[%s4286_s24 + $0x1a30] sm:$0xff] }
 0x159   : > { %v679_v44 = vld [vmem:[%s4286_s24 + $0xa58] sm:$0xff] }
 0x15a   : > { %3185 = vmatpush1.bf16.msra.mxu1 %v3184_v53  ;;  %v658_v53 = vld [vmem:[%s4286_s24 + $0x9b0] sm:$0xff] }
 0x15b   : > { %3697 = vmatpush1.bf16.msra.mxu0 %v3696_v54  ;;  %3187 = vmatprep.subr.bf16.mxu1 %v3186_v55  ;;  %v1168_v54 = vld [vmem:[%s4286_s24 + $0x19a0] sm:$0xff]  ;;  %v3718_v55 = vpack.c.bf16 %v1171_v48, %v1169_v47  ;;  %v3208_v61 = vpack.c.bf16 %v658_v53, %v656_v52  ;;  %v327_v47 = vld [vmem:[%s4296_s19 + $0x58] sm:$0xff]  ;;  %v678_v53 = vld [vmem:[%s4286_s24 + $0xa50] sm:$0xff] }
 0x15c   : > { %3699 = vmatprep.subr.bf16.mxu0 %v3698_v59  ;;  %v1173_v59 = vld [vmem:[%s4286_s24 + $0x19c8] sm:$0xff]  ;;  %v3720_v62 = vpack.c.bf16 %v1170_v56, %v1168_v54  ;;  %v676_v52 = vld [vmem:[%s4286_s24 + $0xa40] sm:$0xff]  ;;  %v1190_v56 = vld [vmem:[%s4286_s24 + $0x1a50] sm:$0xff] }
 0x15d   : > { %v1188_v54 = vld [vmem:[%s4286_s24 + $0x1a40] sm:$0xff] }
 0x15e   : > { %3189 = vmatpush1.bf16.msra.mxu1 %v3188_v1  ;;  %v662_v1 = vld [vmem:[%s4286_s24 + $0x9d0] sm:$0xff] }
 0x15f   : > { %3701 = vmatpush1.bf16.msra.mxu0 %v3700_v2  ;;  %3191 = vmatprep.subr.bf16.mxu1 %v3190_v3  ;;  %v1172_v2 = vld [vmem:[%s4286_s24 + $0x19c0] sm:$0xff]  ;;  %v3722_v3 = vpack.c.bf16 %v1175_v60, %v1173_v59  ;;  %v3212_v9 = vpack.c.bf16 %v662_v1, %v660_v0  ;;  %v1193_v59 = vld [vmem:[%s4286_s24 + $0x1a68] sm:$0xff]  ;;  %v1195_v60 = vld [vmem:[%s4286_s24 + $0x1a78] sm:$0xff] }
 0x160   : > { %3703 = vmatprep.subr.bf16.mxu0 %v3702_v7  ;;  %v1177_v7 = vld [vmem:[%s4286_s24 + $0x19e8] sm:$0xff]  ;;  %v3724_v10 = vpack.c.bf16 %v1174_v4, %v1172_v2  ;;  %v680_v0 = vld [vmem:[%s4286_s24 + $0xa60] sm:$0xff]  ;;  %v682_v1 = vld [vmem:[%s4286_s24 + $0xa70] sm:$0xff] }
 0x161   : > { %v1192_v2 = vld [vmem:[%s4286_s24 + $0x1a60] sm:$0xff]  ;;  %v1194_v4 = vld [vmem:[%s4286_s24 + $0x1a70] sm:$0xff] }
 0x162   : > { %3193 = vmatpush1.bf16.msra.mxu1 %v3192_v13  ;;  %v666_v13 = vld [vmem:[%s4286_s24 + $0x9f0] sm:$0xff] }
 0x163   : > { %3705 = vmatpush1.bf16.msra.mxu0 %v3704_v14  ;;  %3195 = vmatprep.subr.bf16.mxu1 %v3194_v15  ;;  %v1176_v14 = vld [vmem:[%s4286_s24 + $0x19e0] sm:$0xff]  ;;  %v3726_v15 = vpack.c.bf16 %v1179_v8, %v1177_v7  ;;  %v3216_v21 = vpack.c.bf16 %v666_v13, %v664_v12  ;;  %v1197_v7 = vld [vmem:[%s4286_s24 + $0x1a88] sm:$0xff]  ;;  %v1199_v8 = vld [vmem:[%s4286_s24 + $0x1a98] sm:$0xff] }
 0x164   : > { %3707 = vmatprep.subr.bf16.mxu0 %v3706_v19  ;;  %v1181_v19 = vld [vmem:[%s4286_s24 + $0x1a08] sm:$0xff]  ;;  %v3728_v22 = vpack.c.bf16 %v1178_v16, %v1176_v14  ;;  %v684_v12 = vld [vmem:[%s4286_s24 + $0xa80] sm:$0xff]  ;;  %v686_v13 = vld [vmem:[%s4286_s24 + $0xa90] sm:$0xff] }
 0x165   : > { %v1196_v14 = vld [vmem:[%s4286_s24 + $0x1a80] sm:$0xff]  ;;  %v1198_v16 = vld [vmem:[%s4286_s24 + $0x1a90] sm:$0xff] }
 0x166   : > { %3197 = vmatpush1.bf16.msra.mxu1 %v3196_v25  ;;  %v670_v25 = vld [vmem:[%s4286_s24 + $0xa10] sm:$0xff] }
 0x167   : > { %3709 = vmatpush1.bf16.msra.mxu0 %v3708_v26  ;;  %3199 = vmatprep.subr.bf16.mxu1 %v3198_v27  ;;  %v1180_v26 = vld [vmem:[%s4286_s24 + $0x1a00] sm:$0xff]  ;;  %v3730_v27 = vpack.c.bf16 %v1183_v20, %v1181_v19  ;;  %v3220_v34 = vpack.c.bf16 %v670_v25, %v668_v24  ;;  %v1201_v19 = vld [vmem:[%s4286_s24 + $0x1aa8] sm:$0xff]  ;;  %v1203_v20 = vld [vmem:[%s4286_s24 + $0x1ab8] sm:$0xff] }
 0x168   : > { %3711 = vmatprep.subr.bf16.mxu0 %v3710_v31  ;;  %v1185_v31 = vld [vmem:[%s4286_s24 + $0x1a28] sm:$0xff]  ;;  %v3732_v36 = vpack.c.bf16 %v1182_v28, %v1180_v26  ;;  %v688_v24 = vld [vmem:[%s4286_s24 + $0xaa0] sm:$0xff]  ;;  %v690_v25 = vld [vmem:[%s4286_s24 + $0xab0] sm:$0xff] }
 0x169   : > { %v3734_v41 = vpack.c.bf16 %v1187_v32, %v1185_v31  ;;  %v1200_v26 = vld [vmem:[%s4286_s24 + $0x1aa0] sm:$0xff]  ;;  %v1202_v28 = vld [vmem:[%s4286_s24 + $0x1ab0] sm:$0xff]  ;;  %v1205_v31 = vld [vmem:[%s4286_s24 + $0x1ac8] sm:$0xff] }
 0x16a   : > { %3201 = vmatpush1.bf16.msra.mxu1 %v3200_v37  ;;  %v3222_v37 = vpack.c.bf16 %v675_v30, %v673_v29  ;;  %v693_v29 = vld [vmem:[%s4286_s24 + $0xac8] sm:$0xff]  ;;  %v695_v30 = vld [vmem:[%s4286_s24 + $0xad8] sm:$0xff] }
 0x16b   : > { %3713 = vmatpush1.bf16.msra.mxu0 %v3712_v38  ;;  %3203 = vmatprep.subr.bf16.mxu1 %v3202_v39  ;;  %v672_v38 = vld [vmem:[%s4286_s24 + $0xa20] sm:$0xff]  ;;  %v674_v39 = vld [vmem:[%s4286_s24 + $0xa30] sm:$0xff]  ;;  %v1207_v32 = vld [vmem:[%s4286_s24 + $0x1ad8] sm:$0xff] }
 0x16c   : > { %3715 = vmatprep.subr.bf16.mxu0 %v3714_v43  ;;  %v677_v43 = vld [vmem:[%s4286_s24 + $0xa48] sm:$0xff]  ;;  %v3224_v48 = vpack.c.bf16 %v674_v39, %v672_v38  ;;  %v1204_v38 = vld [vmem:[%s4286_s24 + $0x1ac0] sm:$0xff]  ;;  %v3754_v39 = vpack.c.bf16 %v1207_v32, %v1205_v31 }
 0x16d   : > { %v712_v32 = vld [vmem:[%s4286_s24 + $0xb60] sm:$0xff] }
 0x16e   : > { %3205 = vmatpush1.bf16.msra.mxu1 %v3204_v49  ;;  %v343_v49 = vld [vmem:[%s4296_s19 + $0xd8] sm:$0xff] }
 0x16f   : > { %3717 = vmatpush1.bf16.msra.mxu0 %v3716_v50  ;;  %3207 = vmatprep.subr.bf16.mxu1 %v3206_v51  ;;  %v3736_v50 = vpack.c.bf16 %v1186_v42, %v1184_v40  ;;  %v3226_v51 = vpack.c.bf16 %v679_v44, %v677_v43  ;;  %v1206_v40 = vld [vmem:[%s4286_s24 + $0x1ad0] sm:$0xff]  ;;  %v699_v42 = vld [vmem:[%s4286_s24 + $0xaf8] sm:$0xff]  ;;  %v1209_v43 = vld [vmem:[%s4286_s24 + $0x1ae8] sm:$0xff] }
 0x170   : > { %3719 = vmatprep.subr.bf16.mxu0 %v3718_v55  ;;  %v3738_v55 = vpack.c.bf16 %v1191_v46, %v1189_v45  ;;  %v1211_v44 = vld [vmem:[%s4286_s24 + $0x1af8] sm:$0xff]  ;;  %v3756_v46 = vpack.c.bf16 %v1206_v40, %v1204_v38 }
 0x171   : > { %v719_v38 = vld [vmem:[%s4286_s24 + $0xb98] sm:$0xff] }
 0x172   : > { %3209 = vmatpush1.bf16.msra.mxu1 %v3208_v61  ;;  %v3228_v61 = vpack.c.bf16 %v678_v53, %v676_v52  ;;  %v1210_v52 = vld [vmem:[%s4286_s24 + $0x1af0] sm:$0xff]  ;;  %v701_v53 = vld [vmem:[%s4286_s24 + $0xb08] sm:$0xff]  ;;  %v1231_v40 = vld [vmem:[%s4286_s24 + $0x1b98] sm:$0xff] }
 0x173   : > { %3721 = vmatpush1.bf16.msra.mxu0 %v3720_v62  ;;  %3211 = vmatprep.subr.bf16.mxu1 %v3210_v63  ;;  %v3740_v62 = vpack.c.bf16 %v1190_v56, %v1188_v54  ;;  %v3230_v63 = vpack.c.bf16 %v683_v58, %v681_v57  ;;  %v703_v54 = vld [vmem:[%s4286_s24 + $0xb18] sm:$0xff] }
 0x174   : > { %3723 = vmatprep.subr.bf16.mxu0 %v3722_v3  ;;  %v3742_v3 = vpack.c.bf16 %v1195_v60, %v1193_v59  ;;  %v1215_v56 = vld [vmem:[%s4286_s24 + $0x1b18] sm:$0xff]  ;;  %v3250_v59 = vpack.c.bf16 %v703_v54, %v701_v53  ;;  %v700_v60 = vld [vmem:[%s4286_s24 + $0xb00] sm:$0xff] }
 0x176   : > { %3213 = vmatpush1.bf16.msra.mxu1 %v3212_v9  ;;  %v3232_v9 = vpack.c.bf16 %v682_v1, %v680_v0  ;;  %v1214_v0 = vld [vmem:[%s4286_s24 + $0x1b10] sm:$0xff]  ;;  %v705_v1 = vld [vmem:[%s4286_s24 + $0xb28] sm:$0xff] }
 0x177   : > { %3725 = vmatpush1.bf16.msra.mxu0 %v3724_v10  ;;  %3215 = vmatprep.subr.bf16.mxu1 %v3214_v11  ;;  %v3744_v10 = vpack.c.bf16 %v1194_v4, %v1192_v2  ;;  %v3234_v11 = vpack.c.bf16 %v687_v6, %v685_v5  ;;  %v707_v2 = vld [vmem:[%s4286_s24 + $0xb38] sm:$0xff] }
 0x178   : > { %3727 = vmatprep.subr.bf16.mxu0 %v3726_v15  ;;  %v3746_v15 = vpack.c.bf16 %v1199_v8, %v1197_v7  ;;  %v1219_v4 = vld [vmem:[%s4286_s24 + $0x1b38] sm:$0xff]  ;;  %v3254_v7 = vpack.c.bf16 %v707_v2, %v705_v1  ;;  %v704_v8 = vld [vmem:[%s4286_s24 + $0xb20] sm:$0xff] }
 0x17a   : > { %3217 = vmatpush1.bf16.msra.mxu1 %v3216_v21  ;;  %v3236_v21 = vpack.c.bf16 %v686_v13, %v684_v12  ;;  %v1218_v12 = vld [vmem:[%s4286_s24 + $0x1b30] sm:$0xff]  ;;  %v709_v13 = vld [vmem:[%s4286_s24 + $0xb48] sm:$0xff] }
 0x17b   : > { %3729 = vmatpush1.bf16.msra.mxu0 %v3728_v22  ;;  %3219 = vmatprep.subr.bf16.mxu1 %v3218_v23  ;;  %v3748_v22 = vpack.c.bf16 %v1198_v16, %v1196_v14  ;;  %v3238_v23 = vpack.c.bf16 %v691_v18, %v689_v17  ;;  %v711_v14 = vld [vmem:[%s4286_s24 + $0xb58] sm:$0xff] }
 0x17c   : > { %3731 = vmatprep.subr.bf16.mxu0 %v3730_v27  ;;  %v3750_v27 = vpack.c.bf16 %v1203_v20, %v1201_v19  ;;  %v1223_v16 = vld [vmem:[%s4286_s24 + $0x1b58] sm:$0xff]  ;;  %v3258_v19 = vpack.c.bf16 %v711_v14, %v709_v13  ;;  %v708_v20 = vld [vmem:[%s4286_s24 + $0xb40] sm:$0xff] }
 0x17d   : > { %1721 = vmatmul.mubr.f32.vlgmr.msra.gmra.mrb[0].mxu1 %v324_v33  ;;  %v3240_v33 = vpack.c.bf16 %v690_v25, %v688_v24  ;;  %v1222_v24 = vld [vmem:[%s4286_s24 + $0x1b50] sm:$0xff]  ;;  %v713_v25 = vld [vmem:[%s4286_s24 + $0xb68] sm:$0xff] }
 0x17e   : > { %3221 = vmatpush1.bf16.msra.mxu1 %v3220_v34  ;;  %2289 = vmatmul.mubr.f32.vlgmr.msra.gmra.mrb[0].mxu0 %v340_v35  ;;  %v3752_v34 = vpack.c.bf16 %v1202_v28, %v1200_v26  ;;  %v3242_v35 = vpack.c.bf16 %v695_v30, %v693_v29  ;;  %v715_v26 = vld [vmem:[%s4286_s24 + $0xb78] sm:$0xff] }
 0x17f   : > { %3733 = vmatpush1.bf16.msra.mxu0 %v3732_v36  ;;  %3223 = vmatprep.subr.bf16.mxu1 %v3222_v37  ;;  %v692_v36 = vld [vmem:[%s4286_s24 + $0xac0] sm:$0xff]  ;;  %v694_v37 = vld [vmem:[%s4286_s24 + $0xad0] sm:$0xff]  ;;  %v1227_v28 = vld [vmem:[%s4286_s24 + $0x1b78] sm:$0xff]  ;;  %v3262_v31 = vpack.c.bf16 %v715_v26, %v713_v25 }
 0x180   : > { %3735 = vmatprep.subr.bf16.mxu0 %v3734_v41  ;;  %1791 = vmatprep.mubr.f32.mxu1 %v327_v47  ;;  %v697_v41 = vld [vmem:[%s4286_s24 + $0xae8] sm:$0xff]  ;;  %v3244_v45 = vpack.c.bf16 %v694_v37, %v692_v36  ;;  %v1226_v36 = vld [vmem:[%s4286_s24 + $0x1b70] sm:$0xff] }
 0x181   : > { %2359 = vmatprep.mubr.f32.mxu0 %v343_v49  ;;  %v3246_v47 = vpack.c.bf16 %v699_v42, %v697_v41  ;;  %v698_v49 = vld [vmem:[%s4286_s24 + $0xaf0] sm:$0xff]  ;;  %v717_v37 = vld [vmem:[%s4286_s24 + $0xb88] sm:$0xff] }
 0x182   : > { %3225 = vmatpush1.bf16.msra.mxu1 %v3224_v48  ;;  %v696_v48 = vld [vmem:[%s4286_s24 + $0xae0] sm:$0xff] }
 0x183   : > { %3737 = vmatpush1.bf16.msra.mxu0 %v3736_v50  ;;  %3227 = vmatprep.subr.bf16.mxu1 %v3226_v51  ;;  %v1208_v50 = vld [vmem:[%s4286_s24 + $0x1ae0] sm:$0xff]  ;;  %v3758_v51 = vpack.c.bf16 %v1211_v44, %v1209_v43  ;;  %v3248_v57 = vpack.c.bf16 %v698_v49, %v696_v48  ;;  %v3266_v43 = vpack.c.bf16 %v719_v38, %v717_v37  ;;  %v1230_v48 = vld [vmem:[%s4286_s24 + $0x1b90] sm:$0xff]  ;;  %v721_v49 = vld [vmem:[%s4286_s24 + $0xba8] sm:$0xff] }
 0x184   : > { %3739 = vmatprep.subr.bf16.mxu0 %v3738_v55  ;;  %v1213_v55 = vld [vmem:[%s4286_s24 + $0x1b08] sm:$0xff]  ;;  %v3760_v58 = vpack.c.bf16 %v1210_v52, %v1208_v50  ;;  %v716_v44 = vld [vmem:[%s4286_s24 + $0xb80] sm:$0xff]  ;;  %v723_v50 = vld [vmem:[%s4286_s24 + $0xbb8] sm:$0xff] }
 0x185   : > { %v1235_v52 = vld [vmem:[%s4286_s24 + $0x1bb8] sm:$0xff]  ;;  %v326_v37 = vld [vmem:[%s4296_s19 + $0x50] sm:$0xff] }
 0x186   : > { %3229 = vmatpush1.bf16.msra.mxu1 %v3228_v61  ;;  %v702_v61 = vld [vmem:[%s4286_s24 + $0xb10] sm:$0xff] }
 0x187   : > { %3741 = vmatpush1.bf16.msra.mxu0 %v3740_v62  ;;  %3231 = vmatprep.subr.bf16.mxu1 %v3230_v63  ;;  %v1212_v62 = vld [vmem:[%s4286_s24 + $0x1b00] sm:$0xff]  ;;  %v3762_v63 = vpack.c.bf16 %v1215_v56, %v1213_v55  ;;  %v3252_v5 = vpack.c.bf16 %v702_v61, %v700_v60  ;;  %v3270_v55 = vpack.c.bf16 %v723_v50, %v721_v49  ;;  %v1234_v60 = vld [vmem:[%s4286_s24 + $0x1bb0] sm:$0xff]  ;;  %v725_v61 = vld [vmem:[%s4286_s24 + $0xbc8] sm:$0xff] }
 0x188   : > { %3743 = vmatprep.subr.bf16.mxu0 %v3742_v3  ;;  %v1217_v3 = vld [vmem:[%s4286_s24 + $0x1b28] sm:$0xff]  ;;  %v3764_v6 = vpack.c.bf16 %v1214_v0, %v1212_v62  ;;  %v720_v56 = vld [vmem:[%s4286_s24 + $0xba0] sm:$0xff]  ;;  %v727_v62 = vld [vmem:[%s4286_s24 + $0xbd8] sm:$0xff] }
 0x189   : > { %v1239_v0 = vld [vmem:[%s4286_s24 + $0x1bd8] sm:$0xff]  ;;  %v1253_v49 = vld [vmem:[%s4286_s24 + $0x1c48] sm:$0xff] }
 0x18a   : > { %3233 = vmatpush1.bf16.msra.mxu1 %v3232_v9  ;;  %v706_v9 = vld [vmem:[%s4286_s24 + $0xb30] sm:$0xff]  ;;  %v1255_v50 = vld [vmem:[%s4286_s24 + $0x1c58] sm:$0xff] }
 0x18b   : > { %3745 = vmatpush1.bf16.msra.mxu0 %v3744_v10  ;;  %3235 = vmatprep.subr.bf16.mxu1 %v3234_v11  ;;  %v1216_v10 = vld [vmem:[%s4286_s24 + $0x1b20] sm:$0xff]  ;;  %v3766_v11 = vpack.c.bf16 %v1219_v4, %v1217_v3  ;;  %v3256_v17 = vpack.c.bf16 %v706_v9, %v704_v8  ;;  %v3274_v3 = vpack.c.bf16 %v727_v62, %v725_v61  ;;  %v1238_v8 = vld [vmem:[%s4286_s24 + $0x1bd0] sm:$0xff]  ;;  %v729_v9 = vld [vmem:[%s4286_s24 + $0xbe8] sm:$0xff] }
 0x18c   : > { %3747 = vmatprep.subr.bf16.mxu0 %v3746_v15  ;;  %v1221_v15 = vld [vmem:[%s4286_s24 + $0x1b48] sm:$0xff]  ;;  %v3768_v18 = vpack.c.bf16 %v1218_v12, %v1216_v10  ;;  %v724_v4 = vld [vmem:[%s4286_s24 + $0xbc0] sm:$0xff]  ;;  %v731_v10 = vld [vmem:[%s4286_s24 + $0xbf8] sm:$0xff] }
 0x18d   : > { %v1243_v12 = vld [vmem:[%s4286_s24 + $0x1bf8] sm:$0xff]  ;;  %v745_v61 = vld [vmem:[%s4286_s24 + $0xc68] sm:$0xff] }
 0x18e   : > { %3237 = vmatpush1.bf16.msra.mxu1 %v3236_v21  ;;  %v710_v21 = vld [vmem:[%s4286_s24 + $0xb50] sm:$0xff]  ;;  %v747_v62 = vld [vmem:[%s4286_s24 + $0xc78] sm:$0xff] }
 0x18f   : > { %3749 = vmatpush1.bf16.msra.mxu0 %v3748_v22  ;;  %3239 = vmatprep.subr.bf16.mxu1 %v3238_v23  ;;  %v1220_v22 = vld [vmem:[%s4286_s24 + $0x1b40] sm:$0xff]  ;;  %v3770_v23 = vpack.c.bf16 %v1223_v16, %v1221_v15  ;;  %v3260_v29 = vpack.c.bf16 %v710_v21, %v708_v20  ;;  %v3278_v15 = vpack.c.bf16 %v731_v10, %v729_v9  ;;  %v1242_v20 = vld [vmem:[%s4286_s24 + $0x1bf0] sm:$0xff]  ;;  %v733_v21 = vld [vmem:[%s4286_s24 + $0xc08] sm:$0xff] }
 0x190   : > { %3751 = vmatprep.subr.bf16.mxu0 %v3750_v27  ;;  %v1225_v27 = vld [vmem:[%s4286_s24 + $0x1b68] sm:$0xff]  ;;  %v3772_v30 = vpack.c.bf16 %v1222_v24, %v1220_v22  ;;  %v728_v16 = vld [vmem:[%s4286_s24 + $0xbe0] sm:$0xff]  ;;  %v735_v22 = vld [vmem:[%s4286_s24 + $0xc18] sm:$0xff] }
 0x191   : > { %v1247_v24 = vld [vmem:[%s4286_s24 + $0x1c18] sm:$0xff]  ;;  %v749_v9 = vld [vmem:[%s4286_s24 + $0xc88] sm:$0xff] }
 0x192   : > { %3241 = vmatpush1.bf16.msra.mxu1 %v3240_v33  ;;  %v714_v33 = vld [vmem:[%s4286_s24 + $0xb70] sm:$0xff]  ;;  %v751_v10 = vld [vmem:[%s4286_s24 + $0xc98] sm:$0xff] }
 0x193   : > { %3753 = vmatpush1.bf16.msra.mxu0 %v3752_v34  ;;  %3243 = vmatprep.subr.bf16.mxu1 %v3242_v35  ;;  %v1224_v34 = vld [vmem:[%s4286_s24 + $0x1b60] sm:$0xff]  ;;  %v3774_v35 = vpack.c.bf16 %v1227_v28, %v1225_v27  ;;  %v3264_v41 = vpack.c.bf16 %v714_v33, %v712_v32  ;;  %v3282_v27 = vpack.c.bf16 %v735_v22, %v733_v21  ;;  %v1246_v32 = vld [vmem:[%s4286_s24 + $0x1c10] sm:$0xff]  ;;  %v737_v33 = vld [vmem:[%s4286_s24 + $0xc28] sm:$0xff] }
 0x194   : > { %3755 = vmatprep.subr.bf16.mxu0 %v3754_v39  ;;  %v1229_v39 = vld [vmem:[%s4286_s24 + $0x1b88] sm:$0xff]  ;;  %v3776_v42 = vpack.c.bf16 %v1226_v36, %v1224_v34  ;;  %v732_v28 = vld [vmem:[%s4286_s24 + $0xc00] sm:$0xff]  ;;  %v739_v34 = vld [vmem:[%s4286_s24 + $0xc38] sm:$0xff] }
 0x195   : > { %v1251_v36 = vld [vmem:[%s4286_s24 + $0x1c38] sm:$0xff]  ;;  %v753_v21 = vld [vmem:[%s4286_s24 + $0xca8] sm:$0xff] }
 0x196   : > { %3245 = vmatpush1.bf16.msra.mxu1 %v3244_v45  ;;  %v718_v45 = vld [vmem:[%s4286_s24 + $0xb90] sm:$0xff]  ;;  %v755_v22 = vld [vmem:[%s4286_s24 + $0xcb8] sm:$0xff] }
 0x197   : > { %3757 = vmatpush1.bf16.msra.mxu0 %v3756_v46  ;;  %3247 = vmatprep.subr.bf16.mxu1 %v3246_v47  ;;  %v1228_v46 = vld [vmem:[%s4286_s24 + $0x1b80] sm:$0xff]  ;;  %v3778_v47 = vpack.c.bf16 %v1231_v40, %v1229_v39  ;;  %v3268_v53 = vpack.c.bf16 %v718_v45, %v716_v44 }
 0x198   : > { %3759 = vmatprep.subr.bf16.mxu0 %v3758_v51  ;;  %v1233_v51 = vld [vmem:[%s4286_s24 + $0x1ba8] sm:$0xff]  ;;  %v3780_v54 = vpack.c.bf16 %v1230_v48, %v1228_v46  ;;  %v342_v39 = vld [vmem:[%s4296_s19 + $0xd0] sm:$0xff]  ;;  %v1250_v46 = vld [vmem:[%s4286_s24 + $0x1c30] sm:$0xff] }
 0x199   : > { %v1248_v44 = vld [vmem:[%s4286_s24 + $0x1c20] sm:$0xff]  ;;  %v743_v48 = vld [vmem:[%s4286_s24 + $0xc58] sm:$0xff] }
 0x19a   : > { %3249 = vmatpush1.bf16.msra.mxu1 %v3248_v57  ;;  %v722_v57 = vld [vmem:[%s4286_s24 + $0xbb0] sm:$0xff] }
 0x19b   : > { %3761 = vmatpush1.bf16.msra.mxu0 %v3760_v58  ;;  %3251 = vmatprep.subr.bf16.mxu1 %v3250_v59  ;;  %v1232_v58 = vld [vmem:[%s4286_s24 + $0x1ba0] sm:$0xff]  ;;  %v3782_v59 = vpack.c.bf16 %v1235_v52, %v1233_v51  ;;  %v3272_v1 = vpack.c.bf16 %v722_v57, %v720_v56  ;;  %v329_v51 = vld [vmem:[%s4296_s19 + $0x68] sm:$0xff]  ;;  %v742_v57 = vld [vmem:[%s4286_s24 + $0xc50] sm:$0xff] }
 0x19c   : > { %3763 = vmatprep.subr.bf16.mxu0 %v3762_v63  ;;  %v1237_v63 = vld [vmem:[%s4286_s24 + $0x1bc8] sm:$0xff]  ;;  %v3784_v2 = vpack.c.bf16 %v1234_v60, %v1232_v58  ;;  %v740_v56 = vld [vmem:[%s4286_s24 + $0xc40] sm:$0xff]  ;;  %v1254_v60 = vld [vmem:[%s4286_s24 + $0x1c50] sm:$0xff] }
 0x19d   : > { %v1252_v58 = vld [vmem:[%s4286_s24 + $0x1c40] sm:$0xff] }
 0x19e   : > { %3253 = vmatpush1.bf16.msra.mxu1 %v3252_v5  ;;  %v726_v5 = vld [vmem:[%s4286_s24 + $0xbd0] sm:$0xff] }
 0x19f   : > { %3765 = vmatpush1.bf16.msra.mxu0 %v3764_v6  ;;  %3255 = vmatprep.subr.bf16.mxu1 %v3254_v7  ;;  %v1236_v6 = vld [vmem:[%s4286_s24 + $0x1bc0] sm:$0xff]  ;;  %v3786_v7 = vpack.c.bf16 %v1239_v0, %v1237_v63  ;;  %v3276_v13 = vpack.c.bf16 %v726_v5, %v724_v4  ;;  %v1257_v63 = vld [vmem:[%s4286_s24 + $0x1c68] sm:$0xff]  ;;  %v1259_v0 = vld [vmem:[%s4286_s24 + $0x1c78] sm:$0xff] }
 0x1a0   : > { %3767 = vmatprep.subr.bf16.mxu0 %v3766_v11  ;;  %v1241_v11 = vld [vmem:[%s4286_s24 + $0x1be8] sm:$0xff]  ;;  %v3788_v14 = vpack.c.bf16 %v1238_v8, %v1236_v6  ;;  %v744_v4 = vld [vmem:[%s4286_s24 + $0xc60] sm:$0xff]  ;;  %v746_v5 = vld [vmem:[%s4286_s24 + $0xc70] sm:$0xff] }
 0x1a1   : > { %v1256_v6 = vld [vmem:[%s4286_s24 + $0x1c60] sm:$0xff]  ;;  %v1258_v8 = vld [vmem:[%s4286_s24 + $0x1c70] sm:$0xff] }
 0x1a2   : > { %3257 = vmatpush1.bf16.msra.mxu1 %v3256_v17  ;;  %v730_v17 = vld [vmem:[%s4286_s24 + $0xbf0] sm:$0xff] }
 0x1a3   : > { %3769 = vmatpush1.bf16.msra.mxu0 %v3768_v18  ;;  %3259 = vmatprep.subr.bf16.mxu1 %v3258_v19  ;;  %v1240_v18 = vld [vmem:[%s4286_s24 + $0x1be0] sm:$0xff]  ;;  %v3790_v19 = vpack.c.bf16 %v1243_v12, %v1241_v11  ;;  %v3280_v25 = vpack.c.bf16 %v730_v17, %v728_v16  ;;  %v1261_v11 = vld [vmem:[%s4286_s24 + $0x1c88] sm:$0xff]  ;;  %v1263_v12 = vld [vmem:[%s4286_s24 + $0x1c98] sm:$0xff] }
 0x1a4   : > { %3771 = vmatprep.subr.bf16.mxu0 %v3770_v23  ;;  %v1245_v23 = vld [vmem:[%s4286_s24 + $0x1c08] sm:$0xff]  ;;  %v3792_v26 = vpack.c.bf16 %v1242_v20, %v1240_v18  ;;  %v748_v16 = vld [vmem:[%s4286_s24 + $0xc80] sm:$0xff]  ;;  %v750_v17 = vld [vmem:[%s4286_s24 + $0xc90] sm:$0xff] }
 0x1a5   : > { %v1260_v18 = vld [vmem:[%s4286_s24 + $0x1c80] sm:$0xff]  ;;  %v1262_v20 = vld [vmem:[%s4286_s24 + $0x1c90] sm:$0xff] }
 0x1a6   : > { %3261 = vmatpush1.bf16.msra.mxu1 %v3260_v29  ;;  %v734_v29 = vld [vmem:[%s4286_s24 + $0xc10] sm:$0xff] }
 0x1a7   : > { %3773 = vmatpush1.bf16.msra.mxu0 %v3772_v30  ;;  %3263 = vmatprep.subr.bf16.mxu1 %v3262_v31  ;;  %v1244_v30 = vld [vmem:[%s4286_s24 + $0x1c00] sm:$0xff]  ;;  %v3794_v31 = vpack.c.bf16 %v1247_v24, %v1245_v23  ;;  %v3284_v38 = vpack.c.bf16 %v734_v29, %v732_v28  ;;  %v1265_v23 = vld [vmem:[%s4286_s24 + $0x1ca8] sm:$0xff]  ;;  %v1267_v24 = vld [vmem:[%s4286_s24 + $0x1cb8] sm:$0xff] }
 0x1a8   : > { %3775 = vmatprep.subr.bf16.mxu0 %v3774_v35  ;;  %v1249_v35 = vld [vmem:[%s4286_s24 + $0x1c28] sm:$0xff]  ;;  %v3796_v40 = vpack.c.bf16 %v1246_v32, %v1244_v30  ;;  %v752_v28 = vld [vmem:[%s4286_s24 + $0xca0] sm:$0xff]  ;;  %v754_v29 = vld [vmem:[%s4286_s24 + $0xcb0] sm:$0xff] }
 0x1a9   : > { %v3798_v45 = vpack.c.bf16 %v1251_v36, %v1249_v35  ;;  %v1264_v30 = vld [vmem:[%s4286_s24 + $0x1ca0] sm:$0xff]  ;;  %v1266_v32 = vld [vmem:[%s4286_s24 + $0x1cb0] sm:$0xff]  ;;  %v1269_v35 = vld [vmem:[%s4286_s24 + $0x1cc8] sm:$0xff] }
 0x1aa   : > { %3265 = vmatpush1.bf16.msra.mxu1 %v3264_v41  ;;  %v3286_v41 = vpack.c.bf16 %v739_v34, %v737_v33  ;;  %v757_v33 = vld [vmem:[%s4286_s24 + $0xcc8] sm:$0xff]  ;;  %v759_v34 = vld [vmem:[%s4286_s24 + $0xcd8] sm:$0xff] }
 0x1ab   : > { %3777 = vmatpush1.bf16.msra.mxu0 %v3776_v42  ;;  %3267 = vmatprep.subr.bf16.mxu1 %v3266_v43  ;;  %v736_v42 = vld [vmem:[%s4286_s24 + $0xc20] sm:$0xff]  ;;  %v738_v43 = vld [vmem:[%s4286_s24 + $0xc30] sm:$0xff]  ;;  %v1271_v36 = vld [vmem:[%s4286_s24 + $0x1cd8] sm:$0xff] }
 0x1ac   : > { %3779 = vmatprep.subr.bf16.mxu0 %v3778_v47  ;;  %v741_v47 = vld [vmem:[%s4286_s24 + $0xc48] sm:$0xff]  ;;  %v3288_v52 = vpack.c.bf16 %v738_v43, %v736_v42  ;;  %v1268_v42 = vld [vmem:[%s4286_s24 + $0x1cc0] sm:$0xff]  ;;  %v3818_v43 = vpack.c.bf16 %v1271_v36, %v1269_v35 }
 0x1ad   : > { %v776_v36 = vld [vmem:[%s4286_s24 + $0xd60] sm:$0xff] }
 0x1ae   : > { %3269 = vmatpush1.bf16.msra.mxu1 %v3268_v53  ;;  %v345_v53 = vld [vmem:[%s4296_s19 + $0xe8] sm:$0xff] }
 0x1af   : > { %3781 = vmatpush1.bf16.msra.mxu0 %v3780_v54  ;;  %3271 = vmatprep.subr.bf16.mxu1 %v3270_v55  ;;  %v3800_v54 = vpack.c.bf16 %v1250_v46, %v1248_v44  ;;  %v3290_v55 = vpack.c.bf16 %v743_v48, %v741_v47  ;;  %v1270_v44 = vld [vmem:[%s4286_s24 + $0x1cd0] sm:$0xff]  ;;  %v763_v46 = vld [vmem:[%s4286_s24 + $0xcf8] sm:$0xff]  ;;  %v1273_v47 = vld [vmem:[%s4286_s24 + $0x1ce8] sm:$0xff] }
 0x1b0   : > { %3783 = vmatprep.subr.bf16.mxu0 %v3782_v59  ;;  %v3802_v59 = vpack.c.bf16 %v1255_v50, %v1253_v49  ;;  %v1275_v48 = vld [vmem:[%s4286_s24 + $0x1cf8] sm:$0xff]  ;;  %v3820_v50 = vpack.c.bf16 %v1270_v44, %v1268_v42 }
 0x1b1   : > { %v783_v42 = vld [vmem:[%s4286_s24 + $0xd98] sm:$0xff] }
 0x1b2   : > { %3273 = vmatpush1.bf16.msra.mxu1 %v3272_v1  ;;  %v3292_v1 = vpack.c.bf16 %v742_v57, %v740_v56  ;;  %v1274_v56 = vld [vmem:[%s4286_s24 + $0x1cf0] sm:$0xff]  ;;  %v765_v57 = vld [vmem:[%s4286_s24 + $0xd08] sm:$0xff]  ;;  %v1295_v44 = vld [vmem:[%s4286_s24 + $0x1d98] sm:$0xff] }
 0x1b3   : > { %3785 = vmatpush1.bf16.msra.mxu0 %v3784_v2  ;;  %3275 = vmatprep.subr.bf16.mxu1 %v3274_v3  ;;  %v3804_v2 = vpack.c.bf16 %v1254_v60, %v1252_v58  ;;  %v3294_v3 = vpack.c.bf16 %v747_v62, %v745_v61  ;;  %v767_v58 = vld [vmem:[%s4286_s24 + $0xd18] sm:$0xff] }
 0x1b4   : > { %3787 = vmatprep.subr.bf16.mxu0 %v3786_v7  ;;  %v3806_v7 = vpack.c.bf16 %v1259_v0, %v1257_v63  ;;  %v1279_v60 = vld [vmem:[%s4286_s24 + $0x1d18] sm:$0xff]  ;;  %v3314_v63 = vpack.c.bf16 %v767_v58, %v765_v57  ;;  %v764_v0 = vld [vmem:[%s4286_s24 + $0xd00] sm:$0xff] }
 0x1b6   : > { %3277 = vmatpush1.bf16.msra.mxu1 %v3276_v13  ;;  %v3296_v13 = vpack.c.bf16 %v746_v5, %v744_v4  ;;  %v1278_v4 = vld [vmem:[%s4286_s24 + $0x1d10] sm:$0xff]  ;;  %v769_v5 = vld [vmem:[%s4286_s24 + $0xd28] sm:$0xff] }
 0x1b7   : > { %3789 = vmatpush1.bf16.msra.mxu0 %v3788_v14  ;;  %3279 = vmatprep.subr.bf16.mxu1 %v3278_v15  ;;  %v3808_v14 = vpack.c.bf16 %v1258_v8, %v1256_v6  ;;  %v3298_v15 = vpack.c.bf16 %v751_v10, %v749_v9  ;;  %v771_v6 = vld [vmem:[%s4286_s24 + $0xd38] sm:$0xff] }
 0x1b8   : > { %3791 = vmatprep.subr.bf16.mxu0 %v3790_v19  ;;  %v3810_v19 = vpack.c.bf16 %v1263_v12, %v1261_v11  ;;  %v1283_v8 = vld [vmem:[%s4286_s24 + $0x1d38] sm:$0xff]  ;;  %v3318_v11 = vpack.c.bf16 %v771_v6, %v769_v5  ;;  %v768_v12 = vld [vmem:[%s4286_s24 + $0xd20] sm:$0xff] }
 0x1ba   : > { %3281 = vmatpush1.bf16.msra.mxu1 %v3280_v25  ;;  %v3300_v25 = vpack.c.bf16 %v750_v17, %v748_v16  ;;  %v1282_v16 = vld [vmem:[%s4286_s24 + $0x1d30] sm:$0xff]  ;;  %v773_v17 = vld [vmem:[%s4286_s24 + $0xd48] sm:$0xff] }
 0x1bb   : > { %3793 = vmatpush1.bf16.msra.mxu0 %v3792_v26  ;;  %3283 = vmatprep.subr.bf16.mxu1 %v3282_v27  ;;  %v3812_v26 = vpack.c.bf16 %v1262_v20, %v1260_v18  ;;  %v3302_v27 = vpack.c.bf16 %v755_v22, %v753_v21  ;;  %v775_v18 = vld [vmem:[%s4286_s24 + $0xd58] sm:$0xff] }
 0x1bc   : > { %3795 = vmatprep.subr.bf16.mxu0 %v3794_v31  ;;  %v3814_v31 = vpack.c.bf16 %v1267_v24, %v1265_v23  ;;  %v1287_v20 = vld [vmem:[%s4286_s24 + $0x1d58] sm:$0xff]  ;;  %v3322_v23 = vpack.c.bf16 %v775_v18, %v773_v17  ;;  %v772_v24 = vld [vmem:[%s4286_s24 + $0xd40] sm:$0xff] }
 0x1bd   : > { %1792 = vmatmul.mubr.f32.vlgmr.msra.gmra.mrb[0].mxu1 %v326_v37  ;;  %v3304_v37 = vpack.c.bf16 %v754_v29, %v752_v28  ;;  %v1286_v28 = vld [vmem:[%s4286_s24 + $0x1d50] sm:$0xff]  ;;  %v777_v29 = vld [vmem:[%s4286_s24 + $0xd68] sm:$0xff] }
 0x1be   : > { %3285 = vmatpush1.bf16.msra.mxu1 %v3284_v38  ;;  %2360 = vmatmul.mubr.f32.vlgmr.msra.gmra.mrb[0].mxu0 %v342_v39  ;;  %v3816_v38 = vpack.c.bf16 %v1266_v32, %v1264_v30  ;;  %v3306_v39 = vpack.c.bf16 %v759_v34, %v757_v33  ;;  %v779_v30 = vld [vmem:[%s4286_s24 + $0xd78] sm:$0xff] }
 0x1bf   : > { %3797 = vmatpush1.bf16.msra.mxu0 %v3796_v40  ;;  %3287 = vmatprep.subr.bf16.mxu1 %v3286_v41  ;;  %v756_v40 = vld [vmem:[%s4286_s24 + $0xcc0] sm:$0xff]  ;;  %v758_v41 = vld [vmem:[%s4286_s24 + $0xcd0] sm:$0xff]  ;;  %v1291_v32 = vld [vmem:[%s4286_s24 + $0x1d78] sm:$0xff]  ;;  %v3326_v35 = vpack.c.bf16 %v779_v30, %v777_v29 }
 0x1c0   : > { %3799 = vmatprep.subr.bf16.mxu0 %v3798_v45  ;;  %1862 = vmatprep.mubr.f32.mxu1 %v329_v51  ;;  %v761_v45 = vld [vmem:[%s4286_s24 + $0xce8] sm:$0xff]  ;;  %v3308_v49 = vpack.c.bf16 %v758_v41, %v756_v40  ;;  %v1290_v40 = vld [vmem:[%s4286_s24 + $0x1d70] sm:$0xff] }
 0x1c1   : > { %2430 = vmatprep.mubr.f32.mxu0 %v345_v53  ;;  %v3310_v51 = vpack.c.bf16 %v763_v46, %v761_v45  ;;  %v762_v53 = vld [vmem:[%s4286_s24 + $0xcf0] sm:$0xff]  ;;  %v781_v41 = vld [vmem:[%s4286_s24 + $0xd88] sm:$0xff] }
 0x1c2   : > { %3289 = vmatpush1.bf16.msra.mxu1 %v3288_v52  ;;  %v760_v52 = vld [vmem:[%s4286_s24 + $0xce0] sm:$0xff] }
 0x1c3   : > { %3801 = vmatpush1.bf16.msra.mxu0 %v3800_v54  ;;  %3291 = vmatprep.subr.bf16.mxu1 %v3290_v55  ;;  %v1272_v54 = vld [vmem:[%s4286_s24 + $0x1ce0] sm:$0xff]  ;;  %v3822_v55 = vpack.c.bf16 %v1275_v48, %v1273_v47  ;;  %v3312_v61 = vpack.c.bf16 %v762_v53, %v760_v52  ;;  %v3330_v47 = vpack.c.bf16 %v783_v42, %v781_v41  ;;  %v1294_v52 = vld [vmem:[%s4286_s24 + $0x1d90] sm:$0xff]  ;;  %v785_v53 = vld [vmem:[%s4286_s24 + $0xda8] sm:$0xff] }
 0x1c4   : > { %3803 = vmatprep.subr.bf16.mxu0 %v3802_v59  ;;  %v1277_v59 = vld [vmem:[%s4286_s24 + $0x1d08] sm:$0xff]  ;;  %v3824_v62 = vpack.c.bf16 %v1274_v56, %v1272_v54  ;;  %v780_v48 = vld [vmem:[%s4286_s24 + $0xd80] sm:$0xff]  ;;  %v787_v54 = vld [vmem:[%s4286_s24 + $0xdb8] sm:$0xff] }
 0x1c5   : > { %v1299_v56 = vld [vmem:[%s4286_s24 + $0x1db8] sm:$0xff]  ;;  %v328_v41 = vld [vmem:[%s4296_s19 + $0x60] sm:$0xff] }
 0x1c6   : > { %3293 = vmatpush1.bf16.msra.mxu1 %v3292_v1  ;;  %v766_v1 = vld [vmem:[%s4286_s24 + $0xd10] sm:$0xff] }
 0x1c7   : > { %3805 = vmatpush1.bf16.msra.mxu0 %v3804_v2  ;;  %3295 = vmatprep.subr.bf16.mxu1 %v3294_v3  ;;  %v1276_v2 = vld [vmem:[%s4286_s24 + $0x1d00] sm:$0xff]  ;;  %v3826_v3 = vpack.c.bf16 %v1279_v60, %v1277_v59  ;;  %v3316_v9 = vpack.c.bf16 %v766_v1, %v764_v0  ;;  %v3334_v59 = vpack.c.bf16 %v787_v54, %v785_v53  ;;  %v1298_v0 = vld [vmem:[%s4286_s24 + $0x1db0] sm:$0xff]  ;;  %v789_v1 = vld [vmem:[%s4286_s24 + $0xdc8] sm:$0xff] }
 0x1c8   : > { %3807 = vmatprep.subr.bf16.mxu0 %v3806_v7  ;;  %v1281_v7 = vld [vmem:[%s4286_s24 + $0x1d28] sm:$0xff]  ;;  %v3828_v10 = vpack.c.bf16 %v1278_v4, %v1276_v2  ;;  %v784_v60 = vld [vmem:[%s4286_s24 + $0xda0] sm:$0xff]  ;;  %v791_v2 = vld [vmem:[%s4286_s24 + $0xdd8] sm:$0xff] }
 0x1c9   : > { %v1303_v4 = vld [vmem:[%s4286_s24 + $0x1dd8] sm:$0xff]  ;;  %v1317_v53 = vld [vmem:[%s4286_s24 + $0x1e48] sm:$0xff] }
 0x1ca   : > { %3297 = vmatpush1.bf16.msra.mxu1 %v3296_v13  ;;  %v770_v13 = vld [vmem:[%s4286_s24 + $0xd30] sm:$0xff]  ;;  %v1319_v54 = vld [vmem:[%s4286_s24 + $0x1e58] sm:$0xff] }
 0x1cb   : > { %3809 = vmatpush1.bf16.msra.mxu0 %v3808_v14  ;;  %3299 = vmatprep.subr.bf16.mxu1 %v3298_v15  ;;  %v1280_v14 = vld [vmem:[%s4286_s24 + $0x1d20] sm:$0xff]  ;;  %v3830_v15 = vpack.c.bf16 %v1283_v8, %v1281_v7  ;;  %v3320_v21 = vpack.c.bf16 %v770_v13, %v768_v12  ;;  %v3338_v7 = vpack.c.bf16 %v791_v2, %v789_v1  ;;  %v1302_v12 = vld [vmem:[%s4286_s24 + $0x1dd0] sm:$0xff]  ;;  %v793_v13 = vld [vmem:[%s4286_s24 + $0xde8] sm:$0xff] }
 0x1cc   : > { %3811 = vmatprep.subr.bf16.mxu0 %v3810_v19  ;;  %v1285_v19 = vld [vmem:[%s4286_s24 + $0x1d48] sm:$0xff]  ;;  %v3832_v22 = vpack.c.bf16 %v1282_v16, %v1280_v14  ;;  %v788_v8 = vld [vmem:[%s4286_s24 + $0xdc0] sm:$0xff]  ;;  %v795_v14 = vld [vmem:[%s4286_s24 + $0xdf8] sm:$0xff] }
 0x1cd   : > { %v1307_v16 = vld [vmem:[%s4286_s24 + $0x1df8] sm:$0xff]  ;;  %v809_v1 = vld [vmem:[%s4286_s24 + $0xe68] sm:$0xff] }
 0x1ce   : > { %3301 = vmatpush1.bf16.msra.mxu1 %v3300_v25  ;;  %v774_v25 = vld [vmem:[%s4286_s24 + $0xd50] sm:$0xff]  ;;  %v811_v2 = vld [vmem:[%s4286_s24 + $0xe78] sm:$0xff] }
 0x1cf   : > { %3813 = vmatpush1.bf16.msra.mxu0 %v3812_v26  ;;  %3303 = vmatprep.subr.bf16.mxu1 %v3302_v27  ;;  %v1284_v26 = vld [vmem:[%s4286_s24 + $0x1d40] sm:$0xff]  ;;  %v3834_v27 = vpack.c.bf16 %v1287_v20, %v1285_v19  ;;  %v3324_v33 = vpack.c.bf16 %v774_v25, %v772_v24  ;;  %v3342_v19 = vpack.c.bf16 %v795_v14, %v793_v13  ;;  %v1306_v24 = vld [vmem:[%s4286_s24 + $0x1df0] sm:$0xff]  ;;  %v797_v25 = vld [vmem:[%s4286_s24 + $0xe08] sm:$0xff] }
 0x1d0   : > { %3815 = vmatprep.subr.bf16.mxu0 %v3814_v31  ;;  %v1289_v31 = vld [vmem:[%s4286_s24 + $0x1d68] sm:$0xff]  ;;  %v3836_v34 = vpack.c.bf16 %v1286_v28, %v1284_v26  ;;  %v792_v20 = vld [vmem:[%s4286_s24 + $0xde0] sm:$0xff]  ;;  %v799_v26 = vld [vmem:[%s4286_s24 + $0xe18] sm:$0xff] }
 0x1d1   : > { %v1311_v28 = vld [vmem:[%s4286_s24 + $0x1e18] sm:$0xff]  ;;  %v813_v13 = vld [vmem:[%s4286_s24 + $0xe88] sm:$0xff] }
 0x1d2   : > { %3305 = vmatpush1.bf16.msra.mxu1 %v3304_v37  ;;  %v778_v37 = vld [vmem:[%s4286_s24 + $0xd70] sm:$0xff]  ;;  %v815_v14 = vld [vmem:[%s4286_s24 + $0xe98] sm:$0xff] }
 0x1d3   : > { %3817 = vmatpush1.bf16.msra.mxu0 %v3816_v38  ;;  %3307 = vmatprep.subr.bf16.mxu1 %v3306_v39  ;;  %v1288_v38 = vld [vmem:[%s4286_s24 + $0x1d60] sm:$0xff]  ;;  %v3838_v39 = vpack.c.bf16 %v1291_v32, %v1289_v31  ;;  %v3328_v45 = vpack.c.bf16 %v778_v37, %v776_v36  ;;  %v3346_v31 = vpack.c.bf16 %v799_v26, %v797_v25  ;;  %v1310_v36 = vld [vmem:[%s4286_s24 + $0x1e10] sm:$0xff]  ;;  %v801_v37 = vld [vmem:[%s4286_s24 + $0xe28] sm:$0xff] }
 0x1d4   : > { %3819 = vmatprep.subr.bf16.mxu0 %v3818_v43  ;;  %v1293_v43 = vld [vmem:[%s4286_s24 + $0x1d88] sm:$0xff]  ;;  %v3840_v46 = vpack.c.bf16 %v1290_v40, %v1288_v38  ;;  %v796_v32 = vld [vmem:[%s4286_s24 + $0xe00] sm:$0xff]  ;;  %v803_v38 = vld [vmem:[%s4286_s24 + $0xe38] sm:$0xff] }
 0x1d5   : > { %v1315_v40 = vld [vmem:[%s4286_s24 + $0x1e38] sm:$0xff]  ;;  %v817_v25 = vld [vmem:[%s4286_s24 + $0xea8] sm:$0xff] }
 0x1d6   : > { %3309 = vmatpush1.bf16.msra.mxu1 %v3308_v49  ;;  %v782_v49 = vld [vmem:[%s4286_s24 + $0xd90] sm:$0xff]  ;;  %v819_v26 = vld [vmem:[%s4286_s24 + $0xeb8] sm:$0xff] }
 0x1d7   : > { %3821 = vmatpush1.bf16.msra.mxu0 %v3820_v50  ;;  %3311 = vmatprep.subr.bf16.mxu1 %v3310_v51  ;;  %v1292_v50 = vld [vmem:[%s4286_s24 + $0x1d80] sm:$0xff]  ;;  %v3842_v51 = vpack.c.bf16 %v1295_v44, %v1293_v43  ;;  %v3332_v57 = vpack.c.bf16 %v782_v49, %v780_v48  ;;  %v344_v43 = vld [vmem:[%s4296_s19 + $0xe0] sm:$0xff] }
 0x1d8   : > { %3823 = vmatprep.subr.bf16.mxu0 %v3822_v55  ;;  %v1297_v55 = vld [vmem:[%s4286_s24 + $0x1da8] sm:$0xff]  ;;  %v3844_v58 = vpack.c.bf16 %v1294_v52, %v1292_v50  ;;  %v1312_v48 = vld [vmem:[%s4286_s24 + $0x1e20] sm:$0xff]  ;;  %v1314_v50 = vld [vmem:[%s4286_s24 + $0x1e30] sm:$0xff] }
 0x1d9   : > { %v807_v52 = vld [vmem:[%s4286_s24 + $0xe58] sm:$0xff] }
 0x1da   : > { %3313 = vmatpush1.bf16.msra.mxu1 %v3312_v61  ;;  %v786_v61 = vld [vmem:[%s4286_s24 + $0xdb0] sm:$0xff] }
 0x1db   : > { %3825 = vmatpush1.bf16.msra.mxu0 %v3824_v62  ;;  %3315 = vmatprep.subr.bf16.mxu1 %v3314_v63  ;;  %v1296_v62 = vld [vmem:[%s4286_s24 + $0x1da0] sm:$0xff]  ;;  %v3846_v63 = vpack.c.bf16 %v1299_v56, %v1297_v55  ;;  %v3336_v5 = vpack.c.bf16 %v786_v61, %v784_v60  ;;  %v331_v55 = vld [vmem:[%s4296_s19 + $0x78] sm:$0xff]  ;;  %v806_v61 = vld [vmem:[%s4286_s24 + $0xe50] sm:$0xff] }
 0x1dc   : > { %3827 = vmatprep.subr.bf16.mxu0 %v3826_v3  ;;  %v1301_v3 = vld [vmem:[%s4286_s24 + $0x1dc8] sm:$0xff]  ;;  %v3848_v6 = vpack.c.bf16 %v1298_v0, %v1296_v62  ;;  %v804_v60 = vld [vmem:[%s4286_s24 + $0xe40] sm:$0xff]  ;;  %v1318_v0 = vld [vmem:[%s4286_s24 + $0x1e50] sm:$0xff] }
 0x1dd   : > { %v1316_v62 = vld [vmem:[%s4286_s24 + $0x1e40] sm:$0xff] }
 0x1de   : > { %3317 = vmatpush1.bf16.msra.mxu1 %v3316_v9  ;;  %v790_v9 = vld [vmem:[%s4286_s24 + $0xdd0] sm:$0xff] }
 0x1df   : > { %3829 = vmatpush1.bf16.msra.mxu0 %v3828_v10  ;;  %3319 = vmatprep.subr.bf16.mxu1 %v3318_v11  ;;  %v1300_v10 = vld [vmem:[%s4286_s24 + $0x1dc0] sm:$0xff]  ;;  %v3850_v11 = vpack.c.bf16 %v1303_v4, %v1301_v3  ;;  %v3340_v17 = vpack.c.bf16 %v790_v9, %v788_v8  ;;  %v1321_v3 = vld [vmem:[%s4286_s24 + $0x1e68] sm:$0xff]  ;;  %v1323_v4 = vld [vmem:[%s4286_s24 + $0x1e78] sm:$0xff] }
 0x1e0   : > { %3831 = vmatprep.subr.bf16.mxu0 %v3830_v15  ;;  %v1305_v15 = vld [vmem:[%s4286_s24 + $0x1de8] sm:$0xff]  ;;  %v3852_v18 = vpack.c.bf16 %v1302_v12, %v1300_v10  ;;  %v808_v8 = vld [vmem:[%s4286_s24 + $0xe60] sm:$0xff]  ;;  %v810_v9 = vld [vmem:[%s4286_s24 + $0xe70] sm:$0xff] }
 0x1e1   : > { %v1320_v10 = vld [vmem:[%s4286_s24 + $0x1e60] sm:$0xff]  ;;  %v1322_v12 = vld [vmem:[%s4286_s24 + $0x1e70] sm:$0xff] }
 0x1e2   : > { %3321 = vmatpush1.bf16.msra.mxu1 %v3320_v21  ;;  %v794_v21 = vld [vmem:[%s4286_s24 + $0xdf0] sm:$0xff] }
 0x1e3   : > { %3833 = vmatpush1.bf16.msra.mxu0 %v3832_v22  ;;  %3323 = vmatprep.subr.bf16.mxu1 %v3322_v23  ;;  %v1304_v22 = vld [vmem:[%s4286_s24 + $0x1de0] sm:$0xff]  ;;  %v3854_v23 = vpack.c.bf16 %v1307_v16, %v1305_v15  ;;  %v3344_v29 = vpack.c.bf16 %v794_v21, %v792_v20  ;;  %v1325_v15 = vld [vmem:[%s4286_s24 + $0x1e88] sm:$0xff]  ;;  %v1327_v16 = vld [vmem:[%s4286_s24 + $0x1e98] sm:$0xff] }
 0x1e4   : > { %3835 = vmatprep.subr.bf16.mxu0 %v3834_v27  ;;  %v1309_v27 = vld [vmem:[%s4286_s24 + $0x1e08] sm:$0xff]  ;;  %v3856_v30 = vpack.c.bf16 %v1306_v24, %v1304_v22  ;;  %v812_v20 = vld [vmem:[%s4286_s24 + $0xe80] sm:$0xff]  ;;  %v814_v21 = vld [vmem:[%s4286_s24 + $0xe90] sm:$0xff] }
 0x1e5   : > { %v1324_v22 = vld [vmem:[%s4286_s24 + $0x1e80] sm:$0xff]  ;;  %v1326_v24 = vld [vmem:[%s4286_s24 + $0x1e90] sm:$0xff] }
 0x1e6   : > { %3325 = vmatpush1.bf16.msra.mxu1 %v3324_v33  ;;  %v798_v33 = vld [vmem:[%s4286_s24 + $0xe10] sm:$0xff] }
 0x1e7   : > { %3837 = vmatpush1.bf16.msra.mxu0 %v3836_v34  ;;  %3327 = vmatprep.subr.bf16.mxu1 %v3326_v35  ;;  %v1308_v34 = vld [vmem:[%s4286_s24 + $0x1e00] sm:$0xff]  ;;  %v3858_v35 = vpack.c.bf16 %v1311_v28, %v1309_v27  ;;  %v3348_v42 = vpack.c.bf16 %v798_v33, %v796_v32  ;;  %v1329_v27 = vld [vmem:[%s4286_s24 + $0x1ea8] sm:$0xff]  ;;  %v1331_v28 = vld [vmem:[%s4286_s24 + $0x1eb8] sm:$0xff] }
 0x1e8   : > { %3839 = vmatprep.subr.bf16.mxu0 %v3838_v39  ;;  %v1313_v39 = vld [vmem:[%s4286_s24 + $0x1e28] sm:$0xff]  ;;  %v3860_v44 = vpack.c.bf16 %v1310_v36, %v1308_v34  ;;  %v816_v32 = vld [vmem:[%s4286_s24 + $0xea0] sm:$0xff]  ;;  %v818_v33 = vld [vmem:[%s4286_s24 + $0xeb0] sm:$0xff] }
 0x1e9   : > { %v3862_v49 = vpack.c.bf16 %v1315_v40, %v1313_v39  ;;  %v1328_v34 = vld [vmem:[%s4286_s24 + $0x1ea0] sm:$0xff]  ;;  %v1330_v36 = vld [vmem:[%s4286_s24 + $0x1eb0] sm:$0xff]  ;;  %v1333_v39 = vld [vmem:[%s4286_s24 + $0x1ec8] sm:$0xff] }
 0x1ea   : > { %3329 = vmatpush1.bf16.msra.mxu1 %v3328_v45  ;;  %v3350_v45 = vpack.c.bf16 %v803_v38, %v801_v37  ;;  %v821_v37 = vld [vmem:[%s4286_s24 + $0xec8] sm:$0xff]  ;;  %v823_v38 = vld [vmem:[%s4286_s24 + $0xed8] sm:$0xff] }
 0x1eb   : > { %3841 = vmatpush1.bf16.msra.mxu0 %v3840_v46  ;;  %3331 = vmatprep.subr.bf16.mxu1 %v3330_v47  ;;  %v800_v46 = vld [vmem:[%s4286_s24 + $0xe20] sm:$0xff]  ;;  %v802_v47 = vld [vmem:[%s4286_s24 + $0xe30] sm:$0xff]  ;;  %v1335_v40 = vld [vmem:[%s4286_s24 + $0x1ed8] sm:$0xff] }
 0x1ec   : > { %3843 = vmatprep.subr.bf16.mxu0 %v3842_v51  ;;  %v805_v51 = vld [vmem:[%s4286_s24 + $0xe48] sm:$0xff]  ;;  %v3352_v56 = vpack.c.bf16 %v802_v47, %v800_v46  ;;  %v1332_v46 = vld [vmem:[%s4286_s24 + $0x1ec0] sm:$0xff]  ;;  %v3882_v47 = vpack.c.bf16 %v1335_v40, %v1333_v39 }
 0x1ed   : > { %v840_v40 = vld [vmem:[%s4286_s24 + $0xf60] sm:$0xff] }
 0x1ee   : > { %3333 = vmatpush1.bf16.msra.mxu1 %v3332_v57  ;;  %v347_v57 = vld [vmem:[%s4296_s19 + $0xf8] sm:$0xff] }
 0x1ef   : > { %3845 = vmatpush1.bf16.msra.mxu0 %v3844_v58  ;;  %3335 = vmatprep.subr.bf16.mxu1 %v3334_v59  ;;  %v3864_v58 = vpack.c.bf16 %v1314_v50, %v1312_v48  ;;  %v3354_v59 = vpack.c.bf16 %v807_v52, %v805_v51  ;;  %v1334_v48 = vld [vmem:[%s4286_s24 + $0x1ed0] sm:$0xff]  ;;  %v827_v50 = vld [vmem:[%s4286_s24 + $0xef8] sm:$0xff]  ;;  %v1337_v51 = vld [vmem:[%s4286_s24 + $0x1ee8] sm:$0xff] }
 0x1f0   : > { %3847 = vmatprep.subr.bf16.mxu0 %v3846_v63  ;;  %v3866_v63 = vpack.c.bf16 %v1319_v54, %v1317_v53  ;;  %v1339_v52 = vld [vmem:[%s4286_s24 + $0x1ef8] sm:$0xff]  ;;  %v3884_v54 = vpack.c.bf16 %v1334_v48, %v1332_v46 }
 0x1f1   : > { %v847_v46 = vld [vmem:[%s4286_s24 + $0xf98] sm:$0xff] }
 0x1f2   : > { %3337 = vmatpush1.bf16.msra.mxu1 %v3336_v5  ;;  %v3356_v5 = vpack.c.bf16 %v806_v61, %v804_v60  ;;  %v1338_v60 = vld [vmem:[%s4286_s24 + $0x1ef0] sm:$0xff]  ;;  %v829_v61 = vld [vmem:[%s4286_s24 + $0xf08] sm:$0xff]  ;;  %v1359_v48 = vld [vmem:[%s4286_s24 + $0x1f98] sm:$0xff] }
 0x1f3   : > { %3849 = vmatpush1.bf16.msra.mxu0 %v3848_v6  ;;  %3339 = vmatprep.subr.bf16.mxu1 %v3338_v7  ;;  %v3868_v6 = vpack.c.bf16 %v1318_v0, %v1316_v62  ;;  %v3358_v7 = vpack.c.bf16 %v811_v2, %v809_v1  ;;  %v831_v62 = vld [vmem:[%s4286_s24 + $0xf18] sm:$0xff] }
 0x1f4   : > { %3851 = vmatprep.subr.bf16.mxu0 %v3850_v11  ;;  %v3870_v11 = vpack.c.bf16 %v1323_v4, %v1321_v3  ;;  %v1343_v0 = vld [vmem:[%s4286_s24 + $0x1f18] sm:$0xff]  ;;  %v3378_v3 = vpack.c.bf16 %v831_v62, %v829_v61  ;;  %v828_v4 = vld [vmem:[%s4286_s24 + $0xf00] sm:$0xff] }
 0x1f6   : > { %3341 = vmatpush1.bf16.msra.mxu1 %v3340_v17  ;;  %v3360_v17 = vpack.c.bf16 %v810_v9, %v808_v8  ;;  %v1342_v8 = vld [vmem:[%s4286_s24 + $0x1f10] sm:$0xff]  ;;  %v833_v9 = vld [vmem:[%s4286_s24 + $0xf28] sm:$0xff] }
 0x1f7   : > { %3853 = vmatpush1.bf16.msra.mxu0 %v3852_v18  ;;  %3343 = vmatprep.subr.bf16.mxu1 %v3342_v19  ;;  %v3872_v18 = vpack.c.bf16 %v1322_v12, %v1320_v10  ;;  %v3362_v19 = vpack.c.bf16 %v815_v14, %v813_v13  ;;  %v835_v10 = vld [vmem:[%s4286_s24 + $0xf38] sm:$0xff] }
 0x1f8   : > { %3855 = vmatprep.subr.bf16.mxu0 %v3854_v23  ;;  %v3874_v23 = vpack.c.bf16 %v1327_v16, %v1325_v15  ;;  %v1347_v12 = vld [vmem:[%s4286_s24 + $0x1f38] sm:$0xff]  ;;  %v3382_v15 = vpack.c.bf16 %v835_v10, %v833_v9  ;;  %v832_v16 = vld [vmem:[%s4286_s24 + $0xf20] sm:$0xff] }
 0x1fa   : > { %3345 = vmatpush1.bf16.msra.mxu1 %v3344_v29  ;;  %v3364_v29 = vpack.c.bf16 %v814_v21, %v812_v20  ;;  %v1346_v20 = vld [vmem:[%s4286_s24 + $0x1f30] sm:$0xff]  ;;  %v837_v21 = vld [vmem:[%s4286_s24 + $0xf48] sm:$0xff] }
 0x1fb   : > { %3857 = vmatpush1.bf16.msra.mxu0 %v3856_v30  ;;  %3347 = vmatprep.subr.bf16.mxu1 %v3346_v31  ;;  %v3876_v30 = vpack.c.bf16 %v1326_v24, %v1324_v22  ;;  %v3366_v31 = vpack.c.bf16 %v819_v26, %v817_v25  ;;  %v839_v22 = vld [vmem:[%s4286_s24 + $0xf58] sm:$0xff] }
 0x1fc   : > { %3859 = vmatprep.subr.bf16.mxu0 %v3858_v35  ;;  %v3878_v35 = vpack.c.bf16 %v1331_v28, %v1329_v27  ;;  %v1351_v24 = vld [vmem:[%s4286_s24 + $0x1f58] sm:$0xff]  ;;  %v3386_v27 = vpack.c.bf16 %v839_v22, %v837_v21  ;;  %v836_v28 = vld [vmem:[%s4286_s24 + $0xf40] sm:$0xff] }
 0x1fd   : > { %1863 = vmatmul.mubr.f32.vlgmr.msra.gmra.mrb[0].mxu1 %v328_v41  ;;  %v3368_v41 = vpack.c.bf16 %v818_v33, %v816_v32  ;;  %v1350_v32 = vld [vmem:[%s4286_s24 + $0x1f50] sm:$0xff]  ;;  %v841_v33 = vld [vmem:[%s4286_s24 + $0xf68] sm:$0xff] }
 0x1fe   : > { %3349 = vmatpush1.bf16.msra.mxu1 %v3348_v42  ;;  %2431 = vmatmul.mubr.f32.vlgmr.msra.gmra.mrb[0].mxu0 %v344_v43  ;;  %v3880_v42 = vpack.c.bf16 %v1330_v36, %v1328_v34  ;;  %v3370_v43 = vpack.c.bf16 %v823_v38, %v821_v37  ;;  %v843_v34 = vld [vmem:[%s4286_s24 + $0xf78] sm:$0xff] }
 0x1ff   : > { %3861 = vmatpush1.bf16.msra.mxu0 %v3860_v44  ;;  %3351 = vmatprep.subr.bf16.mxu1 %v3350_v45  ;;  %v820_v44 = vld [vmem:[%s4286_s24 + $0xec0] sm:$0xff]  ;;  %v822_v45 = vld [vmem:[%s4286_s24 + $0xed0] sm:$0xff]  ;;  %v1355_v36 = vld [vmem:[%s4286_s24 + $0x1f78] sm:$0xff]  ;;  %v3390_v39 = vpack.c.bf16 %v843_v34, %v841_v33 }
 0x200   : > { %3863 = vmatprep.subr.bf16.mxu0 %v3862_v49  ;;  %1933 = vmatprep.mubr.f32.mxu1 %v331_v55  ;;  %v825_v49 = vld [vmem:[%s4286_s24 + $0xee8] sm:$0xff]  ;;  %v3372_v53 = vpack.c.bf16 %v822_v45, %v820_v44  ;;  %v1354_v44 = vld [vmem:[%s4286_s24 + $0x1f70] sm:$0xff] }
 0x201   : > { %2501 = vmatprep.mubr.f32.mxu0 %v347_v57  ;;  %v3374_v55 = vpack.c.bf16 %v827_v50, %v825_v49  ;;  %v826_v57 = vld [vmem:[%s4286_s24 + $0xef0] sm:$0xff]  ;;  %v845_v45 = vld [vmem:[%s4286_s24 + $0xf88] sm:$0xff] }
 0x202   : > { %3353 = vmatpush1.bf16.msra.mxu1 %v3352_v56  ;;  %v824_v56 = vld [vmem:[%s4286_s24 + $0xee0] sm:$0xff]  ;;  %v314_v34 = vld [vmem:[#allocation2] sm:$0xff] }
 0x203   : > { %3865 = vmatpush1.bf16.msra.mxu0 %v3864_v58  ;;  %3355 = vmatprep.subr.bf16.mxu1 %v3354_v59  ;;  %v1336_v58 = vld [vmem:[%s4286_s24 + $0x1ee0] sm:$0xff]  ;;  %v3886_v59 = vpack.c.bf16 %v1339_v52, %v1337_v51  ;;  %v3376_v1 = vpack.c.bf16 %v826_v57, %v824_v56  ;;  %v3394_v51 = vpack.c.bf16 %v847_v46, %v845_v45  ;;  %v1358_v56 = vld [vmem:[%s4286_s24 + $0x1f90] sm:$0xff]  ;;  %v849_v57 = vld [vmem:[%s4286_s24 + $0xfa8] sm:$0xff] }
 0x204   : > { %3867 = vmatprep.subr.bf16.mxu0 %v3866_v63  ;;  %v1341_v63 = vld [vmem:[%s4286_s24 + $0x1f08] sm:$0xff]  ;;  %v3888_v2 = vpack.c.bf16 %v1338_v60, %v1336_v58  ;;  %v844_v52 = vld [vmem:[%s4286_s24 + $0xf80] sm:$0xff]  ;;  %v851_v58 = vld [vmem:[%s4286_s24 + $0xfb8] sm:$0xff] }
 0x205   : > { %v1363_v60 = vld [vmem:[%s4286_s24 + $0x1fb8] sm:$0xff]  ;;  %v2534_v45 = vld [vmem:[%s5684_s3] sm:$0xff] (!%p2857_p7) }
 0x206   : > { %3357 = vmatpush1.bf16.msra.mxu1 %v3356_v5  ;;  %v830_v5 = vld [vmem:[%s4286_s24 + $0xf10] sm:$0xff] }
 0x207   : > { %3869 = vmatpush1.bf16.msra.mxu0 %v3868_v6  ;;  %3359 = vmatprep.subr.bf16.mxu1 %v3358_v7  ;;  %v1340_v6 = vld [vmem:[%s4286_s24 + $0x1f00] sm:$0xff]  ;;  %v3890_v7 = vpack.c.bf16 %v1343_v0, %v1341_v63  ;;  %v3380_v13 = vpack.c.bf16 %v830_v5, %v828_v4  ;;  %v3398_v63 = vpack.c.bf16 %v851_v58, %v849_v57  ;;  %v1362_v4 = vld [vmem:[%s4286_s24 + $0x1fb0] sm:$0xff]  ;;  %v853_v5 = vld [vmem:[%s4286_s24 + $0xfc8] sm:$0xff] }
 0x208   : > { %3871 = vmatprep.subr.bf16.mxu0 %v3870_v11  ;;  %v1345_v11 = vld [vmem:[%s4286_s24 + $0x1f28] sm:$0xff]  ;;  %v3892_v14 = vpack.c.bf16 %v1342_v8, %v1340_v6  ;;  %v848_v0 = vld [vmem:[%s4286_s24 + $0xfa0] sm:$0xff]  ;;  %v855_v6 = vld [vmem:[%s4286_s24 + $0xfd8] sm:$0xff] }
 0x209   : > { %v1367_v8 = vld [vmem:[%s4286_s24 + $0x1fd8] sm:$0xff]  ;;  %v2542_v58 = vld [vmem:[%s5684_s3 + $0x40] sm:$0xff] (!%p2857_p7) }
 0x20a   : > { %3361 = vmatpush1.bf16.msra.mxu1 %v3360_v17  ;;  %v834_v17 = vld [vmem:[%s4286_s24 + $0xf30] sm:$0xff] }
 0x20b   : > { %3873 = vmatpush1.bf16.msra.mxu0 %v3872_v18  ;;  %3363 = vmatprep.subr.bf16.mxu1 %v3362_v19  ;;  %v1344_v18 = vld [vmem:[%s4286_s24 + $0x1f20] sm:$0xff]  ;;  %v3894_v19 = vpack.c.bf16 %v1347_v12, %v1345_v11  ;;  %v3384_v25 = vpack.c.bf16 %v834_v17, %v832_v16  ;;  %v3402_v11 = vpack.c.bf16 %v855_v6, %v853_v5  ;;  %v1366_v16 = vld [vmem:[%s4286_s24 + $0x1fd0] sm:$0xff]  ;;  %v857_v17 = vld [vmem:[%s4286_s24 + $0xfe8] sm:$0xff] }
 0x20c   : > { %3875 = vmatprep.subr.bf16.mxu0 %v3874_v23  ;;  %v1349_v23 = vld [vmem:[%s4286_s24 + $0x1f48] sm:$0xff]  ;;  %v3896_v26 = vpack.c.bf16 %v1346_v20, %v1344_v18  ;;  %v852_v12 = vld [vmem:[%s4286_s24 + $0xfc0] sm:$0xff]  ;;  %v859_v18 = vld [vmem:[%s4286_s24 + $0xff8] sm:$0xff] }
 0x20d   : > { %v1371_v20 = vld [vmem:[%s4286_s24 + $0x1ff8] sm:$0xff] }
 0x20e   : > { %3365 = vmatpush1.bf16.msra.mxu1 %v3364_v29  ;;  %v838_v29 = vld [vmem:[%s4286_s24 + $0xf50] sm:$0xff] }
 0x20f   : > { %3877 = vmatpush1.bf16.msra.mxu0 %v3876_v30  ;;  %3367 = vmatprep.subr.bf16.mxu1 %v3366_v31  ;;  %v1348_v30 = vld [vmem:[%s4286_s24 + $0x1f40] sm:$0xff]  ;;  %v3898_v31 = vpack.c.bf16 %v1351_v24, %v1349_v23  ;;  %v3388_v37 = vpack.c.bf16 %v838_v29, %v836_v28  ;;  %v3406_v23 = vpack.c.bf16 %v859_v18, %v857_v17  ;;  %v1370_v28 = vld [vmem:[%s4286_s24 + $0x1ff0] sm:$0xff]  ;;  %v2561_v17 = vld [vmem:[%s5684_s3 + $0xd8] sm:$0xff] (!%p2857_p7) }
 0x210   : > { %3879 = vmatprep.subr.bf16.mxu0 %v3878_v35  ;;  %v1353_v35 = vld [vmem:[%s4286_s24 + $0x1f68] sm:$0xff]  ;;  %v3900_v38 = vpack.c.bf16 %v1350_v32, %v1348_v30  ;;  %v856_v24 = vld [vmem:[%s4286_s24 + $0xfe0] sm:$0xff] }
 0x211   : > { %v346_v32 = vld [vmem:[%s4296_s19 + $0xf0] sm:$0xff] }
 0x212   : > { %3369 = vmatpush1.bf16.msra.mxu1 %v3368_v41  ;;  %v842_v41 = vld [vmem:[%s4286_s24 + $0xf70] sm:$0xff] }
 0x213   : > { %3881 = vmatpush1.bf16.msra.mxu0 %v3880_v42  ;;  %3371 = vmatprep.subr.bf16.mxu1 %v3370_v43  ;;  %v1352_v42 = vld [vmem:[%s4286_s24 + $0x1f60] sm:$0xff]  ;;  %v3902_v43 = vpack.c.bf16 %v1355_v36, %v1353_v35  ;;  %v3392_v49 = vpack.c.bf16 %v842_v41, %v840_v40 }
 0x214   : > { %3883 = vmatprep.subr.bf16.mxu0 %v3882_v47  ;;  %v1357_v47 = vld [vmem:[%s4286_s24 + $0x1f88] sm:$0xff]  ;;  %v3904_v50 = vpack.c.bf16 %v1354_v44, %v1352_v42 }
 0x215   : > { %v2537_v44 = vld [vmem:[%s5684_s3 + $0x18] sm:$0xff] (!%p2857_p7) }
 0x216   : > { %3373 = vmatpush1.bf16.msra.mxu1 %v3372_v53  ;;  %v846_v53 = vld [vmem:[%s4286_s24 + $0xf90] sm:$0xff] }
 0x217   : > { %3885 = vmatpush1.bf16.msra.mxu0 %v3884_v54  ;;  %3375 = vmatprep.subr.bf16.mxu1 %v3374_v55  ;;  %v1356_v54 = vld [vmem:[%s4286_s24 + $0x1f80] sm:$0xff]  ;;  %v3906_v55 = vpack.c.bf16 %v1359_v48, %v1357_v47  ;;  %v3396_v61 = vpack.c.bf16 %v846_v53, %v844_v52  ;;  %v2539_v48 = vld [vmem:[%s5684_s3 + $0x28] sm:$0xff] (!%p2857_p7)  ;;  %v2538_v52 = vld [vmem:[%s5684_s3 + $0x20] sm:$0xff] (!%p2857_p7) }
 0x218   : > { %3887 = vmatprep.subr.bf16.mxu0 %v3886_v59  ;;  %v1361_v59 = vld [vmem:[%s4286_s24 + $0x1fa8] sm:$0xff]  ;;  %v3908_v62 = vpack.c.bf16 %v1358_v56, %v1356_v54  ;;  %v2536_v47 = vld [vmem:[%s5684_s3 + $0x10] sm:$0xff] (!%p2857_p7)  ;;  %v2543_v54 = vld [vmem:[%s5684_s3 + $0x48] sm:$0xff] (!%p2857_p7) }
 0x219   : > { %v2540_v53 = vld [vmem:[%s5684_s3 + $0x30] sm:$0xff] (!%p2857_p7) }
 0x21a   : > { %3377 = vmatpush1.bf16.msra.mxu1 %v3376_v1  ;;  %v850_v1 = vld [vmem:[%s4286_s24 + $0xfb0] sm:$0xff]  ;;  %v3928_v56 = vpack.c.bf16 (!%p2857_p7), %v2540_v53, %v2538_v52  ;;  %v2688_v52 = vld [vmem:[%s5686_s5 + $0x28] sm:$0xff] (!%p2857_p7) }
 0x21b   : > { %3889 = vmatpush1.bf16.msra.mxu0 %v3888_v2  ;;  %3379 = vmatprep.subr.bf16.mxu1 %v3378_v3  ;;  %v1360_v2 = vld [vmem:[%s4286_s24 + $0x1fa0] sm:$0xff]  ;;  %v3910_v3 = vpack.c.bf16 %v1363_v60, %v1361_v59  ;;  %v3400_v9 = vpack.c.bf16 %v850_v1, %v848_v0  ;;  %v2547_v60 = vld [vmem:[%s5684_s3 + $0x68] sm:$0xff] (!%p2857_p7)  ;;  %v2546_v0 = vld [vmem:[%s5684_s3 + $0x60] sm:$0xff] (!%p2857_p7) }
 0x21c   : > { %3891 = vmatprep.subr.bf16.mxu0 %v3890_v7  ;;  %v1365_v7 = vld [vmem:[%s4286_s24 + $0x1fc8] sm:$0xff]  ;;  %v3912_v10 = vpack.c.bf16 %v1362_v4, %v1360_v2  ;;  %v2544_v59 = vld [vmem:[%s5684_s3 + $0x50] sm:$0xff] (!%p2857_p7)  ;;  %v2551_v2 = vld [vmem:[%s5684_s3 + $0x88] sm:$0xff] (!%p2857_p7)  ;;  %v2520_v4 = vlaneseq (!%p2857_p7) }
 0x21d   : > { %v2548_v1 = vld [vmem:[%s5684_s3 + $0x70] sm:$0xff] (!%p2857_p7) }
 0x21e   : > { %3381 = vmatpush1.bf16.msra.mxu1 %v3380_v13  ;;  %v854_v13 = vld [vmem:[%s4286_s24 + $0xfd0] sm:$0xff]  ;;  %v3936_v5 = vpack.c.bf16 (!%p2857_p7), %v2548_v1, %v2546_v0  ;;  %v2690_v0 = vld [vmem:[%s5686_s5 + $0x38] sm:$0xff] (!%p2857_p7) }
 0x21f   : > { %3893 = vmatpush1.bf16.msra.mxu0 %v3892_v14  ;;  %3383 = vmatprep.subr.bf16.mxu1 %v3382_v15  ;;  %v1364_v14 = vld [vmem:[%s4286_s24 + $0x1fc0] sm:$0xff]  ;;  %v3914_v15 = vpack.c.bf16 %v1367_v8, %v1365_v7  ;;  %v3404_v21 = vpack.c.bf16 %v854_v13, %v852_v12  ;;  %v2550_v7 = vld [vmem:[%s5684_s3 + $0x80] sm:$0xff] (!%p2857_p7) }
 0x220   : > { %3895 = vmatprep.subr.bf16.mxu0 %v3894_v19  ;;  %v1369_v19 = vld [vmem:[%s4286_s24 + $0x1fe8] sm:$0xff]  ;;  %v3916_v22 = vpack.c.bf16 %v1366_v16, %v1364_v14  ;;  %v2552_v8 = vld [vmem:[%s5684_s3 + $0x90] sm:$0xff] (!%p2857_p7)  ;;  %v2554_v14 = vld [vmem:[%s5684_s3 + $0xa0] sm:$0xff] (!%p2857_p7) }
 0x221   : > { %v3940_v12 = vpack.c.bf16 (!%p2857_p7), %v2552_v8, %v2550_v7  ;;  %v2559_v16 = vld [vmem:[%s5684_s3 + $0xc8] sm:$0xff] (!%p2857_p7)  ;;  %v2577_v8 = vld [vmem:[%s5684_s3 + $0x158] sm:$0xff] (!%p2857_p7) }
 0x222   : > { %3385 = vmatpush1.bf16.msra.mxu1 %v3384_v25  ;;  %v858_v25 = vld [vmem:[%s4286_s24 + $0xff0] sm:$0xff]  ;;  %v2575_v7 = vld [vmem:[%s5684_s3 + $0x148] sm:$0xff] (!%p2857_p7) }
 0x223   : > { %3897 = vmatpush1.bf16.msra.mxu0 %v3896_v26  ;;  %3387 = vmatprep.subr.bf16.mxu1 %v3386_v27  ;;  %v3918_v26 = vpack.c.bf16 %v1371_v20, %v1369_v19  ;;  %v1368_v27 = vld [vmem:[%s4286_s24 + $0x1fe0] sm:$0xff]  ;;  %v3408_v29 = vpack.c.bf16 %v858_v25, %v856_v24  ;;  %v2558_v20 = vld [vmem:[%s5684_s3 + $0xc0] sm:$0xff] (!%p2857_p7) }
 0x224   : > { %3899 = vmatprep.subr.bf16.mxu0 %v3898_v31  ;;  %v3920_v30 = vpack.c.bf16 %v1370_v28, %v1368_v27  ;;  %v330_v31 = vld [vmem:[%s4296_s19 + $0x70] sm:$0xff]  ;;  %v5449_v25 = vld [vmem:[%s5683_s2] sm:$0x3] (!%p2857_p7) }
 0x225   : > { %v2699_v28 = vld [vmem:[%s5686_s5 + $0x80] sm:$0xff] (!%p2857_p7) }
 0x226   : > { %3389 = vmatpush1.bf16.msra.mxu1 %v3388_v37 }
 0x227   : > { %3901 = vmatpush1.bf16.msra.mxu0 %v3900_v38  ;;  %3391 = vmatprep.subr.bf16.mxu1 %v3390_v39  ;;  %v315_v38 = vld [vmem:[#allocation2 + $0x8] sm:$0xff] }
 0x228   : > { %3903 = vmatprep.subr.bf16.mxu0 %v3902_v43  ;;  %v2535_v43 = vld [vmem:[%s5684_s3 + $0x8] sm:$0xff] (!%p2857_p7) }
 0x229   : > { %v3922_v46 = vpack.c.bf16 (!%p2857_p7), %v2537_v44, %v2535_v43  ;;  %v2703_v44 = vld [vmem:[%s5686_s5 + $0xa0] sm:$0xff] (!%p2857_p7) }
 0x22a   : > { %3393 = vmatpush1.bf16.msra.mxu1 %v3392_v49  ;;  %v2541_v49 = vld [vmem:[%s5684_s3 + $0x38] sm:$0xff] (!%p2857_p7) }
 0x22b   : > { %3905 = vmatpush1.bf16.msra.mxu0 %v3904_v50  ;;  %3395 = vmatprep.subr.bf16.mxu1 %v3394_v51  ;;  %v3924_v50 = vpack.c.bf16 (!%p2857_p7), %v2536_v47, %v2534_v45  ;;  %v3926_v51 = vpack.c.bf16 (!%p2857_p7), %v2541_v49, %v2539_v48  ;;  %v2704_v45 = vld [vmem:[%s5686_s5 + $0xa8] sm:$0xff] (!%p2857_p7)  ;;  %v2569_v47 = vld [vmem:[%s5684_s3 + $0x118] sm:$0xff] (!%p2857_p7) }
 0x22c   : > { %3907 = vmatprep.subr.bf16.mxu0 %v3906_v55  ;;  %v2545_v55 = vld [vmem:[%s5684_s3 + $0x58] sm:$0xff] (!%p2857_p7) }
 0x22d   : > { %v3930_v57 = vpack.c.bf16 (!%p2857_p7), %v2545_v55, %v2543_v54  ;;  %v2705_v54 = vld [vmem:[%s5686_s5 + $0xb0] sm:$0xff] (!%p2857_p7)  ;;  %v2706_v55 = vld [vmem:[%s5686_s5 + $0xb8] sm:$0xff] (!%p2857_p7) }
 0x22e   : > { %3397 = vmatpush1.bf16.msra.mxu1 %v3396_v61  ;;  %v2549_v61 = vld [vmem:[%s5684_s3 + $0x78] sm:$0xff] (!%p2857_p7) }
 0x22f   : > { %3909 = vmatpush1.bf16.msra.mxu0 %v3908_v62  ;;  %3399 = vmatprep.subr.bf16.mxu1 %v3398_v63  ;;  %v3932_v62 = vpack.c.bf16 (!%p2857_p7), %v2544_v59, %v2542_v58  ;;  %v3934_v63 = vpack.c.bf16 (!%p2857_p7), %v2549_v61, %v2547_v60  ;;  %v2568_v58 = vld [vmem:[%s5684_s3 + $0x110] sm:$0xff] (!%p2857_p7)  ;;  %v2571_v59 = vld [vmem:[%s5684_s3 + $0x128] sm:$0xff] (!%p2857_p7)  ;;  %v2573_v60 = vld [vmem:[%s5684_s3 + $0x138] sm:$0xff] (!%p2857_p7) }
 0x230   : > { %3911 = vmatprep.subr.bf16.mxu0 %v3910_v3  ;;  %v2553_v3 = vld [vmem:[%s5684_s3 + $0x98] sm:$0xff] (!%p2857_p7) }
 0x231   : > { %v3938_v6 = vpack.c.bf16 (!%p2857_p7), %v2553_v3, %v2551_v2  ;;  %v2707_v2 = vld [vmem:[%s5686_s5 + $0xc0] sm:$0xff] (!%p2857_p7)  ;;  %v2708_v3 = vld [vmem:[%s5686_s5 + $0xc8] sm:$0xff] (!%p2857_p7) }
 0x232   : > { %3401 = vmatpush1.bf16.msra.mxu1 %v3400_v9  ;;  %v2555_v9 = vld [vmem:[%s5684_s3 + $0xa8] sm:$0xff] (!%p2857_p7) }
 0x233   : > { %3913 = vmatpush1.bf16.msra.mxu0 %v3912_v10  ;;  %3403 = vmatprep.subr.bf16.mxu1 %v3402_v11  ;;  %v2557_v10 = vld [vmem:[%s5684_s3 + $0xb8] sm:$0xff] (!%p2857_p7)  ;;  %v5422_v11 = vshrl.u32 (!%p2857_p7), %v2520_v4, 7  ;;  %v3958_v4 = vpack.c.bf16 (!%p2857_p7), %v2573_v60, %v2571_v59 }
 0x234   : > { %3915 = vmatprep.subr.bf16.mxu0 %v3914_v15  ;;  %v3942_v13 = vpack.c.bf16 (!%p2857_p7), %v2557_v10, %v2555_v9  ;;  %v2556_v15 = vld [vmem:[%s5684_s3 + $0xb0] sm:$0xff] (!%p2857_p7)  ;;  %v4002_v10 = vpack.c.bf16 (!%p2857_p7), %v2708_v3, %v2707_v2  ;;  %v2696_v2 = vld [vmem:[%s5686_s5 + $0x68] sm:$0xff] (!%p2857_p7) }
 0x235   : > { %v2526_v18 = vsub.s32 (!%p2857_p7), 1, %v5422_v11  ;;  %v3944_v19 = vpack.c.bf16 (!%p2857_p7), %v2556_v15, %v2554_v14  ;;  %v2709_v15 = vld [vmem:[%s5686_s5 + $0xd0] sm:$0xff] (!%p2857_p7) }
 0x236   : > { %3405 = vmatpush1.bf16.msra.mxu1 %v3404_v21  ;;  %v2560_v21 = vld [vmem:[%s5684_s3 + $0xd0] sm:$0xff] (!%p2857_p7) }
 0x237   : > { %3917 = vmatpush1.bf16.msra.mxu0 %v3916_v22  ;;  %3407 = vmatprep.subr.bf16.mxu1 %v3406_v23  ;;  %v3946_v22 = vpack.c.bf16 (!%p2857_p7), %v2561_v17, %v2559_v16  ;;  %v2563_v23 = vld [vmem:[%s5684_s3 + $0xe8] sm:$0xff] (!%p2857_p7)  ;;  %v2527_v27 = vrot.slane (!%p2857_p7), %v5449_v25, %v2526_v18  ;;  %v2710_v16 = vld [vmem:[%s5686_s5 + $0xd8] sm:$0xff] (!%p2857_p7)  ;;  %v3962_v17 = vpack.c.bf16 (!%p2857_p7), %v2577_v8, %v2575_v7  ;;  %v2697_v7 = vld [vmem:[%s5686_s5 + $0x70] sm:$0xff] (!%p2857_p7) }
 0x238   : > { %3919 = vmatprep.subr.bf16.mxu0 %v3918_v26  ;;  %v2565_v26 = vld [vmem:[%s5684_s3 + $0xf8] sm:$0xff] (!%p2857_p7) }
 0x239   : > { %v2698_v8 = vld [vmem:[%s5686_s5 + $0x78] sm:$0xff] (!%p2857_p7) }
 0x23a   : > { %3409 = vmatpush1.bf16.msra.mxu1 %v3408_v29  ;;  %v2700_v29 = vld [vmem:[%s5686_s5 + $0x88] sm:$0xff] (!%p2857_p7) }
 0x23b   : > { %3921 = vmatpush1.bf16.msra.mxu0 %v3920_v30  ;;  %v2562_v30 = vld [vmem:[%s5684_s3 + $0xe0] sm:$0xff] (!%p2857_p7) }
 0x23c   : > { %3923 = vmatprep.subr.bf16.mxu0 (!%p2857_p7), %v3922_v46  ;;  %v2567_v46 = vld [vmem:[%s5684_s3 + $0x108] sm:$0xff] (!%p2857_p7) }
 0x23d   : > { %1934 = vmatmul.mubr.f32.vlgmr.msra.gmra.mrb[0].mxu1 %v330_v31  ;;  %v3986_v31 = vpack.c.bf16 (!%p2857_p7), %v2700_v29, %v2699_v28  ;;  %v2711_v29 = vld [vmem:[%s5686_s5 + $0xe0] sm:$0xff] (!%p2857_p7) }
 0x23e   : > { %2502 = vmatmul.mubr.f32.vlgmr.msra.gmra.mrb[0].mxu0 %v346_v32  ;;  %v2683_v32 = vld [vmem:[%s5686_s5] sm:$0xff] (!%p2857_p7) }
 0x23f   : > { %3925 = vmatpush1.bf16.msra.mxu0 (!%p2857_p7), %v3924_v50  ;;  %3987 = vmatprep.subr.bf16.mxu1 (!%p2857_p7), %v3986_v31  ;;  %v3994_v50 = vpack.c.bf16 (!%p2857_p7), %v2704_v45, %v2703_v44 }
 0x240   : > { %3927 = vmatprep.subr.bf16.mxu0 (!%p2857_p7), %v3926_v51  ;;  %v2687_v51 = vld [vmem:[%s5686_s5 + $0x20] sm:$0xff] (!%p2857_p7) }
 0x241   : > { %v3996_v61 = vpack.c.bf16 (!%p2857_p7), %v2688_v52, %v2687_v51 }
 0x243   : > { %3929 = vmatpush1.bf16.msra.mxu0 (!%p2857_p7), %v3928_v56  ;;  %v3954_v56 = vpack.c.bf16 (!%p2857_p7), %v2569_v47, %v2567_v46  ;;  %v2586_v46 = vld [vmem:[%s5684_s3 + $0x1a0] sm:$0xff] (!%p2857_p7)  ;;  %v2588_v47 = vld [vmem:[%s5684_s3 + $0x1b0] sm:$0xff] (!%p2857_p7) }
 0x244   : > { %3931 = vmatprep.subr.bf16.mxu0 (!%p2857_p7), %v3930_v57  ;;  %v2566_v57 = vld [vmem:[%s5684_s3 + $0x100] sm:$0xff] (!%p2857_p7)  ;;  %v3976_v51 = vpack.c.bf16 (!%p2857_p7), %v2588_v47, %v2586_v46 }
 0x245   : > { %v3956_v1 = vpack.c.bf16 (!%p2857_p7), %v2568_v58, %v2566_v57 }
 0x247   : > { %3933 = vmatpush1.bf16.msra.mxu0 (!%p2857_p7), %v3932_v62  ;;  %v3998_v62 = vpack.c.bf16 (!%p2857_p7), %v2706_v55, %v2705_v54  ;;  %v2592_v54 = vld [vmem:[%s5684_s3 + $0x1d0] sm:$0xff] (!%p2857_p7)  ;;  %v2595_v55 = vld [vmem:[%s5684_s3 + $0x1e8] sm:$0xff] (!%p2857_p7) }
 0x248   : > { %3935 = vmatprep.subr.bf16.mxu0 (!%p2857_p7), %v3934_v63  ;;  %v2689_v63 = vld [vmem:[%s5686_s5 + $0x30] sm:$0xff] (!%p2857_p7) }
 0x249   : > { %v4000_v9 = vpack.c.bf16 (!%p2857_p7), %v2690_v0, %v2689_v63 }
 0x24b   : > { %3937 = vmatpush1.bf16.msra.mxu0 (!%p2857_p7), %v3936_v5  ;;  %v2570_v5 = vld [vmem:[%s5684_s3 + $0x120] sm:$0xff] (!%p2857_p7) }
 0x24c   : > { %3939 = vmatprep.subr.bf16.mxu0 (!%p2857_p7), %v3938_v6  ;;  %v2572_v6 = vld [vmem:[%s5684_s3 + $0x130] sm:$0xff] (!%p2857_p7) }
 0x24d   : > { %v3960_v14 = vpack.c.bf16 (!%p2857_p7), %v2572_v6, %v2570_v5  ;;  %v2714_v5 = vld [vmem:[%s5686_s5 + $0xf8] sm:$0xff] (!%p2857_p7) }
 0x24f   : > { %3941 = vmatpush1.bf16.msra.mxu0 (!%p2857_p7), %v3940_v12  ;;  %v2691_v12 = vld [vmem:[%s5686_s5 + $0x40] sm:$0xff] (!%p2857_p7) }
 0x250   : > { %3943 = vmatprep.subr.bf16.mxu0 (!%p2857_p7), %v3942_v13  ;;  %v2692_v13 = vld [vmem:[%s5686_s5 + $0x48] sm:$0xff] (!%p2857_p7) }
 0x253   : > { %3945 = vmatpush1.bf16.msra.mxu0 (!%p2857_p7), %v3944_v19  ;;  %v2574_v19 = vld [vmem:[%s5684_s3 + $0x140] sm:$0xff] (!%p2857_p7) }
 0x254   : > { %3947 = vmatprep.subr.bf16.mxu0 (!%p2857_p7), %v3946_v22  ;;  %v2581_v22 = vld [vmem:[%s5684_s3 + $0x178] sm:$0xff] (!%p2857_p7) }
 0x310   : > { %v1935_v33 = vpop.f32.mrb[0].mxu1 }
 0x311   : > { %v2503_v35 = vpop.f32.mrb[0].mxu0  ;;  %v1937_v36 = vpop.f32.mrb[1].mxu1  ;;  %2515 = sbr.rel (%p2857_p7) target bundleno = 1265 (0x4f1), region = 60 }
 0x312   : > { %v4018_v37 = vadd.f32 %v2503_v35, %v1935_v33  ;;  %v2505_v39 = vpop.f32.mrb[1].mxu0  ;;  %v2684_v33 = vld [vmem:[%s5686_s5 + $0x8] sm:$0xff] (!%p2857_p7)  ;;  %v3948_v35 = vpack.c.bf16 (!%p2857_p7), %v2560_v21, %v2558_v20  ;;  %v2576_v20 = vld [vmem:[%s5684_s3 + $0x150] sm:$0xff] (!%p2857_p7) }
 0x313   : > { %v4019_v40 = vadd.f32 %v2505_v39, %v1937_v36  ;;  %v2685_v39 = vld [vmem:[%s5686_s5 + $0x10] sm:$0xff] (!%p2857_p7)  ;;  %v2579_v21 = vld [vmem:[%s5684_s3 + $0x168] sm:$0xff] (!%p2857_p7)  ;;  %v3964_v28 = vpack.c.bf16 (!%p2857_p7), %v2576_v20, %v2574_v19 }
 0x314   : > { %v2508_v41 = vadd.f32 %v4018_v37, %v314_v34  ;;  %v2701_v34 = vld [vmem:[%s5686_s5 + $0x90] sm:$0xff] (!%p2857_p7)  ;;  %v3988_v37 = vpack.c.bf16 (!%p2857_p7), %v2684_v33, %v2683_v32  ;;  %3949 = vmatpush1.bf16.msra.mxu0 (!%p2857_p7), %v3948_v35  ;;  %v3966_v31 = vpack.c.bf16 (!%p2857_p7), %v2581_v22, %v2579_v21  ;;  %v2578_v32 = vld [vmem:[%s5684_s3 + $0x160] sm:$0xff] (!%p2857_p7)  ;;  %v2585_v35 = vld [vmem:[%s5684_s3 + $0x198] sm:$0xff] (!%p2857_p7) }
 0x315   : > { %v2509_v42 = vadd.f32 %v4019_v40, %v315_v38  ;;  %v2702_v38 = vld [vmem:[%s5686_s5 + $0x98] sm:$0xff] (!%p2857_p7)  ;;  %v2580_v33 = vld [vmem:[%s5684_s3 + $0x170] sm:$0xff] (!%p2857_p7)  ;;  %v2858_v22 = vld [vmem:[%s5687_s6] ss:$0 sm:$0xff] (!%p2857_p7) }
 0x316   : > { %2510 = vst [vmem:[#allocation2] sm:$0xff] %v2508_v41  ;;  %v2686_v40 = vld [vmem:[%s5686_s5 + $0x18] sm:$0xff] (!%p2857_p7)  ;;  %v3950_v41 = vpack.c.bf16 (!%p2857_p7), %v2565_v26, %v2563_v23  ;;  %v3990_v43 = vpack.c.bf16 (!%p2857_p7), %v2702_v38, %v2701_v34  ;;  %3989 = vmatpush3.bf16.msra.mxu1 (!%p2857_p7), %v3988_v37  ;;  %v4004_v23 = vpack.c.bf16 (!%p2857_p7), %v2692_v13, %v2691_v12  ;;  %v2693_v26 = vld [vmem:[%s5686_s5 + $0x50] sm:$0xff] (!%p2857_p7)  ;;  %v2583_v34 = vld [vmem:[%s5684_s3 + $0x188] sm:$0xff] (!%p2857_p7) }
 0x317   : > { %2511 = vst [vmem:[#allocation2 + $0x8] sm:$0xff] %v2509_v42  ;;  %v2564_v42 = vld [vmem:[%s5684_s3 + $0xf0] sm:$0xff] (!%p2857_p7)  ;;  %v3992_v49 = vpack.c.bf16 (!%p2857_p7), %v2686_v40, %v2685_v39  ;;  %v3968_v38 = vpack.c.bf16 (!%p2857_p7), %v2580_v33, %v2578_v32  ;;  %v3970_v39 = vpack.c.bf16 (!%p2857_p7), %v2585_v35, %v2583_v34  ;;  %v2582_v40 = vld [vmem:[%s5684_s3 + $0x180] sm:$0xff] (!%p2857_p7) }
 0x318   : > { %3991 = vmatprep.subr.bf16.mxu1 %v3990_v43  ;;  %v3952_v53 = vpack.c.bf16 %v2564_v42, %v2562_v30  ;;  %3951 = vmatprep.subr.bf16.mxu0 %v3950_v41  ;;  %v2712_v30 = vld [vmem:[%s5686_s5 + $0xe8] sm:$0xff]  ;;  %v2584_v41 = vld [vmem:[%s5684_s3 + $0x190] sm:$0xff]  ;;  %v2589_v43 = vld [vmem:[%s5684_s3 + $0x1b8] sm:$0xff] }
 0x319   : > { %v4010_v37 = vpack.c.bf16 %v2712_v30, %v2711_v29  ;;  %v2587_v42 = vld [vmem:[%s5684_s3 + $0x1a8] sm:$0xff]  ;;  %v3972_v44 = vpack.c.bf16 %v2584_v41, %v2582_v40 }
 0x31a   : > { %3993 = vmatpush3.bf16.msra.mxu1 %v3992_v49  ;;  %3953 = vmatpush1.bf16.msra.mxu0 %v3952_v53  ;;  %v3974_v45 = vpack.c.bf16 %v2589_v43, %v2587_v42  ;;  %v2593_v49 = vld [vmem:[%s5684_s3 + $0x1d8] sm:$0xff]  ;;  %v2590_v53 = vld [vmem:[%s5684_s3 + $0x1c0] sm:$0xff] }
 0x31b   : > { %3995 = vmatprep.subr.bf16.mxu1 %v3994_v50  ;;  %3955 = vmatprep.subr.bf16.mxu0 %v3954_v56  ;;  %v2522_v50 = vsub.s32 0, %v5422_v11  ;;  %v2597_v56 = vld [vmem:[%s5684_s3 + $0x1f8] sm:$0xff]  ;;  %v3980_v58 = vpack.c.bf16 %v2592_v54, %v2590_v53 }
 0x31c   : > { %v3982_v60 = vpack.c.bf16 %v2597_v56, %v2595_v55 }
 0x31d   : > { %v2523_v57 = vrot.slane %v5449_v25, %v2522_v50  ;;  %v2516_v59 = vld [vmem:[#allocation2] sm:$0xff] }
 0x31e   : > { %v2517_v24 = vld [vmem:[#allocation2 + $0x8] sm:$0xff]  ;;  %3997 = vmatpush3.bf16.msra.mxu1 %v3996_v61  ;;  %3957 = vmatpush1.bf16.msra.mxu0 %v3956_v1  ;;  %v2594_v61 = vld [vmem:[%s5684_s3 + $0x1e0] sm:$0xff] }
 0x31f   : > { %v2531_v36 = vadd.f32 %v2527_v27, %v2517_v24  ;;  %3999 = vmatprep.subr.bf16.mxu1 %v3998_v62  ;;  %3959 = vmatprep.subr.bf16.mxu0 %v3958_v4  ;;  %v4006_v24 = vpack.c.bf16 %v2710_v16, %v2709_v15  ;;  %v2694_v27 = vld [vmem:[%s5686_s5 + $0x58] sm:$0xff]  ;;  %v2596_v62 = vld [vmem:[%s5684_s3 + $0x1f0] sm:$0xff]  ;;  %v2530_v63 = vadd.f32 %v2523_v57, %v2516_v59  ;;  %v2695_v25 = vld [vmem:[%s5686_s5 + $0x60] sm:$0xff] }
 0x320   : > { %v3984_v0 = vpack.c.bf16 %v2596_v62, %v2594_v61  ;;  %v4012_v3 = vpack.c.bf16 %v2696_v2, %v2695_v25  ;;  %v2713_v4 = vld [vmem:[%s5686_s5 + $0xf0] sm:$0xff] }
 0x321   : > { %v2533_v48 = vmax.f32 %v2531_v36, 0.0  ;;  %v4008_v36 = vpack.c.bf16 %v2694_v27, %v2693_v26  ;;  %v2532_v1 = vmax.f32 %v2530_v63, 0.0  ;;  %v4014_v6 = vpack.c.bf16 %v2714_v5, %v2713_v4 }
 0x322   : > { %4001 = vmatpush3.bf16.msra.mxu1 %v4000_v9  ;;  %3961 = vmatpush1.bf16.msra.mxu0 %v3960_v14  ;;  %v4016_v9 = vpack.c.bf16 %v2698_v8, %v2697_v7 }
 0x323   : > { %2674 = vmatprep.mubr.f32.mxu0 %v2533_v48  ;;  %4003 = vmatprep.subr.bf16.mxu1 %v4002_v10  ;;  %v2591_v48 = vld [vmem:[%s5684_s3 + $0x1c8] sm:$0xff]  ;;  %v2598_v10 = vld [vmem:[%s5685_s4] sm:$0x3] }
 0x324   : > { %3963 = vmatprep.subr.bf16.mxu0 %v3962_v17  ;;  %v3978_v52 = vpack.c.bf16 %v2593_v49, %v2591_v48  ;;  %v2603_v12 = vrot.slane %v2598_v10, %v2522_v50  ;;  %v2607_v13 = vrot.slane %v2598_v10, %v2526_v18 }
 0x326   : > { %4005 = vmatpush3.bf16.msra.mxu1 %v4004_v23  ;;  %3965 = vmatpush1.bf16.msra.mxu0 %v3964_v28 }
 0x327   : > { %4007 = vmatprep.subr.bf16.mxu1 %v4006_v24  ;;  %3967 = vmatprep.subr.bf16.mxu0 %v3966_v31 }
 0x32a   : > { %4009 = vmatpush3.bf16.msra.mxu1 %v4008_v36  ;;  %3969 = vmatpush1.bf16.msra.mxu0 %v3968_v38 }
 0x32b   : > { %4011 = vmatprep.subr.bf16.mxu1 %v4010_v37  ;;  %3971 = vmatprep.subr.bf16.mxu0 %v3970_v39 }
 0x32e   : > { %3973 = vmatpush1.bf16.msra.mxu0 %v3972_v44  ;;  %4013 = vmatpush3.bf16.msra.mxu1 %v4012_v3 }
 0x32f   : > { %3975 = vmatprep.subr.bf16.mxu0 %v3974_v45  ;;  %4015 = vmatprep.subr.bf16.mxu1 %v4014_v6 }
 0x332   : > { %3977 = vmatpush1.bf16.msra.mxu0 %v3976_v51  ;;  %4017 = vmatpush3.bf16.msra.mxu1 %v4016_v9 }
 0x333   : > { %3979 = vmatprep.subr.bf16.mxu0 %v3978_v52 }
 0x336   : > { %3981 = vmatpush1.bf16.msra.mxu0 %v3980_v58 }
 0x337   : > { %3983 = vmatprep.subr.bf16.mxu0 %v3982_v60 }
 0x33a   : > { %3985 = vmatpush1.bf16.msra.mxu0 %v3984_v0 }
 0x33d   : > { %2675 = vmatmul.mubr.f32.vlgmr.msra.gmra.mrb[0].mxu0 %v2532_v1 }
 0x410   : > { %v2676_v14 = vpop.f32.mrb[0].mxu0 }
 0x411   : > { %v2677_v15 = vadd.f32 %v2676_v14, %v2603_v12  ;;  %v2678_v16 = vpop.f32.mrb[1].mxu0 }
 0x412   : > { %v2679_v17 = vadd.f32 %v2678_v16, %v2607_v13 }
 0x413   : > { %v2681_v20 = vmax.f32 %v2677_v15, 0.0 }
 0x414   : > { %v2682_v19 = vmax.f32 %v2679_v17, 0.0 }
 0x416   : > { %2786 = vmatprep.mubr.f32.mxu1 %v2682_v19 }
 0x417   : > { %2787 = vmatmul.mubr.f32.vlgmr.msra.gmra.mrb[0].mxu1 %v2681_v20 }
 0x4ea   : > { %v2895_v21 = vpop.f32.mrb[0].mxu1 }
 0x4eb   : > { %v2896_v23 = vpop.f32.mrb[1].mxu1 }
 0x4ec   : > { %v2897_v24 = vadd.f32 %v2896_v23, %v2895_v21 }
 0x4ee   : > { %v2789_v26 = vadd.f32 %v2897_v24, %v2858_v22 }
 0x4f0   : > { %2793 = vst.msk [vmem:[%s5688_s7] sm:$0xff] %vm2792_vm0, %v2789_v26 }
 0x4f1 PF: > { %p17_p4 = scmp.ge.s32.totalorder %s4222_s29, 13   ;;  %s5692_s24 = smov %s4146_s25 }
 0x4f2   : > { %s5693_s25 = smov %s4150_s26  ;;  %s5694_s26 = smov %s4232_s9 }
 0x4f3   : > { %s5695_s27 = smov %s4222_s29  ;;  %19 = sbr.rel (!%p17_p4) target bundleno = 3 (0x3), region = 95 }
 0x4fa   :  { %2805 = vsyncpa [#allocation4], 1 }
 0x4fb   :  { %2807 = vsyncpa [#allocation4 + $0x1], 1 }

</bundles_post_ra>
